<compile_context>
chip_gen: v7x
topology: tpu7x:2x2x1
jax: 0.10.0
libtpu: 0.0.40
codegen_flags: <defaults>
</compile_context>

<pallas_src>
import jax
import jax.numpy as jnp
from jax.experimental import pallas as pl
from jax.experimental.pallas import tpu as pltpu


def _kernel(p_ref, w_ref, b_ref, o_ref):
    """One grid step: y = sigmoid(W @ P + b), stored as one dense slab.

    p_ref : (1, 1, 2*K*C_in, cols)   im2col patch for this row tile
    w_ref : (2*C_out, 2*K*C_in)      fused even/odd-row weight matrix (resident)
    b_ref : (2*C_out, 1)             bias stacked twice (resident)
    o_ref : (1, 1, 2*C_out, cols)    parity-major output slab (fully written)
    """
    acc = jnp.dot(
        w_ref[...], p_ref[0, 0],
        preferred_element_type=jnp.float32,
        precision=jax.lax.Precision.HIGHEST,
    )
    o_ref[0, 0] = jax.nn.sigmoid(acc + b_ref[...]).astype(o_ref.dtype)


def conv_transpose2d_sigmoid(x, weight, bias, *, n_row_tiles=2):
    """sigmoid(ConvTranspose2d(Cin, Cout, 3, stride=2, padding=0, output_padding=1)(x)).

    x:      (N, C_in, H, W)
    weight: (C_in, C_out, 3, 3)  -- PyTorch ConvTranspose2d layout
    bias:   (C_out,)
    returns (N, C_out, 2*H+2, 2*W+2) float32 in NCHW.
    """
    x = x.astype(jnp.float32)
    weight = weight.astype(jnp.float32)
    bias = bias.astype(jnp.float32)

    n, c_in, h, w = x.shape
    assert weight.shape[0] == c_in and weight.shape[2:] == (3, 3)
    c_out = weight.shape[1]
    k = 3

    h_out = 2 * h + 2
    w_out = 2 * w + 2
    pairs_total = h_out // 2                       # = h + 1 (row pairs: even/odd)
    n_tiles = max(1, min(n_row_tiles, pairs_total))
    ppt = -(-pairs_total // n_tiles)               # pairs per tile (ceil)
    pairs_pad = n_tiles * ppt
    cols = ppt * w_out

    # ---- tiny wrapper-side im2col prep (input is ~100 KB; output writeback is the hot path) ----
    # Column-dilated input, left-padded by 2:  dp[n, ci, m+1, 2 + 2*iw] = x[n, ci, m, iw].
    wd = 2 * w + 4
    xz = jnp.stack([x, jnp.zeros_like(x)], axis=-1).reshape(n, c_in, h, 2 * w)
    dp = jnp.pad(xz, ((0, 0), (0, 0), (1, pairs_pad - h), (2, wd - 2 - 2 * w)))
    hi = dp[:, :, 1:, :]     # (n, c_in, pairs_pad, wd)  dilated row ih = m
    lo = dp[:, :, :-1, :]    # (n, c_in, pairs_pad, wd)  dilated row ih = m - 1
    # Per-kw shifted views (shift s = 2 - kw), stacked along the contraction dim.
    patch = jnp.concatenate(
        [hi[..., 2:2 + w_out], hi[..., 1:1 + w_out], hi[..., 0:w_out],
         lo[..., 2:2 + w_out], lo[..., 1:1 + w_out], lo[..., 0:w_out]],
        axis=1)                                     # (n, 6*c_in, pairs_pad, w_out)
    patch = patch.reshape(n, 2 * k * c_in, n_tiles, ppt, w_out)
    patch = jnp.transpose(patch, (0, 2, 1, 3, 4)).reshape(n, n_tiles, 2 * k * c_in, cols)

    # Fused weight matrix:
    #   rows [0, C_out)       -> even output rows: taps kh=0 (from `hi`) and kh=2 (from `lo`)
    #   rows [C_out, 2*C_out) -> odd  output rows: taps kh=1 (from `hi`), zeros for `lo`
    wk = jnp.transpose(weight, (2, 3, 0, 1)).reshape(k, k * c_in, c_out)   # [kh, kw*C_in+ci, co]
    w_even = jnp.concatenate([wk[0], wk[2]], axis=0)                       # (2*K*C_in, C_out)
    w_odd = jnp.concatenate([wk[1], jnp.zeros_like(wk[1])], axis=0)        # (2*K*C_in, C_out)
    w_pair = jnp.concatenate([w_even.T, w_odd.T], axis=0)                  # (2*C_out, 2*K*C_in)
    b_pair = jnp.concatenate([bias, bias]).reshape(2 * c_out, 1)           # (2*C_out, 1)

    grid = (n, n_tiles)
    in_specs = [
        pl.BlockSpec((1, 1, 2 * k * c_in, cols), lambda b, i: (b, i, 0, 0)),
        pl.BlockSpec((2 * c_out, 2 * k * c_in), lambda b, i: (0, 0)),   # resident weights
        pl.BlockSpec((2 * c_out, 1), lambda b, i: (0, 0)),              # resident bias
    ]
    out_specs = pl.BlockSpec((1, 1, 2 * c_out, cols), lambda b, i: (b, i, 0, 0))
    out_shape = jax.ShapeDtypeStruct((n, n_tiles, 2 * c_out, cols), jnp.float32)

    y = pl.pallas_call(
        _kernel,
        grid=grid,
        in_specs=in_specs,
        out_specs=out_specs,
        out_shape=out_shape,
        compiler_params=pltpu.CompilerParams(
            dimension_semantics=("parallel", "parallel")),
    )(patch, w_pair, b_pair)

    # parity-major slab -> NCHW (cheap XLA transpose on the final tensor)
    y = y.reshape(n, n_tiles, 2, c_out, ppt, w_out)
    y = jnp.transpose(y, (0, 3, 1, 4, 2, 5)).reshape(n, c_out, 2 * pairs_pad, w_out)
    return y[:, :, :h_out, :]


def _reference(x, weight, bias):
    """Pure-JAX reference: transposed conv as a dilated conv with the flipped kernel."""
    x = x.astype(jnp.float32)
    c_out = weight.shape[1]
    w_conv = jnp.transpose(jnp.flip(weight, (2, 3)), (1, 0, 2, 3)).astype(jnp.float32)
    y = jax.lax.conv_general_dilated(
        x, w_conv, window_strides=(1, 1), padding=((2, 3), (2, 3)),
        lhs_dilation=(2, 2), rhs_dilation=(1, 1),
        dimension_numbers=("NCHW", "OIHW", "NCHW"),
        precision=jax.lax.Precision.HIGHEST)
    return jax.nn.sigmoid(y + bias.reshape(1, c_out, 1, 1).astype(jnp.float32))


if __name__ == "__main__":
    key = jax.random.PRNGKey(0)
    kx, kw, kb = jax.random.split(key, 3)
    x = jax.random.normal(kx, (1, 3, 32, 32), dtype=jnp.float32)
    weight = jax.random.normal(kw, (3, 128, 3, 3), dtype=jnp.float32) * 0.2
    bias = jax.random.normal(kb, (128,), dtype=jnp.float32) * 0.1

    out = jax.block_until_ready(conv_transpose2d_sigmoid(x, weight, bias))
    assert out.shape == (1, 128, 66, 66), out.shape

    ref = jax.block_until_ready(_reference(x, weight, bias))
    err = float(jnp.max(jnp.abs(out - ref)))
    assert err < 5e-3, f"max abs error too large: {err}"

    print("KERNEL_OK")
</pallas_src>

<mosaic_0001>
module attributes {stable_mosaic.version = 11 : i64} {
  func.func @_kernel(%arg0: i32, %arg1: i32, %arg2: memref<1x1x18x1122xf32, #tpu.memory_space<vmem>>, %arg3: memref<256x18xf32, #tpu.memory_space<vmem>>, %arg4: memref<256x1xf32, #tpu.memory_space<vmem>>, %arg5: memref<1x1x256x1122xf32, #tpu.memory_space<vmem>>) attributes {dimension_semantics = [#tpu.dimension_semantics<parallel>, #tpu.dimension_semantics<parallel>], iteration_bounds = array<i64: 1, 2>, scalar_prefetch = 0 : i64, scratch_operands = 0 : i64, tpu.core_type = #tpu.core_type<tc>, window_params = [{transform_indices = @transform_0, window_bounds = array<i64: 1, 1, 18, 1122>}, {pipeline_mode = #tpu.pipeline_mode<synchronous>, transform_indices = @transform_1, window_bounds = array<i64: 256, 18>}, {pipeline_mode = #tpu.pipeline_mode<synchronous>, transform_indices = @transform_2, window_bounds = array<i64: 256, 1>}, {transform_indices = @transform_3, window_bounds = array<i64: 1, 1, 256, 1122>}]} {
    %c0 = arith.constant 0 : index
    %c0_0 = arith.constant 0 : index
    %0 = vector.load %arg3[%c0, %c0_0] : memref<256x18xf32, #tpu.memory_space<vmem>>, vector<256x18xf32>
    %c0_1 = arith.constant 0 : index
    %c0_2 = arith.constant 0 : index
    %c0_3 = arith.constant 0 : index
    %c0_4 = arith.constant 0 : index
    %1 = vector.load %arg2[%c0_1, %c0_2, %c0_3, %c0_4] : memref<1x1x18x1122xf32, #tpu.memory_space<vmem>>, vector<1x1x18x1122xf32>
    %2 = vector.shape_cast %1 : vector<1x1x18x1122xf32> to vector<18x1122xf32>
    %cst = arith.constant dense<0.000000e+00> : vector<256x1122xf32>
    %3 = tpu.matmul %0, %2, %cst {dimension_numbers = #tpu.dot_dimension_numbers<[1], [0], [0], [1], [0, 0, 1, 1], [], []>, precision = #tpu.contract_precision<fp32>} : vector<256x18xf32>, vector<18x1122xf32>, vector<256x1122xf32> -> vector<256x1122xf32>
    %c0_5 = arith.constant 0 : index
    %c0_6 = arith.constant 0 : index
    %4 = vector.load %arg4[%c0_5, %c0_6] : memref<256x1xf32, #tpu.memory_space<vmem>>, vector<256x1xf32>
    %5 = vector.broadcast %4 : vector<256x1xf32> to vector<256x1122xf32>
    %6 = arith.addf %3, %5 : vector<256x1122xf32>
    %7 = arith.negf %6 : vector<256x1122xf32>
    %8 = math.exp %7 : vector<256x1122xf32>
    %cst_7 = arith.constant 1.000000e+00 : f32
    %9 = vector.broadcast %cst_7 : f32 to vector<256x1122xf32>
    %10 = arith.addf %9, %8 : vector<256x1122xf32>
    %11 = arith.divf %9, %10 : vector<256x1122xf32>
    %c0_8 = arith.constant 0 : index
    %c0_9 = arith.constant 0 : index
    %c0_10 = arith.constant 0 : index
    %c0_11 = arith.constant 0 : index
    %12 = vector.load %arg5[%c0_8, %c0_9, %c0_10, %c0_11] : memref<1x1x256x1122xf32, #tpu.memory_space<vmem>>, vector<1x1x256x1122xf32>
    %13 = vector.shape_cast %12 : vector<1x1x256x1122xf32> to vector<256x1122xf32>
    %14 = vector.shape_cast %11 : vector<256x1122xf32> to vector<1x1x256x1122xf32>
    tpu.vector_store %arg5[%c0_8, %c0_9, %c0_10, %c0_11], %14 {strides = array<i32>} : memref<1x1x256x1122xf32, #tpu.memory_space<vmem>>, vector<1x1x256x1122xf32>,
    return
  }
  func.func @transform_0(%arg0: i32, %arg1: i32) -> (i32, i32, i32, i32) {
    %c0_i32 = arith.constant 0 : i32
    %c0_i32_0 = arith.constant 0 : i32
    %c0_i32_1 = arith.constant 0 : i32
    return %arg0, %arg1, %c0_i32, %c0_i32_0 : i32, i32, i32, i32
  }
  func.func @transform_1(%arg0: i32, %arg1: i32) -> (i32, i32) {
    %c0_i32 = arith.constant 0 : i32
    %c0_i32_0 = arith.constant 0 : i32
    %c0_i32_1 = arith.constant 0 : i32
    return %c0_i32, %c0_i32_0 : i32, i32
  }
  func.func @transform_2(%arg0: i32, %arg1: i32) -> (i32, i32) {
    %c0_i32 = arith.constant 0 : i32
    %c0_i32_0 = arith.constant 0 : i32
    %c0_i32_1 = arith.constant 0 : i32
    return %c0_i32, %c0_i32_0 : i32, i32
  }
  func.func @transform_3(%arg0: i32, %arg1: i32) -> (i32, i32, i32, i32) {
    %c0_i32 = arith.constant 0 : i32
    %c0_i32_0 = arith.constant 0 : i32
    %c0_i32_1 = arith.constant 0 : i32
    return %arg0, %arg1, %c0_i32, %c0_i32_0 : i32, i32, i32, i32
  }
}

</mosaic_0001>

<bundles_post_ra>
// kernel: tpu_custom_call.1
= control target key start
LH: loop header
LB: loop body
LE: loop exit
PB: predicated region body
PF: predicated region fallthrough
CT: control target
= control target key end

     0   :  { %s16554_s12 = smov 0   ;;  %s16556_s13 = smov 0   ;;  %s20427_s0 = inlined_call_operand.vmem [shape: f32[1,2,18,1122], index: 0, kind: input, shape index: {}]   ;;  %s20428_s1 = inlined_call_operand.vmem [shape: f32[256,18], index: 1, kind: input, shape index: {}]   ;;  %s20429_s2 = inlined_call_operand.vmem [shape: f32[256,1], index: 2, kind: input, shape index: {}]   ;;  %s20430_s3 = inlined_call_operand.vmem [shape: f32[1,2,256,1122], index: 3, kind: output, shape index: {}]  }
   0x1   :  { %s16558_s14 = smov 0  }
   0x2 LB: > { %s22_s15 = sadd.s32 1, %s16526_s13  ;;  %p12645_p0 = scmp.ge.s32.totalorder %s16530_s14, 1  ;;  %s16530_s14 = sphi %s16558_s14, %s13_s14   ;;  %s16526_s13 = sphi %s16556_s13, %s21681_s13   ;;  %s16522_s12 = sphi %s16554_s12, %s21680_s12  }
   0x3   : > { %p23_p1 = scmp.ge.s32.totalorder %s22_s15, 2  ;;  %p157_p2 = scmp.lt.s32.totalorder %s16530_s14, 3 }
   0x5   : > { %s21683_s15 = smov (%p23_p1, %s22_s15), 0  ;;  %p158_p3 = pnand %p12645_p0, %p157_p2 }
   0x7   : > { %161 = sbr.rel (%p158_p3) target bundleno = 2064 (0x810), region = 32 }
   0xe   : > { %p191_p4 = scmp.lt.s32.totalorder %s16522_s12, 1  ;;  %v207_v0 = vld [vmem:[%s20428_s1] sm:$0xff]  ;;  %vm458_vm0 = vcmask 146432   ;;  %v208_v1 = vld [vmem:[%s20428_s1 + $0x8] sm:$0xff]  ;;  %v20439_v2 = vmov 0.0   ;;  %v209_v5 = vld [vmem:[%s20428_s1 + $0x10] sm:$0xff] }
   0xf   : > { %653 = vmatprep.mubr.f32.mxu1 %v20439_v2  ;;  %v460_v3 = vsel %vm458_vm0, %v207_v0, 0  ;;  %v463_v4 = vsel %vm458_vm0, %v208_v1, 0  ;;  %1100 = vmatprep.mubr.f32.mxu0 %v20439_v2  ;;  %v210_v6 = vld [vmem:[%s20428_s1 + $0x18] sm:$0xff]  ;;  %v211_v7 = vld [vmem:[%s20428_s1 + $0x20] sm:$0xff]  ;;  %v466_v10 = vsel %vm458_vm0, %v209_v5, 0  ;;  %v16533_v12 = vmov 0  }
  0x10   : > { %s21685_s12 = smov (!%p191_p4, %s16522_s12), 1  ;;  %v16593_v8 = vand.u32 4294901760, %v460_v3  ;;  %v16595_v9 = vand.u32 4294901760, %v463_v4  ;;  %v469_v11 = vsel %vm458_vm0, %v210_v6, 0  ;;  %15352 = vset.pattern.permute.xlu0 %v16533_v12  ;;  %15353 = vset.pattern.permute.xlu1 %v16533_v12  ;;  %v16599_v13 = vand.u32 4294901760, %v466_v10  ;;  %v212_v17 = vld [vmem:[%s20428_s1 + $0x28] sm:$0xff] }
  0x11   : > { %s15324_s26 = smul.u32 216, %s21685_s12  ;;  %v16605_v15 = vand.u32 4294901760, %v469_v11  ;;  %v472_v16 = vsel %vm458_vm0, %v211_v7, 0  ;;  %vm555_vm1 = vcmask 1041408   ;;  %v16631_v25 = vsel %vm458_vm0, %v212_v17, 0  ;;  %v266_v45 = vld [vmem:[%s20429_s2] sm:$0xff] }
  0x12   : > { %20837 = vst [vmem:[#allocation2_spill] sm:$0xff] %v16593_v8  ;;  %20838 = vst [vmem:[#allocation3_spill] sm:$0xff] %v16595_v9  ;;  %v16603_v14 = vsub.f32 %v460_v3, %v16593_v8  ;;  %v16612_v18 = vsub.f32 %v463_v4, %v16595_v9  ;;  %v16626_v23 = vsub.f32 %v466_v10, %v16599_v13  ;;  %v16628_v24 = vand.u32 4294901760, %v472_v16  ;;  %v267_v54 = vld [vmem:[%s20429_s2 + $0x8] sm:$0xff]  ;;  %v268_v55 = vld [vmem:[%s20429_s2 + $0x10] sm:$0xff]  ;;  %s15325_s11 = smul.u32 2304, %s21685_s12 }
  0x13   : > { %20839 = vst [vmem:[#allocation4_spill] sm:$0xff] %v16599_v13  ;;  %20841 = vst [vmem:[#allocation6_spill] sm:$0xff] %v16605_v15  ;;  %s16617_s4 = scalar_lea.vmem %s20427_s0, %s15324_s26  ;;  %v16636_v31 = vsub.f32 %v469_v11, %v16605_v15  ;;  %300 = vperm.xlu0 %15352, %v266_v45   ;;  %310 = vperm.xlu1 %15353, %v268_v55   ;;  %v16705_v63 = vand.u32 4294901760, %v16631_v25  ;;  %v269_v0 = vld [vmem:[%s20429_s2 + $0x18] sm:$0xff]  ;;  %v213_v6 = vld [vmem:[%s20428_s1 + $0x30] sm:$0xff]  ;;  %vm12268_vm2 = vcmask 801792  }
  0x14   : > { %20840 = vst [vmem:[#allocation5_spill] sm:$0xff] %v16603_v14  ;;  %20842 = vst [vmem:[#allocation7_spill] sm:$0xff] %v16612_v18  ;;  %v16620_v19 = vand.u32 4294901760, %v16603_v14  ;;  %v240_v20 = vld [vmem:[%s16617_s4 + $0x8] sm:$0xff]  ;;  %v249_v21 = vld [vmem:[%s16617_s4 + $0x50] sm:$0xff]  ;;  %v16643_v36 = vand.u32 4294901760, %v16612_v18  ;;  %v16712_v5 = vsub.f32 %v472_v16, %v16628_v24  ;;  %s18333_s17 = scalar_lea.vmem %s20430_s3, %s15325_s11 }
  0x15   : > { %v239_v22 = vld [vmem:[%s16617_s4] sm:$0xff]  ;;  %20844 = vst [vmem:[#allocation9_spill] sm:$0xff] %v16626_v23  ;;  %20845 = vst [vmem:[#allocation10_spill] sm:$0xff] %v16628_v24  ;;  %v583_v26 = vand.u32 4294901760, %v240_v20  ;;  %v587_v27 = vand.u32 4294901760, %v249_v21  ;;  %v248_v28 = vld [vmem:[%s16617_s4 + $0x48] sm:$0xff] }
  0x16   : > { %20843 = vst [vmem:[#allocation8_spill] sm:$0xff] %v16620_v19  ;;  %v585_v29 = vand.u32 4294901760, %v239_v22  ;;  %v258_v30 = vld [vmem:[%s16617_s4 + $0x98] sm:$0x3]  ;;  %20846 = vst [vmem:[#allocation11_spill] sm:$0xff] %v16636_v31  ;;  %v589_v32 = vand.u32 4294901760, %v248_v28  ;;  %v657_v35 = vsub.f32 %v16603_v14, %v16620_v19  ;;  %v668_v52 = vsub.f32 %v16612_v18, %v16643_v36 }
  0x17   : > { %v560_v33 = vsel %vm555_vm1, %v258_v30, 0  ;;  %v257_v34 = vld [vmem:[%s16617_s4 + $0x90] sm:$0x3]  ;;  %20847 = vst [vmem:[#allocation12_spill] sm:$0xff] %v16643_v36  ;;  %v16645_v37 = vpack.c.bf16 %v587_v27, %v583_v26  ;;  %v16647_v38 = vsub.f32 %v240_v20, %v583_v26  ;;  %v16649_v39 = vsub.f32 %v249_v21, %v587_v27  ;;  %20853 = vst [vmem:[#allocation18_spill] sm:$0xff] %v16705_v63  ;;  %v215_v55 = vld [vmem:[%s20428_s1 + $0x40] sm:$0xff] }
  0x18   : > { %v16651_v40 = vsub.f32 %v239_v22, %v585_v29  ;;  %v16653_v41 = vpack.c.bf16 %v589_v32, %v585_v29  ;;  %v16655_v42 = vsub.f32 %v248_v28, %v589_v32  ;;  %v16657_v43 = vand.u32 4294901760, %v560_v33  ;;  %20854 = vst [vmem:[#allocation19_spill] sm:$0xff] %v16712_v5  ;;  %305 = vperm.xlu0 %15352, %v267_v54   ;;  %v214_v28 = vld [vmem:[%s20428_s1 + $0x38] sm:$0xff]  ;;  %v270_v32 = vld [vmem:[%s20429_s2 + $0x20] sm:$0xff] }
  0x19   : > { %v557_v44 = vsel %vm555_vm1, %v257_v34, 0  ;;  %13473 = vmatprep.subr.bf16.mxu1 %v16645_v37  ;;  %v20436_v47 = vand.u32 4294901760, %v16647_v38  ;;  %v20435_v48 = vand.u32 4294901760, %v16649_v39  ;;  %v16669_v49 = vand.u32 4294901760, %v16626_v23  ;;  %315 = vperm.xlu1 %15353, %v269_v0  }
  0x1a   : > { %20848 = vst [vmem:[#allocation13_spill] sm:$0xff] %v16653_v41  ;;  %20849 = vst [vmem:[#allocation14_spill] sm:$0xff] %v16657_v43  ;;  %v16664_v46 = vand.u32 4294901760, %v557_v44  ;;  %13475 = vmatpush1.bf16.msra.mxu1 %v16653_v41  ;;  %v20434_v50 = vand.u32 4294901760, %v16651_v40  ;;  %v20433_v51 = vand.u32 4294901760, %v16655_v42  ;;  %v16677_v53 = vsub.f32 %v560_v33, %v16657_v43  ;;  %v271_v33 = vld [vmem:[%s20429_s2 + $0x28] sm:$0xff] }
  0x1b   : > { %20851 = vst [vmem:[#allocation16_spill] sm:$0xff] %v16669_v49  ;;  %592 = vmatprep.subr.mxu1 %v16657_v43  ;;  %v16686_v56 = vand.u32 4294901760, %v657_v35  ;;  %v1009_v57 = vsub.f32 %v16647_v38, %v20436_v47  ;;  %v1021_v58 = vsub.f32 %v16649_v39, %v20435_v48  ;;  %v16722_v12 = vand.u32 4294901760, %v16636_v31 }
  0x1c   : > { %20850 = vst [vmem:[#allocation15_spill] sm:$0xff] %v16664_v46  ;;  %v16695_v59 = vsub.f32 %v557_v44, %v16664_v46  ;;  %v1015_v60 = vsub.f32 %v16651_v40, %v20434_v50  ;;  %v1027_v61 = vsub.f32 %v16655_v42, %v20433_v51  ;;  %v20432_v62 = vand.u32 4294901760, %v16677_v53  ;;  %320 = vperm.xlu0 %15352, %v270_v32   ;;  %v275_v32 = vld [vmem:[%s20429_s2 + $0x48] sm:$0xff] }
  0x1d   : > { %20852 = vst [vmem:[#allocation17_spill] sm:$0xff] %v16686_v56  ;;  %v1010_v1 = vand.u32 4294901760, %v1009_v57  ;;  %v1022_v3 = vand.u32 4294901760, %v1021_v58  ;;  %20855 = vst [vmem:[#allocation20_spill] sm:$0xff] %v16722_v12  ;;  %v16725_v17 = vand.u32 4294901760, %v668_v52  ;;  %v679_v21 = vsub.f32 %v16626_v23, %v16669_v49  ;;  %325 = vperm.xlu1 %15353, %v271_v33  }
  0x1e   : > { %v20431_v4 = vand.u32 4294901760, %v16695_v59  ;;  %594 = vmatpush1.msra.mxu1 %v16664_v46  ;;  %v1016_v7 = vand.u32 4294901760, %v1015_v60  ;;  %v1028_v10 = vand.u32 4294901760, %v1027_v61  ;;  %v1033_v11 = vsub.f32 %v16677_v53, %v20432_v62 }
  0x1f   : > { %659 = vmatmul.mubr.f32.vlgmr.msra.gmra.mrb[0].mxu1 %v16686_v56  ;;  %v13476_v16 = vpack.c.bf16 %v1022_v3, %v1010_v1  ;;  %20856 = vst [vmem:[#allocation21_spill] sm:$0xff] %v16725_v17  ;;  %v478_v27 = vsel %vm458_vm0, %v213_v6, 0  ;;  %v16739_v30 = vsub.f32 %v16631_v25, %v16705_v63  ;;  %v16748_v34 = vand.u32 4294901760, %v679_v21  ;;  %v272_v1 = vld [vmem:[%s20429_s2 + $0x30] sm:$0xff]  ;;  %v216_v6 = vld [vmem:[%s20428_s1 + $0x48] sm:$0xff] }
  0x20   : > { %v1039_v20 = vsub.f32 %v16695_v59, %v20431_v4  ;;  %664 = vmatprep.mubr.f32.mxu1 %v20439_v2  ;;  %v13478_v22 = vpack.c.bf16 %v1028_v10, %v1016_v7  ;;  %v1034_v26 = vand.u32 4294901760, %v1033_v11  ;;  %v690_v35 = vsub.f32 %v16636_v31, %v16722_v12  ;;  %330 = vperm.xlu0 %15352, %v272_v1   ;;  %v273_v10 = vld [vmem:[%s20429_s2 + $0x38] sm:$0xff] }
  0x21   : > { %13477 = vmatprep.subr.bf16.mxu0 %v13476_v16  ;;  %13592 = vmatprep.subr.bf16.mxu1 %v13476_v16  ;;  %20857 = vst [vmem:[#allocation22_spill] sm:$0xff] %v16739_v30  ;;  %20858 = vst [vmem:[#allocation23_spill] sm:$0xff] %v16748_v34  ;;  %v16753_v44 = vand.u32 4294901760, %v16712_v5  ;;  %v16755_v25 = vand.u32 4294901760, %v478_v27  ;;  %v13480_v45 = vpack.c.bf16 %v16649_v39, %v16647_v38  ;;  %v481_v52 = vsel %vm458_vm0, %v214_v28, 0 }
  0x22   : > { %13479 = vmatpush1.bf16.msra.mxu0 %v13478_v22  ;;  %v1040_v29 = vand.u32 4294901760, %v1039_v20  ;;  %13594 = vmatpush1.bf16.msra.mxu1 %v13478_v22  ;;  %v13482_v54 = vpack.c.bf16 %v16655_v42, %v16651_v40  ;;  %v16767_v57 = vand.u32 4294901760, %v16739_v30  ;;  %v16771_v58 = vand.u32 4294901760, %v690_v35  ;;  %v217_v22 = vld [vmem:[%s20428_s1 + $0x50] sm:$0xff] }
  0x23   : > { %670 = vmatmul.mubr.f32.gmra.mrb[2].mxu1 %v16725_v17  ;;  %1035 = vmatprep.subr.mxu0 %v1034_v26  ;;  %20859 = vst [vmem:[#allocation24_spill] sm:$0xff] %v16753_v44  ;;  %20860 = vst [vmem:[#allocation25_spill] sm:$0xff] %v16755_v25  ;;  %v701_v60 = vsub.f32 %v16712_v5, %v16753_v44  ;;  %v16776_v61 = vsub.f32 %v478_v27, %v16755_v25  ;;  %v16778_v0 = vand.u32 4294901760, %v481_v52  ;;  %v232_v44 = vld [vmem:[%s20428_s1 + $0xc8] sm:$0xff] }
  0x24   : > { %675 = vmatprep.mubr.f32.mxu1 %v20439_v2  ;;  %13593 = vmatprep.subr.mxu1 %v1034_v26  ;;  %20861 = vst [vmem:[#allocation26_spill] sm:$0xff] %v16767_v57  ;;  %20862 = vst [vmem:[#allocation27_spill] sm:$0xff] %v16771_v58  ;;  %v484_v3 = vsel %vm458_vm0, %v215_v55, 0  ;;  %v712_v7 = vsub.f32 %v16739_v30, %v16767_v57  ;;  %v274_v26 = vld [vmem:[%s20429_s2 + $0x40] sm:$0xff]  ;;  %v487_v27 = vsel %vm458_vm0, %v216_v6, 0  ;;  %v276_v55 = vld [vmem:[%s20429_s2 + $0x50] sm:$0xff] }
  0x25   : > { %20863 = vst [vmem:[#allocation28_spill] sm:$0xff] %v16776_v61  ;;  %20864 = vst [vmem:[#allocation29_spill] sm:$0xff] %v16778_v0  ;;  %v16797_v11 = vand.u32 4294901760, %v701_v60  ;;  %v16800_v16 = vand.u32 4294901760, %v16776_v61  ;;  %v16803_v20 = vsub.f32 %v481_v52, %v16778_v0  ;;  %v16805_v21 = vand.u32 4294901760, %v484_v3  ;;  %335 = vperm.xlu1 %15353, %v273_v10   ;;  %340 = vperm.xlu0 %15352, %v274_v26   ;;  %v219_v26 = vld [vmem:[%s20428_s1 + $0x60] sm:$0xff] }
  0x26   : > { %1041 = vmatpush1.msra.mxu0 %v1040_v29  ;;  %13595 = vmatpush1.msra.mxu1 %v1040_v29  ;;  %v16817_v28 = vand.u32 4294901760, %v712_v7  ;;  %v490_v29 = vsel %vm458_vm0, %v217_v22, 0  ;;  %v16834_v52 = vand.u32 4294901760, %v487_v27 }
  0x27   : > { %681 = vmatmul.mubr.f32.gmra.mrb[4].mxu1 %v16748_v34  ;;  %1102 = vmatmul.mubr.f32.vlgmr.msra.gmra.mrb[0].mxu0 %v16593_v8  ;;  %20865 = vst [vmem:[#allocation30_spill] sm:$0xff] %v16797_v11  ;;  %20866 = vst [vmem:[#allocation31_spill] sm:$0xff] %v16800_v16  ;;  %v723_v33 = vsub.f32 %v16776_v61, %v16800_v16  ;;  %v16829_v35 = vand.u32 4294901760, %v16803_v20  ;;  %v16844_v60 = vand.u32 4294901760, %v490_v29  ;;  %v228_v16 = vld [vmem:[%s20428_s1 + $0xa8] sm:$0xff] }
  0x28   : > { %13481 = vmatprep.subr.bf16.mxu0 %v13480_v45  ;;  %686 = vmatprep.mubr.f32.mxu1 %v20439_v2  ;;  %20867 = vst [vmem:[#allocation32_spill] sm:$0xff] %v16803_v20  ;;  %20868 = vst [vmem:[#allocation33_spill] sm:$0xff] %v16805_v21  ;;  %v16832_v45 = vsub.f32 %v484_v3, %v16805_v21  ;;  %v277_v3 = vld [vmem:[%s20429_s2 + $0x58] sm:$0xff]  ;;  %v16860_v22 = vsub.f32 %v487_v27, %v16834_v52  ;;  %v279_v27 = vld [vmem:[%s20429_s2 + $0x68] sm:$0xff] }
  0x29   : > { %13483 = vmatpush1.bf16.msra.mxu0 %v13482_v54  ;;  %1107 = vmatprep.mubr.f32.mxu0 %v20439_v2  ;;  %20869 = vst [vmem:[#allocation34_spill] sm:$0xff] %v16817_v28  ;;  %20870 = vst [vmem:[#allocation35_spill] sm:$0xff] %v16829_v35  ;;  %v218_v54 = vld [vmem:[%s20428_s1 + $0x58] sm:$0xff]  ;;  %v16852_v6 = vand.u32 4294901760, %v723_v33  ;;  %v734_v7 = vsub.f32 %v16803_v20, %v16829_v35  ;;  %v16886_v62 = vsub.f32 %v490_v29, %v16844_v60 }
  0x2a   : > { %1339 = vmatprep.subr.mxu0 %v16677_v53  ;;  %20871 = vst [vmem:[#allocation36_spill] sm:$0xff] %v16832_v45  ;;  %20872 = vst [vmem:[#allocation37_spill] sm:$0xff] %v16834_v52  ;;  %345 = vperm.xlu1 %15353, %v275_v32   ;;  %v493_v1 = vsel %vm458_vm0, %v218_v54, 0  ;;  %v16857_v10 = vand.u32 4294901760, %v16832_v45  ;;  %v278_v32 = vld [vmem:[%s20429_s2 + $0x60] sm:$0xff]  ;;  %v496_v54 = vsel %vm458_vm0, %v219_v26, 0 }
  0x2b   : > { %692 = vmatmul.mubr.f32.gmra.mrb[6].mxu1 %v16771_v58  ;;  %1109 = vmatmul.mubr.f32.gmra.mrb[2].mxu0 %v16595_v9  ;;  %20873 = vst [vmem:[#allocation38_spill] sm:$0xff] %v16844_v60  ;;  %20874 = vst [vmem:[#allocation39_spill] sm:$0xff] %v16852_v6  ;;  %v16870_v33 = vand.u32 4294901760, %v493_v1  ;;  %v280_v26 = vld [vmem:[%s20429_s2 + $0x70] sm:$0xff]  ;;  %v16899_v51 = vand.u32 4294901760, %v496_v54  ;;  %v281_v29 = vld [vmem:[%s20429_s2 + $0x78] sm:$0xff] }
  0x2c   : > { %697 = vmatprep.mubr.f32.mxu1 %v20439_v2  ;;  %1114 = vmatprep.mubr.f32.mxu0 %v20439_v2  ;;  %20875 = vst [vmem:[#allocation40_spill] sm:$0xff] %v16857_v10  ;;  %20876 = vst [vmem:[#allocation41_spill] sm:$0xff] %v16860_v22  ;;  %v745_v4 = vsub.f32 %v16832_v45, %v16857_v10  ;;  %v251_v9 = vld [vmem:[%s16617_s4 + $0x60] sm:$0xff] }
  0x2d   : > { %1342 = vmatpush1.msra.mxu0 %v16695_v59  ;;  %350 = vperm.xlu0 %15352, %v276_v55   ;;  %20877 = vst [vmem:[#allocation42_spill] sm:$0xff] %v16870_v33  ;;  %v16878_v55 = vand.u32 4294901760, %v734_v7  ;;  %20880 = vst [vmem:[#allocation45_spill] sm:$0xff] %v16886_v62  ;;  %v220_v7 = vld [vmem:[%s20428_s1 + $0x68] sm:$0xff]  ;;  %v16923_v47 = vsub.f32 %v496_v54, %v16899_v51  ;;  %v222_v54 = vld [vmem:[%s20428_s1 + $0x78] sm:$0xff] }
  0x2e   : > { %13485 = vmatprep.subr.bf16.mxu0 %v16645_v37  ;;  %355 = vperm.xlu1 %15353, %v277_v3   ;;  %v16883_v3 = vand.u32 4294901760, %v16860_v22  ;;  %20882 = vst [vmem:[#allocation47_spill] sm:$0xff] %v16899_v51  ;;  %v16906_v50 = vand.u32 4294901760, %v745_v4 }
  0x2f   : > { %703 = vmatmul.mubr.f32.gmra.mrb[8].mxu1 %v16797_v11  ;;  %1116 = vmatmul.mubr.f32.gmra.mrb[4].mxu0 %v16599_v13  ;;  %20878 = vst [vmem:[#allocation43_spill] sm:$0xff] %v16878_v55  ;;  %20886 = vst [vmem:[#allocation51_spill] sm:$0xff] %v16923_v47 }
  0x30   : > { %708 = vmatprep.mubr.f32.mxu1 %v20439_v2  ;;  %1121 = vmatprep.mubr.f32.mxu0 %v20439_v2  ;;  %20879 = vst [vmem:[#allocation44_spill] sm:$0xff] %v16883_v3  ;;  %20883 = vst [vmem:[#allocation48_spill] sm:$0xff] %v16906_v50  ;;  %v756_v48 = vsub.f32 %v16860_v22, %v16883_v3  ;;  %v2623_v3 = vand.u32 4294901760, %v251_v9 }
  0x31   : > { %360 = vperm.xlu0 %15352, %v278_v32   ;;  %v16897_v32 = vsub.f32 %v493_v1, %v16870_v33  ;;  %v499_v1 = vsel %vm458_vm0, %v220_v7, 0 }
  0x32   : > { %365 = vperm.xlu1 %15353, %v279_v27   ;;  %v16911_v27 = vand.u32 4294901760, %v16886_v62  ;;  %v16929_v7 = vand.u32 4294901760, %v756_v48 }
  0x33   : > { %714 = vmatmul.mubr.f32.gmra.mrb[10].mxu1 %v16817_v28  ;;  %1123 = vmatmul.mubr.f32.gmra.mrb[6].mxu0 %v16605_v15  ;;  %20881 = vst [vmem:[#allocation46_spill] sm:$0xff] %v16897_v32  ;;  %v16920_v4 = vand.u32 4294901760, %v16897_v32 }
  0x34   : > { %719 = vmatprep.mubr.f32.mxu1 %v20439_v2  ;;  %1128 = vmatprep.mubr.f32.mxu0 %v20439_v2  ;;  %20884 = vst [vmem:[#allocation49_spill] sm:$0xff] %v16911_v27  ;;  %20888 = vst [vmem:[#allocation53_spill] sm:$0xff] %v16929_v7 }
  0x35   : > { %370 = vperm.xlu0 %15352, %v280_v26   ;;  %v221_v26 = vld [vmem:[%s20428_s1 + $0x70] sm:$0xff]  ;;  %20885 = vst [vmem:[#allocation50_spill] sm:$0xff] %v16920_v4  ;;  %v778_v15 = vsub.f32 %v16897_v32, %v16920_v4  ;;  %v505_v4 = vsel %vm458_vm0, %v222_v54, 0 }
  0x36   : > { %375 = vperm.xlu1 %15353, %v281_v29   ;;  %v502_v29 = vsel %vm458_vm0, %v221_v26, 0  ;;  %v242_v26 = vld [vmem:[%s16617_s4 + $0x18] sm:$0xff]  ;;  %v16973_v54 = vand.u32 4294901760, %v505_v4 }
  0x37   : > { %725 = vmatmul.mubr.f32.gmra.mrb[12].mxu1 %v16852_v6  ;;  %1130 = vmatmul.mubr.f32.gmra.mrb[8].mxu0 %v16628_v24  ;;  %v20889_v24 = vmov 0.0   ;;  %v16947_v13 = vand.u32 4294901760, %v502_v29  ;;  %v16961_v10 = vand.u32 4294901760, %v778_v15  ;;  %v16979_v15 = vsub.f32 %v251_v9, %v2623_v3 }
  0x38   : > { %730 = vmatprep.mubr.f32.mxu1 %v20439_v2  ;;  %1135 = vmatprep.mubr.f32.mxu0 %v20439_v2  ;;  %20897 = vst [vmem:[#allocation61_spill] sm:$0xff] %v16973_v54 }
  0x39   : > { %20892 = vst [vmem:[#allocation56_spill] sm:$0xff] %v16947_v13  ;;  %20894 = vst [vmem:[#allocation58_spill] sm:$0xff] %v16961_v10 }
  0x3b   : > { %736 = vmatmul.mubr.f32.gmra.mrb[14].mxu1 %v16878_v55  ;;  %1137 = vmatmul.mubr.f32.gmra.mrb[10].mxu0 %v16705_v63  ;;  %v16925_v63 = vand.u32 4294901760, %v499_v1 }
  0x3c   : > { %741 = vmatprep.mubr.f32.mxu1 %v20439_v2  ;;  %1142 = vmatprep.mubr.f32.mxu0 %v20439_v2  ;;  %v767_v2 = vsub.f32 %v16886_v62, %v16911_v27  ;;  %v2619_v27 = vand.u32 4294901760, %v242_v26 }
  0x3d   : > { %20887 = vst [vmem:[#allocation52_spill] sm:$0xff] %v16925_v63  ;;  %v16945_v48 = vsub.f32 %v499_v1, %v16925_v63  ;;  %v223_v1 = vld [vmem:[%s20428_s1 + $0x80] sm:$0xff] }
  0x3e   : > { %v16953_v8 = vand.u32 4294901760, %v767_v2  ;;  %v16975_v35 = vpack.c.bf16 %v2623_v3, %v2619_v27  ;;  %v16998_v3 = vsub.f32 %v505_v4, %v16973_v54 }
  0x3f   : > { %747 = vmatmul.mubr.f32.gmra.mrb[16].mxu1 %v16906_v50  ;;  %1144 = vmatmul.mubr.f32.gmra.mrb[12].mxu0 %v16755_v25  ;;  %v16942_v25 = vand.u32 4294901760, %v16923_v47  ;;  %20891 = vst [vmem:[#allocation55_spill] sm:$0xff] %v16945_v48  ;;  %v16966_v2 = vand.u32 4294901760, %v16945_v48  ;;  %v16977_v50 = vsub.f32 %v242_v26, %v2619_v27 }
  0x40   : > { %752 = vmatprep.mubr.f32.mxu1 %v20889_v24  ;;  %1149 = vmatprep.mubr.f32.mxu0 %v20889_v24  ;;  %20893 = vst [vmem:[#allocation57_spill] sm:$0xff] %v16953_v8  ;;  %20898 = vst [vmem:[#allocation62_spill] sm:$0xff] %v16975_v35 }
  0x41   : > { %20890 = vst [vmem:[#allocation54_spill] sm:$0xff] %v16942_v25  ;;  %20895 = vst [vmem:[#allocation59_spill] sm:$0xff] %v16966_v2  ;;  %13497 = vmatprep.subr.bf16.mxu1 %v16975_v35  ;;  %v800_v27 = vsub.f32 %v16945_v48, %v16966_v2  ;;  %v17018_v2 = vand.u32 4294901760, %v16998_v3 }
  0x42   : > { %20901 = vst [vmem:[#allocation65_spill] sm:$0xff] %v16998_v3 }
  0x43   : > { %758 = vmatmul.mubr.f32.gmra.mrb[18].mxu1 %v16929_v7  ;;  %1151 = vmatmul.mubr.f32.gmra.mrb[14].mxu0 %v16778_v0  ;;  %v789_v7 = vsub.f32 %v16923_v47, %v16942_v25  ;;  %v16969_v0 = vsub.f32 %v502_v29, %v16947_v13  ;;  %v508_v25 = vsel %vm458_vm0, %v223_v1, 0  ;;  %v224_v29 = vld [vmem:[%s20428_s1 + $0x88] sm:$0xff]  ;;  %v17013_v4 = vand.u32 4294901760, %v800_v27  ;;  %20904 = vst [vmem:[#allocation68_spill] sm:$0xff] %v17018_v2 }
  0x44   : > { %763 = vmatprep.mubr.f32.mxu1 %v20889_v24  ;;  %1156 = vmatprep.mubr.f32.mxu0 %v20889_v24  ;;  %v17000_v26 = vand.u32 4294901760, %v508_v25  ;;  %v511_v1 = vsel %vm458_vm0, %v224_v29, 0 }
  0x45   : > { %20896 = vst [vmem:[#allocation60_spill] sm:$0xff] %v16969_v0  ;;  %v16995_v9 = vand.u32 4294901760, %v16969_v0  ;;  %v17008_v35 = vand.u32 4294901760, %v511_v1  ;;  %20903 = vst [vmem:[#allocation67_spill] sm:$0xff] %v17013_v4 }
  0x46   : > { %20902 = vst [vmem:[#allocation66_spill] sm:$0xff] %v17000_v26 }
  0x47   : > { %769 = vmatmul.mubr.f32.gmra.mrb[20].mxu1 %v16953_v8  ;;  %1158 = vmatmul.mubr.f32.gmra.mrb[16].mxu0 %v16805_v21  ;;  %v16988_v21 = vand.u32 4294901760, %v789_v7  ;;  %20900 = vst [vmem:[#allocation64_spill] sm:$0xff] %v16995_v9  ;;  %v225_v7 = vld [vmem:[%s20428_s1 + $0x90] sm:$0xff]  ;;  %v811_v29 = vsub.f32 %v16969_v0, %v16995_v9  ;;  %v226_v8 = vld [vmem:[%s20428_s1 + $0x98] sm:$0xff] }
  0x48   : > { %774 = vmatprep.mubr.f32.mxu1 %v20889_v24  ;;  %1163 = vmatprep.mubr.f32.mxu0 %v20889_v24  ;;  %v517_v27 = vsel %vm458_vm0, %v226_v8, 0  ;;  %v227_v8 = vld [vmem:[%s20428_s1 + $0xa0] sm:$0xff] }
  0x49   : > { %20899 = vst [vmem:[#allocation63_spill] sm:$0xff] %v16988_v21 }
  0x4b   : > { %780 = vmatmul.mubr.f32.gmra.mrb[22].mxu1 %v16961_v10  ;;  %1165 = vmatmul.mubr.f32.gmra.mrb[18].mxu0 %v16834_v52  ;;  %v514_v52 = vsel %vm458_vm0, %v225_v7, 0  ;;  %v17021_v10 = vsub.f32 %v508_v25, %v17000_v26  ;;  %v822_v25 = vsub.f32 %v16998_v3, %v17018_v2 }
  0x4c   : > { %785 = vmatprep.mubr.f32.mxu1 %v20889_v24  ;;  %1170 = vmatprep.mubr.f32.mxu0 %v20889_v24  ;;  %v17028_v7 = vand.u32 4294901760, %v514_v52 }
  0x4d   : > { %20905 = vst [vmem:[#allocation69_spill] sm:$0xff] %v17021_v10  ;;  %v17038_v9 = vand.u32 4294901760, %v17021_v10 }
  0x4f   : > { %791 = vmatmul.mubr.f32.gmra.mrb[24].mxu1 %v16988_v21  ;;  %1172 = vmatmul.mubr.f32.gmra.mrb[20].mxu0 %v16844_v60  ;;  %v17033_v60 = vand.u32 4294901760, %v811_v29  ;;  %20907 = vst [vmem:[#allocation71_spill] sm:$0xff] %v17038_v9  ;;  %v17041_v21 = vsub.f32 %v511_v1, %v17008_v35  ;;  %v17052_v29 = vand.u32 4294901760, %v822_v25  ;;  %v833_v1 = vsub.f32 %v17021_v10, %v17038_v9 }
  0x50   : > { %796 = vmatprep.mubr.f32.mxu1 %v20889_v24  ;;  %1177 = vmatprep.mubr.f32.mxu0 %v20889_v24  ;;  %v520_v25 = vsel %vm458_vm0, %v227_v8, 0  ;;  %v523_v9 = vsel %vm458_vm0, %v228_v16, 0  ;;  %v229_v16 = vld [vmem:[%s20428_s1 + $0xb0] sm:$0xff] }
  0x51   : > { %20906 = vst [vmem:[#allocation70_spill] sm:$0xff] %v17033_v60  ;;  %20908 = vst [vmem:[#allocation72_spill] sm:$0xff] %v17041_v21  ;;  %v17057_v2 = vand.u32 4294901760, %v17041_v21  ;;  %v17081_v57 = vand.u32 4294901760, %v520_v25 }
  0x52   : > { %20910 = vst [vmem:[#allocation74_spill] sm:$0xff] %v17052_v29 }
  0x53   : > { %802 = vmatmul.mubr.f32.gmra.mrb[26].mxu1 %v17013_v4  ;;  %1179 = vmatmul.mubr.f32.gmra.mrb[22].mxu0 %v16870_v33  ;;  %v17048_v33 = vand.u32 4294901760, %v517_v27  ;;  %20911 = vst [vmem:[#allocation75_spill] sm:$0xff] %v17057_v2  ;;  %v17060_v4 = vsub.f32 %v514_v52, %v17028_v7  ;;  %v17074_v52 = vand.u32 4294901760, %v833_v1 }
  0x54   : > { %807 = vmatprep.mubr.f32.mxu1 %v20889_v24  ;;  %1184 = vmatprep.mubr.f32.mxu0 %v20889_v24 }
  0x55   : > { %20909 = vst [vmem:[#allocation73_spill] sm:$0xff] %v17048_v33  ;;  %20912 = vst [vmem:[#allocation76_spill] sm:$0xff] %v17060_v4  ;;  %v17079_v55 = vand.u32 4294901760, %v17060_v4 }
  0x56   : > { %20914 = vst [vmem:[#allocation78_spill] sm:$0xff] %v17074_v52 }
  0x57   : > { %813 = vmatmul.mubr.f32.gmra.mrb[28].mxu1 %v17033_v60  ;;  %1186 = vmatmul.mubr.f32.gmra.mrb[24].mxu0 %v16899_v51  ;;  %v17069_v51 = vsub.f32 %v517_v27, %v17048_v33  ;;  %v844_v60 = vsub.f32 %v17041_v21, %v17057_v2  ;;  %20915 = vst [vmem:[#allocation79_spill] sm:$0xff] %v17079_v55  ;;  %v17088_v27 = vand.u32 4294901760, %v523_v9 }
  0x58   : > { %818 = vmatprep.mubr.f32.mxu1 %v20889_v24  ;;  %1191 = vmatprep.mubr.f32.mxu0 %v20889_v24  ;;  %v855_v1 = vsub.f32 %v17060_v4, %v17079_v55  ;;  %v17100_v2 = vsub.f32 %v520_v25, %v17081_v57 }
  0x59   : > { %20913 = vst [vmem:[#allocation77_spill] sm:$0xff] %v17069_v51  ;;  %v17092_v8 = vand.u32 4294901760, %v844_v60  ;;  %v230_v60 = vld [vmem:[%s20428_s1 + $0xb8] sm:$0xff] }
  0x5a   : > { %20918 = vst [vmem:[#allocation82_spill] sm:$0xff] %v17100_v2  ;;  %v17113_v55 = vand.u32 4294901760, %v855_v1 }
  0x5b   : > { %824 = vmatmul.mubr.f32.gmra.mrb[30].mxu1 %v17052_v29  ;;  %1193 = vmatmul.mubr.f32.gmra.mrb[26].mxu0 %v16925_v63  ;;  %20916 = vst [vmem:[#allocation80_spill] sm:$0xff] %v17092_v8  ;;  %v17097_v63 = vand.u32 4294901760, %v17069_v51  ;;  %v526_v29 = vsel %vm458_vm0, %v229_v16, 0 }
  0x5c   : > { %829 = vmatprep.mubr.f32.mxu1 %v20889_v24  ;;  %1198 = vmatprep.mubr.f32.mxu0 %v20889_v24  ;;  %20920 = vst [vmem:[#allocation84_spill] sm:$0xff] %v17113_v55  ;;  %v17120_v16 = vand.u32 4294901760, %v526_v29 }
  0x5d   : > { %20917 = vst [vmem:[#allocation81_spill] sm:$0xff] %v17097_v63  ;;  %v866_v25 = vsub.f32 %v17069_v51, %v17097_v63 }
  0x5e   : > { %v17138_v6 = vsub.f32 %v526_v29, %v17120_v16 }
  0x5f   : > { %835 = vmatmul.mubr.f32.gmra.mrb[32].mxu1 %v17074_v52  ;;  %1200 = vmatmul.mubr.f32.gmra.mrb[28].mxu0 %v16947_v13  ;;  %v17109_v13 = vsub.f32 %v523_v9, %v17088_v27  ;;  %v17118_v52 = vand.u32 4294901760, %v17100_v2  ;;  %v529_v9 = vsel %vm458_vm0, %v230_v60, 0  ;;  %v17133_v63 = vand.u32 4294901760, %v866_v25 }
  0x60   : > { %840 = vmatprep.mubr.f32.mxu1 %v20889_v24  ;;  %1205 = vmatprep.mubr.f32.mxu0 %v20889_v24  ;;  %20924 = vst [vmem:[#allocation88_spill] sm:$0xff] %v17138_v6  ;;  %v17140_v60 = vand.u32 4294901760, %v529_v9  ;;  %v535_v25 = vsel %vm458_vm0, %v232_v44, 0 }
  0x61   : > { %20919 = vst [vmem:[#allocation83_spill] sm:$0xff] %v17109_v13  ;;  %20921 = vst [vmem:[#allocation85_spill] sm:$0xff] %v17118_v52  ;;  %v17129_v1 = vand.u32 4294901760, %v17109_v13 }
  0x62   : > { %20923 = vst [vmem:[#allocation87_spill] sm:$0xff] %v17133_v63 }
  0x63   : > { %846 = vmatmul.mubr.f32.gmra.mrb[34].mxu1 %v17092_v8  ;;  %1207 = vmatmul.mubr.f32.gmra.mrb[30].mxu0 %v16973_v54  ;;  %v231_v54 = vld [vmem:[%s20428_s1 + $0xc0] sm:$0xff]  ;;  %20922 = vst [vmem:[#allocation86_spill] sm:$0xff] %v17129_v1  ;;  %v877_v8 = vsub.f32 %v17100_v2, %v17118_v52  ;;  %v888_v29 = vsub.f32 %v17109_v13, %v17129_v1  ;;  %v20925_v52 = vand.u32 4294901760, %v16647_v38  ;;  %v233_v38 = vld [vmem:[%s20428_s1 + $0xd0] sm:$0xff] }
  0x64   : > { %851 = vmatprep.mubr.f32.mxu1 %v20889_v24  ;;  %1401 = vmatprep.mubr.f32.mxu0 %v20889_v24 }
  0x65   : > { %v17179_v44 = vand.u32 4294901760, %v888_v29  ;;  %v282_v29 = vld [vmem:[%s20429_s2 + $0x80] sm:$0xff] }
  0x66   : > { %380 = vperm.xlu0 %15352, %v282_v29  }
  0x67   : > { %857 = vmatmul.mubr.f32.gmra.mrb[36].mxu1 %v17113_v55  ;;  %1404 = vmatmul.mubr.f32.vlgmr.msra.gmra.mrb[0].mxu0 %v16603_v14  ;;  %v532_v14 = vsel %vm458_vm0, %v231_v54, 0  ;;  %v20926_v55 = vand.u32 4294901760, %v16649_v39  ;;  %v17162_v54 = vand.u32 4294901760, %v17138_v6  ;;  %v17175_v39 = vand.u32 4294901760, %v535_v25  ;;  %20930 = vst [vmem:[#allocation92_spill] sm:$0xff] %v17179_v44 }
  0x68   : > { %13487 = vmatpush1.bf16.msra.mxu0 %v16653_v41  ;;  %862 = vmatprep.mubr.f32.mxu1 %v20889_v24  ;;  %v17159_v41 = vand.u32 4294901760, %v877_v8  ;;  %v17167_v1 = vand.u32 4294901760, %v532_v14 }
  0x69   : > { %1409 = vmatprep.mubr.f32.mxu0 %v20889_v24  ;;  %1667 = vmatprep.subr.mxu0 %v16657_v43  ;;  %v13488_v28 = vpack.c.bf16 %v20926_v55, %v20925_v52  ;;  %20928 = vst [vmem:[#allocation90_spill] sm:$0xff] %v17162_v54  ;;  %v17165_v43 = vsub.f32 %v529_v9, %v17140_v60  ;;  %v234_v9 = vld [vmem:[%s20428_s1 + $0xd8] sm:$0xff] }
  0x6a   : > { %20927 = vst [vmem:[#allocation89_spill] sm:$0xff] %v17159_v41  ;;  %v899_v55 = vsub.f32 %v17138_v6, %v17162_v54  ;;  %v17187_v8 = vsub.f32 %v532_v14, %v17167_v1  ;;  %v541_v14 = vsel %vm458_vm0, %v234_v9, 0 }
  0x6b   : > { %868 = vmatmul.mubr.f32.gmra.mrb[38].mxu1 %v17133_v63  ;;  %1412 = vmatmul.mubr.f32.gmra.mrb[2].mxu0 %v16612_v18  ;;  %20929 = vst [vmem:[#allocation91_spill] sm:$0xff] %v17165_v43  ;;  %v17184_v52 = vand.u32 4294901760, %v17165_v43  ;;  %v17221_v9 = vand.u32 4294901760, %v541_v14 }
  0x6c   : > { %873 = vmatprep.mubr.f32.mxu1 %v20889_v24  ;;  %1417 = vmatprep.mubr.f32.mxu0 %v20889_v24  ;;  %20932 = vst [vmem:[#allocation94_spill] sm:$0xff] %v17187_v8  ;;  %v17204_v18 = vand.u32 4294901760, %v899_v55  ;;  %v235_v55 = vld [vmem:[%s20428_s1 + $0xe0] sm:$0xff] }
  0x6d   : > { %1669 = vmatpush1.msra.mxu0 %v16664_v46  ;;  %20931 = vst [vmem:[#allocation93_spill] sm:$0xff] %v17184_v52  ;;  %v910_v46 = vsub.f32 %v17165_v43, %v17184_v52 }
  0x6e   : > { %13489 = vmatprep.subr.bf16.mxu0 %v13488_v28  ;;  %v538_v28 = vsel %vm458_vm0, %v233_v38, 0  ;;  %20934 = vst [vmem:[#allocation96_spill] sm:$0xff] %v17204_v18  ;;  %v17209_v38 = vand.u32 4294901760, %v17187_v8 }
  0x6f   : > { %879 = vmatmul.mubr.f32.gmra.mrb[40].mxu1 %v17159_v41  ;;  %1420 = vmatmul.mubr.f32.gmra.mrb[4].mxu0 %v16626_v23  ;;  %v17199_v23 = vsub.f32 %v535_v25, %v17175_v39  ;;  %v17211_v54 = vand.u32 4294901760, %v538_v28  ;;  %v283_v25 = vld [vmem:[%s20429_s2 + $0x88] sm:$0xff]  ;;  %v17225_v29 = vand.u32 4294901760, %v910_v46  ;;  %v544_v46 = vsel %vm458_vm0, %v235_v55, 0 }
  0x70   : > { %884 = vmatprep.mubr.f32.mxu1 %v20889_v24  ;;  %1425 = vmatprep.mubr.f32.mxu0 %v20889_v24  ;;  %20935 = vst [vmem:[#allocation97_spill] sm:$0xff] %v17209_v38  ;;  %v17257_v63 = vand.u32 4294901760, %v544_v46 }
  0x71   : > { %20933 = vst [vmem:[#allocation95_spill] sm:$0xff] %v17199_v23  ;;  %385 = vperm.xlu1 %15353, %v283_v25   ;;  %20936 = vst [vmem:[#allocation98_spill] sm:$0xff] %v17225_v29  ;;  %v17230_v52 = vand.u32 4294901760, %v17199_v23  ;;  %v236_v25 = vld [vmem:[%s20428_s1 + $0xe8] sm:$0xff] }
  0x73   : > { %890 = vmatmul.mubr.f32.gmra.mrb[42].mxu1 %v17179_v44  ;;  %1428 = vmatmul.mubr.f32.gmra.mrb[6].mxu0 %v16636_v31  ;;  %v921_v31 = vsub.f32 %v17187_v8, %v17209_v38  ;;  %20937 = vst [vmem:[#allocation99_spill] sm:$0xff] %v17230_v52  ;;  %v17233_v44 = vsub.f32 %v538_v28, %v17211_v54  ;;  %v547_v28 = vsel %vm458_vm0, %v236_v25, 0 }
  0x74   : > { %895 = vmatprep.mubr.f32.mxu1 %v20889_v24  ;;  %1433 = vmatprep.mubr.f32.mxu0 %v20889_v24  ;;  %v17245_v38 = vsub.f32 %v541_v14, %v17221_v9  ;;  %v932_v41 = vsub.f32 %v17199_v23, %v17230_v52  ;;  %v17267_v14 = vand.u32 4294901760, %v547_v28 }
  0x75   : > { %20938 = vst [vmem:[#allocation100_spill] sm:$0xff] %v17233_v44  ;;  %v17255_v55 = vand.u32 4294901760, %v17233_v44 }
  0x76   : > { %20939 = vst [vmem:[#allocation101_spill] sm:$0xff] %v17245_v38  ;;  %20942 = vst [vmem:[#allocation104_spill] sm:$0xff] %v17267_v14  ;;  %v17271_v25 = vand.u32 4294901760, %v932_v41  ;;  %v17276_v52 = vand.u32 4294901760, %v17245_v38  ;;  %v286_v41 = vld [vmem:[%s20429_s2 + $0xa0] sm:$0xff] }
  0x77   : > { %901 = vmatmul.mubr.f32.gmra.mrb[44].mxu1 %v17204_v18  ;;  %1436 = vmatmul.mubr.f32.gmra.mrb[8].mxu0 %v16712_v5  ;;  %v284_v5 = vld [vmem:[%s20429_s2 + $0x90] sm:$0xff]  ;;  %v17250_v18 = vand.u32 4294901760, %v921_v31  ;;  %20941 = vst [vmem:[#allocation103_spill] sm:$0xff] %v17255_v55 }
  0x78   : > { %906 = vmatprep.mubr.f32.mxu1 %v20889_v24  ;;  %1441 = vmatprep.mubr.f32.mxu0 %v20889_v24  ;;  %v237_v31 = vld [vmem:[%s20428_s1 + $0xf0] sm:$0xff]  ;;  %20943 = vst [vmem:[#allocation105_spill] sm:$0xff] %v17271_v25  ;;  %20944 = vst [vmem:[#allocation106_spill] sm:$0xff] %v17276_v52 }
  0x79   : > { %390 = vperm.xlu0 %15352, %v284_v5   ;;  %20940 = vst [vmem:[#allocation102_spill] sm:$0xff] %v17250_v18  ;;  %v285_v5 = vld [vmem:[%s20429_s2 + $0x98] sm:$0xff] }
  0x7a   : > { %395 = vperm.xlu1 %15353, %v285_v5   ;;  %v550_v5 = vsel %vm458_vm0, %v237_v31, 0  ;;  %v954_v31 = vsub.f32 %v17245_v38, %v17276_v52 }
  0x7b   : > { %912 = vmatmul.mubr.f32.gmra.mrb[46].mxu1 %v17225_v29  ;;  %1444 = vmatmul.mubr.f32.gmra.mrb[10].mxu0 %v16739_v30  ;;  %v943_v30 = vsub.f32 %v17233_v44, %v17255_v55  ;;  %v17279_v29 = vsub.f32 %v544_v46, %v17257_v63  ;;  %v17291_v55 = vsub.f32 %v547_v28, %v17267_v14  ;;  %v17302_v12 = vand.u32 4294901760, %v550_v5 }
  0x7c   : > { %917 = vmatprep.mubr.f32.mxu1 %v20889_v24  ;;  %1449 = vmatprep.mubr.f32.mxu0 %v20889_v24 }
  0x7d   : > { %20945 = vst [vmem:[#allocation107_spill] sm:$0xff] %v17279_v29  ;;  %400 = vperm.xlu0 %15352, %v286_v41   ;;  %20946 = vst [vmem:[#allocation108_spill] sm:$0xff] %v17291_v55  ;;  %v17295_v46 = vand.u32 4294901760, %v943_v30  ;;  %v287_v41 = vld [vmem:[%s20429_s2 + $0xa8] sm:$0xff]  ;;  %v17311_v30 = vand.u32 4294901760, %v17291_v55 }
  0x7e   : > { %20949 = vst [vmem:[#allocation111_spill] sm:$0xff] %v17302_v12  ;;  %405 = vperm.xlu1 %15353, %v287_v41   ;;  %v288_v41 = vld [vmem:[%s20429_s2 + $0xb0] sm:$0xff] }
  0x7f   : > { %923 = vmatmul.mubr.f32.gmra.mrb[48].mxu1 %v17250_v18  ;;  %1452 = vmatmul.mubr.f32.gmra.mrb[12].mxu0 %v16776_v61  ;;  %v238_v61 = vld [vmem:[%s20428_s1 + $0xf8] sm:$0xff]  ;;  %20947 = vst [vmem:[#allocation109_spill] sm:$0xff] %v17295_v46  ;;  %v17300_v18 = vand.u32 4294901760, %v17279_v29  ;;  %20950 = vst [vmem:[#allocation112_spill] sm:$0xff] %v17311_v30 }
  0x80   : > { %928 = vmatprep.mubr.f32.mxu1 %v20889_v24  ;;  %1457 = vmatprep.mubr.f32.mxu0 %v20889_v24  ;;  %v553_v28 = vsel %vm458_vm0, %v238_v61, 0 }
  0x81   : > { %20948 = vst [vmem:[#allocation110_spill] sm:$0xff] %v17300_v18  ;;  %v965_v52 = vsub.f32 %v17279_v29, %v17300_v18  ;;  %v17322_v61 = vand.u32 4294901760, %v553_v28  ;;  %410 = vperm.xlu0 %15352, %v288_v41   ;;  %v289_v41 = vld [vmem:[%s20429_s2 + $0xb8] sm:$0xff] }
  0x82   : > { %415 = vperm.xlu1 %15353, %v289_v41   ;;  %v290_v41 = vld [vmem:[%s20429_s2 + $0xc0] sm:$0xff] }
  0x83   : > { %934 = vmatmul.mubr.f32.gmra.mrb[50].mxu1 %v17271_v25  ;;  %1460 = vmatmul.mubr.f32.gmra.mrb[14].mxu0 %v16803_v20  ;;  %v17315_v20 = vand.u32 4294901760, %v954_v31  ;;  %v17320_v25 = vsub.f32 %v550_v5, %v17302_v12  ;;  %20953 = vst [vmem:[#allocation115_spill] sm:$0xff] %v17322_v61  ;;  %v17331_v31 = vand.u32 4294901760, %v965_v52  ;;  %v976_v5 = vsub.f32 %v17291_v55, %v17311_v30  ;;  %v17375_v30 = vld [vmem:[%s16617_s4 + $0x58] sm:$0xff] }
  0x84   : > { %939 = vmatprep.mubr.f32.mxu1 %v20889_v24  ;;  %1465 = vmatprep.mubr.f32.mxu0 %v20889_v24  ;;  %v17339_v18 = vsub.f32 %v553_v28, %v17322_v61 }
  0x85   : > { %20951 = vst [vmem:[#allocation113_spill] sm:$0xff] %v17315_v20  ;;  %20952 = vst [vmem:[#allocation114_spill] sm:$0xff] %v17320_v25  ;;  %v17348_v52 = vand.u32 4294901760, %v976_v5  ;;  %420 = vperm.xlu0 %15352, %v290_v41   ;;  %v17372_v41 = vld [vmem:[%s16617_s4 + $0x10] sm:$0xff] }
  0x86   : > { %20954 = vst [vmem:[#allocation116_spill] sm:$0xff] %v17331_v31  ;;  %20956 = vst [vmem:[#allocation118_spill] sm:$0xff] %v17339_v18 }
  0x87   : > { %945 = vmatmul.mubr.f32.gmra.mrb[52].mxu1 %v17295_v46  ;;  %1468 = vmatmul.mubr.f32.gmra.mrb[16].mxu0 %v16832_v45  ;;  %v17336_v45 = vand.u32 4294901760, %v17320_v25  ;;  %20957 = vst [vmem:[#allocation119_spill] sm:$0xff] %v17348_v52  ;;  %v259_v46 = vld [vmem:[%s16617_s4 + $0xa0] sm:$0x3] }
  0x88   : > { %950 = vmatprep.mubr.f32.mxu1 %v20889_v24  ;;  %1473 = vmatprep.mubr.f32.mxu0 %v20889_v24 }
  0x89   : > { %20955 = vst [vmem:[#allocation117_spill] sm:$0xff] %v17336_v45  ;;  %v987_v28 = vsub.f32 %v17320_v25, %v17336_v45  ;;  %v291_v45 = vld [vmem:[%s20429_s2 + $0xc8] sm:$0xff] }
  0x8a   : > { %425 = vperm.xlu1 %15353, %v291_v45   ;;  %v260_v45 = vld [vmem:[%s16617_s4 + $0xa8] sm:$0x3] }
  0x8b   : > { %956 = vmatmul.mubr.f32.gmra.mrb[54].mxu1 %v17315_v20  ;;  %1476 = vmatmul.mubr.f32.gmra.mrb[18].mxu0 %v16860_v22  ;;  %v17353_v22 = vand.u32 4294901760, %v17339_v18  ;;  %v17362_v5 = vand.u32 4294901760, %v987_v28  ;;  %v20616_v28 = vand.u32 4294901760, %v17375_v30  ;;  %v17400_v20 = vsel %vm555_vm1, %v260_v45, 0 }
  0x8c   : > { %961 = vmatprep.mubr.f32.mxu1 %v20889_v24  ;;  %1481 = vmatprep.mubr.f32.mxu0 %v20889_v24  ;;  %v17418_v45 = vsel %vm555_vm1, %v259_v46, 0  ;;  %v295_v46 = vld [vmem:[%s20429_s2 + $0xe8] sm:$0xff] }
  0x8d   : > { %20958 = vst [vmem:[#allocation120_spill] sm:$0xff] %v17353_v22  ;;  %20959 = vst [vmem:[#allocation121_spill] sm:$0xff] %v17362_v5 }
  0x8f   : > { %967 = vmatmul.mubr.f32.gmra.mrb[56].mxu1 %v17331_v31  ;;  %1484 = vmatmul.mubr.f32.gmra.mrb[20].mxu0 %v16886_v62  ;;  %v998_v62 = vsub.f32 %v17339_v18, %v17353_v22 }
  0x90   : > { %972 = vmatprep.mubr.f32.mxu1 %v20889_v24  ;;  %1489 = vmatprep.mubr.f32.mxu0 %v20889_v24 }
  0x91   : > { %v17381_v22 = vand.u32 4294901760, %v998_v62  ;;  %v20962_v62 = vand.u32 4294901760, %v16979_v15 }
  0x93   : > { %978 = vmatmul.mubr.f32.gmra.mrb[58].mxu1 %v17348_v52  ;;  %1492 = vmatmul.mubr.f32.gmra.mrb[22].mxu0 %v16897_v32  ;;  %20960 = vst [vmem:[#allocation122_spill] sm:$0xff] %v17381_v22  ;;  %v292_v52 = vld [vmem:[%s20429_s2 + $0xd0] sm:$0xff]  ;;  %v2621_v32 = vand.u32 4294901760, %v17372_v41  ;;  %v3057_v31 = vsub.f32 %v16979_v15, %v20962_v62  ;;  %v17415_v62 = vand.u32 4294901760, %v17400_v20 }
  0x94   : > { %983 = vmatprep.mubr.f32.mxu1 %v20889_v24  ;;  %1497 = vmatprep.mubr.f32.mxu0 %v20889_v24 }
  0x95   : > { %430 = vperm.xlu0 %15352, %v292_v52   ;;  %v293_v52 = vld [vmem:[%s20429_s2 + $0xd8] sm:$0xff]  ;;  %20964 = vst [vmem:[#allocation124_spill] sm:$0xff] %v17415_v62 }
  0x96   : > { %435 = vperm.xlu1 %15353, %v293_v52   ;;  %v294_v52 = vld [vmem:[%s20429_s2 + $0xe0] sm:$0xff] }
  0x97   : > { %989 = vmatmul.mubr.f32.gmra.mrb[60].mxu1 %v17362_v5  ;;  %1500 = vmatmul.mubr.f32.gmra.mrb[24].mxu0 %v16923_v47  ;;  %v20961_v5 = vand.u32 4294901760, %v16977_v50 }
  0x98   : > { %994 = vmatprep.mubr.f32.mxu1 %v20889_v24  ;;  %1505 = vmatprep.mubr.f32.mxu0 %v20889_v24 }
  0x99   : > { %v3045_v47 = vsub.f32 %v16977_v50, %v20961_v5  ;;  %v17412_v5 = vpack.c.bf16 %v20616_v28, %v2621_v32  ;;  %v17429_v28 = vand.u32 4294901760, %v17418_v45  ;;  %440 = vperm.xlu0 %15352, %v294_v52   ;;  %v20966_v52 = vand.u32 4294901760, %v17375_v30 }
  0x9a   : > { %445 = vperm.xlu1 %15353, %v295_v46  }
  0x9b   : > { %1000 = vmatmul.mubr.f32.gmra.mrb[62].mxu1 %v17381_v22  ;;  %1508 = vmatmul.mubr.f32.gmra.mrb[26].mxu0 %v16945_v48  ;;  %20963 = vst [vmem:[#allocation123_spill] sm:$0xff] %v17412_v5  ;;  %v3046_v48 = vand.u32 4294901760, %v3045_v47  ;;  %v3058_v22 = vand.u32 4294901760, %v3057_v31  ;;  %v17489_v31 = vsub.f32 %v17372_v41, %v2621_v32  ;;  %v17504_v32 = vsub.f32 %v17400_v20, %v17415_v62 }
  0x9c   : > { %1212 = vmatprep.mubr.f32.mxu1 %v20889_v24  ;;  %1513 = vmatprep.mubr.f32.mxu0 %v20889_v24 }
  0x9d   : > { %v13500_v47 = vpack.c.bf16 %v3058_v22, %v3046_v48  ;;  %v296_v22 = vld [vmem:[%s20429_s2 + $0xf0] sm:$0xff]  ;;  %v297_v48 = vld [vmem:[%s20429_s2 + $0xf8] sm:$0xff]  ;;  %20965 = vst [vmem:[#allocation125_spill] sm:$0xff] %v17489_v31  ;;  %v20619_v46 = vand.u32 4294901760, %v17489_v31  ;;  %20968 = vst [vmem:[#allocation127_spill] sm:$0xff] %v17504_v32 }
  0x9e   : > { %450 = vperm.xlu0 %15352, %v296_v22   ;;  %455 = vperm.xlu1 %15353, %v297_v48   ;;  %v20621_v48 = vand.u32 4294901760, %v17504_v32 }
  0x9f   : > { %1214 = vmatmul.mubr.f32.vlgmr.msra.gmra.mrb[32].mxu1 %v17000_v26  ;;  %1516 = vmatmul.mubr.f32.gmra.mrb[28].mxu0 %v16969_v0  ;;  %v3051_v41 = vsub.f32 %v17489_v31, %v20619_v46 }
  0xa0   : > { %1219 = vmatprep.mubr.f32.mxu1 %v20889_v24  ;;  %1521 = vmatprep.mubr.f32.mxu0 %v20889_v24  ;;  %v3069_v46 = vsub.f32 %v17504_v32, %v20621_v48 }
  0xa1   : > { %13499 = vmatpush1.bf16.msra.mxu1 %v17412_v5 }
  0xa2   : > { %2628 = vmatprep.subr.mxu1 %v17415_v62 }
  0xa3   : > { %1221 = vmatmul.mubr.f32.gmra.mrb[34].mxu1 %v17008_v35  ;;  %1524 = vmatmul.mubr.f32.gmra.mrb[30].mxu0 %v16998_v3 }
  0xa4   : > { %1226 = vmatprep.mubr.f32.mxu1 %v20889_v24  ;;  %1529 = vmatprep.mubr.f32.mxu0 %v20889_v24 }
  0xa5   : > { %2630 = vmatpush1.msra.mxu1 %v17429_v28 }
  0xa6   : > { %13501 = vmatprep.subr.bf16.mxu1 %v13500_v47  ;;  %v17494_v47 = vsub.f32 %v17375_v30, %v20966_v52  ;;  %v17512_v30 = vsub.f32 %v17418_v45, %v17429_v28  ;;  %v3052_v45 = vand.u32 4294901760, %v3051_v41 }
  0xa7   : > { %1228 = vmatmul.mubr.f32.gmra.mrb[36].mxu1 %v17028_v7  ;;  %1532 = vmatmul.mubr.f32.gmra.mrb[32].mxu0 %v17021_v10 }
  0xa8   : > { %1233 = vmatprep.mubr.f32.mxu1 %v20889_v24  ;;  %1537 = vmatprep.mubr.f32.mxu0 %v20889_v24  ;;  %20967 = vst [vmem:[#allocation126_spill] sm:$0xff] %v17494_v47  ;;  %v20620_v22 = vand.u32 4294901760, %v17494_v47  ;;  %20969 = vst [vmem:[#allocation128_spill] sm:$0xff] %v17512_v30 }
  0xaa   : > { %v3063_v20 = vsub.f32 %v17494_v47, %v20620_v22 }
  0xab   : > { %1235 = vmatmul.mubr.f32.gmra.mrb[38].mxu1 %v17048_v33  ;;  %1540 = vmatmul.mubr.f32.gmra.mrb[34].mxu0 %v17041_v21 }
  0xac   : > { %1240 = vmatprep.mubr.f32.mxu1 %v20889_v24  ;;  %1545 = vmatprep.mubr.f32.mxu0 %v20889_v24  ;;  %v3064_v52 = vand.u32 4294901760, %v3063_v20  ;;  %v3070_v20 = vand.u32 4294901760, %v3069_v46  ;;  %v20970_v46 = vand.u32 4294901760, %v16651_v40  ;;  %v20973_v40 = vand.u32 4294901760, %v16695_v59  ;;  %v20979_v59 = vld [vmem:[#allocation24_spill] sm:$0xff] }
  0xae   : > { %v13502_v22 = vpack.c.bf16 %v3064_v52, %v3052_v45  ;;  %v20971_v45 = vand.u32 4294901760, %v16655_v42 }
  0xaf   : > { %1242 = vmatmul.mubr.f32.gmra.mrb[40].mxu1 %v17081_v57  ;;  %1548 = vmatmul.mubr.f32.gmra.mrb[36].mxu0 %v17060_v4 }
  0xb0   : > { %1247 = vmatprep.mubr.f32.mxu1 %v20889_v24  ;;  %1553 = vmatprep.mubr.f32.mxu0 %v20889_v24  ;;  %v13490_v52 = vpack.c.bf16 %v20971_v45, %v20970_v46  ;;  %v20980_v46 = vld [vmem:[#allocation39_spill] sm:$0xff] }
  0xb3   : > { %1249 = vmatmul.mubr.f32.gmra.mrb[42].mxu1 %v17088_v27  ;;  %1556 = vmatmul.mubr.f32.gmra.mrb[38].mxu0 %v17069_v51 }
  0xb4   : > { %1254 = vmatprep.mubr.f32.mxu1 %v20889_v24  ;;  %1561 = vmatprep.mubr.f32.mxu0 %v20889_v24 }
  0xb7   : > { %1256 = vmatmul.mubr.f32.gmra.mrb[44].mxu1 %v17120_v16  ;;  %1564 = vmatmul.mubr.f32.gmra.mrb[40].mxu0 %v17100_v2 }
  0xb8   : > { %1261 = vmatprep.mubr.f32.mxu1 %v20889_v24  ;;  %1569 = vmatprep.mubr.f32.mxu0 %v20889_v24 }
  0xbb   : > { %1263 = vmatmul.mubr.f32.gmra.mrb[46].mxu1 %v17140_v60  ;;  %1572 = vmatmul.mubr.f32.gmra.mrb[42].mxu0 %v17109_v13 }
  0xbc   : > { %1268 = vmatprep.mubr.f32.mxu1 %v20889_v24  ;;  %1577 = vmatprep.mubr.f32.mxu0 %v20889_v24 }
  0xbf   : > { %1270 = vmatmul.mubr.f32.gmra.mrb[48].mxu1 %v17167_v1  ;;  %1580 = vmatmul.mubr.f32.gmra.mrb[44].mxu0 %v17138_v6 }
  0xc0   : > { %1275 = vmatprep.mubr.f32.mxu1 %v20889_v24  ;;  %1585 = vmatprep.mubr.f32.mxu0 %v20889_v24 }
  0xc3   : > { %1277 = vmatmul.mubr.f32.gmra.mrb[50].mxu1 %v17175_v39  ;;  %1588 = vmatmul.mubr.f32.gmra.mrb[46].mxu0 %v17165_v43 }
  0xc4   : > { %1282 = vmatprep.mubr.f32.mxu1 %v20889_v24  ;;  %1593 = vmatprep.mubr.f32.mxu0 %v20889_v24 }
  0xc7   : > { %1284 = vmatmul.mubr.f32.gmra.mrb[52].mxu1 %v17211_v54  ;;  %1596 = vmatmul.mubr.f32.gmra.mrb[48].mxu0 %v17187_v8 }
  0xc8   : > { %1289 = vmatprep.mubr.f32.mxu1 %v20889_v24  ;;  %1601 = vmatprep.mubr.f32.mxu0 %v20889_v24 }
  0xcb   : > { %1291 = vmatmul.mubr.f32.gmra.mrb[54].mxu1 %v17221_v9  ;;  %1604 = vmatmul.mubr.f32.gmra.mrb[50].mxu0 %v17199_v23 }
  0xcc   : > { %1296 = vmatprep.mubr.f32.mxu1 %v20889_v24  ;;  %1609 = vmatprep.mubr.f32.mxu0 %v20889_v24 }
  0xcf   : > { %1298 = vmatmul.mubr.f32.gmra.mrb[56].mxu1 %v17257_v63  ;;  %1612 = vmatmul.mubr.f32.gmra.mrb[52].mxu0 %v17233_v44 }
  0xd0   : > { %1303 = vmatprep.mubr.f32.mxu1 %v20889_v24  ;;  %1617 = vmatprep.mubr.f32.mxu0 %v20889_v24 }
  0xd3   : > { %1305 = vmatmul.mubr.f32.gmra.mrb[58].mxu1 %v17267_v14  ;;  %1620 = vmatmul.mubr.f32.gmra.mrb[54].mxu0 %v17245_v38  ;;  %v20622_v38 = vand.u32 4294901760, %v17512_v30 }
  0xd4   : > { %1310 = vmatprep.mubr.f32.mxu1 %v20889_v24  ;;  %1625 = vmatprep.mubr.f32.mxu0 %v20889_v24 }
  0xd5   : > { %v3075_v41 = vsub.f32 %v17512_v30, %v20622_v38 }
  0xd7   : > { %1312 = vmatmul.mubr.f32.gmra.mrb[60].mxu1 %v17302_v12  ;;  %1628 = vmatmul.mubr.f32.gmra.mrb[56].mxu0 %v17279_v29  ;;  %v3076_v48 = vand.u32 4294901760, %v3075_v41  ;;  %v20972_v41 = vand.u32 4294901760, %v16677_v53  ;;  %v20975_v53 = vld [vmem:[#allocation20_spill] sm:$0xff] }
  0xd8   : > { %1317 = vmatprep.mubr.f32.mxu1 %v20889_v24  ;;  %1633 = vmatprep.mubr.f32.mxu0 %v20889_v24 }
  0xdb   : > { %1319 = vmatmul.mubr.f32.gmra.mrb[62].mxu1 %v17322_v61  ;;  %1636 = vmatmul.mubr.f32.gmra.mrb[58].mxu0 %v17291_v55 }
  0xdc   : > { %1641 = vmatprep.mubr.f32.mxu0 %v20889_v24  ;;  %2689 = vmatprep.mubr.f32.mxu1 %v20889_v24 }
  0xdf   : > { %1644 = vmatmul.mubr.f32.gmra.mrb[60].mxu0 %v17320_v25  ;;  %2695 = vmatmul.mubr.f32.vlgmr.msra.gmra.mrb[64].mxu1 %v16686_v56  ;;  %v21070_v56 = vld [vmem:[#allocation6_spill] sm:$0xff] }
  0xe0   : > { %1649 = vmatprep.mubr.f32.mxu0 %v20889_v24  ;;  %2700 = vmatprep.mubr.f32.mxu1 %v20889_v24 }
  0xe1   : > { %13503 = vmatpush1.bf16.msra.mxu1 %v13502_v22  ;;  %v13504_v22 = vpack.c.bf16 %v16979_v15, %v16977_v50 }
  0xe2   : > { %3071 = vmatprep.subr.mxu1 %v3070_v20 }
  0xe3   : > { %1652 = vmatmul.mubr.f32.gmra.mrb[62].mxu0 %v17339_v18  ;;  %2706 = vmatmul.mubr.f32.gmra.mrb[66].mxu1 %v16725_v17  ;;  %v21106_v18 = vld [vmem:[#allocation61_spill] sm:$0xff] }
  0xe4   : > { %1728 = vmatprep.mubr.f32.mxu0 %v20889_v24  ;;  %2711 = vmatprep.mubr.f32.mxu1 %v20889_v24 }
  0xe5   : > { %3077 = vmatpush1.msra.mxu1 %v3076_v48  ;;  %v20976_v48 = vld [vmem:[#allocation34_spill] sm:$0xff] }
  0xe6   : > { %13505 = vmatprep.subr.bf16.mxu1 %v13504_v22  ;;  %v20983_v22 = vld [vmem:[#allocation26_spill] sm:$0xff] }
  0xe7   : > { %1732 = vmatmul.mubr.f32.vlgmr.msra.gmra.mrb[0].mxu0 %v16620_v19  ;;  %2717 = vmatmul.mubr.f32.gmra.mrb[68].mxu1 %v16748_v34  ;;  %v21097_v19 = vld [vmem:[#allocation47_spill] sm:$0xff] }
  0xe8   : > { %13491 = vmatpush1.bf16.msra.mxu0 %v13490_v52  ;;  %1737 = vmatprep.mubr.f32.mxu0 %v20889_v24 }
  0xe9   : > { %2722 = vmatprep.mubr.f32.mxu1 %v20889_v24  ;;  %2036 = vmatprep.subr.mxu0 %v20972_v41  ;;  %v20984_v41 = vld [vmem:[#allocation43_spill] sm:$0xff] }
  0xeb   : > { %1741 = vmatmul.mubr.f32.gmra.mrb[2].mxu0 %v16643_v36  ;;  %2728 = vmatmul.mubr.f32.gmra.mrb[70].mxu1 %v16771_v58  ;;  %v21091_v36 = vld [vmem:[#allocation38_spill] sm:$0xff] }
  0xec   : > { %1746 = vmatprep.mubr.f32.mxu0 %v20889_v24  ;;  %2733 = vmatprep.mubr.f32.mxu1 %v20889_v24 }
  0xed   : > { %2040 = vmatpush1.msra.mxu0 %v20973_v40 }
  0xee   : > { %13493 = vmatprep.subr.bf16.mxu0 %v16645_v37 }
  0xef   : > { %1750 = vmatmul.mubr.f32.gmra.mrb[4].mxu0 %v16669_v49  ;;  %2739 = vmatmul.mubr.f32.gmra.mrb[72].mxu1 %v16797_v11  ;;  %v21082_v49 = vld [vmem:[#allocation29_spill] sm:$0xff] }
  0xf0   : > { %1755 = vmatprep.mubr.f32.mxu0 %v20889_v24  ;;  %2744 = vmatprep.mubr.f32.mxu1 %v20889_v24 }
  0xf2   : > { %v17567_v42 = vpop.f32.mrb[0].mxu1 }
  0xf3   : > { %20974 = vst [vmem:[#allocation129_spill] sm:$0xff] %v17567_v42  ;;  %1759 = vmatmul.mubr.f32.gmra.mrb[6].mxu0 %v20975_v53  ;;  %2750 = vmatmul.mubr.f32.gmra.mrb[74].mxu1 %v20976_v48  ;;  %v17571_v20 = vpop.f32.mrb[1].mxu1  ;;  %v20991_v42 = vld [vmem:[#allocation35_spill] sm:$0xff] }
  0xf4   : > { %20977 = vst [vmem:[#allocation130_spill] sm:$0xff] %v17571_v20  ;;  %1764 = vmatprep.mubr.f32.mxu0 %v20889_v24  ;;  %2755 = vmatprep.mubr.f32.mxu1 %v20889_v24 }
  0xf6   : > { %v17575_v37 = vpop.f32.mrb[2].mxu1 }
  0xf7   : > { %20978 = vst [vmem:[#allocation131_spill] sm:$0xff] %v17575_v37  ;;  %1768 = vmatmul.mubr.f32.gmra.mrb[8].mxu0 %v20979_v59  ;;  %2761 = vmatmul.mubr.f32.gmra.mrb[76].mxu1 %v20980_v46  ;;  %v17579_v45 = vpop.f32.mrb[3].mxu1  ;;  %v20987_v37 = vld [vmem:[#allocation31_spill] sm:$0xff] }
  0xf8   : > { %20981 = vst [vmem:[#allocation132_spill] sm:$0xff] %v17579_v45  ;;  %1773 = vmatprep.mubr.f32.mxu0 %v20889_v24  ;;  %2766 = vmatprep.mubr.f32.mxu1 %v20889_v24  ;;  %v20988_v45 = vld [vmem:[#allocation48_spill] sm:$0xff] }
  0xfa   : > { %v17583_v52 = vpop.f32.mrb[4].mxu1 }
  0xfb   : > { %20982 = vst [vmem:[#allocation133_spill] sm:$0xff] %v17583_v52  ;;  %1777 = vmatmul.mubr.f32.gmra.mrb[10].mxu0 %v20983_v22  ;;  %2772 = vmatmul.mubr.f32.gmra.mrb[78].mxu1 %v20984_v41  ;;  %v17587_v40 = vpop.f32.mrb[5].mxu1  ;;  %v21067_v22 = vld [vmem:[#allocation14_spill] sm:$0xff] }
  0xfc   : > { %20985 = vst [vmem:[#allocation134_spill] sm:$0xff] %v17587_v40  ;;  %1782 = vmatprep.mubr.f32.mxu0 %v20889_v24  ;;  %2777 = vmatprep.mubr.f32.mxu1 %v20889_v24  ;;  %v20992_v40 = vld [vmem:[#allocation53_spill] sm:$0xff] }
  0xfe   : > { %v17591_v38 = vpop.f32.mrb[6].mxu1 }
  0xff   : > { %20986 = vst [vmem:[#allocation135_spill] sm:$0xff] %v17591_v38  ;;  %1786 = vmatmul.mubr.f32.gmra.mrb[12].mxu0 %v20987_v37  ;;  %2783 = vmatmul.mubr.f32.gmra.mrb[80].mxu1 %v20988_v45  ;;  %v17595_v20 = vpop.f32.mrb[7].mxu1  ;;  %v20995_v45 = vld [vmem:[#allocation40_spill] sm:$0xff]  ;;  %v17762_v37 = vld [vmem:[%s16617_s4 + $0x68] sm:$0xff] }
 0x100   : > { %20989 = vst [vmem:[#allocation136_spill] sm:$0xff] %v17595_v20  ;;  %1791 = vmatprep.mubr.f32.mxu0 %v20889_v24  ;;  %2788 = vmatprep.mubr.f32.mxu1 %v20889_v24  ;;  %v20996_v20 = vld [vmem:[#allocation57_spill] sm:$0xff]  ;;  %v20633_v34 = vand.u32 4294901760, %v17762_v37 }
 0x102   : > { %v17599_v52 = vpop.f32.mrb[8].mxu1 }
 0x103   : > { %20990 = vst [vmem:[#allocation137_spill] sm:$0xff] %v17599_v52  ;;  %1795 = vmatmul.mubr.f32.gmra.mrb[14].mxu0 %v20991_v42  ;;  %2794 = vmatmul.mubr.f32.gmra.mrb[82].mxu1 %v20992_v40  ;;  %v17603_v41 = vpop.f32.mrb[9].mxu1  ;;  %v20999_v40 = vld [vmem:[#allocation44_spill] sm:$0xff]  ;;  %v21066_v42 = vld [vmem:[#allocation13_spill] sm:$0xff] }
 0x104   : > { %20993 = vst [vmem:[#allocation138_spill] sm:$0xff] %v17603_v41  ;;  %1800 = vmatprep.mubr.f32.mxu0 %v20889_v24  ;;  %2799 = vmatprep.mubr.f32.mxu1 %v20889_v24  ;;  %v21000_v41 = vld [vmem:[#allocation58_spill] sm:$0xff] }
 0x106   : > { %v17607_v38 = vpop.f32.mrb[10].mxu1 }
 0x107   : > { %20994 = vst [vmem:[#allocation139_spill] sm:$0xff] %v17607_v38  ;;  %1804 = vmatmul.mubr.f32.gmra.mrb[16].mxu0 %v20995_v45  ;;  %2805 = vmatmul.mubr.f32.gmra.mrb[84].mxu1 %v20996_v20  ;;  %v17611_v46 = vpop.f32.mrb[11].mxu1  ;;  %v21003_v20 = vld [vmem:[#allocation49_spill] sm:$0xff] }
 0x108   : > { %20997 = vst [vmem:[#allocation140_spill] sm:$0xff] %v17611_v46  ;;  %1809 = vmatprep.mubr.f32.mxu0 %v20889_v24  ;;  %2810 = vmatprep.mubr.f32.mxu1 %v20889_v24  ;;  %v21004_v46 = vld [vmem:[#allocation63_spill] sm:$0xff] }
 0x10a   : > { %v17615_v52 = vpop.f32.mrb[12].mxu1 }
 0x10b   : > { %20998 = vst [vmem:[#allocation141_spill] sm:$0xff] %v17615_v52  ;;  %1813 = vmatmul.mubr.f32.gmra.mrb[18].mxu0 %v20999_v40  ;;  %2816 = vmatmul.mubr.f32.gmra.mrb[86].mxu1 %v21000_v41  ;;  %v17619_v48 = vpop.f32.mrb[13].mxu1  ;;  %v21007_v41 = vld [vmem:[#allocation50_spill] sm:$0xff] }
 0x10c   : > { %21001 = vst [vmem:[#allocation142_spill] sm:$0xff] %v17619_v48  ;;  %1818 = vmatprep.mubr.f32.mxu0 %v20889_v24  ;;  %2821 = vmatprep.mubr.f32.mxu1 %v20889_v24  ;;  %v21008_v48 = vld [vmem:[#allocation67_spill] sm:$0xff] }
 0x10e   : > { %v17623_v38 = vpop.f32.mrb[14].mxu1 }
 0x10f   : > { %21002 = vst [vmem:[#allocation143_spill] sm:$0xff] %v17623_v38  ;;  %1822 = vmatmul.mubr.f32.gmra.mrb[20].mxu0 %v21003_v20  ;;  %2827 = vmatmul.mubr.f32.gmra.mrb[88].mxu1 %v21004_v46  ;;  %v17627_v45 = vpop.f32.mrb[15].mxu1  ;;  %v21011_v46 = vld [vmem:[#allocation54_spill] sm:$0xff] }
 0x110   : > { %21005 = vst [vmem:[#allocation144_spill] sm:$0xff] %v17627_v45  ;;  %1827 = vmatprep.mubr.f32.mxu0 %v20889_v24  ;;  %2832 = vmatprep.mubr.f32.mxu1 %v20889_v24  ;;  %v21012_v45 = vld [vmem:[#allocation70_spill] sm:$0xff] }
 0x112   : > { %v17631_v52 = vpop.f32.mrb[16].mxu1 }
 0x113   : > { %21006 = vst [vmem:[#allocation145_spill] sm:$0xff] %v17631_v52  ;;  %1831 = vmatmul.mubr.f32.gmra.mrb[22].mxu0 %v21007_v41  ;;  %2838 = vmatmul.mubr.f32.gmra.mrb[90].mxu1 %v21008_v48  ;;  %v17635_v40 = vpop.f32.mrb[17].mxu1  ;;  %v21015_v48 = vld [vmem:[#allocation59_spill] sm:$0xff] }
 0x114   : > { %21009 = vst [vmem:[#allocation146_spill] sm:$0xff] %v17635_v40  ;;  %1836 = vmatprep.mubr.f32.mxu0 %v20889_v24  ;;  %2843 = vmatprep.mubr.f32.mxu1 %v20889_v24  ;;  %v21016_v40 = vld [vmem:[#allocation74_spill] sm:$0xff] }
 0x116   : > { %v17639_v38 = vpop.f32.mrb[18].mxu1 }
 0x117   : > { %21010 = vst [vmem:[#allocation147_spill] sm:$0xff] %v17639_v38  ;;  %1840 = vmatmul.mubr.f32.gmra.mrb[24].mxu0 %v21011_v46  ;;  %2849 = vmatmul.mubr.f32.gmra.mrb[92].mxu1 %v21012_v45  ;;  %v17643_v20 = vpop.f32.mrb[19].mxu1  ;;  %v21019_v45 = vld [vmem:[#allocation64_spill] sm:$0xff] }
 0x118   : > { %21013 = vst [vmem:[#allocation148_spill] sm:$0xff] %v17643_v20  ;;  %1845 = vmatprep.mubr.f32.mxu0 %v20889_v24  ;;  %2854 = vmatprep.mubr.f32.mxu1 %v20889_v24  ;;  %v21020_v20 = vld [vmem:[#allocation78_spill] sm:$0xff] }
 0x11a   : > { %v17647_v52 = vpop.f32.mrb[20].mxu1 }
 0x11b   : > { %21014 = vst [vmem:[#allocation149_spill] sm:$0xff] %v17647_v52  ;;  %1849 = vmatmul.mubr.f32.gmra.mrb[26].mxu0 %v21015_v48  ;;  %2860 = vmatmul.mubr.f32.gmra.mrb[94].mxu1 %v21016_v40  ;;  %v17651_v41 = vpop.f32.mrb[21].mxu1  ;;  %v21023_v40 = vld [vmem:[#allocation68_spill] sm:$0xff] }
 0x11c   : > { %21017 = vst [vmem:[#allocation150_spill] sm:$0xff] %v17651_v41  ;;  %1854 = vmatprep.mubr.f32.mxu0 %v20889_v24  ;;  %2865 = vmatprep.mubr.f32.mxu1 %v20889_v24  ;;  %v21024_v41 = vld [vmem:[#allocation80_spill] sm:$0xff] }
 0x11e   : > { %v17655_v38 = vpop.f32.mrb[22].mxu1 }
 0x11f   : > { %21018 = vst [vmem:[#allocation151_spill] sm:$0xff] %v17655_v38  ;;  %1858 = vmatmul.mubr.f32.gmra.mrb[28].mxu0 %v21019_v45  ;;  %2871 = vmatmul.mubr.f32.gmra.mrb[96].mxu1 %v21020_v20  ;;  %v17659_v46 = vpop.f32.mrb[23].mxu1  ;;  %v21027_v20 = vld [vmem:[#allocation71_spill] sm:$0xff] }
 0x120   : > { %21021 = vst [vmem:[#allocation152_spill] sm:$0xff] %v17659_v46  ;;  %1863 = vmatprep.mubr.f32.mxu0 %v20889_v24  ;;  %2876 = vmatprep.mubr.f32.mxu1 %v20889_v24  ;;  %v21028_v46 = vld [vmem:[#allocation84_spill] sm:$0xff] }
 0x122   : > { %v17663_v52 = vpop.f32.mrb[24].mxu1 }
 0x123   : > { %21022 = vst [vmem:[#allocation153_spill] sm:$0xff] %v17663_v52  ;;  %1867 = vmatmul.mubr.f32.gmra.mrb[30].mxu0 %v21023_v40  ;;  %2882 = vmatmul.mubr.f32.gmra.mrb[98].mxu1 %v21024_v41  ;;  %v17667_v48 = vpop.f32.mrb[25].mxu1  ;;  %v21031_v41 = vld [vmem:[#allocation75_spill] sm:$0xff] }
 0x124   : > { %21025 = vst [vmem:[#allocation154_spill] sm:$0xff] %v17667_v48  ;;  %1872 = vmatprep.mubr.f32.mxu0 %v20889_v24  ;;  %2887 = vmatprep.mubr.f32.mxu1 %v20889_v24  ;;  %v21032_v48 = vld [vmem:[#allocation87_spill] sm:$0xff] }
 0x126   : > { %v17671_v38 = vpop.f32.mrb[26].mxu1 }
 0x127   : > { %21026 = vst [vmem:[#allocation155_spill] sm:$0xff] %v17671_v38  ;;  %1876 = vmatmul.mubr.f32.gmra.mrb[32].mxu0 %v21027_v20  ;;  %2893 = vmatmul.mubr.f32.gmra.mrb[100].mxu1 %v21028_v46  ;;  %v17675_v45 = vpop.f32.mrb[27].mxu1  ;;  %v21035_v46 = vld [vmem:[#allocation79_spill] sm:$0xff] }
 0x128   : > { %21029 = vst [vmem:[#allocation156_spill] sm:$0xff] %v17675_v45  ;;  %1881 = vmatprep.mubr.f32.mxu0 %v20889_v24  ;;  %2898 = vmatprep.mubr.f32.mxu1 %v20889_v24  ;;  %v21036_v45 = vld [vmem:[#allocation89_spill] sm:$0xff] }
 0x12a   : > { %v17679_v52 = vpop.f32.mrb[28].mxu1 }
 0x12b   : > { %21030 = vst [vmem:[#allocation157_spill] sm:$0xff] %v17679_v52  ;;  %1885 = vmatmul.mubr.f32.gmra.mrb[34].mxu0 %v21031_v41  ;;  %2904 = vmatmul.mubr.f32.gmra.mrb[102].mxu1 %v21032_v48  ;;  %v17683_v40 = vpop.f32.mrb[29].mxu1  ;;  %v21038_v52 = vld [vmem:[#allocation81_spill] sm:$0xff]  ;;  %v21039_v48 = vld [vmem:[#allocation92_spill] sm:$0xff]  ;;  %v17757_v41 = vld [vmem:[%s16617_s4 + $0x20] sm:$0xff] }
 0x12c   : > { %21033 = vst [vmem:[#allocation158_spill] sm:$0xff] %v17683_v40  ;;  %1890 = vmatprep.mubr.f32.mxu0 %v20889_v24  ;;  %2909 = vmatprep.mubr.f32.mxu1 %v20889_v24  ;;  %v21040_v40 = vld [vmem:[#allocation85_spill] sm:$0xff]  ;;  %v20634_v58 = vand.u32 4294901760, %v17757_v41 }
 0x12e   : > { %v17687_v38 = vpop.f32.mrb[30].mxu1 }
 0x12f   : > { %21034 = vst [vmem:[#allocation159_spill] sm:$0xff] %v17687_v38  ;;  %1894 = vmatmul.mubr.f32.gmra.mrb[36].mxu0 %v21035_v46  ;;  %2915 = vmatmul.mubr.f32.gmra.mrb[104].mxu1 %v21036_v45  ;;  %v17691_v20 = vpop.f32.mrb[31].mxu1  ;;  %v21041_v38 = vld [vmem:[#allocation96_spill] sm:$0xff]  ;;  %v21043_v45 = vld [vmem:[#allocation98_spill] sm:$0xff] }
 0x130   : > { %21037 = vst [vmem:[#allocation160_spill] sm:$0xff] %v17691_v20  ;;  %1899 = vmatprep.mubr.f32.mxu0 %v20889_v24  ;;  %2920 = vmatprep.mubr.f32.mxu1 %v20889_v24  ;;  %v21042_v20 = vld [vmem:[#allocation86_spill] sm:$0xff]  ;;  %v253_v46 = vld [vmem:[%s16617_s4 + $0x70] sm:$0xff] }
 0x131   : > { %v4659_v11 = vand.u32 4294901760, %v253_v46 }
 0x133   : > { %1903 = vmatmul.mubr.f32.gmra.mrb[38].mxu0 %v21038_v52  ;;  %2926 = vmatmul.mubr.f32.gmra.mrb[106].mxu1 %v21039_v48  ;;  %v21044_v48 = vld [vmem:[#allocation90_spill] sm:$0xff]  ;;  %v17772_v53 = vsub.f32 %v253_v46, %v4659_v11 }
 0x134   : > { %1908 = vmatprep.mubr.f32.mxu0 %v20889_v24  ;;  %2931 = vmatprep.mubr.f32.mxu1 %v20889_v24  ;;  %v21045_v52 = vld [vmem:[#allocation102_spill] sm:$0xff] }
 0x135   : > { %v21073_v46 = vld [vmem:[#allocation10_spill] sm:$0xff] }
 0x137   : > { %1912 = vmatmul.mubr.f32.gmra.mrb[40].mxu0 %v21040_v40  ;;  %2937 = vmatmul.mubr.f32.gmra.mrb[108].mxu1 %v21041_v38  ;;  %v21046_v38 = vld [vmem:[#allocation93_spill] sm:$0xff] }
 0x138   : > { %1917 = vmatprep.mubr.f32.mxu0 %v20889_v24  ;;  %2942 = vmatprep.mubr.f32.mxu1 %v20889_v24  ;;  %v21047_v40 = vld [vmem:[#allocation105_spill] sm:$0xff] }
 0x13b   : > { %1921 = vmatmul.mubr.f32.gmra.mrb[42].mxu0 %v21042_v20  ;;  %2948 = vmatmul.mubr.f32.gmra.mrb[110].mxu1 %v21043_v45  ;;  %v21048_v45 = vld [vmem:[#allocation97_spill] sm:$0xff] }
 0x13c   : > { %1926 = vmatprep.mubr.f32.mxu0 %v20889_v24  ;;  %2953 = vmatprep.mubr.f32.mxu1 %v20889_v24  ;;  %v21049_v20 = vld [vmem:[#allocation109_spill] sm:$0xff] }
 0x13f   : > { %1930 = vmatmul.mubr.f32.gmra.mrb[44].mxu0 %v21044_v48  ;;  %2959 = vmatmul.mubr.f32.gmra.mrb[112].mxu1 %v21045_v52  ;;  %v21050_v52 = vld [vmem:[#allocation99_spill] sm:$0xff]  ;;  %v21051_v48 = vld [vmem:[#allocation113_spill] sm:$0xff] }
 0x140   : > { %1935 = vmatprep.mubr.f32.mxu0 %v20889_v24  ;;  %2964 = vmatprep.mubr.f32.mxu1 %v20889_v24 }
 0x143   : > { %1939 = vmatmul.mubr.f32.gmra.mrb[46].mxu0 %v21046_v38  ;;  %2970 = vmatmul.mubr.f32.gmra.mrb[114].mxu1 %v21047_v40  ;;  %v21052_v40 = vld [vmem:[#allocation103_spill] sm:$0xff]  ;;  %v21053_v38 = vld [vmem:[#allocation116_spill] sm:$0xff] }
 0x144   : > { %1944 = vmatprep.mubr.f32.mxu0 %v20889_v24  ;;  %2975 = vmatprep.mubr.f32.mxu1 %v20889_v24 }
 0x147   : > { %1948 = vmatmul.mubr.f32.gmra.mrb[48].mxu0 %v21048_v45  ;;  %2981 = vmatmul.mubr.f32.gmra.mrb[116].mxu1 %v21049_v20  ;;  %v21054_v20 = vld [vmem:[#allocation106_spill] sm:$0xff]  ;;  %v21055_v45 = vld [vmem:[#allocation119_spill] sm:$0xff] }
 0x148   : > { %1953 = vmatprep.mubr.f32.mxu0 %v20889_v24  ;;  %2986 = vmatprep.mubr.f32.mxu1 %v20889_v24 }
 0x14b   : > { %1957 = vmatmul.mubr.f32.gmra.mrb[50].mxu0 %v21050_v52  ;;  %2992 = vmatmul.mubr.f32.gmra.mrb[118].mxu1 %v21051_v48  ;;  %v21056_v48 = vld [vmem:[#allocation110_spill] sm:$0xff]  ;;  %v21057_v52 = vld [vmem:[#allocation121_spill] sm:$0xff] }
 0x14c   : > { %1962 = vmatprep.mubr.f32.mxu0 %v20889_v24  ;;  %2997 = vmatprep.mubr.f32.mxu1 %v20889_v24 }
 0x14f   : > { %1966 = vmatmul.mubr.f32.gmra.mrb[52].mxu0 %v21052_v40  ;;  %3003 = vmatmul.mubr.f32.gmra.mrb[120].mxu1 %v21053_v38  ;;  %v21058_v38 = vld [vmem:[#allocation112_spill] sm:$0xff]  ;;  %v21059_v40 = vld [vmem:[#allocation122_spill] sm:$0xff] }
 0x150   : > { %1971 = vmatprep.mubr.f32.mxu0 %v20889_v24  ;;  %3008 = vmatprep.mubr.f32.mxu1 %v20889_v24 }
 0x153   : > { %1975 = vmatmul.mubr.f32.gmra.mrb[54].mxu0 %v21054_v20  ;;  %3014 = vmatmul.mubr.f32.gmra.mrb[122].mxu1 %v21055_v45  ;;  %v13506_v45 = vpack.c.bf16 %v17494_v47, %v17489_v31  ;;  %v21060_v20 = vld [vmem:[#allocation117_spill] sm:$0xff]  ;;  %v21100_v47 = vld [vmem:[#allocation52_spill] sm:$0xff] }
 0x154   : > { %1980 = vmatprep.mubr.f32.mxu0 %v20889_v24  ;;  %3019 = vmatprep.mubr.f32.mxu1 %v20889_v24  ;;  %v21103_v31 = vld [vmem:[#allocation56_spill] sm:$0xff] }
 0x157   : > { %1984 = vmatmul.mubr.f32.gmra.mrb[56].mxu0 %v21056_v48  ;;  %3025 = vmatmul.mubr.f32.gmra.mrb[124].mxu1 %v21057_v52  ;;  %v21061_v52 = vld [vmem:[#allocation2_spill] sm:$0xff]  ;;  %v21065_v48 = vld [vmem:[#allocation4_spill] sm:$0xff] }
 0x158   : > { %1989 = vmatprep.mubr.f32.mxu0 %v20889_v24  ;;  %3030 = vmatprep.mubr.f32.mxu1 %v20889_v24 }
 0x15b   : > { %1993 = vmatmul.mubr.f32.gmra.mrb[58].mxu0 %v21058_v38  ;;  %3036 = vmatmul.mubr.f32.gmra.mrb[126].mxu1 %v21059_v40  ;;  %v21062_v40 = vld [vmem:[#allocation120_spill] sm:$0xff]  ;;  %v21063_v38 = vld [vmem:[#allocation3_spill] sm:$0xff] }
 0x15c   : > { %1998 = vmatprep.mubr.f32.mxu0 %v20889_v24  ;;  %3136 = vmatprep.mubr.f32.mxu1 %v20889_v24 }
 0x15f   : > { %2002 = vmatmul.mubr.f32.gmra.mrb[60].mxu0 %v21060_v20  ;;  %3138 = vmatmul.mubr.f32.vlgmr.msra.gmra.mrb[64].mxu1 %v21061_v52  ;;  %v21064_v20 = vld [vmem:[#allocation62_spill] sm:$0xff] }
 0x160   : > { %2007 = vmatprep.mubr.f32.mxu0 %v20889_v24  ;;  %3143 = vmatprep.mubr.f32.mxu1 %v20889_v24 }
 0x161   : > { %13507 = vmatpush1.bf16.msra.mxu1 %v13506_v45  ;;  %v244_v45 = vld [vmem:[%s16617_s4 + $0x28] sm:$0xff] }
 0x162   : > { %3375 = vmatprep.subr.mxu1 %v17504_v32  ;;  %v21094_v32 = vld [vmem:[#allocation42_spill] sm:$0xff] }
 0x163   : > { %2011 = vmatmul.mubr.f32.gmra.mrb[62].mxu0 %v21062_v40  ;;  %3145 = vmatmul.mubr.f32.gmra.mrb[66].mxu1 %v21063_v38  ;;  %v4655_v40 = vand.u32 4294901760, %v244_v45 }
 0x164   : > { %2099 = vmatprep.mubr.f32.mxu0 %v20889_v24  ;;  %3150 = vmatprep.mubr.f32.mxu1 %v20889_v24 }
 0x165   : > { %3378 = vmatpush1.msra.mxu1 %v17512_v30  ;;  %v17768_v59 = vpack.c.bf16 %v4659_v11, %v4655_v40  ;;  %v17770_v17 = vsub.f32 %v244_v45, %v4655_v40  ;;  %v21072_v11 = vld [vmem:[#allocation15_spill] sm:$0xff]  ;;  %v21088_v30 = vld [vmem:[#allocation37_spill] sm:$0xff] }
 0x166   : > { %13509 = vmatprep.subr.bf16.mxu1 %v21064_v20  ;;  %v21085_v20 = vld [vmem:[#allocation33_spill] sm:$0xff] }
 0x167   : > { %2101 = vmatmul.mubr.f32.vlgmr.msra.gmra.mrb[0].mxu0 %v21061_v52  ;;  %3152 = vmatmul.mubr.f32.gmra.mrb[68].mxu1 %v21065_v48  ;;  %21068 = vst [vmem:[#allocation2_spill] sm:$0xff] %v17768_v59 }
 0x168   : > { %13495 = vmatpush1.bf16.msra.mxu0 %v21066_v42  ;;  %2106 = vmatprep.mubr.f32.mxu0 %v20889_v24  ;;  %v17777_v42 = vsub.f32 %v17757_v41, %v20634_v58 }
 0x169   : > { %3157 = vmatprep.mubr.f32.mxu1 %v20889_v24  ;;  %2333 = vmatprep.subr.mxu0 %v21067_v22  ;;  %v17784_v22 = vsub.f32 %v17762_v37, %v20633_v34  ;;  %v21076_v34 = vld [vmem:[#allocation18_spill] sm:$0xff] }
 0x16a   : > { %21069 = vst [vmem:[#allocation3_spill] sm:$0xff] %v17777_v42 }
 0x16b   : > { %2108 = vmatmul.mubr.f32.gmra.mrb[2].mxu0 %v21063_v38  ;;  %3159 = vmatmul.mubr.f32.gmra.mrb[70].mxu1 %v21070_v56  ;;  %21071 = vst [vmem:[#allocation4_spill] sm:$0xff] %v17784_v22 }
 0x16c   : > { %2113 = vmatprep.mubr.f32.mxu0 %v20889_v24  ;;  %3164 = vmatprep.mubr.f32.mxu1 %v20889_v24 }
 0x16d   : > { %2335 = vmatpush1.msra.mxu0 %v21072_v11 }
 0x16e   : > { %13521 = vmatprep.subr.bf16.mxu0 %v17768_v59  ;;  %v21079_v59 = vld [vmem:[#allocation25_spill] sm:$0xff] }
 0x16f   : > { %2115 = vmatmul.mubr.f32.gmra.mrb[4].mxu0 %v21065_v48  ;;  %3166 = vmatmul.mubr.f32.gmra.mrb[72].mxu1 %v21073_v46 }
 0x170   : > { %2120 = vmatprep.mubr.f32.mxu0 %v20889_v24  ;;  %3171 = vmatprep.mubr.f32.mxu1 %v20889_v24 }
 0x172   : > { %v17794_v40 = vpop.f32.mrb[32].mxu1 }
 0x173   : > { %21074 = vst [vmem:[#allocation13_spill] sm:$0xff] %v17794_v40  ;;  %v17796_v45 = vpop.f32.mrb[33].mxu1  ;;  %2122 = vmatmul.mubr.f32.gmra.mrb[6].mxu0 %v21070_v56  ;;  %3173 = vmatmul.mubr.f32.gmra.mrb[74].mxu1 %v21076_v34 }
 0x174   : > { %21075 = vst [vmem:[#allocation14_spill] sm:$0xff] %v17796_v45  ;;  %2127 = vmatprep.mubr.f32.mxu0 %v20889_v24  ;;  %3178 = vmatprep.mubr.f32.mxu1 %v20889_v24 }
 0x176   : > { %v17802_v11 = vpop.f32.mrb[34].mxu1 }
 0x177   : > { %21077 = vst [vmem:[#allocation6_spill] sm:$0xff] %v17802_v11  ;;  %v17804_v58 = vpop.f32.mrb[35].mxu1  ;;  %2129 = vmatmul.mubr.f32.gmra.mrb[8].mxu0 %v21073_v46  ;;  %3180 = vmatmul.mubr.f32.gmra.mrb[76].mxu1 %v21079_v59 }
 0x178   : > { %21078 = vst [vmem:[#allocation15_spill] sm:$0xff] %v17804_v58  ;;  %2134 = vmatprep.mubr.f32.mxu0 %v20889_v24  ;;  %3185 = vmatprep.mubr.f32.mxu1 %v20889_v24 }
 0x17a   : > { %v17810_v45 = vpop.f32.mrb[36].mxu1 }
 0x17b   : > { %21080 = vst [vmem:[#allocation10_spill] sm:$0xff] %v17810_v45  ;;  %v17812_v40 = vpop.f32.mrb[37].mxu1  ;;  %2136 = vmatmul.mubr.f32.gmra.mrb[10].mxu0 %v21076_v34  ;;  %3187 = vmatmul.mubr.f32.gmra.mrb[78].mxu1 %v21082_v49 }
 0x17c   : > { %21081 = vst [vmem:[#allocation18_spill] sm:$0xff] %v17812_v40  ;;  %2141 = vmatprep.mubr.f32.mxu0 %v20889_v24  ;;  %3192 = vmatprep.mubr.f32.mxu1 %v20889_v24 }
 0x17e   : > { %v17818_v58 = vpop.f32.mrb[38].mxu1 }
 0x17f   : > { %21083 = vst [vmem:[#allocation25_spill] sm:$0xff] %v17818_v58  ;;  %v17820_v11 = vpop.f32.mrb[39].mxu1  ;;  %2143 = vmatmul.mubr.f32.gmra.mrb[12].mxu0 %v21079_v59  ;;  %3194 = vmatmul.mubr.f32.gmra.mrb[80].mxu1 %v21085_v20 }
 0x180   : > { %21084 = vst [vmem:[#allocation29_spill] sm:$0xff] %v17820_v11  ;;  %2148 = vmatprep.mubr.f32.mxu0 %v20889_v24  ;;  %3199 = vmatprep.mubr.f32.mxu1 %v20889_v24 }
 0x182   : > { %v17826_v40 = vpop.f32.mrb[40].mxu1 }
 0x183   : > { %21086 = vst [vmem:[#allocation33_spill] sm:$0xff] %v17826_v40  ;;  %v17828_v45 = vpop.f32.mrb[41].mxu1  ;;  %2150 = vmatmul.mubr.f32.gmra.mrb[14].mxu0 %v21082_v49  ;;  %3201 = vmatmul.mubr.f32.gmra.mrb[82].mxu1 %v21088_v30 }
 0x184   : > { %21087 = vst [vmem:[#allocation161_spill] sm:$0xff] %v17828_v45  ;;  %2155 = vmatprep.mubr.f32.mxu0 %v20889_v24  ;;  %3206 = vmatprep.mubr.f32.mxu1 %v20889_v24 }
 0x186   : > { %v17834_v11 = vpop.f32.mrb[42].mxu1 }
 0x187   : > { %21089 = vst [vmem:[#allocation37_spill] sm:$0xff] %v17834_v11  ;;  %v17836_v58 = vpop.f32.mrb[43].mxu1  ;;  %2157 = vmatmul.mubr.f32.gmra.mrb[16].mxu0 %v21085_v20  ;;  %3208 = vmatmul.mubr.f32.gmra.mrb[84].mxu1 %v21091_v36 }
 0x188   : > { %21090 = vst [vmem:[#allocation162_spill] sm:$0xff] %v17836_v58  ;;  %2162 = vmatprep.mubr.f32.mxu0 %v20889_v24  ;;  %3213 = vmatprep.mubr.f32.mxu1 %v20889_v24 }
 0x18a   : > { %v17842_v45 = vpop.f32.mrb[44].mxu1 }
 0x18b   : > { %21092 = vst [vmem:[#allocation38_spill] sm:$0xff] %v17842_v45  ;;  %v17844_v40 = vpop.f32.mrb[45].mxu1  ;;  %2164 = vmatmul.mubr.f32.gmra.mrb[18].mxu0 %v21088_v30  ;;  %3215 = vmatmul.mubr.f32.gmra.mrb[86].mxu1 %v21094_v32 }
 0x18c   : > { %21093 = vst [vmem:[#allocation163_spill] sm:$0xff] %v17844_v40  ;;  %2169 = vmatprep.mubr.f32.mxu0 %v20889_v24  ;;  %3220 = vmatprep.mubr.f32.mxu1 %v20889_v24 }
 0x18e   : > { %v17850_v58 = vpop.f32.mrb[46].mxu1 }
 0x18f   : > { %21095 = vst [vmem:[#allocation42_spill] sm:$0xff] %v17850_v58  ;;  %v17852_v11 = vpop.f32.mrb[47].mxu1  ;;  %2171 = vmatmul.mubr.f32.gmra.mrb[20].mxu0 %v21091_v36  ;;  %3222 = vmatmul.mubr.f32.gmra.mrb[88].mxu1 %v21097_v19 }
 0x190   : > { %21096 = vst [vmem:[#allocation164_spill] sm:$0xff] %v17852_v11  ;;  %2176 = vmatprep.mubr.f32.mxu0 %v20889_v24  ;;  %3227 = vmatprep.mubr.f32.mxu1 %v20889_v24 }
 0x192   : > { %v17858_v40 = vpop.f32.mrb[48].mxu1 }
 0x193   : > { %21098 = vst [vmem:[#allocation47_spill] sm:$0xff] %v17858_v40  ;;  %v17860_v45 = vpop.f32.mrb[49].mxu1  ;;  %2178 = vmatmul.mubr.f32.gmra.mrb[22].mxu0 %v21094_v32  ;;  %3229 = vmatmul.mubr.f32.gmra.mrb[90].mxu1 %v21100_v47 }
 0x194   : > { %21099 = vst [vmem:[#allocation165_spill] sm:$0xff] %v17860_v45  ;;  %2183 = vmatprep.mubr.f32.mxu0 %v20889_v24  ;;  %3234 = vmatprep.mubr.f32.mxu1 %v20889_v24 }
 0x196   : > { %v17866_v11 = vpop.f32.mrb[50].mxu1 }
 0x197   : > { %21101 = vst [vmem:[#allocation52_spill] sm:$0xff] %v17866_v11  ;;  %v17868_v58 = vpop.f32.mrb[51].mxu1  ;;  %2185 = vmatmul.mubr.f32.gmra.mrb[24].mxu0 %v21097_v19  ;;  %3236 = vmatmul.mubr.f32.gmra.mrb[92].mxu1 %v21103_v31 }
 0x198   : > { %21102 = vst [vmem:[#allocation166_spill] sm:$0xff] %v17868_v58  ;;  %2190 = vmatprep.mubr.f32.mxu0 %v20889_v24  ;;  %3241 = vmatprep.mubr.f32.mxu1 %v20889_v24 }
 0x19a   : > { %v17874_v45 = vpop.f32.mrb[52].mxu1 }
 0x19b   : > { %21104 = vst [vmem:[#allocation56_spill] sm:$0xff] %v17874_v45  ;;  %v17876_v40 = vpop.f32.mrb[53].mxu1  ;;  %2192 = vmatmul.mubr.f32.gmra.mrb[26].mxu0 %v21100_v47  ;;  %3243 = vmatmul.mubr.f32.gmra.mrb[94].mxu1 %v21106_v18 }
 0x19c   : > { %21105 = vst [vmem:[#allocation167_spill] sm:$0xff] %v17876_v40  ;;  %2197 = vmatprep.mubr.f32.mxu0 %v20889_v24  ;;  %3248 = vmatprep.mubr.f32.mxu1 %v20889_v24 }
 0x19e   : > { %v17882_v58 = vpop.f32.mrb[54].mxu1 }
 0x19f   : > { %21107 = vst [vmem:[#allocation168_spill] sm:$0xff] %v17882_v58  ;;  %v17884_v11 = vpop.f32.mrb[55].mxu1  ;;  %2199 = vmatmul.mubr.f32.gmra.mrb[28].mxu0 %v21103_v31  ;;  %3250 = vmatmul.mubr.f32.gmra.mrb[96].mxu1 %v17000_v26 }
 0x1a0   : > { %21108 = vst [vmem:[#allocation169_spill] sm:$0xff] %v17884_v11  ;;  %2204 = vmatprep.mubr.f32.mxu0 %v20889_v24  ;;  %3255 = vmatprep.mubr.f32.mxu1 %v20889_v24 }
 0x1a2   : > { %v17890_v40 = vpop.f32.mrb[56].mxu1 }
 0x1a3   : > { %21109 = vst [vmem:[#allocation170_spill] sm:$0xff] %v17890_v40  ;;  %v17892_v45 = vpop.f32.mrb[57].mxu1  ;;  %2206 = vmatmul.mubr.f32.gmra.mrb[30].mxu0 %v21106_v18  ;;  %3257 = vmatmul.mubr.f32.gmra.mrb[98].mxu1 %v17008_v35 }
 0x1a4   : > { %21110 = vst [vmem:[#allocation171_spill] sm:$0xff] %v17892_v45  ;;  %2211 = vmatprep.mubr.f32.mxu0 %v20889_v24  ;;  %3262 = vmatprep.mubr.f32.mxu1 %v20889_v24 }
 0x1a6   : > { %v17898_v11 = vpop.f32.mrb[58].mxu1 }
 0x1a7   : > { %21111 = vst [vmem:[#allocation172_spill] sm:$0xff] %v17898_v11  ;;  %v17900_v58 = vpop.f32.mrb[59].mxu1  ;;  %2213 = vmatmul.mubr.f32.gmra.mrb[32].mxu0 %v17000_v26  ;;  %3264 = vmatmul.mubr.f32.gmra.mrb[100].mxu1 %v17028_v7 }
 0x1a8   : > { %21112 = vst [vmem:[#allocation173_spill] sm:$0xff] %v17900_v58  ;;  %2218 = vmatprep.mubr.f32.mxu0 %v20889_v24  ;;  %3269 = vmatprep.mubr.f32.mxu1 %v20889_v24 }
 0x1aa   : > { %v17906_v45 = vpop.f32.mrb[60].mxu1 }
 0x1ab   : > { %21113 = vst [vmem:[#allocation174_spill] sm:$0xff] %v17906_v45  ;;  %v17908_v40 = vpop.f32.mrb[61].mxu1  ;;  %2220 = vmatmul.mubr.f32.gmra.mrb[34].mxu0 %v17008_v35  ;;  %3271 = vmatmul.mubr.f32.gmra.mrb[102].mxu1 %v17048_v33  ;;  %v21118_v45 = vld [vmem:[#allocation7_spill] sm:$0xff] }
 0x1ac   : > { %21114 = vst [vmem:[#allocation175_spill] sm:$0xff] %v17908_v40  ;;  %2225 = vmatprep.mubr.f32.mxu0 %v20889_v24  ;;  %3276 = vmatprep.mubr.f32.mxu1 %v20889_v24 }
 0x1ae   : > { %v17914_v58 = vpop.f32.mrb[62].mxu1 }
 0x1af   : > { %21115 = vst [vmem:[#allocation176_spill] sm:$0xff] %v17914_v58  ;;  %v17916_v11 = vpop.f32.mrb[63].mxu1  ;;  %2227 = vmatmul.mubr.f32.gmra.mrb[36].mxu0 %v17028_v7  ;;  %3278 = vmatmul.mubr.f32.gmra.mrb[104].mxu1 %v17081_v57  ;;  %v262_v58 = vld [vmem:[%s16617_s4 + $0xb8] sm:$0x3] }
 0x1b0   : > { %21116 = vst [vmem:[#allocation177_spill] sm:$0xff] %v17916_v11  ;;  %2232 = vmatprep.mubr.f32.mxu0 %v20889_v24  ;;  %3283 = vmatprep.mubr.f32.mxu1 %v20889_v24  ;;  %v21117_v11 = vld [vmem:[#allocation5_spill] sm:$0xff]  ;;  %v17974_v40 = vsel %vm555_vm1, %v262_v58, 0 }
 0x1b3   : > { %2234 = vmatmul.mubr.f32.gmra.mrb[38].mxu0 %v17048_v33  ;;  %3285 = vmatmul.mubr.f32.gmra.mrb[106].mxu1 %v17088_v27 }
 0x1b4   : > { %2239 = vmatprep.mubr.f32.mxu0 %v20889_v24  ;;  %3290 = vmatprep.mubr.f32.mxu1 %v20889_v24 }
 0x1b7   : > { %2241 = vmatmul.mubr.f32.gmra.mrb[40].mxu0 %v17081_v57  ;;  %3292 = vmatmul.mubr.f32.gmra.mrb[108].mxu1 %v17120_v16 }
 0x1b8   : > { %2246 = vmatprep.mubr.f32.mxu0 %v20889_v24  ;;  %3297 = vmatprep.mubr.f32.mxu1 %v20889_v24 }
 0x1bb   : > { %2248 = vmatmul.mubr.f32.gmra.mrb[42].mxu0 %v17088_v27  ;;  %3299 = vmatmul.mubr.f32.gmra.mrb[110].mxu1 %v17140_v60 }
 0x1bc   : > { %2253 = vmatprep.mubr.f32.mxu0 %v20889_v24  ;;  %3304 = vmatprep.mubr.f32.mxu1 %v20889_v24 }
 0x1bf   : > { %2255 = vmatmul.mubr.f32.gmra.mrb[44].mxu0 %v17120_v16  ;;  %3306 = vmatmul.mubr.f32.gmra.mrb[112].mxu1 %v17167_v1 }
 0x1c0   : > { %2260 = vmatprep.mubr.f32.mxu0 %v20889_v24  ;;  %3311 = vmatprep.mubr.f32.mxu1 %v20889_v24 }
 0x1c3   : > { %2262 = vmatmul.mubr.f32.gmra.mrb[46].mxu0 %v17140_v60  ;;  %3313 = vmatmul.mubr.f32.gmra.mrb[114].mxu1 %v17175_v39 }
 0x1c4   : > { %2267 = vmatprep.mubr.f32.mxu0 %v20889_v24  ;;  %3318 = vmatprep.mubr.f32.mxu1 %v20889_v24 }
 0x1c7   : > { %2269 = vmatmul.mubr.f32.gmra.mrb[48].mxu0 %v17167_v1  ;;  %3320 = vmatmul.mubr.f32.gmra.mrb[116].mxu1 %v17211_v54 }
 0x1c8   : > { %2274 = vmatprep.mubr.f32.mxu0 %v20889_v24  ;;  %3325 = vmatprep.mubr.f32.mxu1 %v20889_v24 }
 0x1cb   : > { %2276 = vmatmul.mubr.f32.gmra.mrb[50].mxu0 %v17175_v39  ;;  %3327 = vmatmul.mubr.f32.gmra.mrb[118].mxu1 %v17221_v9 }
 0x1cc   : > { %2281 = vmatprep.mubr.f32.mxu0 %v20889_v24  ;;  %3332 = vmatprep.mubr.f32.mxu1 %v20889_v24 }
 0x1cf   : > { %2283 = vmatmul.mubr.f32.gmra.mrb[52].mxu0 %v17211_v54  ;;  %3334 = vmatmul.mubr.f32.gmra.mrb[120].mxu1 %v17257_v63 }
 0x1d0   : > { %2288 = vmatprep.mubr.f32.mxu0 %v20889_v24  ;;  %3339 = vmatprep.mubr.f32.mxu1 %v20889_v24 }
 0x1d3   : > { %2290 = vmatmul.mubr.f32.gmra.mrb[54].mxu0 %v17221_v9  ;;  %3341 = vmatmul.mubr.f32.gmra.mrb[122].mxu1 %v17267_v14 }
 0x1d4   : > { %2295 = vmatprep.mubr.f32.mxu0 %v20889_v24  ;;  %3346 = vmatprep.mubr.f32.mxu1 %v20889_v24 }
 0x1d7   : > { %2297 = vmatmul.mubr.f32.gmra.mrb[56].mxu0 %v17257_v63  ;;  %3348 = vmatmul.mubr.f32.gmra.mrb[124].mxu1 %v17302_v12 }
 0x1d8   : > { %2302 = vmatprep.mubr.f32.mxu0 %v20889_v24  ;;  %3353 = vmatprep.mubr.f32.mxu1 %v20889_v24 }
 0x1db   : > { %2304 = vmatmul.mubr.f32.gmra.mrb[58].mxu0 %v17267_v14  ;;  %3355 = vmatmul.mubr.f32.gmra.mrb[126].mxu1 %v17322_v61  ;;  %v261_v14 = vld [vmem:[%s16617_s4 + $0xb0] sm:$0x3] }
 0x1dc   : > { %2309 = vmatprep.mubr.f32.mxu0 %v20889_v24  ;;  %3437 = vmatprep.mubr.f32.mxu1 %v20889_v24  ;;  %v17992_v58 = vsel %vm555_vm1, %v261_v14, 0 }
 0x1dd   : > { %v18007_v14 = vand.u32 4294901760, %v17992_v58 }
 0x1df   : > { %2311 = vmatmul.mubr.f32.gmra.mrb[60].mxu0 %v17302_v12  ;;  %3440 = vmatmul.mubr.f32.vlgmr.msra.gmra.mrb[64].mxu1 %v21117_v11  ;;  %v21119_v11 = vand.u32 4294901760, %v17757_v41  ;;  %v21120_v12 = vand.u32 4294901760, %v17762_v37  ;;  %v21123_v41 = vand.u32 4294901760, %v16979_v15  ;;  %v20659_v37 = vand.u32 4294901760, %v17772_v53 }
 0x1e0   : > { %2316 = vmatprep.mubr.f32.mxu0 %v20889_v24  ;;  %3445 = vmatprep.mubr.f32.mxu1 %v20889_v24 }
 0x1e1   : > { %13511 = vmatpush1.bf16.msra.mxu1 %v17412_v5  ;;  %v17985_v22 = vpack.c.bf16 %v21120_v12, %v21119_v11  ;;  %v21122_v5 = vand.u32 4294901760, %v16977_v50  ;;  %v20658_v12 = vand.u32 4294901760, %v17770_v17  ;;  %v5093_v15 = vsub.f32 %v17772_v53, %v20659_v37  ;;  %v21132_v37 = vld [vmem:[#allocation46_spill] sm:$0xff] }
 0x1e2   : > { %3703 = vmatprep.subr.mxu1 %v17415_v62  ;;  %v17988_v62 = vand.u32 4294901760, %v17974_v40 }
 0x1e3   : > { %2318 = vmatmul.mubr.f32.gmra.mrb[62].mxu0 %v17322_v61  ;;  %3448 = vmatmul.mubr.f32.gmra.mrb[66].mxu1 %v21118_v45  ;;  %v21121_v45 = vld [vmem:[#allocation9_spill] sm:$0xff]  ;;  %v13512_v61 = vpack.c.bf16 %v21123_v41, %v21122_v5  ;;  %v5081_v50 = vsub.f32 %v17770_v17, %v20658_v12  ;;  %v21124_v5 = vld [vmem:[#allocation11_spill] sm:$0xff]  ;;  %v5094_v41 = vand.u32 4294901760, %v5093_v15  ;;  %v21128_v15 = vld [vmem:[#allocation32_spill] sm:$0xff] }
 0x1e4   : > { %2394 = vmatprep.mubr.f32.mxu0 %v20889_v24  ;;  %3453 = vmatprep.mubr.f32.mxu1 %v20889_v24  ;;  %v21125_v12 = vld [vmem:[#allocation19_spill] sm:$0xff] }
 0x1e5   : > { %3705 = vmatpush1.msra.mxu1 %v17429_v28  ;;  %v5082_v11 = vand.u32 4294901760, %v5081_v50  ;;  %v21127_v50 = vld [vmem:[#allocation28_spill] sm:$0xff] }
 0x1e6   : > { %13513 = vmatprep.subr.bf16.mxu1 %v13512_v61  ;;  %v21126_v61 = vld [vmem:[#allocation22_spill] sm:$0xff] }
 0x1e7   : > { %2396 = vmatmul.mubr.f32.vlgmr.msra.gmra.mrb[0].mxu0 %v21061_v52  ;;  %3456 = vmatmul.mubr.f32.gmra.mrb[68].mxu1 %v21121_v45  ;;  %v13524_v45 = vpack.c.bf16 %v5094_v41, %v5082_v11  ;;  %v21130_v11 = vld [vmem:[#allocation41_spill] sm:$0xff] }
 0x1e8   : > { %13523 = vmatpush1.bf16.msra.mxu0 %v17985_v22  ;;  %2401 = vmatprep.mubr.f32.mxu0 %v20889_v24  ;;  %v21131_v41 = vld [vmem:[#allocation45_spill] sm:$0xff] }
 0x1e9   : > { %3461 = vmatprep.mubr.f32.mxu1 %v20889_v24  ;;  %4664 = vmatprep.subr.mxu0 %v17988_v62 }
 0x1eb   : > { %2403 = vmatmul.mubr.f32.gmra.mrb[2].mxu0 %v21063_v38  ;;  %3464 = vmatmul.mubr.f32.gmra.mrb[70].mxu1 %v21124_v5 }
 0x1ec   : > { %2408 = vmatprep.mubr.f32.mxu0 %v20889_v24  ;;  %3469 = vmatprep.mubr.f32.mxu1 %v20889_v24 }
 0x1ed   : > { %4666 = vmatpush1.msra.mxu0 %v18007_v14 }
 0x1ee   : > { %13525 = vmatprep.subr.bf16.mxu0 %v13524_v45  ;;  %v21129_v45 = vld [vmem:[#allocation36_spill] sm:$0xff] }
 0x1ef   : > { %2410 = vmatmul.mubr.f32.gmra.mrb[4].mxu0 %v21065_v48  ;;  %3472 = vmatmul.mubr.f32.gmra.mrb[72].mxu1 %v21125_v12  ;;  %v21230_v12 = vld [vmem:[#allocation112_spill] sm:$0xff] }
 0x1f0   : > { %2415 = vmatprep.mubr.f32.mxu0 %v20889_v24  ;;  %3477 = vmatprep.mubr.f32.mxu1 %v20889_v24 }
 0x1f3   : > { %2417 = vmatmul.mubr.f32.gmra.mrb[6].mxu0 %v21070_v56  ;;  %3480 = vmatmul.mubr.f32.gmra.mrb[74].mxu1 %v21126_v61  ;;  %v21221_v61 = vld [vmem:[#allocation105_spill] sm:$0xff] }
 0x1f4   : > { %2422 = vmatprep.mubr.f32.mxu0 %v20889_v24  ;;  %3485 = vmatprep.mubr.f32.mxu1 %v20889_v24 }
 0x1f7   : > { %2424 = vmatmul.mubr.f32.gmra.mrb[8].mxu0 %v21073_v46  ;;  %3488 = vmatmul.mubr.f32.gmra.mrb[76].mxu1 %v21127_v50  ;;  %v21220_v50 = vld [vmem:[#allocation106_spill] sm:$0xff] }
 0x1f8   : > { %2429 = vmatprep.mubr.f32.mxu0 %v20889_v24  ;;  %3493 = vmatprep.mubr.f32.mxu1 %v20889_v24 }
 0x1fb   : > { %2431 = vmatmul.mubr.f32.gmra.mrb[10].mxu0 %v21076_v34  ;;  %3496 = vmatmul.mubr.f32.gmra.mrb[78].mxu1 %v21128_v15  ;;  %v21206_v15 = vld [vmem:[#allocation96_spill] sm:$0xff] }
 0x1fc   : > { %2436 = vmatprep.mubr.f32.mxu0 %v20889_v24  ;;  %3501 = vmatprep.mubr.f32.mxu1 %v20889_v24 }
 0x1ff   : > { %2438 = vmatmul.mubr.f32.gmra.mrb[12].mxu0 %v21079_v59  ;;  %3504 = vmatmul.mubr.f32.gmra.mrb[80].mxu1 %v21129_v45 }
 0x200   : > { %2443 = vmatprep.mubr.f32.mxu0 %v20889_v24  ;;  %3509 = vmatprep.mubr.f32.mxu1 %v20889_v24 }
 0x203   : > { %2445 = vmatmul.mubr.f32.gmra.mrb[14].mxu0 %v21082_v49  ;;  %3512 = vmatmul.mubr.f32.gmra.mrb[82].mxu1 %v21130_v11  ;;  %v21133_v11 = vld [vmem:[#allocation51_spill] sm:$0xff] }
 0x204   : > { %2450 = vmatprep.mubr.f32.mxu0 %v20889_v24  ;;  %3517 = vmatprep.mubr.f32.mxu1 %v20889_v24 }
 0x207   : > { %2452 = vmatmul.mubr.f32.gmra.mrb[16].mxu0 %v21085_v20  ;;  %3520 = vmatmul.mubr.f32.gmra.mrb[84].mxu1 %v21131_v41  ;;  %v21134_v41 = vld [vmem:[#allocation55_spill] sm:$0xff] }
 0x208   : > { %2457 = vmatprep.mubr.f32.mxu0 %v20889_v24  ;;  %3525 = vmatprep.mubr.f32.mxu1 %v20889_v24 }
 0x20b   : > { %2459 = vmatmul.mubr.f32.gmra.mrb[18].mxu0 %v21088_v30  ;;  %3528 = vmatmul.mubr.f32.gmra.mrb[86].mxu1 %v21132_v37 }
 0x20c   : > { %2464 = vmatprep.mubr.f32.mxu0 %v20889_v24  ;;  %3533 = vmatprep.mubr.f32.mxu1 %v20889_v24 }
 0x20f   : > { %2466 = vmatmul.mubr.f32.gmra.mrb[20].mxu0 %v21091_v36  ;;  %3536 = vmatmul.mubr.f32.gmra.mrb[88].mxu1 %v21133_v11  ;;  %v21203_v11 = vld [vmem:[#allocation131_spill] sm:$0xff] }
 0x210   : > { %2471 = vmatprep.mubr.f32.mxu0 %v20889_v24  ;;  %3541 = vmatprep.mubr.f32.mxu1 %v20889_v24 }
 0x213   : > { %2473 = vmatmul.mubr.f32.gmra.mrb[22].mxu0 %v21094_v32  ;;  %3544 = vmatmul.mubr.f32.gmra.mrb[90].mxu1 %v21134_v41  ;;  %v21153_v41 = vld [vmem:[#allocation62_spill] sm:$0xff] }
 0x214   : > { %2478 = vmatprep.mubr.f32.mxu0 %v20889_v24  ;;  %3549 = vmatprep.mubr.f32.mxu1 %v20889_v24 }
 0x217   : > { %2480 = vmatmul.mubr.f32.gmra.mrb[24].mxu0 %v21097_v19  ;;  %3552 = vmatmul.mubr.f32.gmra.mrb[92].mxu1 %v16969_v0  ;;  %v21150_v0 = vld [vmem:[#allocation12_spill] sm:$0xff] }
 0x218   : > { %2485 = vmatprep.mubr.f32.mxu0 %v20889_v24  ;;  %3557 = vmatprep.mubr.f32.mxu1 %v20889_v24 }
 0x21b   : > { %2487 = vmatmul.mubr.f32.gmra.mrb[26].mxu0 %v21100_v47  ;;  %3560 = vmatmul.mubr.f32.gmra.mrb[94].mxu1 %v16998_v3  ;;  %v21146_v3 = vld [vmem:[#allocation8_spill] sm:$0xff] }
 0x21c   : > { %2492 = vmatprep.mubr.f32.mxu0 %v20889_v24  ;;  %3565 = vmatprep.mubr.f32.mxu1 %v20889_v24 }
 0x21f   : > { %2494 = vmatmul.mubr.f32.gmra.mrb[28].mxu0 %v21103_v31  ;;  %3568 = vmatmul.mubr.f32.gmra.mrb[96].mxu1 %v17021_v10  ;;  %v21145_v10 = vld [vmem:[#allocation111_spill] sm:$0xff] }
 0x220   : > { %2499 = vmatprep.mubr.f32.mxu0 %v20889_v24  ;;  %3573 = vmatprep.mubr.f32.mxu1 %v20889_v24 }
 0x223   : > { %2501 = vmatmul.mubr.f32.gmra.mrb[30].mxu0 %v21106_v18  ;;  %3576 = vmatmul.mubr.f32.gmra.mrb[98].mxu1 %v17041_v21 }
 0x224   : > { %2506 = vmatprep.mubr.f32.mxu0 %v20889_v24  ;;  %3581 = vmatprep.mubr.f32.mxu1 %v20889_v24 }
 0x227   : > { %2508 = vmatmul.mubr.f32.gmra.mrb[32].mxu0 %v17000_v26  ;;  %3584 = vmatmul.mubr.f32.gmra.mrb[100].mxu1 %v17060_v4 }
 0x228   : > { %2513 = vmatprep.mubr.f32.mxu0 %v20889_v24  ;;  %3589 = vmatprep.mubr.f32.mxu1 %v20889_v24 }
 0x22b   : > { %2515 = vmatmul.mubr.f32.gmra.mrb[34].mxu0 %v17008_v35  ;;  %3592 = vmatmul.mubr.f32.gmra.mrb[102].mxu1 %v17069_v51  ;;  %v21143_v51 = vld [vmem:[#allocation126_spill] sm:$0xff] }
 0x22c   : > { %2520 = vmatprep.mubr.f32.mxu0 %v20889_v24  ;;  %3597 = vmatprep.mubr.f32.mxu1 %v20889_v24 }
 0x22f   : > { %2522 = vmatmul.mubr.f32.gmra.mrb[36].mxu0 %v17028_v7  ;;  %3600 = vmatmul.mubr.f32.gmra.mrb[104].mxu1 %v17100_v2 }
 0x230   : > { %2527 = vmatprep.mubr.f32.mxu0 %v20889_v24  ;;  %3605 = vmatprep.mubr.f32.mxu1 %v20889_v24 }
 0x233   : > { %2529 = vmatmul.mubr.f32.gmra.mrb[38].mxu0 %v17048_v33  ;;  %3608 = vmatmul.mubr.f32.gmra.mrb[106].mxu1 %v17109_v13  ;;  %v21141_v13 = vld [vmem:[#allocation125_spill] sm:$0xff] }
 0x234   : > { %2534 = vmatprep.mubr.f32.mxu0 %v20889_v24  ;;  %3613 = vmatprep.mubr.f32.mxu1 %v20889_v24  ;;  %v21142_v2 = vand.u32 4294901760, %v21141_v13 }
 0x237   : > { %2536 = vmatmul.mubr.f32.gmra.mrb[40].mxu0 %v17081_v57  ;;  %3616 = vmatmul.mubr.f32.gmra.mrb[108].mxu1 %v17138_v6 }
 0x238   : > { %2541 = vmatprep.mubr.f32.mxu0 %v20889_v24  ;;  %3621 = vmatprep.mubr.f32.mxu1 %v20889_v24 }
 0x23b   : > { %2543 = vmatmul.mubr.f32.gmra.mrb[42].mxu0 %v17088_v27  ;;  %3624 = vmatmul.mubr.f32.gmra.mrb[110].mxu1 %v17165_v43  ;;  %v21139_v43 = vld [vmem:[#allocation118_spill] sm:$0xff] }
 0x23c   : > { %2548 = vmatprep.mubr.f32.mxu0 %v20889_v24  ;;  %3629 = vmatprep.mubr.f32.mxu1 %v20889_v24 }
 0x23f   : > { %2550 = vmatmul.mubr.f32.gmra.mrb[44].mxu0 %v17120_v16  ;;  %3632 = vmatmul.mubr.f32.gmra.mrb[112].mxu1 %v17187_v8  ;;  %v21135_v8 = vld [vmem:[#allocation101_spill] sm:$0xff] }
 0x240   : > { %2555 = vmatprep.mubr.f32.mxu0 %v20889_v24  ;;  %3637 = vmatprep.mubr.f32.mxu1 %v20889_v24 }
 0x243   : > { %2557 = vmatmul.mubr.f32.gmra.mrb[46].mxu0 %v17140_v60  ;;  %3640 = vmatmul.mubr.f32.gmra.mrb[114].mxu1 %v17199_v23  ;;  %v18132_v23 = vsub.f32 %v17974_v40, %v17988_v62  ;;  %v18146_v40 = vsub.f32 %v17992_v58, %v18007_v14  ;;  %v21149_v58 = vld [vmem:[#allocation115_spill] sm:$0xff] }
 0x244   : > { %2562 = vmatprep.mubr.f32.mxu0 %v20889_v24  ;;  %3645 = vmatprep.mubr.f32.mxu1 %v20889_v24 }
 0x245   : > { %21137 = vst [vmem:[#allocation178_spill] sm:$0xff] %v18132_v23  ;;  %v20694_v21 = vand.u32 4294901760, %v18132_v23 }
 0x247   : > { %2564 = vmatmul.mubr.f32.gmra.mrb[48].mxu0 %v17167_v1  ;;  %3648 = vmatmul.mubr.f32.gmra.mrb[116].mxu1 %v17233_v44  ;;  %v5105_v13 = vsub.f32 %v18132_v23, %v20694_v21 }
 0x248   : > { %2569 = vmatprep.mubr.f32.mxu0 %v20889_v24  ;;  %3653 = vmatprep.mubr.f32.mxu1 %v20889_v24 }
 0x24b   : > { %2571 = vmatmul.mubr.f32.gmra.mrb[50].mxu0 %v17175_v39  ;;  %3656 = vmatmul.mubr.f32.gmra.mrb[118].mxu1 %v21135_v8  ;;  %v21136_v8 = vld [vmem:[#allocation4_spill] sm:$0xff] }
 0x24c   : > { %2576 = vmatprep.mubr.f32.mxu0 %v20889_v24  ;;  %3661 = vmatprep.mubr.f32.mxu1 %v20889_v24  ;;  %v20690_v44 = vand.u32 4294901760, %v21136_v8 }
 0x24e   : > { %v5099_v6 = vsub.f32 %v21136_v8, %v20690_v44 }
 0x24f   : > { %2578 = vmatmul.mubr.f32.gmra.mrb[52].mxu0 %v17211_v54  ;;  %3664 = vmatmul.mubr.f32.gmra.mrb[120].mxu1 %v17279_v29  ;;  %v20691_v29 = vand.u32 4294901760, %v17777_v42 }
 0x250   : > { %2583 = vmatprep.mubr.f32.mxu0 %v20889_v24  ;;  %3669 = vmatprep.mubr.f32.mxu1 %v20889_v24 }
 0x253   : > { %2585 = vmatmul.mubr.f32.gmra.mrb[54].mxu0 %v17221_v9  ;;  %3672 = vmatmul.mubr.f32.gmra.mrb[122].mxu1 %v17291_v55  ;;  %v21138_v55 = vld [vmem:[#allocation104_spill] sm:$0xff] }
 0x254   : > { %2590 = vmatprep.mubr.f32.mxu0 %v20889_v24  ;;  %3677 = vmatprep.mubr.f32.mxu1 %v20889_v24  ;;  %21140 = vst [vmem:[#allocation104_spill] sm:$0xff] %v18146_v40 }
 0x257   : > { %2592 = vmatmul.mubr.f32.gmra.mrb[56].mxu0 %v17257_v63  ;;  %3680 = vmatmul.mubr.f32.gmra.mrb[124].mxu1 %v17320_v25  ;;  %v5087_v25 = vsub.f32 %v17777_v42, %v20691_v29  ;;  %v5100_v29 = vand.u32 4294901760, %v5099_v6  ;;  %v5106_v6 = vand.u32 4294901760, %v5105_v13  ;;  %v21159_v13 = vld [vmem:[#allocation23_spill] sm:$0xff] }
 0x258   : > { %2597 = vmatprep.mubr.f32.mxu0 %v20889_v24  ;;  %3685 = vmatprep.mubr.f32.mxu1 %v20889_v24 }
 0x259   : > { %v5088_v44 = vand.u32 4294901760, %v5087_v25 }
 0x25b   : > { %2599 = vmatmul.mubr.f32.gmra.mrb[58].mxu0 %v21138_v55  ;;  %3688 = vmatmul.mubr.f32.gmra.mrb[126].mxu1 %v21139_v43  ;;  %v21144_v43 = vand.u32 4294901760, %v21143_v51  ;;  %v20695_v51 = vand.u32 4294901760, %v18146_v40  ;;  %v13526_v25 = vpack.c.bf16 %v5100_v29, %v5088_v44  ;;  %v21156_v29 = vld [vmem:[#allocation20_spill] sm:$0xff] }
 0x25c   : > { %2604 = vmatprep.mubr.f32.mxu0 %v20889_v24  ;;  %3764 = vmatprep.mubr.f32.mxu1 %v20889_v24 }
 0x25d   : > { %v13514_v4 = vpack.c.bf16 %v21144_v43, %v21142_v2  ;;  %v21147_v43 = vld [vmem:[#allocation127_spill] sm:$0xff]  ;;  %v5111_v21 = vsub.f32 %v18146_v40, %v20695_v51  ;;  %v21165_v51 = vld [vmem:[#allocation34_spill] sm:$0xff] }
 0x25e   : > { %v21148_v2 = vand.u32 4294901760, %v21147_v43  ;;  %v21154_v43 = vld [vmem:[#allocation16_spill] sm:$0xff] }
 0x25f   : > { %2606 = vmatmul.mubr.f32.gmra.mrb[60].mxu0 %v21145_v10  ;;  %3768 = vmatmul.mubr.f32.vlgmr.msra.gmra.mrb[64].mxu1 %v21146_v3  ;;  %v5112_v44 = vand.u32 4294901760, %v5111_v21  ;;  %v21161_v21 = vld [vmem:[#allocation27_spill] sm:$0xff] }
 0x260   : > { %2611 = vmatprep.mubr.f32.mxu0 %v20889_v24  ;;  %3773 = vmatprep.mubr.f32.mxu1 %v20889_v24 }
 0x261   : > { %13515 = vmatpush1.bf16.msra.mxu1 %v13514_v4  ;;  %v21151_v4 = vld [vmem:[#allocation128_spill] sm:$0xff] }
 0x262   : > { %4072 = vmatprep.subr.mxu1 %v21148_v2  ;;  %v21152_v3 = vand.u32 4294901760, %v21151_v4  ;;  %v21155_v2 = vld [vmem:[#allocation17_spill] sm:$0xff]  ;;  %v21163_v4 = vld [vmem:[#allocation30_spill] sm:$0xff] }
 0x263   : > { %2613 = vmatmul.mubr.f32.gmra.mrb[62].mxu0 %v21149_v58  ;;  %3777 = vmatmul.mubr.f32.gmra.mrb[66].mxu1 %v21150_v0 }
 0x264   : > { %3782 = vmatprep.mubr.f32.mxu1 %v20889_v24  ;;  %4725 = vmatprep.mubr.f32.mxu0 %v20889_v24 }
 0x265   : > { %4076 = vmatpush1.msra.mxu1 %v21152_v3  ;;  %v21157_v3 = vld [vmem:[#allocation21_spill] sm:$0xff] }
 0x266   : > { %13517 = vmatprep.subr.bf16.mxu1 %v21153_v41  ;;  %v21158_v41 = vld [vmem:[#allocation24_spill] sm:$0xff] }
 0x267   : > { %3786 = vmatmul.mubr.f32.gmra.mrb[68].mxu1 %v21154_v43  ;;  %4731 = vmatmul.mubr.f32.vlgmr.msra.gmra.mrb[64].mxu0 %v21155_v2 }
 0x268   : > { %13527 = vmatpush1.bf16.msra.mxu0 %v13526_v25  ;;  %3791 = vmatprep.mubr.f32.mxu1 %v20889_v24  ;;  %v21160_v25 = vld [vmem:[#allocation26_spill] sm:$0xff] }
 0x269   : > { %4736 = vmatprep.mubr.f32.mxu0 %v20889_v24  ;;  %5107 = vmatprep.subr.mxu0 %v5106_v6  ;;  %v21162_v6 = vld [vmem:[#allocation31_spill] sm:$0xff] }
 0x26b   : > { %3795 = vmatmul.mubr.f32.gmra.mrb[70].mxu1 %v21156_v29  ;;  %4742 = vmatmul.mubr.f32.gmra.mrb[66].mxu0 %v21157_v3  ;;  %v21169_v29 = vld [vmem:[#allocation43_spill] sm:$0xff]  ;;  %v21200_v3 = vld [vmem:[#allocation93_spill] sm:$0xff] }
 0x26c   : > { %3800 = vmatprep.mubr.f32.mxu1 %v20889_v24  ;;  %4747 = vmatprep.mubr.f32.mxu0 %v20889_v24 }
 0x26d   : > { %5113 = vmatpush1.msra.mxu0 %v5112_v44  ;;  %v21164_v44 = vld [vmem:[#allocation35_spill] sm:$0xff] }
 0x26f   : > { %3804 = vmatmul.mubr.f32.gmra.mrb[72].mxu1 %v21158_v41  ;;  %4753 = vmatmul.mubr.f32.gmra.mrb[68].mxu0 %v21159_v13  ;;  %v21167_v41 = vld [vmem:[#allocation39_spill] sm:$0xff] }
 0x270   : > { %3809 = vmatprep.mubr.f32.mxu1 %v20889_v24  ;;  %4758 = vmatprep.mubr.f32.mxu0 %v20889_v24 }
 0x273   : > { %3813 = vmatmul.mubr.f32.gmra.mrb[74].mxu1 %v21160_v25  ;;  %4764 = vmatmul.mubr.f32.gmra.mrb[70].mxu0 %v21161_v21  ;;  %v21166_v25 = vld [vmem:[#allocation40_spill] sm:$0xff] }
 0x274   : > { %3818 = vmatprep.mubr.f32.mxu1 %v20889_v24  ;;  %4769 = vmatprep.mubr.f32.mxu0 %v20889_v24 }
 0x277   : > { %3822 = vmatmul.mubr.f32.gmra.mrb[76].mxu1 %v21162_v6  ;;  %4775 = vmatmul.mubr.f32.gmra.mrb[72].mxu0 %v21163_v4  ;;  %v21168_v6 = vld [vmem:[#allocation44_spill] sm:$0xff]  ;;  %v21175_v4 = vld [vmem:[#allocation57_spill] sm:$0xff] }
 0x278   : > { %3827 = vmatprep.mubr.f32.mxu1 %v20889_v24  ;;  %4780 = vmatprep.mubr.f32.mxu0 %v20889_v24 }
 0x27b   : > { %3831 = vmatmul.mubr.f32.gmra.mrb[78].mxu1 %v21164_v44  ;;  %4786 = vmatmul.mubr.f32.gmra.mrb[74].mxu0 %v21165_v51  ;;  %v13528_v44 = vpack.c.bf16 %v17772_v53, %v17770_v17  ;;  %v21170_v51 = vld [vmem:[#allocation49_spill] sm:$0xff] }
 0x27c   : > { %3836 = vmatprep.mubr.f32.mxu1 %v20889_v24  ;;  %4791 = vmatprep.mubr.f32.mxu0 %v20889_v24 }
 0x27d   : > { %13529 = vmatprep.subr.bf16.mxu0 %v13528_v44  ;;  %v21178_v44 = vld [vmem:[#allocation64_spill] sm:$0xff] }
 0x27f   : > { %3840 = vmatmul.mubr.f32.gmra.mrb[80].mxu1 %v21166_v25  ;;  %4797 = vmatmul.mubr.f32.gmra.mrb[76].mxu0 %v21167_v41  ;;  %v21171_v25 = vld [vmem:[#allocation48_spill] sm:$0xff]  ;;  %v21172_v41 = vld [vmem:[#allocation50_spill] sm:$0xff] }
 0x280   : > { %3845 = vmatprep.mubr.f32.mxu1 %v20889_v24  ;;  %4802 = vmatprep.mubr.f32.mxu0 %v20889_v24 }
 0x283   : > { %3849 = vmatmul.mubr.f32.gmra.mrb[82].mxu1 %v21168_v6  ;;  %4808 = vmatmul.mubr.f32.gmra.mrb[78].mxu0 %v21169_v29  ;;  %v21173_v6 = vld [vmem:[#allocation53_spill] sm:$0xff]  ;;  %v21174_v29 = vld [vmem:[#allocation54_spill] sm:$0xff] }
 0x284   : > { %3854 = vmatprep.mubr.f32.mxu1 %v20889_v24  ;;  %4813 = vmatprep.mubr.f32.mxu0 %v20889_v24 }
 0x287   : > { %3858 = vmatmul.mubr.f32.gmra.mrb[84].mxu1 %v21170_v51  ;;  %4819 = vmatmul.mubr.f32.gmra.mrb[80].mxu0 %v21171_v25  ;;  %v21176_v51 = vld [vmem:[#allocation59_spill] sm:$0xff]  ;;  %v21177_v25 = vld [vmem:[#allocation58_spill] sm:$0xff] }
 0x288   : > { %3863 = vmatprep.mubr.f32.mxu1 %v20889_v24  ;;  %4824 = vmatprep.mubr.f32.mxu0 %v20889_v24 }
 0x28b   : > { %3867 = vmatmul.mubr.f32.gmra.mrb[86].mxu1 %v21172_v41  ;;  %4830 = vmatmul.mubr.f32.gmra.mrb[82].mxu0 %v21173_v6  ;;  %v21179_v41 = vld [vmem:[#allocation63_spill] sm:$0xff]  ;;  %v18253_v6 = vpop.permute.xlu0 %300 }
 0x28c   : > { %3872 = vmatprep.mubr.f32.mxu1 %v20889_v24  ;;  %4835 = vmatprep.mubr.f32.mxu0 %v20889_v24  ;;  %21194 = vst [vmem:[#allocation125_spill] sm:$0xff] %v18253_v6 }
 0x28f   : > { %3876 = vmatmul.mubr.f32.gmra.mrb[88].mxu1 %v21174_v29  ;;  %4841 = vmatmul.mubr.f32.gmra.mrb[84].mxu0 %v21175_v4  ;;  %v21180_v29 = vld [vmem:[#allocation68_spill] sm:$0xff]  ;;  %v21181_v4 = vld [vmem:[#allocation67_spill] sm:$0xff]  ;;  %v18265_v43 = vpop.permute.xlu0 %305 }
 0x290   : > { %3881 = vmatprep.mubr.f32.mxu1 %v20889_v24  ;;  %4846 = vmatprep.mubr.f32.mxu0 %v20889_v24  ;;  %21199 = vst [vmem:[#allocation126_spill] sm:$0xff] %v18265_v43 }
 0x293   : > { %3885 = vmatmul.mubr.f32.gmra.mrb[90].mxu1 %v21176_v51  ;;  %4852 = vmatmul.mubr.f32.gmra.mrb[86].mxu0 %v21177_v25  ;;  %v21182_v51 = vld [vmem:[#allocation71_spill] sm:$0xff]  ;;  %v21183_v25 = vld [vmem:[#allocation70_spill] sm:$0xff] }
 0x294   : > { %3890 = vmatprep.mubr.f32.mxu1 %v20889_v24  ;;  %4857 = vmatprep.mubr.f32.mxu0 %v20889_v24 }
 0x297   : > { %3894 = vmatmul.mubr.f32.gmra.mrb[92].mxu1 %v21178_v44  ;;  %4863 = vmatmul.mubr.f32.gmra.mrb[88].mxu0 %v21179_v41  ;;  %v21184_v44 = vld [vmem:[#allocation75_spill] sm:$0xff]  ;;  %v21185_v41 = vld [vmem:[#allocation74_spill] sm:$0xff] }
 0x298   : > { %3899 = vmatprep.mubr.f32.mxu1 %v20889_v24  ;;  %4868 = vmatprep.mubr.f32.mxu0 %v20889_v24 }
 0x29b   : > { %3903 = vmatmul.mubr.f32.gmra.mrb[94].mxu1 %v21180_v29  ;;  %4874 = vmatmul.mubr.f32.gmra.mrb[90].mxu0 %v21181_v4  ;;  %v21186_v29 = vld [vmem:[#allocation79_spill] sm:$0xff]  ;;  %v21187_v4 = vld [vmem:[#allocation78_spill] sm:$0xff] }
 0x29c   : > { %3908 = vmatprep.mubr.f32.mxu1 %v20889_v24  ;;  %4879 = vmatprep.mubr.f32.mxu0 %v20889_v24 }
 0x29f   : > { %3912 = vmatmul.mubr.f32.gmra.mrb[96].mxu1 %v21182_v51  ;;  %4885 = vmatmul.mubr.f32.gmra.mrb[92].mxu0 %v21183_v25  ;;  %v21188_v51 = vld [vmem:[#allocation81_spill] sm:$0xff]  ;;  %v21189_v25 = vld [vmem:[#allocation80_spill] sm:$0xff] }
 0x2a0   : > { %3917 = vmatprep.mubr.f32.mxu1 %v20889_v24  ;;  %4890 = vmatprep.mubr.f32.mxu0 %v20889_v24 }
 0x2a3   : > { %3921 = vmatmul.mubr.f32.gmra.mrb[98].mxu1 %v21184_v44  ;;  %4896 = vmatmul.mubr.f32.gmra.mrb[94].mxu0 %v21185_v41  ;;  %v21190_v44 = vld [vmem:[#allocation85_spill] sm:$0xff]  ;;  %v21191_v41 = vld [vmem:[#allocation84_spill] sm:$0xff] }
 0x2a4   : > { %3926 = vmatprep.mubr.f32.mxu1 %v20889_v24  ;;  %4901 = vmatprep.mubr.f32.mxu0 %v20889_v24 }
 0x2a7   : > { %3930 = vmatmul.mubr.f32.gmra.mrb[100].mxu1 %v21186_v29  ;;  %4907 = vmatmul.mubr.f32.gmra.mrb[96].mxu0 %v21187_v4  ;;  %v21192_v29 = vld [vmem:[#allocation86_spill] sm:$0xff]  ;;  %v21193_v4 = vld [vmem:[#allocation87_spill] sm:$0xff] }
 0x2a8   : > { %3935 = vmatprep.mubr.f32.mxu1 %v20889_v24  ;;  %4912 = vmatprep.mubr.f32.mxu0 %v20889_v24 }
 0x2ab   : > { %3939 = vmatmul.mubr.f32.gmra.mrb[102].mxu1 %v21188_v51  ;;  %4918 = vmatmul.mubr.f32.gmra.mrb[98].mxu0 %v21189_v25  ;;  %v21195_v51 = vld [vmem:[#allocation90_spill] sm:$0xff]  ;;  %v21196_v25 = vld [vmem:[#allocation89_spill] sm:$0xff] }
 0x2ac   : > { %3944 = vmatprep.mubr.f32.mxu1 %v20889_v24  ;;  %4923 = vmatprep.mubr.f32.mxu0 %v20889_v24 }
 0x2af   : > { %3948 = vmatmul.mubr.f32.gmra.mrb[104].mxu1 %v21190_v44  ;;  %4929 = vmatmul.mubr.f32.gmra.mrb[100].mxu0 %v21191_v41  ;;  %v21197_v44 = vld [vmem:[#allocation129_spill] sm:$0xff] }
 0x2b0   : > { %3953 = vmatprep.mubr.f32.mxu1 %v20889_v24  ;;  %4934 = vmatprep.mubr.f32.mxu0 %v20889_v24  ;;  %v661_v41 = vadd.f32 %v21197_v44, %v18253_v6 }
 0x2b3   : > { %3957 = vmatmul.mubr.f32.gmra.mrb[106].mxu1 %v21192_v29  ;;  %4940 = vmatmul.mubr.f32.gmra.mrb[102].mxu0 %v21193_v4  ;;  %v21198_v29 = vld [vmem:[#allocation130_spill] sm:$0xff] }
 0x2b4   : > { %3962 = vmatprep.mubr.f32.mxu1 %v20889_v24  ;;  %4945 = vmatprep.mubr.f32.mxu0 %v20889_v24  ;;  %v663_v4 = vadd.f32 %v21198_v29, %v18253_v6  ;;  %v672_v29 = vadd.f32 %v21203_v11, %v18265_v43  ;;  %v21204_v6 = vld [vmem:[#allocation132_spill] sm:$0xff]  ;;  %v21207_v11 = vld [vmem:[#allocation133_spill] sm:$0xff] }
 0x2b5   : > { %v674_v37 = vadd.f32 %v21204_v6, %v18265_v43 }
 0x2b7   : > { %3966 = vmatmul.mubr.f32.gmra.mrb[108].mxu1 %v21195_v51  ;;  %4951 = vmatmul.mubr.f32.gmra.mrb[104].mxu0 %v21196_v25  ;;  %v21201_v51 = vld [vmem:[#allocation92_spill] sm:$0xff]  ;;  %v18269_v25 = vpop.permute.xlu1 %310 }
 0x2b8   : > { %3971 = vmatprep.mubr.f32.mxu1 %v20889_v24  ;;  %4956 = vmatprep.mubr.f32.mxu0 %v20889_v24  ;;  %21202 = vst [vmem:[#allocation111_spill] sm:$0xff] %v18269_v25 }
 0x2ba   : > { %v2397_v21 = vpop.f32.mrb[0].mxu0 }
 0x2bb   : > { %v13597_v0 = vadd.f32 %v2397_v21, %v661_v41  ;;  %v2399_v13 = vpop.f32.mrb[1].mxu0  ;;  %3975 = vmatmul.mubr.f32.gmra.mrb[110].mxu1 %v21200_v3  ;;  %4962 = vmatmul.mubr.f32.gmra.mrb[106].mxu0 %v21201_v51  ;;  %v21205_v51 = vld [vmem:[#allocation97_spill] sm:$0xff] }
 0x2bc   : > { %v13599_v2 = vadd.f32 %v2399_v13, %v663_v4  ;;  %3980 = vmatprep.mubr.f32.mxu1 %v20889_v24  ;;  %4967 = vmatprep.mubr.f32.mxu0 %v20889_v24  ;;  %v683_v4 = vadd.f32 %v21207_v11, %v18269_v25  ;;  %v21212_v11 = vld [vmem:[#allocation135_spill] sm:$0xff] }
 0x2bd   : > { %v12648_v44 = vmul.f32 -1.442695, %v13597_v0 }
 0x2be   : > { %v12649_v41 = vmul.f32 -1.442695, %v13599_v2  ;;  %v2404_v21 = vpop.f32.mrb[2].mxu0  ;;  %v21208_v2 = vld [vmem:[#allocation134_spill] sm:$0xff] }
 0x2bf   : > { %15354 = vpow2.f32 %v12648_v44  ;;  %v13601_v3 = vadd.f32 %v2404_v21, %v672_v29  ;;  %v2406_v45 = vpop.f32.mrb[3].mxu0  ;;  %3984 = vmatmul.mubr.f32.gmra.mrb[112].mxu1 %v21205_v51  ;;  %4973 = vmatmul.mubr.f32.gmra.mrb[108].mxu0 %v21206_v15  ;;  %v685_v6 = vadd.f32 %v21208_v2, %v18269_v25  ;;  %v18285_v44 = vpop.permute.xlu1 %315 }
 0x2c0   : > { %15356 = vpow2.f32 %v12649_v41  ;;  %v13603_v13 = vadd.f32 %v2406_v45, %v674_v37  ;;  %3989 = vmatprep.mubr.f32.mxu1 %v20889_v24  ;;  %4978 = vmatprep.mubr.f32.mxu0 %v20889_v24  ;;  %21209 = vst [vmem:[#allocation127_spill] sm:$0xff] %v18285_v44  ;;  %v21210_v41 = vld [vmem:[#allocation99_spill] sm:$0xff]  ;;  %v21211_v37 = vld [vmem:[#allocation98_spill] sm:$0xff]  ;;  %v694_v2 = vadd.f32 %v21212_v11, %v18285_v44 }
 0x2c1   : > { %v12657_v0 = vmul.f32 -1.442695, %v13601_v3 }
 0x2c2   : > { %v12658_v29 = vmul.f32 -1.442695, %v13603_v13  ;;  %v2411_v21 = vpop.f32.mrb[4].mxu0  ;;  %v21213_v13 = vld [vmem:[#allocation136_spill] sm:$0xff] }
 0x2c3   : > { %15358 = vpow2.f32 %v12657_v0  ;;  %v13605_v51 = vadd.f32 %v2411_v21, %v683_v4  ;;  %v2413_v15 = vpop.f32.mrb[5].mxu0  ;;  %3993 = vmatmul.mubr.f32.gmra.mrb[114].mxu1 %v21210_v41  ;;  %4984 = vmatmul.mubr.f32.gmra.mrb[110].mxu0 %v21211_v37  ;;  %v696_v25 = vadd.f32 %v21213_v13, %v18285_v44  ;;  %v18295_v0 = vpop.permute.xlu0 %320  ;;  %v21217_v13 = vld [vmem:[#allocation137_spill] sm:$0xff] }
 0x2c4   : > { %15360 = vpow2.f32 %v12658_v29  ;;  %v13607_v45 = vadd.f32 %v2413_v15, %v685_v6  ;;  %3998 = vmatprep.mubr.f32.mxu1 %v20889_v24  ;;  %4989 = vmatprep.mubr.f32.mxu0 %v20889_v24  ;;  %21214 = vst [vmem:[#allocation115_spill] sm:$0xff] %v18295_v0  ;;  %v21215_v29 = vld [vmem:[#allocation103_spill] sm:$0xff]  ;;  %v21216_v15 = vld [vmem:[#allocation102_spill] sm:$0xff]  ;;  %v705_v44 = vadd.f32 %v21217_v13, %v18295_v0 }
 0x2c5   : > { %v12666_v3 = vmul.f32 -1.442695, %v13605_v51 }
 0x2c6   : > { %v12667_v4 = vmul.f32 -1.442695, %v13607_v45  ;;  %v2418_v21 = vpop.f32.mrb[6].mxu0 }
 0x2c7   : > { %15362 = vpow2.f32 %v12666_v3  ;;  %v13609_v41 = vadd.f32 %v2418_v21, %v694_v2  ;;  %v2420_v37 = vpop.f32.mrb[7].mxu0  ;;  %4002 = vmatmul.mubr.f32.gmra.mrb[116].mxu1 %v21215_v29  ;;  %4995 = vmatmul.mubr.f32.gmra.mrb[112].mxu0 %v21216_v15  ;;  %v21218_v3 = vld [vmem:[#allocation138_spill] sm:$0xff]  ;;  %v18305_v21 = vpop.permute.xlu1 %325 }
 0x2c8   : > { %15364 = vpow2.f32 %v12667_v4  ;;  %v13611_v6 = vadd.f32 %v2420_v37, %v696_v25  ;;  %4007 = vmatprep.mubr.f32.mxu1 %v20889_v24  ;;  %5000 = vmatprep.mubr.f32.mxu0 %v20889_v24  ;;  %v707_v2 = vadd.f32 %v21218_v3, %v18295_v0  ;;  %21219 = vst [vmem:[#allocation128_spill] sm:$0xff] %v18305_v21  ;;  %v18315_v3 = vpop.permute.xlu0 %330 }
 0x2c9   : > { %v15355_v51 = vpop.eup %15354  ;;  %v12675_v11 = vmul.f32 -1.442695, %v13609_v41  ;;  %21224 = vst [vmem:[#allocation62_spill] sm:$0xff] %v18315_v3 }
 0x2ca   : > { %v15357_v45 = vpop.eup %15356  ;;  %v11396_v29 = vadd.f32 1.0, %v15355_v51  ;;  %v12676_v43 = vmul.f32 -1.442695, %v13611_v6  ;;  %v2425_v15 = vpop.f32.mrb[8].mxu0  ;;  %v21222_v6 = vld [vmem:[#allocation139_spill] sm:$0xff] }
 0x2cb   : > { %v11397_v4 = vadd.f32 1.0, %v15357_v45  ;;  %15366 = vpow2.f32 %v12675_v11  ;;  %v13613_v25 = vadd.f32 %v2425_v15, %v705_v44  ;;  %v2427_v37 = vpop.f32.mrb[9].mxu0  ;;  %4011 = vmatmul.mubr.f32.gmra.mrb[118].mxu1 %v21220_v50  ;;  %5006 = vmatmul.mubr.f32.gmra.mrb[114].mxu0 %v21221_v61  ;;  %v716_v45 = vadd.f32 %v21222_v6, %v18305_v21  ;;  %v21223_v44 = vld [vmem:[#allocation140_spill] sm:$0xff] }
 0x2cc   : > { %15368 = vrcp.f32 %v11396_v29  ;;  %v13615_v41 = vadd.f32 %v2427_v37, %v707_v2  ;;  %4016 = vmatprep.mubr.f32.mxu1 %v20889_v24  ;;  %5011 = vmatprep.mubr.f32.mxu0 %v20889_v24  ;;  %v718_v15 = vadd.f32 %v21223_v44, %v18305_v21 }
 0x2cd   : > { %v15359_v13 = vpop.eup %15358  ;;  %15370 = vrcp.f32 %v11397_v4  ;;  %v12684_v51 = vmul.f32 -1.442695, %v13613_v25  ;;  %v21225_v4 = vld [vmem:[#allocation110_spill] sm:$0xff]  ;;  %v21226_v25 = vld [vmem:[#allocation109_spill] sm:$0xff] }
 0x2ce   : > { %v15361_v11 = vpop.eup %15360  ;;  %v11405_v50 = vadd.f32 1.0, %v15359_v13  ;;  %15372 = vpow2.f32 %v12676_v43  ;;  %v12685_v29 = vmul.f32 -1.442695, %v13615_v41  ;;  %v2432_v2 = vpop.f32.mrb[10].mxu0  ;;  %v21227_v41 = vld [vmem:[#allocation141_spill] sm:$0xff] }
 0x2cf   : > { %v11406_v37 = vadd.f32 1.0, %v15361_v11  ;;  %15374 = vpow2.f32 %v12684_v51  ;;  %v13617_v61 = vadd.f32 %v2432_v2, %v716_v45  ;;  %v2434_v0 = vpop.f32.mrb[11].mxu0  ;;  %4020 = vmatmul.mubr.f32.gmra.mrb[120].mxu1 %v21225_v4  ;;  %5017 = vmatmul.mubr.f32.gmra.mrb[116].mxu0 %v21226_v25  ;;  %v727_v13 = vadd.f32 %v21227_v41, %v18315_v3  ;;  %v21228_v45 = vld [vmem:[#allocation142_spill] sm:$0xff]  ;;  %v18326_v2 = vpop.permute.xlu1 %335 }
 0x2d0   : > { %15376 = vrcp.f32 %v11405_v50  ;;  %v13619_v6 = vadd.f32 %v2434_v0, %v718_v15  ;;  %4025 = vmatprep.mubr.f32.mxu1 %v20889_v24  ;;  %5022 = vmatprep.mubr.f32.mxu0 %v20889_v24  ;;  %v729_v11 = vadd.f32 %v21228_v45, %v18315_v3  ;;  %21229 = vst [vmem:[#allocation129_spill] sm:$0xff] %v18326_v2  ;;  %v18341_v45 = vpop.permute.xlu0 %340 }
 0x2d1   : > { %v15363_v44 = vpop.eup %15362  ;;  %15378 = vrcp.f32 %v11406_v37  ;;  %v12693_v43 = vmul.f32 -1.442695, %v13617_v61  ;;  %v21231_v61 = vld [vmem:[#allocation113_spill] sm:$0xff]  ;;  %21234 = vst [vmem:[#allocation130_spill] sm:$0xff] %v18341_v45 }
 0x2d2   : > { %v15365_v51 = vpop.eup %15364  ;;  %v11414_v4 = vadd.f32 1.0, %v15363_v44  ;;  %15380 = vpow2.f32 %v12685_v29  ;;  %v12694_v50 = vmul.f32 -1.442695, %v13619_v6  ;;  %v2439_v0 = vpop.f32.mrb[12].mxu0  ;;  %v21232_v44 = vld [vmem:[#allocation143_spill] sm:$0xff] }
 0x2d3   : > { %v11415_v15 = vadd.f32 1.0, %v15365_v51  ;;  %15382 = vpow2.f32 %v12693_v43  ;;  %v13621_v25 = vadd.f32 %v2439_v0, %v727_v13  ;;  %v2441_v21 = vpop.f32.mrb[13].mxu0  ;;  %4029 = vmatmul.mubr.f32.gmra.mrb[122].mxu1 %v21230_v12  ;;  %5028 = vmatmul.mubr.f32.gmra.mrb[118].mxu0 %v21231_v61  ;;  %v738_v43 = vadd.f32 %v21232_v44, %v18326_v2  ;;  %v21233_v13 = vld [vmem:[#allocation144_spill] sm:$0xff] }
 0x2d4   : > { %15384 = vrcp.f32 %v11414_v4  ;;  %v13623_v37 = vadd.f32 %v2441_v21, %v729_v11  ;;  %4034 = vmatprep.mubr.f32.mxu1 %v20889_v24  ;;  %5033 = vmatprep.mubr.f32.mxu0 %v20889_v24  ;;  %v740_v51 = vadd.f32 %v21233_v13, %v18326_v2  ;;  %v21236_v61 = vld [vmem:[#allocation116_spill] sm:$0xff] }
 0x2d5   : > { %v15367_v29 = vpop.eup %15366  ;;  %15386 = vrcp.f32 %v11415_v15  ;;  %v12702_v6 = vmul.f32 -1.442695, %v13621_v25  ;;  %v21235_v25 = vld [vmem:[#allocation117_spill] sm:$0xff] }
 0x2d6   : > { %v15369_v41 = vpop.eup %15368  ;;  %v11423_v4 = vadd.f32 1.0, %v15367_v29  ;;  %15388 = vpow2.f32 %v12694_v50  ;;  %v12703_v21 = vmul.f32 -1.442695, %v13623_v37  ;;  %v2446_v11 = vpop.f32.mrb[14].mxu0 }
 0x2d7   : > { %v15371_v0 = vpop.eup %15370  ;;  %12260 = vst [vmem:[%s18333_s17] sm:$0xff] %v15369_v41  ;;  %15390 = vpow2.f32 %v12702_v6  ;;  %v13625_v12 = vadd.f32 %v2446_v11, %v738_v43  ;;  %v2448_v15 = vpop.f32.mrb[15].mxu0  ;;  %4038 = vmatmul.mubr.f32.gmra.mrb[124].mxu1 %v21235_v25  ;;  %5039 = vmatmul.mubr.f32.gmra.mrb[120].mxu0 %v21236_v61  ;;  %v21237_v6 = vld [vmem:[#allocation145_spill] sm:$0xff]  ;;  %v21238_v11 = vld [vmem:[#allocation146_spill] sm:$0xff] }
 0x2d8   : > { %v15373_v44 = vpop.eup %15372  ;;  %12261 = vst [vmem:[%s18333_s17 + $0x8] sm:$0xff] %v15371_v0  ;;  %15392 = vrcp.f32 %v11423_v4  ;;  %v13627_v13 = vadd.f32 %v2448_v15, %v740_v51  ;;  %4043 = vmatprep.mubr.f32.mxu1 %v20889_v24  ;;  %5044 = vmatprep.mubr.f32.mxu0 %v20889_v24  ;;  %v749_v43 = vadd.f32 %v21237_v6, %v18341_v45  ;;  %v18353_v0 = vpop.permute.xlu1 %345 }
 0x2d9   : > { %v15375_v50 = vpop.eup %15374  ;;  %v11424_v37 = vadd.f32 1.0, %v15373_v44  ;;  %15394 = vpow2.f32 %v12703_v21  ;;  %v12711_v29 = vmul.f32 -1.442695, %v13625_v12  ;;  %v751_v25 = vadd.f32 %v21238_v11, %v18341_v45  ;;  %21239 = vst [vmem:[#allocation131_spill] sm:$0xff] %v18353_v0  ;;  %v21240_v21 = vld [vmem:[#allocation120_spill] sm:$0xff]  ;;  %v21241_v12 = vld [vmem:[#allocation119_spill] sm:$0xff] }
 0x2da   : > { %v15377_v41 = vpop.eup %15376  ;;  %v11432_v4 = vadd.f32 1.0, %v15375_v50  ;;  %v12712_v51 = vmul.f32 -1.442695, %v13627_v13  ;;  %v2453_v15 = vpop.f32.mrb[16].mxu0 }
 0x2db   : > { %v15379_v61 = vpop.eup %15378  ;;  %12270 = vst [vmem:[%s18333_s17 + $0x48] sm:$0xff] %v15377_v41  ;;  %15396 = vrcp.f32 %v11424_v37  ;;  %v13629_v2 = vadd.f32 %v2453_v15, %v749_v43  ;;  %v2455_v44 = vpop.f32.mrb[17].mxu0  ;;  %4047 = vmatmul.mubr.f32.gmra.mrb[126].mxu1 %v21240_v21  ;;  %5050 = vmatmul.mubr.f32.gmra.mrb[122].mxu0 %v21241_v12  ;;  %v21242_v37 = vld [vmem:[#allocation147_spill] sm:$0xff]  ;;  %v21243_v15 = vld [vmem:[#allocation148_spill] sm:$0xff] }
 0x2dc   : > { %v15381_v3 = vpop.eup %15380  ;;  %12271 = vst [vmem:[%s18333_s17 + $0x50] sm:$0xff] %v15379_v61  ;;  %15398 = vrcp.f32 %v11432_v4  ;;  %v13631_v6 = vadd.f32 %v2455_v44, %v751_v25  ;;  %4135 = vmatprep.mubr.f32.mxu1 %v20889_v24  ;;  %5055 = vmatprep.mubr.f32.mxu0 %v20889_v24  ;;  %v760_v43 = vadd.f32 %v21242_v37, %v18353_v0  ;;  %v18365_v61 = vpop.permute.xlu0 %350 }
 0x2dd   : > { %v15383_v13 = vpop.eup %15382  ;;  %v11433_v50 = vadd.f32 1.0, %v15381_v3  ;;  %15400 = vpow2.f32 %v12711_v29  ;;  %v12720_v41 = vmul.f32 -1.442695, %v13629_v2  ;;  %v762_v21 = vadd.f32 %v21243_v15, %v18353_v0  ;;  %21244 = vst [vmem:[#allocation132_spill] sm:$0xff] %v18365_v61  ;;  %v21245_v2 = vld [vmem:[#allocation121_spill] sm:$0xff]  ;;  %v18370_v45 = vpop.permute.xlu1 %355 }
 0x2de   : > { %v15385_v11 = vpop.eup %15384  ;;  %v11441_v25 = vadd.f32 1.0, %v15383_v13  ;;  %15402 = vpow2.f32 %v12712_v51  ;;  %v12721_v4 = vmul.f32 -1.442695, %v13631_v6  ;;  %v2460_v44 = vpop.f32.mrb[18].mxu0  ;;  %21246 = vst [vmem:[#allocation133_spill] sm:$0xff] %v18370_v45 }
 0x2df   : > { %v15387_v12 = vpop.eup %15386  ;;  %12279 = vst [vmem:[%s18333_s17 + $0x90] sm:$0xff] %v15385_v11  ;;  %15404 = vrcp.f32 %v11433_v50  ;;  %v13633_v3 = vadd.f32 %v2460_v44, %v760_v43  ;;  %v2462_v29 = vpop.f32.mrb[19].mxu0  ;;  %4137 = vmatmul.mubr.f32.vlgmr.msra.gmra.mrb[64].mxu1 %v21061_v52  ;;  %5061 = vmatmul.mubr.f32.gmra.mrb[124].mxu0 %v21245_v2  ;;  %v21247_v50 = vld [vmem:[#allocation149_spill] sm:$0xff]  ;;  %v21248_v11 = vld [vmem:[#allocation123_spill] sm:$0xff]  ;;  %v21249_v2 = vld [vmem:[#allocation150_spill] sm:$0xff] }
 0x2e0   : > { %v15389_v37 = vpop.eup %15388  ;;  %12280 = vst [vmem:[%s18333_s17 + $0x98] sm:$0xff] %v15387_v12  ;;  %15406 = vrcp.f32 %v11441_v25  ;;  %v13635_v15 = vadd.f32 %v2462_v29, %v762_v21  ;;  %4142 = vmatprep.mubr.f32.mxu1 %v20889_v24  ;;  %5066 = vmatprep.mubr.f32.mxu0 %v20889_v24  ;;  %v771_v43 = vadd.f32 %v21247_v50, %v18365_v61  ;;  %v21250_v29 = vld [vmem:[#allocation124_spill] sm:$0xff]  ;;  %v18381_v5 = vpop.permute.xlu0 %360  ;;  %v21252_v50 = vld [vmem:[#allocation122_spill] sm:$0xff] }
 0x2e1   : > { %v15391_v51 = vpop.eup %15390  ;;  %v11442_v6 = vadd.f32 1.0, %v15389_v37  ;;  %15408 = vpow2.f32 %v12720_v41  ;;  %v12729_v13 = vmul.f32 -1.442695, %v13633_v3  ;;  %13519 = vmatpush1.bf16.msra.mxu1 %v21248_v11  ;;  %v773_v12 = vadd.f32 %v21249_v2, %v18365_v61  ;;  %21251 = vst [vmem:[#allocation134_spill] sm:$0xff] %v18381_v5  ;;  %v18386_v11 = vpop.permute.xlu1 %365 }
 0x2e2   : > { %v15393_v44 = vpop.eup %15392  ;;  %v11450_v25 = vadd.f32 1.0, %v15391_v51  ;;  %15410 = vpow2.f32 %v12721_v4  ;;  %v2467_v21 = vpop.f32.mrb[20].mxu0  ;;  %4369 = vmatprep.subr.mxu1 %v21250_v29  ;;  %v12730_v41 = vmul.f32 -1.442695, %v13635_v15  ;;  %21253 = vst [vmem:[#allocation135_spill] sm:$0xff] %v18386_v11  ;;  %v13530_v15 = vpack.c.bf16 %v21136_v8, %v17777_v42 }
 0x2e3   : > { %v15395_v0 = vpop.eup %15394  ;;  %12288 = vst [vmem:[%s18333_s17 + $0xd8] sm:$0xff] %v15393_v44  ;;  %15412 = vrcp.f32 %v11442_v6  ;;  %v13637_v3 = vadd.f32 %v2467_v21, %v771_v43  ;;  %v2469_v37 = vpop.f32.mrb[21].mxu0  ;;  %4144 = vmatmul.mubr.f32.gmra.mrb[66].mxu1 %v21063_v38  ;;  %5072 = vmatmul.mubr.f32.gmra.mrb[126].mxu0 %v21252_v50  ;;  %v21254_v43 = vld [vmem:[#allocation151_spill] sm:$0xff] }
 0x2e4   : > { %15414 = vrcp.f32 %v11450_v25  ;;  %v11451_v4 = vadd.f32 1.0, %v15395_v0  ;;  %v13639_v2 = vadd.f32 %v2469_v37, %v773_v12  ;;  %4149 = vmatprep.mubr.f32.mxu1 %v20889_v24  ;;  %5172 = vmatprep.mubr.f32.mxu0 %v20889_v24  ;;  %v782_v44 = vadd.f32 %v21254_v43, %v18370_v45  ;;  %v21255_v0 = vld [vmem:[#allocation152_spill] sm:$0xff]  ;;  %v21256_v37 = vld [vmem:[#allocation153_spill] sm:$0xff] }
 0x2e5   : > { %v15397_v51 = vpop.eup %15396  ;;  %15416 = vpow2.f32 %v12729_v13  ;;  %v12738_v6 = vmul.f32 -1.442695, %v13637_v3  ;;  %4371 = vmatpush1.msra.mxu1 %v17429_v28  ;;  %v784_v12 = vadd.f32 %v21255_v0, %v18370_v45  ;;  %v793_v50 = vadd.f32 %v21256_v37, %v18381_v5  ;;  %v21257_v3 = vld [vmem:[#allocation154_spill] sm:$0xff] }
 0x2e6   : > { %v15399_v21 = vpop.eup %15398  ;;  %12289 = vst [vmem:[%s18333_s17 + $0xe0] sm:$0xff] %v15397_v51  ;;  %15418 = vrcp.f32 %v11451_v4  ;;  %v12739_v25 = vmul.f32 -1.442695, %v13639_v2  ;;  %v2474_v29 = vpop.f32.mrb[22].mxu0  ;;  %v795_v61 = vadd.f32 %v21257_v3, %v18381_v5  ;;  %v21258_v4 = vld [vmem:[#allocation155_spill] sm:$0xff]  ;;  %v246_v51 = vld [vmem:[%s16617_s4 + $0x38] sm:$0xff] }
 0x2e7   : > { %v15401_v13 = vpop.eup %15400  ;;  %12297 = vst [vmem:[%s18333_s17 + $0x120] sm:$0xff] %v15399_v21  ;;  %15420 = vpow2.f32 %v12730_v41  ;;  %v13641_v28 = vadd.f32 %v2474_v29, %v782_v44  ;;  %v2476_v43 = vpop.f32.mrb[23].mxu0  ;;  %4151 = vmatmul.mubr.f32.gmra.mrb[68].mxu1 %v21065_v48  ;;  %5174 = vmatmul.mubr.f32.vlgmr.msra.gmra.mrb[64].mxu0 %v21061_v52  ;;  %v804_v2 = vadd.f32 %v21258_v4, %v18386_v11  ;;  %v255_v0 = vld [vmem:[%s16617_s4 + $0x80] sm:$0xff]  ;;  %v6691_v41 = vand.u32 4294901760, %v246_v51  ;;  %v18411_v44 = vld [vmem:[%s16617_s4 + $0x30] sm:$0xff] }
 0x2e8   : > { %v15403_v37 = vpop.eup %15402  ;;  %v11459_v45 = vadd.f32 1.0, %v15401_v13  ;;  %15422 = vpow2.f32 %v12738_v6  ;;  %v13643_v3 = vadd.f32 %v2476_v43, %v784_v12  ;;  %13531 = vmatpush1.bf16.msra.mxu0 %v13530_v15  ;;  %4156 = vmatprep.mubr.f32.mxu1 %v20889_v24  ;;  %v6695_v4 = vand.u32 4294901760, %v255_v0  ;;  %v18416_v13 = vld [vmem:[%s16617_s4 + $0x78] sm:$0xff] }
 0x2e9   : > { %v15405_v21 = vpop.eup %15404  ;;  %v11460_v29 = vadd.f32 1.0, %v15403_v37  ;;  %15424 = vpow2.f32 %v12739_v25  ;;  %v12747_v5 = vmul.f32 -1.442695, %v13641_v28  ;;  %5179 = vmatprep.mubr.f32.mxu0 %v20889_v24  ;;  %5411 = vmatprep.subr.mxu0 %v18132_v23  ;;  %v18419_v43 = vsub.f32 %v246_v51, %v6691_v41 }
 0x2ea   : > { %v15407_v6 = vpop.eup %15406  ;;  %12298 = vst [vmem:[%s18333_s17 + $0x128] sm:$0xff] %v15405_v21  ;;  %15426 = vrcp.f32 %v11459_v45  ;;  %v12748_v15 = vmul.f32 -1.442695, %v13643_v3  ;;  %v2481_v12 = vpop.f32.mrb[24].mxu0  ;;  %v20725_v8 = vand.u32 4294901760, %v18411_v44  ;;  %v18425_v37 = vpack.c.bf16 %v6695_v4, %v6691_v41 }
 0x2eb   : > { %21259 = vst [vmem:[#allocation136_spill] sm:$0xff] %v18419_v43  ;;  %v15409_v42 = vpop.eup %15408  ;;  %12306 = vst [vmem:[%s18333_s17 + $0x168] sm:$0xff] %v15407_v6  ;;  %15428 = vrcp.f32 %v11460_v29  ;;  %v13645_v25 = vadd.f32 %v2481_v12, %v793_v50  ;;  %v2483_v28 = vpop.f32.mrb[25].mxu0  ;;  %4158 = vmatmul.mubr.f32.gmra.mrb[70].mxu1 %v21070_v56  ;;  %5181 = vmatmul.mubr.f32.gmra.mrb[66].mxu0 %v21063_v38  ;;  %v18427_v23 = vsub.f32 %v255_v0, %v6695_v4  ;;  %v21264_v12 = vld [vmem:[#allocation2_spill] sm:$0xff] }
 0x2ec   : > { %21260 = vst [vmem:[#allocation137_spill] sm:$0xff] %v18425_v37  ;;  %v15411_v45 = vpop.eup %15410  ;;  %v11468_v3 = vadd.f32 1.0, %v15409_v42  ;;  %15430 = vpow2.f32 %v12747_v5  ;;  %v13647_v51 = vadd.f32 %v2483_v28, %v795_v61  ;;  %4163 = vmatprep.mubr.f32.mxu1 %v20889_v24  ;;  %5186 = vmatprep.mubr.f32.mxu0 %v20889_v24  ;;  %v20726_v50 = vand.u32 4294901760, %v18416_v13  ;;  %v21262_v61 = vld [vmem:[#allocation156_spill] sm:$0xff]  ;;  %v18441_v41 = vpop.permute.xlu0 %370 }
 0x2ed   : > { %21261 = vst [vmem:[#allocation138_spill] sm:$0xff] %v18427_v23  ;;  %v15413_v21 = vpop.eup %15412  ;;  %v11469_v29 = vadd.f32 1.0, %v15411_v45  ;;  %15432 = vpow2.f32 %v12748_v15  ;;  %v12756_v6 = vmul.f32 -1.442695, %v13645_v25  ;;  %5414 = vmatpush1.msra.mxu0 %v18146_v40  ;;  %13545 = vmatprep.subr.bf16.mxu1 %v18425_v37  ;;  %v18437_v42 = vsub.f32 %v18411_v44, %v20725_v8  ;;  %21263 = vst [vmem:[#allocation139_spill] sm:$0xff] %v18441_v41  ;;  %v18460_v37 = vpop.permute.xlu1 %375 }
 0x2ee   : > { %v15415_v5 = vpop.eup %15414  ;;  %v806_v0 = vadd.f32 %v21262_v61, %v18386_v11  ;;  %12307 = vst [vmem:[%s18333_s17 + $0x170] sm:$0xff] %v15413_v21  ;;  %15434 = vrcp.f32 %v11468_v3  ;;  %v12757_v4 = vmul.f32 -1.442695, %v13647_v51  ;;  %v2488_v15 = vpop.f32.mrb[26].mxu0  ;;  %13533 = vmatprep.subr.bf16.mxu0 %v21264_v12  ;;  %v18448_v25 = vsub.f32 %v18416_v13, %v20726_v50  ;;  %21268 = vst [vmem:[#allocation141_spill] sm:$0xff] %v18460_v37 }
 0x2ef   : > { %v15417_v28 = vpop.eup %15416  ;;  %12315 = vst [vmem:[%s18333_s17 + $0x1b0] sm:$0xff] %v15415_v5  ;;  %15436 = vrcp.f32 %v11469_v29  ;;  %v13649_v45 = vadd.f32 %v2488_v15, %v804_v2  ;;  %v2490_v8 = vpop.f32.mrb[27].mxu0  ;;  %4165 = vmatmul.mubr.f32.gmra.mrb[72].mxu1 %v21073_v46  ;;  %5188 = vmatmul.mubr.f32.gmra.mrb[68].mxu0 %v21065_v48  ;;  %v21266_v29 = vld [vmem:[#allocation157_spill] sm:$0xff]  ;;  %v21267_v15 = vld [vmem:[#allocation158_spill] sm:$0xff] }
 0x2f0   : > { %21265 = vst [vmem:[#allocation140_spill] sm:$0xff] %v18448_v25  ;;  %v15419_v3 = vpop.eup %15418  ;;  %v11477_v51 = vadd.f32 1.0, %v15417_v28  ;;  %15438 = vpow2.f32 %v12756_v6  ;;  %v13651_v21 = vadd.f32 %v2490_v8, %v806_v0  ;;  %4170 = vmatprep.mubr.f32.mxu1 %v20889_v24  ;;  %5193 = vmatprep.mubr.f32.mxu0 %v20889_v24  ;;  %v815_v2 = vadd.f32 %v21266_v29, %v18441_v41 }
 0x2f1   : > { %v15421_v61 = vpop.eup %15420  ;;  %12316 = vst [vmem:[%s18333_s17 + $0x1b8] sm:$0xff] %v15419_v3  ;;  %15440 = vpow2.f32 %v12757_v4  ;;  %v12765_v50 = vmul.f32 -1.442695, %v13649_v45  ;;  %v817_v11 = vadd.f32 %v21267_v15, %v18441_v41  ;;  %v18471_v41 = vpop.permute.xlu0 %380 }
 0x2f2   : > { %v15423_v5 = vpop.eup %15422  ;;  %15442 = vrcp.f32 %v11477_v51  ;;  %v11478_v6 = vadd.f32 1.0, %v15421_v61  ;;  %v2495_v8 = vpop.f32.mrb[28].mxu0  ;;  %v12766_v12 = vmul.f32 -1.442695, %v13651_v21  ;;  %v21269_v21 = vld [vmem:[#allocation159_spill] sm:$0xff]  ;;  %21271 = vst [vmem:[#allocation142_spill] sm:$0xff] %v18471_v41 }
 0x2f3   : > { %v15425_v0 = vpop.eup %15424  ;;  %v11486_v28 = vadd.f32 1.0, %v15423_v5  ;;  %15444 = vpow2.f32 %v12765_v50  ;;  %v13653_v3 = vadd.f32 %v2495_v8, %v815_v2  ;;  %v2497_v4 = vpop.f32.mrb[29].mxu0  ;;  %4172 = vmatmul.mubr.f32.gmra.mrb[74].mxu1 %v21076_v34  ;;  %5195 = vmatmul.mubr.f32.gmra.mrb[70].mxu0 %v21070_v56  ;;  %v826_v61 = vadd.f32 %v21269_v21, %v18460_v37  ;;  %v21270_v5 = vld [vmem:[#allocation160_spill] sm:$0xff] }
 0x2f4   : > { %v15427_v45 = vpop.eup %15426  ;;  %15446 = vrcp.f32 %v11478_v6  ;;  %v11487_v29 = vadd.f32 1.0, %v15425_v0  ;;  %v13655_v15 = vadd.f32 %v2497_v4, %v817_v11  ;;  %4177 = vmatprep.mubr.f32.mxu1 %v20889_v24  ;;  %5200 = vmatprep.mubr.f32.mxu0 %v20889_v24  ;;  %v828_v8 = vadd.f32 %v21270_v5, %v18460_v37  ;;  %v18483_v37 = vpop.permute.xlu1 %385 }
 0x2f5   : > { %v15429_v51 = vpop.eup %15428  ;;  %12324 = vst [vmem:[%s18333_s17 + $0x1f8] sm:$0xff] %v15427_v45  ;;  %15448 = vrcp.f32 %v11486_v28  ;;  %v12774_v50 = vmul.f32 -1.442695, %v13653_v3  ;;  %21274 = vst [vmem:[#allocation143_spill] sm:$0xff] %v18483_v37 }
 0x2f6   : > { %v15431_v2 = vpop.eup %15430  ;;  %12325 = vst [vmem:[%s18333_s17 + $0x200] sm:$0xff] %v15429_v51  ;;  %15450 = vrcp.f32 %v11487_v29  ;;  %v2502_v11 = vpop.f32.mrb[30].mxu0  ;;  %v12775_v4 = vmul.f32 -1.442695, %v13655_v15  ;;  %v21272_v51 = vld [vmem:[#allocation13_spill] sm:$0xff] }
 0x2f7   : > { %v15433_v6 = vpop.eup %15432  ;;  %v11495_v0 = vadd.f32 1.0, %v15431_v2  ;;  %15452 = vpow2.f32 %v12766_v12  ;;  %v13657_v45 = vadd.f32 %v2502_v11, %v826_v61  ;;  %v2504_v28 = vpop.f32.mrb[31].mxu0  ;;  %4179 = vmatmul.mubr.f32.gmra.mrb[76].mxu1 %v21079_v59  ;;  %5202 = vmatmul.mubr.f32.gmra.mrb[72].mxu0 %v21073_v46  ;;  %v13660_v12 = vadd.f32 %v21272_v51, %v18471_v41  ;;  %v21273_v2 = vld [vmem:[#allocation14_spill] sm:$0xff] }
 0x2f8   : > { %v15435_v3 = vpop.eup %15434  ;;  %v11496_v21 = vadd.f32 1.0, %v15433_v6  ;;  %15454 = vpow2.f32 %v12774_v50  ;;  %v13659_v5 = vadd.f32 %v2504_v28, %v828_v8  ;;  %4184 = vmatprep.mubr.f32.mxu1 %v20889_v24  ;;  %5207 = vmatprep.mubr.f32.mxu0 %v20889_v24  ;;  %v13662_v11 = vadd.f32 %v21273_v2, %v18471_v41  ;;  %v18495_v2 = vpop.permute.xlu0 %390 }
 0x2f9   : > { %v15437_v29 = vpop.eup %15436  ;;  %12333 = vst [vmem:[%s18333_s17 + $0x240] sm:$0xff] %v15435_v3  ;;  %15456 = vrcp.f32 %v11495_v0  ;;  %v12783_v15 = vmul.f32 -1.442695, %v13657_v45  ;;  %21277 = vst [vmem:[#allocation144_spill] sm:$0xff] %v18495_v2 }
 0x2fa   : > { %v15439_v61 = vpop.eup %15438  ;;  %12334 = vst [vmem:[%s18333_s17 + $0x248] sm:$0xff] %v15437_v29  ;;  %15458 = vrcp.f32 %v11496_v21  ;;  %v2509_v50 = vpop.f32.mrb[32].mxu0  ;;  %v12784_v28 = vmul.f32 -1.442695, %v13659_v5  ;;  %v21275_v29 = vld [vmem:[#allocation6_spill] sm:$0xff] }
 0x2fb   : > { %v15441_v8 = vpop.eup %15440  ;;  %v11504_v6 = vadd.f32 1.0, %v15439_v61  ;;  %15460 = vpow2.f32 %v12775_v4  ;;  %v13661_v40 = vadd.f32 %v13660_v12, %v2509_v50  ;;  %v2511_v25 = vpop.f32.mrb[33].mxu0  ;;  %4186 = vmatmul.mubr.f32.gmra.mrb[78].mxu1 %v21082_v49  ;;  %5209 = vmatmul.mubr.f32.gmra.mrb[74].mxu0 %v21076_v34  ;;  %v13664_v4 = vadd.f32 %v21275_v29, %v18483_v37  ;;  %v21276_v12 = vld [vmem:[#allocation15_spill] sm:$0xff] }
 0x2fc   : > { %v15443_v0 = vpop.eup %15442  ;;  %v11505_v45 = vadd.f32 1.0, %v15441_v8  ;;  %15462 = vpow2.f32 %v12783_v15  ;;  %v13663_v3 = vadd.f32 %v13662_v11, %v2511_v25  ;;  %4191 = vmatprep.mubr.f32.mxu1 %v20889_v24  ;;  %5214 = vmatprep.mubr.f32.mxu0 %v20889_v24  ;;  %v13666_v61 = vadd.f32 %v21276_v12, %v18483_v37  ;;  %v18508_v12 = vpop.permute.xlu1 %395 }
 0x2fd   : > { %v15445_v21 = vpop.eup %15444  ;;  %12342 = vst [vmem:[%s18333_s17 + $0x288] sm:$0xff] %v15443_v0  ;;  %15464 = vrcp.f32 %v11504_v6  ;;  %v12792_v5 = vmul.f32 -1.442695, %v13661_v40  ;;  %21280 = vst [vmem:[#allocation145_spill] sm:$0xff] %v18508_v12 }
 0x2fe   : > { %v15447_v51 = vpop.eup %15446  ;;  %15466 = vrcp.f32 %v11505_v45  ;;  %v11513_v25 = vadd.f32 1.0, %v15445_v21  ;;  %v12793_v15 = vmul.f32 -1.442695, %v13663_v3  ;;  %v2516_v11 = vpop.f32.mrb[34].mxu0  ;;  %v21278_v45 = vld [vmem:[#allocation10_spill] sm:$0xff] }
 0x2ff   : > { %v15449_v50 = vpop.eup %15448  ;;  %12343 = vst [vmem:[%s18333_s17 + $0x290] sm:$0xff] %v15447_v51  ;;  %15468 = vpow2.f32 %v12784_v28  ;;  %v13665_v8 = vadd.f32 %v13664_v4, %v2516_v11  ;;  %v2518_v29 = vpop.f32.mrb[35].mxu0  ;;  %4193 = vmatmul.mubr.f32.gmra.mrb[80].mxu1 %v21085_v20  ;;  %5216 = vmatmul.mubr.f32.gmra.mrb[76].mxu0 %v21079_v59  ;;  %v13668_v3 = vadd.f32 %v21278_v45, %v18495_v2  ;;  %v21279_v4 = vld [vmem:[#allocation18_spill] sm:$0xff] }
 0x300   : > { %v15451_v40 = vpop.eup %15450  ;;  %12351 = vst [vmem:[%s18333_s17 + $0x2d0] sm:$0xff] %v15449_v50  ;;  %15470 = vrcp.f32 %v11513_v25  ;;  %v13667_v6 = vadd.f32 %v13666_v61, %v2518_v29  ;;  %4198 = vmatprep.mubr.f32.mxu1 %v20889_v24  ;;  %5221 = vmatprep.mubr.f32.mxu0 %v20889_v24  ;;  %v13670_v51 = vadd.f32 %v21279_v4, %v18495_v2  ;;  %v18520_v4 = vpop.permute.xlu0 %400 }
 0x301   : > { %v15453_v0 = vpop.eup %15452  ;;  %12352 = vst [vmem:[%s18333_s17 + $0x2d8] sm:$0xff] %v15451_v40  ;;  %15472 = vpow2.f32 %v12792_v5  ;;  %v12801_v28 = vmul.f32 -1.442695, %v13665_v8  ;;  %v21281_v40 = vld [vmem:[#allocation25_spill] sm:$0xff]  ;;  %21283 = vst [vmem:[#allocation146_spill] sm:$0xff] %v18520_v4 }
 0x302   : > { %v15455_v21 = vpop.eup %15454  ;;  %v11514_v25 = vadd.f32 1.0, %v15453_v0  ;;  %15474 = vpow2.f32 %v12793_v15  ;;  %v12802_v61 = vmul.f32 -1.442695, %v13667_v6  ;;  %v2523_v11 = vpop.f32.mrb[36].mxu0  ;;  %v13672_v6 = vadd.f32 %v21281_v40, %v18508_v12 }
 0x303   : > { %v15457_v50 = vpop.eup %15456  ;;  %v11522_v29 = vadd.f32 1.0, %v15455_v21  ;;  %15476 = vpow2.f32 %v12801_v28  ;;  %v13669_v37 = vadd.f32 %v13668_v3, %v2523_v11  ;;  %v2525_v45 = vpop.f32.mrb[37].mxu0  ;;  %4200 = vmatmul.mubr.f32.gmra.mrb[82].mxu1 %v21088_v30  ;;  %5223 = vmatmul.mubr.f32.gmra.mrb[78].mxu0 %v21082_v49  ;;  %v21282_v28 = vld [vmem:[#allocation29_spill] sm:$0xff] }
 0x304   : > { %v15459_v5 = vpop.eup %15458  ;;  %12360 = vst [vmem:[%s18333_s17 + $0x318] sm:$0xff] %v15457_v50  ;;  %15478 = vrcp.f32 %v11514_v25  ;;  %v13671_v8 = vadd.f32 %v13670_v51, %v2525_v45  ;;  %4205 = vmatprep.mubr.f32.mxu1 %v20889_v24  ;;  %5228 = vmatprep.mubr.f32.mxu0 %v20889_v24  ;;  %v13674_v21 = vadd.f32 %v21282_v28, %v18508_v12  ;;  %v18532_v28 = vpop.permute.xlu1 %405 }
 0x305   : > { %v15461_v15 = vpop.eup %15460  ;;  %12361 = vst [vmem:[%s18333_s17 + $0x320] sm:$0xff] %v15459_v5  ;;  %15480 = vrcp.f32 %v11522_v29  ;;  %v12810_v0 = vmul.f32 -1.442695, %v13669_v37  ;;  %v21284_v5 = vld [vmem:[#allocation33_spill] sm:$0xff]  ;;  %21286 = vst [vmem:[#allocation147_spill] sm:$0xff] %v18532_v28 }
 0x306   : > { %v15463_v3 = vpop.eup %15462  ;;  %v11523_v25 = vadd.f32 1.0, %v15461_v15  ;;  %15482 = vpow2.f32 %v12802_v61  ;;  %v12811_v51 = vmul.f32 -1.442695, %v13671_v8  ;;  %v2530_v11 = vpop.f32.mrb[38].mxu0  ;;  %v13676_v8 = vadd.f32 %v21284_v5, %v18520_v4 }
 0x307   : > { %v15465_v50 = vpop.eup %15464  ;;  %v11531_v45 = vadd.f32 1.0, %v15463_v3  ;;  %15484 = vpow2.f32 %v12810_v0  ;;  %v13673_v2 = vadd.f32 %v13672_v6, %v2530_v11  ;;  %v2532_v40 = vpop.f32.mrb[39].mxu0  ;;  %4207 = vmatmul.mubr.f32.gmra.mrb[84].mxu1 %v21091_v36  ;;  %5230 = vmatmul.mubr.f32.gmra.mrb[80].mxu0 %v21085_v20  ;;  %v21285_v0 = vld [vmem:[#allocation161_spill] sm:$0xff] }
 0x308   : > { %v15467_v37 = vpop.eup %15466  ;;  %12369 = vst [vmem:[%s18333_s17 + $0x360] sm:$0xff] %v15465_v50  ;;  %15486 = vrcp.f32 %v11523_v25  ;;  %v13675_v29 = vadd.f32 %v13674_v21, %v2532_v40  ;;  %4212 = vmatprep.mubr.f32.mxu1 %v20889_v24  ;;  %5235 = vmatprep.mubr.f32.mxu0 %v20889_v24  ;;  %v13678_v3 = vadd.f32 %v21285_v0, %v18520_v4 }
 0x309   : > { %v15469_v61 = vpop.eup %15468  ;;  %12370 = vst [vmem:[%s18333_s17 + $0x368] sm:$0xff] %v15467_v37  ;;  %15488 = vrcp.f32 %v11531_v45  ;;  %v12819_v15 = vmul.f32 -1.442695, %v13673_v2 }
 0x30a   : > { %v15471_v6 = vpop.eup %15470  ;;  %v11532_v25 = vadd.f32 1.0, %v15469_v61  ;;  %15490 = vpow2.f32 %v12811_v51  ;;  %v12820_v21 = vmul.f32 -1.442695, %v13675_v29  ;;  %v2537_v11 = vpop.f32.mrb[40].mxu0  ;;  %v21287_v29 = vld [vmem:[#allocation37_spill] sm:$0xff] }
 0x30b   : > { %v15473_v50 = vpop.eup %15472  ;;  %12378 = vst [vmem:[%s18333_s17 + $0x3a8] sm:$0xff] %v15471_v6  ;;  %15492 = vpow2.f32 %v12819_v15  ;;  %v13677_v40 = vadd.f32 %v13676_v8, %v2537_v11  ;;  %v2539_v12 = vpop.f32.mrb[41].mxu0  ;;  %4214 = vmatmul.mubr.f32.gmra.mrb[86].mxu1 %v21094_v32  ;;  %5237 = vmatmul.mubr.f32.gmra.mrb[82].mxu0 %v21088_v30  ;;  %v13680_v61 = vadd.f32 %v21287_v29, %v18532_v28  ;;  %v21288_v6 = vld [vmem:[#allocation162_spill] sm:$0xff] }
 0x30c   : > { %v15475_v2 = vpop.eup %15474  ;;  %15494 = vrcp.f32 %v11532_v25  ;;  %v11540_v45 = vadd.f32 1.0, %v15473_v50  ;;  %v13679_v37 = vadd.f32 %v13678_v3, %v2539_v12  ;;  %4219 = vmatprep.mubr.f32.mxu1 %v20889_v24  ;;  %5242 = vmatprep.mubr.f32.mxu0 %v20889_v24  ;;  %v13682_v0 = vadd.f32 %v21288_v6, %v18532_v28  ;;  %v18543_v25 = vpop.permute.xlu0 %410 }
 0x30d   : > { %v15477_v51 = vpop.eup %15476  ;;  %v11541_v5 = vadd.f32 1.0, %v15475_v2  ;;  %15496 = vpow2.f32 %v12820_v21  ;;  %v12828_v8 = vmul.f32 -1.442695, %v13677_v40  ;;  %21289 = vst [vmem:[#allocation148_spill] sm:$0xff] %v18543_v25  ;;  %v18555_v6 = vpop.permute.xlu1 %415 }
 0x30e   : > { %v15479_v15 = vpop.eup %15478  ;;  %15498 = vrcp.f32 %v11540_v45  ;;  %v11549_v12 = vadd.f32 1.0, %v15477_v51  ;;  %v12829_v3 = vmul.f32 -1.442695, %v13679_v37  ;;  %v2544_v11 = vpop.f32.mrb[42].mxu0  ;;  %v21290_v45 = vld [vmem:[#allocation38_spill] sm:$0xff]  ;;  %21292 = vst [vmem:[#allocation149_spill] sm:$0xff] %v18555_v6 }
 0x30f   : > { %v15481_v50 = vpop.eup %15480  ;;  %12379 = vst [vmem:[%s18333_s17 + $0x3b0] sm:$0xff] %v15479_v15  ;;  %15500 = vrcp.f32 %v11541_v5  ;;  %v13681_v4 = vadd.f32 %v13680_v61, %v2544_v11  ;;  %v2546_v41 = vpop.f32.mrb[43].mxu0  ;;  %4221 = vmatmul.mubr.f32.gmra.mrb[88].mxu1 %v21097_v19  ;;  %5244 = vmatmul.mubr.f32.gmra.mrb[84].mxu0 %v21091_v36  ;;  %v13684_v37 = vadd.f32 %v21290_v45, %v18543_v25  ;;  %v21291_v5 = vld [vmem:[#allocation163_spill] sm:$0xff] }
 0x310   : > { %v15483_v21 = vpop.eup %15482  ;;  %12387 = vst [vmem:[%s18333_s17 + $0x3f0] sm:$0xff] %v15481_v50  ;;  %15502 = vrcp.f32 %v11549_v12  ;;  %v13683_v40 = vadd.f32 %v13682_v0, %v2546_v41  ;;  %4226 = vmatprep.mubr.f32.mxu1 %v20889_v24  ;;  %5249 = vmatprep.mubr.f32.mxu0 %v20889_v24  ;;  %v13686_v15 = vadd.f32 %v21291_v5, %v18543_v25  ;;  %v18567_v5 = vpop.permute.xlu0 %420 }
 0x311   : > { %v15485_v2 = vpop.eup %15484  ;;  %v11550_v51 = vadd.f32 1.0, %v15483_v21  ;;  %15504 = vpow2.f32 %v12828_v8  ;;  %v12837_v29 = vmul.f32 -1.442695, %v13681_v4  ;;  %v21293_v21 = vld [vmem:[#allocation42_spill] sm:$0xff]  ;;  %21295 = vst [vmem:[#allocation123_spill] sm:$0xff] %v18567_v5 }
 0x312   : > { %v15487_v61 = vpop.eup %15486  ;;  %v11558_v41 = vadd.f32 1.0, %v15485_v2  ;;  %15506 = vpow2.f32 %v12829_v3  ;;  %v12838_v0 = vmul.f32 -1.442695, %v13683_v40  ;;  %v2551_v12 = vpop.f32.mrb[44].mxu0  ;;  %v13688_v40 = vadd.f32 %v21293_v21, %v18555_v6 }
 0x313   : > { %v15489_v11 = vpop.eup %15488  ;;  %12388 = vst [vmem:[%s18333_s17 + $0x3f8] sm:$0xff] %v15487_v61  ;;  %15508 = vrcp.f32 %v11550_v51  ;;  %v13685_v50 = vadd.f32 %v13684_v37, %v2551_v12  ;;  %v2553_v28 = vpop.f32.mrb[45].mxu0  ;;  %4228 = vmatmul.mubr.f32.gmra.mrb[90].mxu1 %v21100_v47  ;;  %5251 = vmatmul.mubr.f32.gmra.mrb[86].mxu0 %v21094_v32  ;;  %v21294_v51 = vld [vmem:[#allocation164_spill] sm:$0xff] }
 0x314   : > { %v15491_v4 = vpop.eup %15490  ;;  %12396 = vst [vmem:[%s18333_s17 + $0x438] sm:$0xff] %v15489_v11  ;;  %15510 = vrcp.f32 %v11558_v41  ;;  %v13687_v8 = vadd.f32 %v13686_v15, %v2553_v28  ;;  %4233 = vmatprep.mubr.f32.mxu1 %v20889_v24  ;;  %5256 = vmatprep.mubr.f32.mxu0 %v20889_v24  ;;  %v13690_v61 = vadd.f32 %v21294_v51, %v18555_v6  ;;  %v18579_v51 = vpop.permute.xlu1 %425 }
 0x315   : > { %v15493_v3 = vpop.eup %15492  ;;  %v11559_v2 = vadd.f32 1.0, %v15491_v4  ;;  %15512 = vpow2.f32 %v12837_v29  ;;  %v12846_v45 = vmul.f32 -1.442695, %v13685_v50  ;;  %21298 = vst [vmem:[#allocation150_spill] sm:$0xff] %v18579_v51 }
 0x316   : > { %v15495_v37 = vpop.eup %15494  ;;  %v11567_v41 = vadd.f32 1.0, %v15493_v3  ;;  %15514 = vpow2.f32 %v12838_v0  ;;  %v2558_v28 = vpop.f32.mrb[46].mxu0  ;;  %v12847_v12 = vmul.f32 -1.442695, %v13687_v8  ;;  %v21296_v3 = vld [vmem:[#allocation47_spill] sm:$0xff] }
 0x317   : > { %v15497_v15 = vpop.eup %15496  ;;  %12397 = vst [vmem:[%s18333_s17 + $0x440] sm:$0xff] %v15495_v37  ;;  %15516 = vrcp.f32 %v11559_v2  ;;  %v13689_v11 = vadd.f32 %v13688_v40, %v2558_v28  ;;  %v2560_v25 = vpop.f32.mrb[47].mxu0  ;;  %4235 = vmatmul.mubr.f32.gmra.mrb[92].mxu1 %v21103_v31  ;;  %5258 = vmatmul.mubr.f32.gmra.mrb[88].mxu0 %v21097_v19  ;;  %v13692_v8 = vadd.f32 %v21296_v3, %v18567_v5  ;;  %v21297_v2 = vld [vmem:[#allocation165_spill] sm:$0xff] }
 0x318   : > { %v15499_v29 = vpop.eup %15498  ;;  %15518 = vrcp.f32 %v11567_v41  ;;  %v11568_v50 = vadd.f32 1.0, %v15497_v15  ;;  %v13691_v4 = vadd.f32 %v13690_v61, %v2560_v25  ;;  %4240 = vmatprep.mubr.f32.mxu1 %v20889_v24  ;;  %5263 = vmatprep.mubr.f32.mxu0 %v20889_v24  ;;  %v13694_v37 = vadd.f32 %v21297_v2, %v18567_v5 }
 0x319   : > { %v15501_v0 = vpop.eup %15500  ;;  %12405 = vst [vmem:[%s18333_s17 + $0x480] sm:$0xff] %v15499_v29  ;;  %15520 = vpow2.f32 %v12846_v45  ;;  %v12855_v21 = vmul.f32 -1.442695, %v13689_v11 }
 0x31a   : > { %v15503_v40 = vpop.eup %15502  ;;  %12406 = vst [vmem:[%s18333_s17 + $0x488] sm:$0xff] %v15501_v0  ;;  %15522 = vrcp.f32 %v11568_v50  ;;  %v12856_v25 = vmul.f32 -1.442695, %v13691_v4  ;;  %v2565_v61 = vpop.f32.mrb[48].mxu0  ;;  %v21299_v4 = vld [vmem:[#allocation52_spill] sm:$0xff] }
 0x31b   : > { %v15505_v41 = vpop.eup %15504  ;;  %12414 = vst [vmem:[%s18333_s17 + $0x4c8] sm:$0xff] %v15503_v40  ;;  %15524 = vpow2.f32 %v12847_v12  ;;  %v13693_v28 = vadd.f32 %v13692_v8, %v2565_v61  ;;  %v2567_v15 = vpop.f32.mrb[49].mxu0  ;;  %4242 = vmatmul.mubr.f32.gmra.mrb[94].mxu1 %v21106_v18  ;;  %5265 = vmatmul.mubr.f32.gmra.mrb[90].mxu0 %v21100_v47  ;;  %v13696_v12 = vadd.f32 %v21299_v4, %v18579_v51  ;;  %v21300_v40 = vld [vmem:[#allocation166_spill] sm:$0xff] }
 0x31c   : > { %v15507_v45 = vpop.eup %15506  ;;  %v11576_v11 = vadd.f32 1.0, %v15505_v41  ;;  %15526 = vpow2.f32 %v12855_v21  ;;  %v13695_v29 = vadd.f32 %v13694_v37, %v2567_v15  ;;  %4247 = vmatprep.mubr.f32.mxu1 %v20889_v24  ;;  %5270 = vmatprep.mubr.f32.mxu0 %v20889_v24  ;;  %v13698_v2 = vadd.f32 %v21300_v40, %v18579_v51  ;;  %v18591_v61 = vpop.permute.xlu0 %430 }
 0x31d   : > { %v15509_v50 = vpop.eup %15508  ;;  %v11577_v0 = vadd.f32 1.0, %v15507_v45  ;;  %15528 = vpow2.f32 %v12856_v25  ;;  %v12864_v3 = vmul.f32 -1.442695, %v13693_v28  ;;  %21301 = vst [vmem:[#allocation124_spill] sm:$0xff] %v18591_v61 }
 0x31e   : > { %v15511_v8 = vpop.eup %15510  ;;  %12415 = vst [vmem:[%s18333_s17 + $0x4d0] sm:$0xff] %v15509_v50  ;;  %15530 = vrcp.f32 %v11576_v11  ;;  %v12865_v21 = vmul.f32 -1.442695, %v13695_v29  ;;  %v2572_v37 = vpop.f32.mrb[50].mxu0  ;;  %v21302_v29 = vld [vmem:[#allocation56_spill] sm:$0xff] }
 0x31f   : > { %v15513_v41 = vpop.eup %15512  ;;  %12423 = vst [vmem:[%s18333_s17 + $0x510] sm:$0xff] %v15511_v8  ;;  %15532 = vrcp.f32 %v11577_v0  ;;  %v13697_v15 = vadd.f32 %v13696_v12, %v2572_v37  ;;  %v2574_v5 = vpop.f32.mrb[51].mxu0  ;;  %4249 = vmatmul.mubr.f32.gmra.mrb[96].mxu1 %v17000_v26  ;;  %5272 = vmatmul.mubr.f32.gmra.mrb[92].mxu0 %v21103_v31  ;;  %v13700_v50 = vadd.f32 %v21302_v29, %v18591_v61  ;;  %v21303_v8 = vld [vmem:[#allocation167_spill] sm:$0xff] }
 0x320   : > { %v15515_v25 = vpop.eup %15514  ;;  %v11585_v28 = vadd.f32 1.0, %v15513_v41  ;;  %15534 = vpow2.f32 %v12864_v3  ;;  %v13699_v45 = vadd.f32 %v13698_v2, %v2574_v5  ;;  %4254 = vmatprep.mubr.f32.mxu1 %v20889_v24  ;;  %5277 = vmatprep.mubr.f32.mxu0 %v20889_v24  ;;  %v13702_v40 = vadd.f32 %v21303_v8, %v18591_v61  ;;  %v18603_v37 = vpop.permute.xlu1 %435 }
 0x321   : > { %v15517_v11 = vpop.eup %15516  ;;  %v11586_v4 = vadd.f32 1.0, %v15515_v25  ;;  %15536 = vpow2.f32 %v12865_v21  ;;  %v12873_v12 = vmul.f32 -1.442695, %v13697_v15  ;;  %21304 = vst [vmem:[#allocation151_spill] sm:$0xff] %v18603_v37  ;;  %v18616_v8 = vpop.permute.xlu0 %440 }
 0x322   : > { %v15519_v0 = vpop.eup %15518  ;;  %12424 = vst [vmem:[%s18333_s17 + $0x518] sm:$0xff] %v15517_v11  ;;  %15538 = vrcp.f32 %v11585_v28  ;;  %v12874_v5 = vmul.f32 -1.442695, %v13699_v45  ;;  %v2579_v3 = vpop.f32.mrb[52].mxu0  ;;  %v21305_v45 = vld [vmem:[#allocation168_spill] sm:$0xff]  ;;  %21307 = vst [vmem:[#allocation152_spill] sm:$0xff] %v18616_v8 }
 0x323   : > { %v15521_v2 = vpop.eup %15520  ;;  %12432 = vst [vmem:[%s18333_s17 + $0x558] sm:$0xff] %v15519_v0  ;;  %15540 = vrcp.f32 %v11586_v4  ;;  %v13701_v41 = vadd.f32 %v13700_v50, %v2579_v3  ;;  %v2581_v51 = vpop.f32.mrb[53].mxu0  ;;  %4256 = vmatmul.mubr.f32.gmra.mrb[98].mxu1 %v17008_v35  ;;  %5279 = vmatmul.mubr.f32.gmra.mrb[94].mxu0 %v21106_v18  ;;  %v13704_v11 = vadd.f32 %v21305_v45, %v18603_v37  ;;  %v21306_v4 = vld [vmem:[#allocation169_spill] sm:$0xff] }
 0x324   : > { %v15523_v21 = vpop.eup %15522  ;;  %v11594_v15 = vadd.f32 1.0, %v15521_v2  ;;  %15542 = vpow2.f32 %v12873_v12  ;;  %v13703_v25 = vadd.f32 %v13702_v40, %v2581_v51  ;;  %4261 = vmatprep.mubr.f32.mxu1 %v20889_v24  ;;  %5284 = vmatprep.mubr.f32.mxu0 %v20889_v24  ;;  %v13706_v0 = vadd.f32 %v21306_v4, %v18603_v37  ;;  %v18627_v4 = vpop.permute.xlu1 %445 }
 0x325   : > { %v15525_v28 = vpop.eup %15524  ;;  %12433 = vst [vmem:[%s18333_s17 + $0x560] sm:$0xff] %v15523_v21  ;;  %15544 = vpow2.f32 %v12874_v5  ;;  %v12882_v29 = vmul.f32 -1.442695, %v13701_v41  ;;  %21310 = vst [vmem:[#allocation153_spill] sm:$0xff] %v18627_v4 }
 0x326   : > { %v15527_v50 = vpop.eup %15526  ;;  %15546 = vrcp.f32 %v11594_v15  ;;  %v11595_v12 = vadd.f32 1.0, %v15525_v28  ;;  %v2586_v51 = vpop.f32.mrb[54].mxu0  ;;  %v12883_v2 = vmul.f32 -1.442695, %v13703_v25  ;;  %v21308_v28 = vld [vmem:[#allocation170_spill] sm:$0xff] }
 0x327   : > { %v15529_v40 = vpop.eup %15528  ;;  %v11603_v3 = vadd.f32 1.0, %v15527_v50  ;;  %15548 = vpow2.f32 %v12882_v29  ;;  %v13705_v61 = vadd.f32 %v13704_v11, %v2586_v51  ;;  %v2588_v6 = vpop.f32.mrb[55].mxu0  ;;  %4263 = vmatmul.mubr.f32.gmra.mrb[100].mxu1 %v17028_v7  ;;  %5286 = vmatmul.mubr.f32.gmra.mrb[96].mxu0 %v17000_v26  ;;  %v13708_v45 = vadd.f32 %v21308_v28, %v18616_v8  ;;  %v21309_v29 = vld [vmem:[#allocation171_spill] sm:$0xff] }
 0x328   : > { %v15531_v5 = vpop.eup %15530  ;;  %15550 = vrcp.f32 %v11595_v12  ;;  %v11604_v41 = vadd.f32 1.0, %v15529_v40  ;;  %v13707_v21 = vadd.f32 %v13706_v0, %v2588_v6  ;;  %4268 = vmatprep.mubr.f32.mxu1 %v20889_v24  ;;  %5291 = vmatprep.mubr.f32.mxu0 %v20889_v24  ;;  %v13710_v50 = vadd.f32 %v21309_v29, %v18616_v8  ;;  %v18639_v29 = vpop.permute.xlu0 %450 }
 0x329   : > { %v15533_v15 = vpop.eup %15532  ;;  %12441 = vst [vmem:[%s18333_s17 + $0x5a0] sm:$0xff] %v15531_v5  ;;  %15552 = vrcp.f32 %v11603_v3  ;;  %v12891_v25 = vmul.f32 -1.442695, %v13705_v61  ;;  %21313 = vst [vmem:[#allocation154_spill] sm:$0xff] %v18639_v29 }
 0x32a   : > { %v15535_v11 = vpop.eup %15534  ;;  %12442 = vst [vmem:[%s18333_s17 + $0x5a8] sm:$0xff] %v15533_v15  ;;  %15554 = vrcp.f32 %v11604_v41  ;;  %v2593_v6 = vpop.f32.mrb[56].mxu0  ;;  %v12892_v51 = vmul.f32 -1.442695, %v13707_v21  ;;  %v21311_v15 = vld [vmem:[#allocation172_spill] sm:$0xff] }
 0x32b   : > { %v15537_v0 = vpop.eup %15536  ;;  %v11612_v12 = vadd.f32 1.0, %v15535_v11  ;;  %15556 = vpow2.f32 %v12883_v2  ;;  %v13709_v40 = vadd.f32 %v13708_v45, %v2593_v6  ;;  %v2595_v37 = vpop.f32.mrb[57].mxu0  ;;  %4270 = vmatmul.mubr.f32.gmra.mrb[102].mxu1 %v17048_v33  ;;  %5293 = vmatmul.mubr.f32.gmra.mrb[98].mxu0 %v17008_v35  ;;  %v13712_v2 = vadd.f32 %v21311_v15, %v18627_v4  ;;  %v21312_v45 = vld [vmem:[#allocation173_spill] sm:$0xff] }
 0x32c   : > { %v15539_v61 = vpop.eup %15538  ;;  %v11613_v3 = vadd.f32 1.0, %v15537_v0  ;;  %15558 = vpow2.f32 %v12891_v25  ;;  %v13711_v5 = vadd.f32 %v13710_v50, %v2595_v37  ;;  %4275 = vmatprep.mubr.f32.mxu1 %v20889_v24  ;;  %5298 = vmatprep.mubr.f32.mxu0 %v20889_v24  ;;  %v13714_v11 = vadd.f32 %v21312_v45, %v18627_v4  ;;  %v18651_v45 = vpop.permute.xlu1 %455 }
 0x32d   : > { %v15541_v41 = vpop.eup %15540  ;;  %12450 = vst [vmem:[%s18333_s17 + $0x5e8] sm:$0xff] %v15539_v61  ;;  %15560 = vrcp.f32 %v11612_v12  ;;  %v12900_v21 = vmul.f32 -1.442695, %v13709_v40  ;;  %21316 = vst [vmem:[#allocation155_spill] sm:$0xff] %v18651_v45 }
 0x32e   : > { %v15543_v28 = vpop.eup %15542  ;;  %12451 = vst [vmem:[%s18333_s17 + $0x5f0] sm:$0xff] %v15541_v41  ;;  %15562 = vrcp.f32 %v11613_v3  ;;  %v2600_v37 = vpop.f32.mrb[58].mxu0  ;;  %v12901_v6 = vmul.f32 -1.442695, %v13711_v5  ;;  %v21314_v41 = vld [vmem:[#allocation174_spill] sm:$0xff] }
 0x32f   : > { %v15545_v25 = vpop.eup %15544  ;;  %v11621_v50 = vadd.f32 1.0, %v15543_v28  ;;  %15564 = vpow2.f32 %v12892_v51  ;;  %v13713_v0 = vadd.f32 %v13712_v2, %v2600_v37  ;;  %v2602_v8 = vpop.f32.mrb[59].mxu0  ;;  %4277 = vmatmul.mubr.f32.gmra.mrb[104].mxu1 %v17081_v57  ;;  %5300 = vmatmul.mubr.f32.gmra.mrb[100].mxu0 %v17028_v7  ;;  %v13716_v51 = vadd.f32 %v21314_v41, %v18639_v29  ;;  %v21315_v2 = vld [vmem:[#allocation175_spill] sm:$0xff] }
 0x330   : > { %v15547_v12 = vpop.eup %15546  ;;  %v11622_v40 = vadd.f32 1.0, %v15545_v25  ;;  %15566 = vpow2.f32 %v12900_v21  ;;  %v13715_v61 = vadd.f32 %v13714_v11, %v2602_v8  ;;  %4282 = vmatprep.mubr.f32.mxu1 %v20889_v24  ;;  %5305 = vmatprep.mubr.f32.mxu0 %v20889_v24  ;;  %v13718_v28 = vadd.f32 %v21315_v2, %v18639_v29 }
 0x331   : > { %v15549_v3 = vpop.eup %15548  ;;  %12459 = vst [vmem:[%s18333_s17 + $0x630] sm:$0xff] %v15547_v12  ;;  %15568 = vrcp.f32 %v11621_v50  ;;  %v12909_v5 = vmul.f32 -1.442695, %v13713_v0 }
 0x332   : > { %v15551_v15 = vpop.eup %15550  ;;  %15570 = vrcp.f32 %v11622_v40  ;;  %v11630_v8 = vadd.f32 1.0, %v15549_v3  ;;  %v12910_v21 = vmul.f32 -1.442695, %v13715_v61  ;;  %v2607_v11 = vpop.f32.mrb[60].mxu0  ;;  %v21317_v40 = vld [vmem:[#allocation176_spill] sm:$0xff] }
 0x333   : > { %v15553_v37 = vpop.eup %15552  ;;  %12460 = vst [vmem:[%s18333_s17 + $0x638] sm:$0xff] %v15551_v15  ;;  %15572 = vpow2.f32 %v12901_v6  ;;  %v13717_v25 = vadd.f32 %v13716_v51, %v2607_v11  ;;  %v2609_v41 = vpop.f32.mrb[61].mxu0  ;;  %4284 = vmatmul.mubr.f32.gmra.mrb[106].mxu1 %v17088_v27  ;;  %5307 = vmatmul.mubr.f32.gmra.mrb[102].mxu0 %v17048_v33  ;;  %v13720_v61 = vadd.f32 %v21317_v40, %v18651_v45  ;;  %v21318_v51 = vld [vmem:[#allocation177_spill] sm:$0xff] }
 0x334   : > { %v15555_v50 = vpop.eup %15554  ;;  %12468 = vst [vmem:[%s18333_s17 + $0x678] sm:$0xff] %v15553_v37  ;;  %15574 = vrcp.f32 %v11630_v8  ;;  %v13719_v0 = vadd.f32 %v13718_v28, %v2609_v41  ;;  %4289 = vmatprep.mubr.f32.mxu1 %v20889_v24  ;;  %5312 = vmatprep.mubr.f32.mxu0 %v20889_v24  ;;  %v13722_v15 = vadd.f32 %v21318_v51, %v18651_v45 }
 0x335   : > { %v15557_v12 = vpop.eup %15556  ;;  %12469 = vst [vmem:[%s18333_s17 + $0x680] sm:$0xff] %v15555_v50  ;;  %15576 = vpow2.f32 %v12909_v5  ;;  %v12918_v6 = vmul.f32 -1.442695, %v13717_v25 }
 0x336   : > { %v15559_v3 = vpop.eup %15558  ;;  %v11631_v2 = vadd.f32 1.0, %v15557_v12  ;;  %15578 = vpow2.f32 %v12910_v21  ;;  %v12919_v8 = vmul.f32 -1.442695, %v13719_v0  ;;  %v2614_v28 = vpop.f32.mrb[62].mxu0 }
 0x337   : > { %v15561_v11 = vpop.eup %15560  ;;  %v11639_v37 = vadd.f32 1.0, %v15559_v3  ;;  %15580 = vpow2.f32 %v12918_v6  ;;  %v13721_v41 = vadd.f32 %v13720_v61, %v2614_v28  ;;  %v2616_v29 = vpop.f32.mrb[63].mxu0  ;;  %4291 = vmatmul.mubr.f32.gmra.mrb[108].mxu1 %v17120_v16  ;;  %5314 = vmatmul.mubr.f32.gmra.mrb[104].mxu0 %v17081_v57 }
 0x338   : > { %v15563_v5 = vpop.eup %15562  ;;  %12477 = vst [vmem:[%s18333_s17 + $0x6c0] sm:$0xff] %v15561_v11  ;;  %15582 = vrcp.f32 %v11631_v2  ;;  %v13723_v25 = vadd.f32 %v13722_v15, %v2616_v29  ;;  %4296 = vmatprep.mubr.f32.mxu1 %v20889_v24  ;;  %5319 = vmatprep.mubr.f32.mxu0 %v20889_v24 }
 0x339   : > { %v15565_v21 = vpop.eup %15564  ;;  %12478 = vst [vmem:[%s18333_s17 + $0x6c8] sm:$0xff] %v15563_v5  ;;  %15584 = vrcp.f32 %v11639_v37  ;;  %v12927_v50 = vmul.f32 -1.442695, %v13721_v41 }
 0x33a   : > { %v15567_v0 = vpop.eup %15566  ;;  %v11640_v12 = vadd.f32 1.0, %v15565_v21  ;;  %15586 = vpow2.f32 %v12919_v8  ;;  %v12928_v40 = vmul.f32 -1.442695, %v13723_v25 }
 0x33b   : > { %v15569_v61 = vpop.eup %15568  ;;  %v11648_v6 = vadd.f32 1.0, %v15567_v0  ;;  %15588 = vpow2.f32 %v12927_v50  ;;  %4298 = vmatmul.mubr.f32.gmra.mrb[110].mxu1 %v17140_v60  ;;  %5321 = vmatmul.mubr.f32.gmra.mrb[106].mxu0 %v17088_v27 }
 0x33c   : > { %v15571_v29 = vpop.eup %15570  ;;  %12486 = vst [vmem:[%s18333_s17 + $0x708] sm:$0xff] %v15569_v61  ;;  %15590 = vrcp.f32 %v11640_v12  ;;  %4303 = vmatprep.mubr.f32.mxu1 %v20889_v24  ;;  %5326 = vmatprep.mubr.f32.mxu0 %v20889_v24 }
 0x33d   : > { %v15573_v3 = vpop.eup %15572  ;;  %12487 = vst [vmem:[%s18333_s17 + $0x710] sm:$0xff] %v15571_v29  ;;  %15592 = vrcp.f32 %v11648_v6 }
 0x33e   : > { %v15575_v51 = vpop.eup %15574  ;;  %v11649_v15 = vadd.f32 1.0, %v15573_v3  ;;  %15594 = vpow2.f32 %v12928_v40 }
 0x33f   : > { %v15577_v2 = vpop.eup %15576  ;;  %12495 = vst [vmem:[%s18333_s17 + $0x750] sm:$0xff] %v15575_v51  ;;  %4305 = vmatmul.mubr.f32.gmra.mrb[112].mxu1 %v17167_v1  ;;  %5328 = vmatmul.mubr.f32.gmra.mrb[108].mxu0 %v17120_v16 }
 0x340   : > { %v15579_v8 = vpop.eup %15578  ;;  %15596 = vrcp.f32 %v11649_v15  ;;  %v11657_v28 = vadd.f32 1.0, %v15577_v2  ;;  %4310 = vmatprep.mubr.f32.mxu1 %v20889_v24  ;;  %5333 = vmatprep.mubr.f32.mxu0 %v20889_v24 }
 0x341   : > { %v15581_v11 = vpop.eup %15580  ;;  %v11658_v37 = vadd.f32 1.0, %v15579_v8 }
 0x342   : > { %v15583_v41 = vpop.eup %15582  ;;  %15598 = vrcp.f32 %v11657_v28  ;;  %v11666_v5 = vadd.f32 1.0, %v15581_v11 }
 0x343   : > { %v15585_v25 = vpop.eup %15584  ;;  %12496 = vst [vmem:[%s18333_s17 + $0x758] sm:$0xff] %v15583_v41  ;;  %15600 = vrcp.f32 %v11658_v37  ;;  %4312 = vmatmul.mubr.f32.gmra.mrb[114].mxu1 %v17175_v39  ;;  %5335 = vmatmul.mubr.f32.gmra.mrb[110].mxu0 %v17140_v60  ;;  %v264_v37 = vld [vmem:[%s16617_s4 + $0xc8] sm:$0x3] }
 0x344   : > { %v15587_v21 = vpop.eup %15586  ;;  %12504 = vst [vmem:[%s18333_s17 + $0x798] sm:$0xff] %v15585_v25  ;;  %15602 = vrcp.f32 %v11666_v5  ;;  %4317 = vmatprep.mubr.f32.mxu1 %v20889_v24  ;;  %5340 = vmatprep.mubr.f32.mxu0 %v20889_v24  ;;  %v18720_v41 = vsel %vm555_vm1, %v264_v37, 0  ;;  %v263_v5 = vld [vmem:[%s16617_s4 + $0xc0] sm:$0x3]  ;;  %v21319_v25 = vand.u32 4294901760, %v18411_v44  ;;  %v21328_v37 = vld [vmem:[#allocation19_spill] sm:$0xff] }
 0x345   : > { %v15589_v50 = vpop.eup %15588  ;;  %v11667_v0 = vadd.f32 1.0, %v15587_v21  ;;  %v21320_v21 = vand.u32 4294901760, %v18416_v13  ;;  %v21322_v13 = vld [vmem:[#allocation5_spill] sm:$0xff] }
 0x346   : > { %v15591_v12 = vpop.eup %15590  ;;  %v11675_v40 = vadd.f32 1.0, %v15589_v50 }
 0x347   : > { %v15593_v61 = vpop.eup %15592  ;;  %12505 = vst [vmem:[%s18333_s17 + $0x7a0] sm:$0xff] %v15591_v12  ;;  %15604 = vrcp.f32 %v11667_v0  ;;  %4319 = vmatmul.mubr.f32.gmra.mrb[116].mxu1 %v17211_v54  ;;  %5342 = vmatmul.mubr.f32.gmra.mrb[112].mxu0 %v17167_v1  ;;  %v18729_v50 = vpack.c.bf16 %v21320_v21, %v21319_v25  ;;  %v18732_v0 = vand.u32 4294901760, %v18720_v41  ;;  %v18735_v12 = vsel %vm555_vm1, %v263_v5, 0  ;;  %v21329_v5 = vld [vmem:[#allocation22_spill] sm:$0xff]  ;;  %v21330_v25 = vld [vmem:[#allocation28_spill] sm:$0xff] }
 0x348   : > { %v15595_v6 = vpop.eup %15594  ;;  %12513 = vst [vmem:[%s18333_s17 + $0x7e0] sm:$0xff] %v15593_v61  ;;  %15606 = vrcp.f32 %v11675_v40  ;;  %4324 = vmatprep.mubr.f32.mxu1 %v20889_v24  ;;  %5347 = vmatprep.mubr.f32.mxu0 %v20889_v24  ;;  %v18743_v44 = vand.u32 4294901760, %v18735_v12  ;;  %v20766_v40 = vand.u32 4294901760, %v18419_v43  ;;  %v20765_v61 = vand.u32 4294901760, %v18427_v23  ;;  %v21331_v21 = vld [vmem:[#allocation32_spill] sm:$0xff] }
 0x349   : > { %v11676_v29 = vadd.f32 1.0, %v15595_v6 }
 0x34a   : > { %v15597_v3 = vpop.eup %15596  ;;  %21321 = vst [vmem:[#allocation156_spill] sm:$0xff] %v18743_v44  ;;  %v7117_v6 = vsub.f32 %v18419_v43, %v20766_v40  ;;  %v21341_v40 = vld [vmem:[#allocation72_spill] sm:$0xff] }
 0x34b   : > { %12514 = vst [vmem:[%s18333_s17 + $0x7e8] sm:$0xff] %v15597_v3  ;;  %15608 = vrcp.f32 %v11676_v29  ;;  %4326 = vmatmul.mubr.f32.gmra.mrb[118].mxu1 %v17221_v9  ;;  %5349 = vmatmul.mubr.f32.gmra.mrb[114].mxu0 %v17175_v39  ;;  %v7129_v29 = vsub.f32 %v18427_v23, %v20765_v61  ;;  %v21323_v3 = vand.u32 4294901760, %v17770_v17  ;;  %v21326_v17 = vld [vmem:[#allocation9_spill] sm:$0xff] }
 0x34c   : > { %v15599_v51 = vpop.eup %15598  ;;  %4331 = vmatprep.mubr.f32.mxu1 %v20889_v24  ;;  %5354 = vmatprep.mubr.f32.mxu0 %v20889_v24  ;;  %v21340_v61 = vld [vmem:[#allocation69_spill] sm:$0xff] }
 0x34d   : > { %v15601_v15 = vpop.eup %15600  ;;  %12522 = vst [vmem:[%s18333_s17 + $0x828] sm:$0xff] %v15599_v51  ;;  %v21324_v51 = vand.u32 4294901760, %v17772_v53  ;;  %v21327_v53 = vld [vmem:[#allocation11_spill] sm:$0xff] }
 0x34e   : > { %v15603_v2 = vpop.eup %15602  ;;  %12523 = vst [vmem:[%s18333_s17 + $0x830] sm:$0xff] %v15601_v15 }
 0x34f   : > { %12531 = vst [vmem:[%s18333_s17 + $0x870] sm:$0xff] %v15603_v2  ;;  %4333 = vmatmul.mubr.f32.gmra.mrb[120].mxu1 %v17257_v63  ;;  %5356 = vmatmul.mubr.f32.gmra.mrb[116].mxu0 %v17211_v54  ;;  %v13536_v15 = vpack.c.bf16 %v21324_v51, %v21323_v3  ;;  %v21325_v2 = vld [vmem:[#allocation7_spill] sm:$0xff]  ;;  %v21334_v3 = vld [vmem:[#allocation45_spill] sm:$0xff]  ;;  %v21335_v51 = vld [vmem:[#allocation46_spill] sm:$0xff] }
 0x350   : > { %4338 = vmatprep.mubr.f32.mxu1 %v20889_v24  ;;  %5361 = vmatprep.mubr.f32.mxu0 %v20889_v24 }
 0x351   : > { %v15605_v8 = vpop.eup %15604 }
 0x352   : > { %v15607_v28 = vpop.eup %15606  ;;  %12532 = vst [vmem:[%s18333_s17 + $0x878] sm:$0xff] %v15605_v8  ;;  %v7118_v8 = vand.u32 4294901760, %v7117_v6  ;;  %v21332_v6 = vld [vmem:[#allocation36_spill] sm:$0xff] }
 0x353   : > { %12540 = vst [vmem:[%s18333_s17 + $0x8b8] sm:$0xff] %v15607_v28  ;;  %4340 = vmatmul.mubr.f32.gmra.mrb[122].mxu1 %v21138_v55  ;;  %5363 = vmatmul.mubr.f32.gmra.mrb[118].mxu0 %v17221_v9  ;;  %v7130_v28 = vand.u32 4294901760, %v7129_v29  ;;  %v21333_v29 = vld [vmem:[#allocation41_spill] sm:$0xff] }
 0x354   : > { %4345 = vmatprep.mubr.f32.mxu1 %v20889_v24  ;;  %5368 = vmatprep.mubr.f32.mxu0 %v20889_v24 }
 0x355   : > { %v15609_v11 = vpop.eup %15608 }
 0x356   : > { %12541 = vst [vmem:[%s18333_s17 + $0x8c0] sm:$0xff] %v15609_v11  ;;  %v13548_v11 = vpack.c.bf16 %v7130_v28, %v7118_v8  ;;  %v21337_v8 = vld [vmem:[#allocation55_spill] sm:$0xff]  ;;  %v21338_v28 = vld [vmem:[#allocation60_spill] sm:$0xff] }
 0x357   : > { %4347 = vmatmul.mubr.f32.gmra.mrb[124].mxu1 %v21145_v10  ;;  %5370 = vmatmul.mubr.f32.gmra.mrb[120].mxu0 %v17257_v63 }
 0x358   : > { %4352 = vmatprep.mubr.f32.mxu1 %v20889_v24  ;;  %5375 = vmatprep.mubr.f32.mxu0 %v20889_v24 }
 0x35b   : > { %4354 = vmatmul.mubr.f32.gmra.mrb[126].mxu1 %v21149_v58  ;;  %5377 = vmatmul.mubr.f32.gmra.mrb[122].mxu0 %v21138_v55 }
 0x35c   : > { %4430 = vmatprep.mubr.f32.mxu1 %v20889_v24  ;;  %5382 = vmatprep.mubr.f32.mxu0 %v20889_v24 }
 0x35f   : > { %4432 = vmatmul.mubr.f32.vlgmr.msra.gmra.mrb[64].mxu1 %v21061_v52  ;;  %5384 = vmatmul.mubr.f32.gmra.mrb[124].mxu0 %v21145_v10 }
 0x360   : > { %4437 = vmatprep.mubr.f32.mxu1 %v20889_v24  ;;  %5389 = vmatprep.mubr.f32.mxu0 %v20889_v24 }
 0x361   : > { %13547 = vmatpush1.bf16.msra.mxu1 %v18729_v50 }
 0x362   : > { %6700 = vmatprep.subr.mxu1 %v18732_v0 }
 0x363   : > { %4439 = vmatmul.mubr.f32.gmra.mrb[66].mxu1 %v21063_v38  ;;  %5391 = vmatmul.mubr.f32.gmra.mrb[126].mxu0 %v21149_v58 }
 0x364   : > { %4444 = vmatprep.mubr.f32.mxu1 %v20889_v24  ;;  %5473 = vmatprep.mubr.f32.mxu0 %v20889_v24 }
 0x365   : > { %6702 = vmatpush1.msra.mxu1 %v18743_v44 }
 0x366   : > { %13549 = vmatprep.subr.bf16.mxu1 %v13548_v11  ;;  %v21339_v11 = vld [vmem:[#allocation65_spill] sm:$0xff] }
 0x367   : > { %4446 = vmatmul.mubr.f32.gmra.mrb[68].mxu1 %v21065_v48  ;;  %5476 = vmatmul.mubr.f32.vlgmr.msra.gmra.mrb[64].mxu0 %v21322_v13 }
 0x368   : > { %13535 = vmatpush1.bf16.msra.mxu0 %v17985_v22  ;;  %4451 = vmatprep.mubr.f32.mxu1 %v20889_v24 }
 0x369   : > { %5481 = vmatprep.mubr.f32.mxu0 %v20889_v24  ;;  %5739 = vmatprep.subr.mxu0 %v17988_v62 }
 0x36b   : > { %4453 = vmatmul.mubr.f32.gmra.mrb[70].mxu1 %v21070_v56  ;;  %5484 = vmatmul.mubr.f32.gmra.mrb[66].mxu0 %v21325_v2 }
 0x36c   : > { %4458 = vmatprep.mubr.f32.mxu1 %v20889_v24  ;;  %5489 = vmatprep.mubr.f32.mxu0 %v20889_v24 }
 0x36d   : > { %5741 = vmatpush1.msra.mxu0 %v18007_v14 }
 0x36e   : > { %13537 = vmatprep.subr.bf16.mxu0 %v13536_v15  ;;  %v21336_v15 = vld [vmem:[#allocation51_spill] sm:$0xff] }
 0x36f   : > { %4460 = vmatmul.mubr.f32.gmra.mrb[72].mxu1 %v21073_v46  ;;  %5492 = vmatmul.mubr.f32.gmra.mrb[68].mxu0 %v21326_v17  ;;  %v21420_v17 = vld [vmem:[#allocation93_spill] sm:$0xff] }
 0x370   : > { %4465 = vmatprep.mubr.f32.mxu1 %v20889_v24  ;;  %5497 = vmatprep.mubr.f32.mxu0 %v20889_v24 }
 0x373   : > { %4467 = vmatmul.mubr.f32.gmra.mrb[74].mxu1 %v21076_v34  ;;  %5500 = vmatmul.mubr.f32.gmra.mrb[70].mxu0 %v21327_v53  ;;  %v21411_v53 = vld [vmem:[#allocation85_spill] sm:$0xff] }
 0x374   : > { %4472 = vmatprep.mubr.f32.mxu1 %v20889_v24  ;;  %5505 = vmatprep.mubr.f32.mxu0 %v20889_v24 }
 0x377   : > { %4474 = vmatmul.mubr.f32.gmra.mrb[76].mxu1 %v21079_v59  ;;  %5508 = vmatmul.mubr.f32.gmra.mrb[72].mxu0 %v21328_v37  ;;  %v21365_v37 = vld [vmem:[#allocation23_spill] sm:$0xff] }
 0x378   : > { %4479 = vmatprep.mubr.f32.mxu1 %v20889_v24  ;;  %5513 = vmatprep.mubr.f32.mxu0 %v20889_v24 }
 0x37b   : > { %4481 = vmatmul.mubr.f32.gmra.mrb[78].mxu1 %v21082_v49  ;;  %5516 = vmatmul.mubr.f32.gmra.mrb[74].mxu0 %v21329_v5  ;;  %v21359_v5 = vld [vmem:[#allocation21_spill] sm:$0xff] }
 0x37c   : > { %4486 = vmatprep.mubr.f32.mxu1 %v20889_v24  ;;  %5521 = vmatprep.mubr.f32.mxu0 %v20889_v24 }
 0x37f   : > { %4488 = vmatmul.mubr.f32.gmra.mrb[80].mxu1 %v21085_v20  ;;  %5524 = vmatmul.mubr.f32.gmra.mrb[76].mxu0 %v21330_v25  ;;  %v21357_v25 = vld [vmem:[#allocation17_spill] sm:$0xff] }
 0x380   : > { %4493 = vmatprep.mubr.f32.mxu1 %v20889_v24  ;;  %5529 = vmatprep.mubr.f32.mxu0 %v20889_v24 }
 0x383   : > { %4495 = vmatmul.mubr.f32.gmra.mrb[82].mxu1 %v21088_v30  ;;  %5532 = vmatmul.mubr.f32.gmra.mrb[78].mxu0 %v21331_v21  ;;  %v21356_v21 = vld [vmem:[#allocation114_spill] sm:$0xff] }
 0x384   : > { %4500 = vmatprep.mubr.f32.mxu1 %v20889_v24  ;;  %5537 = vmatprep.mubr.f32.mxu0 %v20889_v24 }
 0x387   : > { %4502 = vmatmul.mubr.f32.gmra.mrb[84].mxu1 %v21091_v36  ;;  %5540 = vmatmul.mubr.f32.gmra.mrb[80].mxu0 %v21332_v6 }
 0x388   : > { %4507 = vmatprep.mubr.f32.mxu1 %v20889_v24  ;;  %5545 = vmatprep.mubr.f32.mxu0 %v20889_v24 }
 0x38b   : > { %4509 = vmatmul.mubr.f32.gmra.mrb[86].mxu1 %v21094_v32  ;;  %5548 = vmatmul.mubr.f32.gmra.mrb[82].mxu0 %v21333_v29 }
 0x38c   : > { %4514 = vmatprep.mubr.f32.mxu1 %v20889_v24  ;;  %5553 = vmatprep.mubr.f32.mxu0 %v20889_v24 }
 0x38f   : > { %4516 = vmatmul.mubr.f32.gmra.mrb[88].mxu1 %v21097_v19  ;;  %5556 = vmatmul.mubr.f32.gmra.mrb[84].mxu0 %v21334_v3 }
 0x390   : > { %4521 = vmatprep.mubr.f32.mxu1 %v20889_v24  ;;  %5561 = vmatprep.mubr.f32.mxu0 %v20889_v24 }
 0x393   : > { %4523 = vmatmul.mubr.f32.gmra.mrb[90].mxu1 %v21100_v47  ;;  %5564 = vmatmul.mubr.f32.gmra.mrb[86].mxu0 %v21335_v51 }
 0x394   : > { %4528 = vmatprep.mubr.f32.mxu1 %v20889_v24  ;;  %5569 = vmatprep.mubr.f32.mxu0 %v20889_v24 }
 0x397   : > { %4530 = vmatmul.mubr.f32.gmra.mrb[92].mxu1 %v21103_v31  ;;  %5572 = vmatmul.mubr.f32.gmra.mrb[88].mxu0 %v21336_v15  ;;  %v18878_v15 = vsub.f32 %v18720_v41, %v18732_v0 }
 0x398   : > { %4535 = vmatprep.mubr.f32.mxu1 %v20889_v24  ;;  %5577 = vmatprep.mubr.f32.mxu0 %v20889_v24 }
 0x399   : > { %v20768_v3 = vand.u32 4294901760, %v18878_v15 }
 0x39b   : > { %4537 = vmatmul.mubr.f32.gmra.mrb[94].mxu1 %v21106_v18  ;;  %5580 = vmatmul.mubr.f32.gmra.mrb[90].mxu0 %v21337_v8 }
 0x39c   : > { %4542 = vmatprep.mubr.f32.mxu1 %v20889_v24  ;;  %5585 = vmatprep.mubr.f32.mxu0 %v20889_v24 }
 0x39f   : > { %4544 = vmatmul.mubr.f32.gmra.mrb[96].mxu1 %v17000_v26  ;;  %5588 = vmatmul.mubr.f32.gmra.mrb[92].mxu0 %v21338_v28  ;;  %v21351_v28 = vld [vmem:[#allocation140_spill] sm:$0xff] }
 0x3a0   : > { %4549 = vmatprep.mubr.f32.mxu1 %v20889_v24  ;;  %5593 = vmatprep.mubr.f32.mxu0 %v20889_v24  ;;  %v21353_v51 = vand.u32 4294901760, %v21351_v28 }
 0x3a2   : > { %v7135_v41 = vsub.f32 %v21351_v28, %v21353_v51  ;;  %v21355_v51 = vld [vmem:[#allocation108_spill] sm:$0xff] }
 0x3a3   : > { %4551 = vmatmul.mubr.f32.gmra.mrb[98].mxu1 %v17008_v35  ;;  %5596 = vmatmul.mubr.f32.gmra.mrb[94].mxu0 %v21339_v11  ;;  %v21342_v11 = vld [vmem:[#allocation76_spill] sm:$0xff] }
 0x3a4   : > { %4556 = vmatprep.mubr.f32.mxu1 %v20889_v24  ;;  %5601 = vmatprep.mubr.f32.mxu0 %v20889_v24  ;;  %v7136_v29 = vand.u32 4294901760, %v7135_v41 }
 0x3a7   : > { %4558 = vmatmul.mubr.f32.gmra.mrb[100].mxu1 %v17028_v7  ;;  %5604 = vmatmul.mubr.f32.gmra.mrb[96].mxu0 %v21340_v61  ;;  %v21343_v61 = vld [vmem:[#allocation77_spill] sm:$0xff] }
 0x3a8   : > { %4563 = vmatprep.mubr.f32.mxu1 %v20889_v24  ;;  %5609 = vmatprep.mubr.f32.mxu0 %v20889_v24 }
 0x3ab   : > { %4565 = vmatmul.mubr.f32.gmra.mrb[102].mxu1 %v17048_v33  ;;  %5612 = vmatmul.mubr.f32.gmra.mrb[98].mxu0 %v21341_v40  ;;  %v21344_v40 = vld [vmem:[#allocation82_spill] sm:$0xff] }
 0x3ac   : > { %4570 = vmatprep.mubr.f32.mxu1 %v20889_v24  ;;  %5617 = vmatprep.mubr.f32.mxu0 %v20889_v24 }
 0x3af   : > { %4572 = vmatmul.mubr.f32.gmra.mrb[104].mxu1 %v17081_v57  ;;  %5620 = vmatmul.mubr.f32.gmra.mrb[100].mxu0 %v21342_v11  ;;  %v21345_v11 = vld [vmem:[#allocation83_spill] sm:$0xff] }
 0x3b0   : > { %4577 = vmatprep.mubr.f32.mxu1 %v20889_v24  ;;  %5625 = vmatprep.mubr.f32.mxu0 %v20889_v24 }
 0x3b3   : > { %4579 = vmatmul.mubr.f32.gmra.mrb[106].mxu1 %v17088_v27  ;;  %5628 = vmatmul.mubr.f32.gmra.mrb[102].mxu0 %v21343_v61  ;;  %v21346_v61 = vld [vmem:[#allocation88_spill] sm:$0xff] }
 0x3b4   : > { %4584 = vmatprep.mubr.f32.mxu1 %v20889_v24  ;;  %5633 = vmatprep.mubr.f32.mxu0 %v20889_v24 }
 0x3b7   : > { %4586 = vmatmul.mubr.f32.gmra.mrb[108].mxu1 %v17120_v16  ;;  %5636 = vmatmul.mubr.f32.gmra.mrb[104].mxu0 %v21344_v40  ;;  %v21347_v40 = vld [vmem:[#allocation91_spill] sm:$0xff] }
 0x3b8   : > { %4591 = vmatprep.mubr.f32.mxu1 %v20889_v24  ;;  %5641 = vmatprep.mubr.f32.mxu0 %v20889_v24 }
 0x3bb   : > { %4593 = vmatmul.mubr.f32.gmra.mrb[110].mxu1 %v17140_v60  ;;  %5644 = vmatmul.mubr.f32.gmra.mrb[106].mxu0 %v21345_v11  ;;  %v21348_v11 = vld [vmem:[#allocation94_spill] sm:$0xff] }
 0x3bc   : > { %4598 = vmatprep.mubr.f32.mxu1 %v20889_v24  ;;  %5649 = vmatprep.mubr.f32.mxu0 %v20889_v24 }
 0x3bf   : > { %4600 = vmatmul.mubr.f32.gmra.mrb[112].mxu1 %v17167_v1  ;;  %5652 = vmatmul.mubr.f32.gmra.mrb[108].mxu0 %v21346_v61  ;;  %v21349_v61 = vld [vmem:[#allocation95_spill] sm:$0xff] }
 0x3c0   : > { %4605 = vmatprep.mubr.f32.mxu1 %v20889_v24  ;;  %5657 = vmatprep.mubr.f32.mxu0 %v20889_v24 }
 0x3c3   : > { %4607 = vmatmul.mubr.f32.gmra.mrb[114].mxu1 %v17175_v39  ;;  %5660 = vmatmul.mubr.f32.gmra.mrb[110].mxu0 %v21347_v40  ;;  %v21350_v40 = vld [vmem:[#allocation100_spill] sm:$0xff] }
 0x3c4   : > { %4612 = vmatprep.mubr.f32.mxu1 %v20889_v24  ;;  %5665 = vmatprep.mubr.f32.mxu0 %v20889_v24 }
 0x3c7   : > { %4614 = vmatmul.mubr.f32.gmra.mrb[116].mxu1 %v17211_v54  ;;  %5668 = vmatmul.mubr.f32.gmra.mrb[112].mxu0 %v21348_v11  ;;  %v20767_v11 = vand.u32 4294901760, %v18437_v42 }
 0x3c8   : > { %4619 = vmatprep.mubr.f32.mxu1 %v20889_v24  ;;  %5673 = vmatprep.mubr.f32.mxu0 %v20889_v24 }
 0x3c9   : > { %v7123_v8 = vsub.f32 %v18437_v42, %v20767_v11  ;;  %v7141_v11 = vsub.f32 %v18878_v15, %v20768_v3 }
 0x3cb   : > { %4621 = vmatmul.mubr.f32.gmra.mrb[118].mxu1 %v17221_v9  ;;  %5676 = vmatmul.mubr.f32.gmra.mrb[114].mxu0 %v21349_v61  ;;  %v21352_v61 = vld [vmem:[#allocation101_spill] sm:$0xff]  ;;  %v7142_v41 = vand.u32 4294901760, %v7141_v11 }
 0x3cc   : > { %4626 = vmatprep.mubr.f32.mxu1 %v20889_v24  ;;  %5681 = vmatprep.mubr.f32.mxu0 %v20889_v24 }
 0x3cf   : > { %4628 = vmatmul.mubr.f32.gmra.mrb[120].mxu1 %v17257_v63  ;;  %5684 = vmatmul.mubr.f32.gmra.mrb[116].mxu0 %v21350_v40  ;;  %v18886_v40 = vsub.f32 %v18735_v12, %v18743_v44  ;;  %v7124_v12 = vand.u32 4294901760, %v7123_v8 }
 0x3d0   : > { %4633 = vmatprep.mubr.f32.mxu1 %v20889_v24  ;;  %5689 = vmatprep.mubr.f32.mxu0 %v20889_v24 }
 0x3d1   : > { %v20769_v6 = vand.u32 4294901760, %v18886_v40 }
 0x3d3   : > { %4635 = vmatmul.mubr.f32.gmra.mrb[122].mxu1 %v21138_v55  ;;  %5692 = vmatmul.mubr.f32.gmra.mrb[118].mxu0 %v21352_v61  ;;  %v21354_v61 = vld [vmem:[#allocation107_spill] sm:$0xff]  ;;  %v7147_v8 = vsub.f32 %v18886_v40, %v20769_v6 }
 0x3d4   : > { %4640 = vmatprep.mubr.f32.mxu1 %v20889_v24  ;;  %5697 = vmatprep.mubr.f32.mxu0 %v20889_v24 }
 0x3d5   : > { %v7148_v3 = vand.u32 4294901760, %v7147_v8 }
 0x3d7   : > { %4642 = vmatmul.mubr.f32.gmra.mrb[124].mxu1 %v21145_v10  ;;  %5700 = vmatmul.mubr.f32.gmra.mrb[120].mxu0 %v21354_v61  ;;  %v13550_v61 = vpack.c.bf16 %v7136_v29, %v7124_v12  ;;  %v21360_v29 = vld [vmem:[#allocation3_spill] sm:$0xff]  ;;  %v21362_v12 = vld [vmem:[#allocation4_spill] sm:$0xff] }
 0x3d8   : > { %4647 = vmatprep.mubr.f32.mxu1 %v20889_v24  ;;  %5705 = vmatprep.mubr.f32.mxu0 %v20889_v24  ;;  %v21361_v11 = vand.u32 4294901760, %v21360_v29  ;;  %v21363_v6 = vand.u32 4294901760, %v21362_v12  ;;  %v21372_v29 = vld [vmem:[#allocation2_spill] sm:$0xff]  ;;  %v21375_v12 = vld [vmem:[#allocation20_spill] sm:$0xff] }
 0x3db   : > { %4649 = vmatmul.mubr.f32.gmra.mrb[126].mxu1 %v21149_v58  ;;  %5708 = vmatmul.mubr.f32.gmra.mrb[122].mxu0 %v21355_v51  ;;  %v21358_v51 = vld [vmem:[#allocation118_spill] sm:$0xff] }
 0x3dc   : > { %5713 = vmatprep.mubr.f32.mxu0 %v20889_v24  ;;  %6761 = vmatprep.mubr.f32.mxu1 %v20889_v24 }
 0x3df   : > { %5716 = vmatmul.mubr.f32.gmra.mrb[124].mxu0 %v21356_v21  ;;  %6767 = vmatmul.mubr.f32.vlgmr.msra.gmra.mrb[128].mxu1 %v21357_v25  ;;  %v13538_v25 = vpack.c.bf16 %v21363_v6, %v21361_v11  ;;  %v21364_v21 = vld [vmem:[#allocation8_spill] sm:$0xff]  ;;  %v21374_v11 = vld [vmem:[#allocation30_spill] sm:$0xff] }
 0x3e0   : > { %5721 = vmatprep.mubr.f32.mxu0 %v20889_v24  ;;  %6772 = vmatprep.mubr.f32.mxu1 %v20889_v24  ;;  %v21370_v6 = vld [vmem:[#allocation104_spill] sm:$0xff] }
 0x3e1   : > { %13551 = vmatpush1.bf16.msra.mxu1 %v13550_v61  ;;  %v21366_v61 = vld [vmem:[#allocation178_spill] sm:$0xff] }
 0x3e2   : > { %7143 = vmatprep.subr.mxu1 %v7142_v41  ;;  %v21367_v8 = vand.u32 4294901760, %v21366_v61  ;;  %v21368_v41 = vld [vmem:[#allocation12_spill] sm:$0xff]  ;;  %v21376_v61 = vld [vmem:[#allocation34_spill] sm:$0xff] }
 0x3e3   : > { %5724 = vmatmul.mubr.f32.gmra.mrb[126].mxu0 %v21358_v51  ;;  %6778 = vmatmul.mubr.f32.gmra.mrb[130].mxu1 %v21359_v5  ;;  %v21369_v5 = vld [vmem:[#allocation27_spill] sm:$0xff] }
 0x3e4   : > { %5800 = vmatprep.mubr.f32.mxu0 %v20889_v24  ;;  %6783 = vmatprep.mubr.f32.mxu1 %v20889_v24 }
 0x3e5   : > { %7149 = vmatpush1.msra.mxu1 %v7148_v3  ;;  %v21371_v3 = vand.u32 4294901760, %v21370_v6  ;;  %v21378_v6 = vld [vmem:[#allocation39_spill] sm:$0xff] }
 0x3e7   : > { %5804 = vmatmul.mubr.f32.vlgmr.msra.gmra.mrb[64].mxu0 %v21364_v21  ;;  %6789 = vmatmul.mubr.f32.gmra.mrb[132].mxu1 %v21365_v37  ;;  %v21408_v37 = vld [vmem:[#allocation81_spill] sm:$0xff] }
 0x3e8   : > { %13539 = vmatpush1.bf16.msra.mxu0 %v13538_v25  ;;  %5809 = vmatprep.mubr.f32.mxu0 %v20889_v24  ;;  %v21373_v25 = vld [vmem:[#allocation16_spill] sm:$0xff] }
 0x3e9   : > { %6794 = vmatprep.mubr.f32.mxu1 %v20889_v24  ;;  %6108 = vmatprep.subr.mxu0 %v21367_v8  ;;  %v21377_v8 = vld [vmem:[#allocation24_spill] sm:$0xff] }
 0x3eb   : > { %5813 = vmatmul.mubr.f32.gmra.mrb[66].mxu0 %v21368_v41  ;;  %6800 = vmatmul.mubr.f32.gmra.mrb[134].mxu1 %v21369_v5  ;;  %v21392_v5 = vld [vmem:[#allocation67_spill] sm:$0xff]  ;;  %v21410_v41 = vld [vmem:[#allocation126_spill] sm:$0xff] }
 0x3ec   : > { %5818 = vmatprep.mubr.f32.mxu0 %v20889_v24  ;;  %6805 = vmatprep.mubr.f32.mxu1 %v20889_v24 }
 0x3ed   : > { %6112 = vmatpush1.msra.mxu0 %v21371_v3  ;;  %v21379_v3 = vld [vmem:[#allocation26_spill] sm:$0xff] }
 0x3ee   : > { %13541 = vmatprep.subr.bf16.mxu0 %v21372_v29  ;;  %v21380_v29 = vld [vmem:[#allocation43_spill] sm:$0xff] }
 0x3ef   : > { %5822 = vmatmul.mubr.f32.gmra.mrb[68].mxu0 %v21373_v25  ;;  %6811 = vmatmul.mubr.f32.gmra.mrb[136].mxu1 %v21374_v11  ;;  %v21382_v11 = vld [vmem:[#allocation48_spill] sm:$0xff] }
 0x3f0   : > { %5827 = vmatprep.mubr.f32.mxu0 %v20889_v24  ;;  %6816 = vmatprep.mubr.f32.mxu1 %v20889_v24 }
 0x3f3   : > { %5831 = vmatmul.mubr.f32.gmra.mrb[70].mxu0 %v21375_v12  ;;  %6822 = vmatmul.mubr.f32.gmra.mrb[138].mxu1 %v21376_v61  ;;  %v21381_v61 = vld [vmem:[#allocation31_spill] sm:$0xff] }
 0x3f4   : > { %5836 = vmatprep.mubr.f32.mxu0 %v20889_v24  ;;  %6827 = vmatprep.mubr.f32.mxu1 %v20889_v24 }
 0x3f7   : > { %5840 = vmatmul.mubr.f32.gmra.mrb[72].mxu0 %v21377_v8  ;;  %6833 = vmatmul.mubr.f32.gmra.mrb[140].mxu1 %v21378_v6  ;;  %v21383_v6 = vld [vmem:[#allocation35_spill] sm:$0xff]  ;;  %v21384_v8 = vld [vmem:[#allocation53_spill] sm:$0xff] }
 0x3f8   : > { %5845 = vmatprep.mubr.f32.mxu0 %v20889_v24  ;;  %6838 = vmatprep.mubr.f32.mxu1 %v20889_v24 }
 0x3fb   : > { %5849 = vmatmul.mubr.f32.gmra.mrb[74].mxu0 %v21379_v3  ;;  %6844 = vmatmul.mubr.f32.gmra.mrb[142].mxu1 %v21380_v29  ;;  %v21385_v29 = vld [vmem:[#allocation40_spill] sm:$0xff]  ;;  %v21386_v3 = vld [vmem:[#allocation57_spill] sm:$0xff] }
 0x3fc   : > { %5854 = vmatprep.mubr.f32.mxu0 %v20889_v24  ;;  %6849 = vmatprep.mubr.f32.mxu1 %v20889_v24 }
 0x3ff   : > { %5858 = vmatmul.mubr.f32.gmra.mrb[76].mxu0 %v21381_v61  ;;  %6855 = vmatmul.mubr.f32.gmra.mrb[144].mxu1 %v21382_v11  ;;  %v13552_v61 = vpack.c.bf16 %v18427_v23, %v18419_v43  ;;  %v21387_v11 = vld [vmem:[#allocation44_spill] sm:$0xff]  ;;  %v21415_v23 = vld [vmem:[#allocation98_spill] sm:$0xff] }
 0x400   : > { %5863 = vmatprep.mubr.f32.mxu0 %v20889_v24  ;;  %6860 = vmatprep.mubr.f32.mxu1 %v20889_v24 }
 0x401   : > { %13553 = vmatprep.subr.bf16.mxu1 %v13552_v61  ;;  %v21393_v61 = vld [vmem:[#allocation54_spill] sm:$0xff] }
 0x403   : > { %5867 = vmatmul.mubr.f32.gmra.mrb[78].mxu0 %v21383_v6  ;;  %6866 = vmatmul.mubr.f32.gmra.mrb[146].mxu1 %v21384_v8  ;;  %v21388_v6 = vld [vmem:[#allocation58_spill] sm:$0xff]  ;;  %v21389_v8 = vld [vmem:[#allocation49_spill] sm:$0xff] }
 0x404   : > { %5872 = vmatprep.mubr.f32.mxu0 %v20889_v24  ;;  %6871 = vmatprep.mubr.f32.mxu1 %v20889_v24 }
 0x407   : > { %5876 = vmatmul.mubr.f32.gmra.mrb[80].mxu0 %v21385_v29  ;;  %6877 = vmatmul.mubr.f32.gmra.mrb[148].mxu1 %v21386_v3  ;;  %v21390_v29 = vld [vmem:[#allocation63_spill] sm:$0xff]  ;;  %v21391_v3 = vld [vmem:[#allocation50_spill] sm:$0xff] }
 0x408   : > { %5881 = vmatprep.mubr.f32.mxu0 %v20889_v24  ;;  %6882 = vmatprep.mubr.f32.mxu1 %v20889_v24 }
 0x40b   : > { %5885 = vmatmul.mubr.f32.gmra.mrb[82].mxu0 %v21387_v11  ;;  %6888 = vmatmul.mubr.f32.gmra.mrb[150].mxu1 %v21388_v6  ;;  %v21394_v11 = vld [vmem:[#allocation70_spill] sm:$0xff] }
 0x40c   : > { %5890 = vmatprep.mubr.f32.mxu0 %v20889_v24  ;;  %6893 = vmatprep.mubr.f32.mxu1 %v20889_v24 }
 0x40f   : > { %5894 = vmatmul.mubr.f32.gmra.mrb[84].mxu0 %v21389_v8  ;;  %6899 = vmatmul.mubr.f32.gmra.mrb[152].mxu1 %v21390_v29  ;;  %v21395_v8 = vld [vmem:[#allocation59_spill] sm:$0xff]  ;;  %v21396_v29 = vld [vmem:[#allocation74_spill] sm:$0xff] }
 0x410   : > { %5899 = vmatprep.mubr.f32.mxu0 %v20889_v24  ;;  %6904 = vmatprep.mubr.f32.mxu1 %v20889_v24 }
 0x413   : > { %5903 = vmatmul.mubr.f32.gmra.mrb[86].mxu0 %v21391_v3  ;;  %6910 = vmatmul.mubr.f32.gmra.mrb[154].mxu1 %v21392_v5  ;;  %v21397_v3 = vld [vmem:[#allocation64_spill] sm:$0xff]  ;;  %v21398_v5 = vld [vmem:[#allocation78_spill] sm:$0xff] }
 0x414   : > { %5908 = vmatprep.mubr.f32.mxu0 %v20889_v24  ;;  %6915 = vmatprep.mubr.f32.mxu1 %v20889_v24 }
 0x417   : > { %5912 = vmatmul.mubr.f32.gmra.mrb[88].mxu0 %v21393_v61  ;;  %6921 = vmatmul.mubr.f32.gmra.mrb[156].mxu1 %v21394_v11  ;;  %v21399_v61 = vld [vmem:[#allocation68_spill] sm:$0xff] }
 0x418   : > { %5917 = vmatprep.mubr.f32.mxu0 %v20889_v24  ;;  %6926 = vmatprep.mubr.f32.mxu1 %v20889_v24  ;;  %v21400_v11 = vld [vmem:[#allocation80_spill] sm:$0xff] }
 0x41b   : > { %5921 = vmatmul.mubr.f32.gmra.mrb[90].mxu0 %v21395_v8  ;;  %6932 = vmatmul.mubr.f32.gmra.mrb[158].mxu1 %v21396_v29  ;;  %v21401_v8 = vld [vmem:[#allocation71_spill] sm:$0xff]  ;;  %v21402_v29 = vld [vmem:[#allocation84_spill] sm:$0xff] }
 0x41c   : > { %5926 = vmatprep.mubr.f32.mxu0 %v20889_v24  ;;  %6937 = vmatprep.mubr.f32.mxu1 %v20889_v24 }
 0x41f   : > { %5930 = vmatmul.mubr.f32.gmra.mrb[92].mxu0 %v21397_v3  ;;  %6943 = vmatmul.mubr.f32.gmra.mrb[160].mxu1 %v21398_v5  ;;  %v21403_v3 = vld [vmem:[#allocation75_spill] sm:$0xff] }
 0x420   : > { %5935 = vmatprep.mubr.f32.mxu0 %v20889_v24  ;;  %6948 = vmatprep.mubr.f32.mxu1 %v20889_v24  ;;  %v21404_v5 = vld [vmem:[#allocation87_spill] sm:$0xff] }
 0x423   : > { %5939 = vmatmul.mubr.f32.gmra.mrb[94].mxu0 %v21399_v61  ;;  %6954 = vmatmul.mubr.f32.gmra.mrb[162].mxu1 %v21400_v11  ;;  %v21405_v61 = vld [vmem:[#allocation79_spill] sm:$0xff]  ;;  %v21406_v11 = vld [vmem:[#allocation89_spill] sm:$0xff] }
 0x424   : > { %5944 = vmatprep.mubr.f32.mxu0 %v20889_v24  ;;  %6959 = vmatprep.mubr.f32.mxu1 %v20889_v24 }
 0x427   : > { %5948 = vmatmul.mubr.f32.gmra.mrb[96].mxu0 %v21401_v8  ;;  %6965 = vmatmul.mubr.f32.gmra.mrb[164].mxu1 %v21402_v29  ;;  %v21407_v29 = vld [vmem:[#allocation125_spill] sm:$0xff] }
 0x428   : > { %5953 = vmatprep.mubr.f32.mxu0 %v20889_v24  ;;  %6970 = vmatprep.mubr.f32.mxu1 %v20889_v24 }
 0x42b   : > { %5957 = vmatmul.mubr.f32.gmra.mrb[98].mxu0 %v21403_v3  ;;  %6976 = vmatmul.mubr.f32.gmra.mrb[166].mxu1 %v21404_v5  ;;  %v21409_v3 = vld [vmem:[#allocation92_spill] sm:$0xff] }
 0x42c   : > { %5962 = vmatprep.mubr.f32.mxu0 %v20889_v24  ;;  %6981 = vmatprep.mubr.f32.mxu1 %v20889_v24 }
 0x42f   : > { %5966 = vmatmul.mubr.f32.gmra.mrb[100].mxu0 %v21405_v61  ;;  %6987 = vmatmul.mubr.f32.gmra.mrb[168].mxu1 %v21406_v11 }
 0x430   : > { %5971 = vmatprep.mubr.f32.mxu0 %v20889_v24  ;;  %6992 = vmatprep.mubr.f32.mxu1 %v20889_v24 }
 0x432   : > { %v4433_v8 = vpop.f32.mrb[64].mxu1 }
 0x433   : > { %v13724_v6 = vadd.f32 %v4433_v8, %v21407_v29  ;;  %v4435_v12 = vpop.f32.mrb[65].mxu1  ;;  %5975 = vmatmul.mubr.f32.gmra.mrb[102].mxu0 %v21408_v37  ;;  %6998 = vmatmul.mubr.f32.gmra.mrb[170].mxu1 %v21409_v3  ;;  %v21412_v8 = vld [vmem:[#allocation96_spill] sm:$0xff] }
 0x434   : > { %v13725_v5 = vadd.f32 %v4435_v12, %v21407_v29  ;;  %5980 = vmatprep.mubr.f32.mxu0 %v20889_v24  ;;  %7003 = vmatprep.mubr.f32.mxu1 %v20889_v24 }
 0x435   : > { %v12650_v61 = vmul.f32 -1.442695, %v13724_v6 }
 0x436   : > { %v12651_v11 = vmul.f32 -1.442695, %v13725_v5  ;;  %v4440_v25 = vpop.f32.mrb[66].mxu1  ;;  %v21413_v5 = vld [vmem:[#allocation111_spill] sm:$0xff] }
 0x437   : > { %15610 = vpow2.f32 %v12650_v61  ;;  %v13726_v21 = vadd.f32 %v4440_v25, %v21410_v41  ;;  %v4442_v51 = vpop.f32.mrb[67].mxu1  ;;  %5984 = vmatmul.mubr.f32.gmra.mrb[104].mxu0 %v21411_v53  ;;  %7009 = vmatmul.mubr.f32.gmra.mrb[172].mxu1 %v21412_v8  ;;  %v21414_v25 = vld [vmem:[#allocation86_spill] sm:$0xff] }
 0x438   : > { %15612 = vpow2.f32 %v12651_v11  ;;  %v13727_v37 = vadd.f32 %v4442_v51, %v21410_v41  ;;  %5989 = vmatprep.mubr.f32.mxu0 %v20889_v24  ;;  %7014 = vmatprep.mubr.f32.mxu1 %v20889_v24  ;;  %v21418_v8 = vld [vmem:[#allocation102_spill] sm:$0xff] }
 0x439   : > { %v12659_v12 = vmul.f32 -1.442695, %v13726_v21 }
 0x43a   : > { %v12660_v29 = vmul.f32 -1.442695, %v13727_v37  ;;  %v4447_v6 = vpop.f32.mrb[68].mxu1  ;;  %v21416_v37 = vld [vmem:[#allocation127_spill] sm:$0xff] }
 0x43b   : > { %15614 = vpow2.f32 %v12659_v12  ;;  %v13728_v61 = vadd.f32 %v4447_v6, %v21413_v5  ;;  %v4449_v3 = vpop.f32.mrb[69].mxu1  ;;  %5993 = vmatmul.mubr.f32.gmra.mrb[106].mxu0 %v21414_v25  ;;  %7020 = vmatmul.mubr.f32.gmra.mrb[174].mxu1 %v21415_v23  ;;  %v21417_v6 = vld [vmem:[#allocation90_spill] sm:$0xff] }
 0x43c   : > { %15616 = vpow2.f32 %v12660_v29  ;;  %v13729_v11 = vadd.f32 %v4449_v3, %v21413_v5  ;;  %5998 = vmatprep.mubr.f32.mxu0 %v20889_v24  ;;  %7025 = vmatprep.mubr.f32.mxu1 %v20889_v24 }
 0x43d   : > { %v12668_v51 = vmul.f32 -1.442695, %v13728_v61 }
 0x43e   : > { %v12669_v41 = vmul.f32 -1.442695, %v13729_v11  ;;  %v4454_v21 = vpop.f32.mrb[70].mxu1 }
 0x43f   : > { %15618 = vpow2.f32 %v12668_v51  ;;  %v13730_v12 = vadd.f32 %v4454_v21, %v21416_v37  ;;  %v4456_v53 = vpop.f32.mrb[71].mxu1  ;;  %6002 = vmatmul.mubr.f32.gmra.mrb[108].mxu0 %v21417_v6  ;;  %7031 = vmatmul.mubr.f32.gmra.mrb[176].mxu1 %v21418_v8  ;;  %v21419_v21 = vld [vmem:[#allocation115_spill] sm:$0xff] }
 0x440   : > { %15620 = vpow2.f32 %v12669_v41  ;;  %v13731_v29 = vadd.f32 %v4456_v53, %v21416_v37  ;;  %6007 = vmatprep.mubr.f32.mxu0 %v20889_v24  ;;  %7036 = vmatprep.mubr.f32.mxu1 %v20889_v24  ;;  %v21421_v41 = vld [vmem:[#allocation105_spill] sm:$0xff] }
 0x441   : > { %v15611_v3 = vpop.eup %15610  ;;  %v12677_v5 = vmul.f32 -1.442695, %v13730_v12 }
 0x442   : > { %v15613_v61 = vpop.eup %15612  ;;  %v11398_v11 = vadd.f32 1.0, %v15611_v3  ;;  %v12678_v25 = vmul.f32 -1.442695, %v13731_v29  ;;  %v4461_v51 = vpop.f32.mrb[72].mxu1 }
 0x443   : > { %v11399_v23 = vadd.f32 1.0, %v15613_v61  ;;  %15622 = vpow2.f32 %v12677_v5  ;;  %v13732_v43 = vadd.f32 %v4461_v51, %v21419_v21  ;;  %v4463_v6 = vpop.f32.mrb[73].mxu1  ;;  %6011 = vmatmul.mubr.f32.gmra.mrb[110].mxu0 %v21420_v17  ;;  %7042 = vmatmul.mubr.f32.gmra.mrb[178].mxu1 %v21421_v41  ;;  %v21422_v17 = vld [vmem:[#allocation128_spill] sm:$0xff] }
 0x444   : > { %15624 = vrcp.f32 %v11398_v11  ;;  %v13733_v53 = vadd.f32 %v4463_v6, %v21419_v21  ;;  %6016 = vmatprep.mubr.f32.mxu0 %v20889_v24  ;;  %7047 = vmatprep.mubr.f32.mxu1 %v20889_v24  ;;  %v21423_v11 = vld [vmem:[#allocation97_spill] sm:$0xff] }
 0x445   : > { %v15615_v12 = vpop.eup %15614  ;;  %15626 = vrcp.f32 %v11399_v23  ;;  %v12686_v29 = vmul.f32 -1.442695, %v13732_v43  ;;  %v21424_v6 = vld [vmem:[#allocation109_spill] sm:$0xff] }
 0x446   : > { %v15617_v3 = vpop.eup %15616  ;;  %v11407_v61 = vadd.f32 1.0, %v15615_v12  ;;  %15628 = vpow2.f32 %v12678_v25  ;;  %v12687_v5 = vmul.f32 -1.442695, %v13733_v53  ;;  %v4468_v51 = vpop.f32.mrb[74].mxu1 }
 0x447   : > { %v11408_v37 = vadd.f32 1.0, %v15617_v3  ;;  %15630 = vpow2.f32 %v12686_v29  ;;  %v13734_v8 = vadd.f32 %v4468_v51, %v21422_v17  ;;  %v4470_v41 = vpop.f32.mrb[75].mxu1  ;;  %6020 = vmatmul.mubr.f32.gmra.mrb[112].mxu0 %v21423_v11  ;;  %7053 = vmatmul.mubr.f32.gmra.mrb[180].mxu1 %v21424_v6  ;;  %v21425_v51 = vld [vmem:[#allocation62_spill] sm:$0xff] }
 0x448   : > { %15632 = vrcp.f32 %v11407_v61  ;;  %v13735_v21 = vadd.f32 %v4470_v41, %v21422_v17  ;;  %6025 = vmatprep.mubr.f32.mxu0 %v20889_v24  ;;  %7058 = vmatprep.mubr.f32.mxu1 %v20889_v24  ;;  %v21426_v61 = vld [vmem:[#allocation99_spill] sm:$0xff]  ;;  %v21427_v41 = vld [vmem:[#allocation113_spill] sm:$0xff] }
 0x449   : > { %v15619_v23 = vpop.eup %15618  ;;  %15634 = vrcp.f32 %v11408_v37  ;;  %v12695_v43 = vmul.f32 -1.442695, %v13734_v8 }
 0x44a   : > { %v15621_v25 = vpop.eup %15620  ;;  %v11416_v53 = vadd.f32 1.0, %v15619_v23  ;;  %15636 = vpow2.f32 %v12687_v5  ;;  %v12696_v12 = vmul.f32 -1.442695, %v13735_v21  ;;  %v4475_v29 = vpop.f32.mrb[76].mxu1 }
 0x44b   : > { %v11417_v3 = vadd.f32 1.0, %v15621_v25  ;;  %15638 = vpow2.f32 %v12695_v43  ;;  %v13736_v11 = vadd.f32 %v4475_v29, %v21425_v51  ;;  %v4477_v6 = vpop.f32.mrb[77].mxu1  ;;  %6029 = vmatmul.mubr.f32.gmra.mrb[114].mxu0 %v21426_v61  ;;  %7064 = vmatmul.mubr.f32.gmra.mrb[182].mxu1 %v21427_v41  ;;  %v21428_v29 = vld [vmem:[#allocation129_spill] sm:$0xff] }
 0x44c   : > { %15640 = vrcp.f32 %v11416_v53  ;;  %v13737_v17 = vadd.f32 %v4477_v6, %v21425_v51  ;;  %6034 = vmatprep.mubr.f32.mxu0 %v20889_v24  ;;  %7069 = vmatprep.mubr.f32.mxu1 %v20889_v24  ;;  %v21429_v6 = vld [vmem:[#allocation103_spill] sm:$0xff]  ;;  %v21430_v51 = vld [vmem:[#allocation116_spill] sm:$0xff] }
 0x44d   : > { %v15623_v8 = vpop.eup %15622  ;;  %15642 = vrcp.f32 %v11417_v3  ;;  %v12704_v37 = vmul.f32 -1.442695, %v13736_v11 }
 0x44e   : > { %v15625_v21 = vpop.eup %15624  ;;  %v11425_v5 = vadd.f32 1.0, %v15623_v8  ;;  %15644 = vpow2.f32 %v12696_v12  ;;  %v12705_v23 = vmul.f32 -1.442695, %v13737_v17  ;;  %v4482_v43 = vpop.f32.mrb[78].mxu1 }
 0x44f   : > { %v15627_v25 = vpop.eup %15626  ;;  %12262 = vst [vmem:[%s18333_s17 + $0x10] sm:$0xff] %v15625_v21  ;;  %15646 = vpow2.f32 %v12704_v37  ;;  %v13738_v53 = vadd.f32 %v4482_v43, %v21428_v29  ;;  %v4484_v61 = vpop.f32.mrb[79].mxu1  ;;  %6038 = vmatmul.mubr.f32.gmra.mrb[116].mxu0 %v21429_v6  ;;  %7075 = vmatmul.mubr.f32.gmra.mrb[184].mxu1 %v21430_v51 }
 0x450   : > { %v15629_v41 = vpop.eup %15628  ;;  %12263 = vst [vmem:[%s18333_s17 + $0x18] sm:$0xff] %v15627_v25  ;;  %15648 = vrcp.f32 %v11425_v5  ;;  %v13739_v11 = vadd.f32 %v4484_v61, %v21428_v29  ;;  %6043 = vmatprep.mubr.f32.mxu0 %v20889_v24  ;;  %7080 = vmatprep.mubr.f32.mxu1 %v20889_v24  ;;  %v21431_v25 = vld [vmem:[#allocation130_spill] sm:$0xff]  ;;  %v21433_v29 = vld [vmem:[#allocation119_spill] sm:$0xff] }
 0x451   : > { %v15631_v17 = vpop.eup %15630  ;;  %v11426_v12 = vadd.f32 1.0, %v15629_v41  ;;  %15650 = vpow2.f32 %v12705_v23  ;;  %v12713_v3 = vmul.f32 -1.442695, %v13738_v53  ;;  %v21432_v61 = vld [vmem:[#allocation106_spill] sm:$0xff] }
 0x452   : > { %v15633_v8 = vpop.eup %15632  ;;  %v11434_v37 = vadd.f32 1.0, %v15631_v17  ;;  %v12714_v21 = vmul.f32 -1.442695, %v13739_v11  ;;  %v4489_v43 = vpop.f32.mrb[80].mxu1 }
 0x453   : > { %v15635_v6 = vpop.eup %15634  ;;  %12272 = vst [vmem:[%s18333_s17 + $0x58] sm:$0xff] %v15633_v8  ;;  %15652 = vrcp.f32 %v11426_v12  ;;  %v13740_v5 = vadd.f32 %v4489_v43, %v21431_v25  ;;  %v4491_v51 = vpop.f32.mrb[81].mxu1  ;;  %6047 = vmatmul.mubr.f32.gmra.mrb[118].mxu0 %v21432_v61  ;;  %7086 = vmatmul.mubr.f32.gmra.mrb[186].mxu1 %v21433_v29  ;;  %v21436_v29 = vld [vmem:[#allocation121_spill] sm:$0xff] }
 0x454   : > { %v15637_v44 = vpop.eup %15636  ;;  %12273 = vst [vmem:[%s18333_s17 + $0x60] sm:$0xff] %v15635_v6  ;;  %15654 = vrcp.f32 %v11434_v37  ;;  %v13741_v41 = vadd.f32 %v4491_v51, %v21431_v25  ;;  %6052 = vmatprep.mubr.f32.mxu0 %v20889_v24  ;;  %7091 = vmatprep.mubr.f32.mxu1 %v20889_v24  ;;  %v21434_v6 = vld [vmem:[#allocation131_spill] sm:$0xff]  ;;  %v21435_v25 = vld [vmem:[#allocation110_spill] sm:$0xff] }
 0x455   : > { %v15639_v23 = vpop.eup %15638  ;;  %v11435_v53 = vadd.f32 1.0, %v15637_v44  ;;  %15656 = vpow2.f32 %v12713_v3  ;;  %v12722_v11 = vmul.f32 -1.442695, %v13740_v5 }
 0x456   : > { %v15641_v17 = vpop.eup %15640  ;;  %v11443_v12 = vadd.f32 1.0, %v15639_v23  ;;  %15658 = vpow2.f32 %v12714_v21  ;;  %v12723_v8 = vmul.f32 -1.442695, %v13741_v41  ;;  %v4496_v43 = vpop.f32.mrb[82].mxu1 }
 0x457   : > { %v15643_v61 = vpop.eup %15642  ;;  %12281 = vst [vmem:[%s18333_s17 + $0xa0] sm:$0xff] %v15641_v17  ;;  %15660 = vrcp.f32 %v11435_v53  ;;  %v13742_v37 = vadd.f32 %v4496_v43, %v21434_v6  ;;  %v4498_v51 = vpop.f32.mrb[83].mxu1  ;;  %6056 = vmatmul.mubr.f32.gmra.mrb[120].mxu0 %v21435_v25  ;;  %7097 = vmatmul.mubr.f32.gmra.mrb[188].mxu1 %v21436_v29  ;;  %v21439_v29 = vld [vmem:[#allocation122_spill] sm:$0xff] }
 0x458   : > { %v15645_v44 = vpop.eup %15644  ;;  %12282 = vst [vmem:[%s18333_s17 + $0xa8] sm:$0xff] %v15643_v61  ;;  %15662 = vrcp.f32 %v11443_v12  ;;  %v13743_v3 = vadd.f32 %v4498_v51, %v21434_v6  ;;  %6061 = vmatprep.mubr.f32.mxu0 %v20889_v24  ;;  %7102 = vmatprep.mubr.f32.mxu1 %v20889_v24  ;;  %v21437_v12 = vld [vmem:[#allocation132_spill] sm:$0xff] }
 0x459   : > { %v15647_v21 = vpop.eup %15646  ;;  %v11444_v5 = vadd.f32 1.0, %v15645_v44  ;;  %15664 = vpow2.f32 %v12722_v11  ;;  %v12731_v41 = vmul.f32 -1.442695, %v13742_v37  ;;  %v21438_v6 = vld [vmem:[#allocation112_spill] sm:$0xff] }
 0x45a   : > { %v15649_v23 = vpop.eup %15648  ;;  %v11452_v53 = vadd.f32 1.0, %v15647_v21  ;;  %15666 = vpow2.f32 %v12723_v8  ;;  %v4503_v17 = vpop.f32.mrb[84].mxu1  ;;  %v12732_v61 = vmul.f32 -1.442695, %v13743_v3  ;;  %v13554_v3 = vpack.c.bf16 %v21351_v28, %v18437_v42 }
 0x45b   : > { %v15651_v43 = vpop.eup %15650  ;;  %12290 = vst [vmem:[%s18333_s17 + $0xe8] sm:$0xff] %v15649_v23  ;;  %15668 = vrcp.f32 %v11444_v5  ;;  %v13744_v25 = vadd.f32 %v4503_v17, %v21437_v12  ;;  %v4505_v51 = vpop.f32.mrb[85].mxu1  ;;  %6065 = vmatmul.mubr.f32.gmra.mrb[122].mxu0 %v21438_v6  ;;  %7108 = vmatmul.mubr.f32.gmra.mrb[190].mxu1 %v21439_v29  ;;  %v21443_v6 = vld [vmem:[#allocation120_spill] sm:$0xff] }
 0x45c   : > { %15670 = vrcp.f32 %v11452_v53  ;;  %v11453_v11 = vadd.f32 1.0, %v15651_v43  ;;  %v13745_v37 = vadd.f32 %v4505_v51, %v21437_v12  ;;  %6070 = vmatprep.mubr.f32.mxu0 %v20889_v24  ;;  %7208 = vmatprep.mubr.f32.mxu1 %v20889_v24  ;;  %v21440_v53 = vld [vmem:[#allocation133_spill] sm:$0xff] }
 0x45d   : > { %v15653_v8 = vpop.eup %15652  ;;  %15672 = vpow2.f32 %v12731_v41  ;;  %v12740_v44 = vmul.f32 -1.442695, %v13744_v25  ;;  %v21441_v12 = vld [vmem:[#allocation117_spill] sm:$0xff] }
 0x45e   : > { %v15655_v21 = vpop.eup %15654  ;;  %12291 = vst [vmem:[%s18333_s17 + $0xf0] sm:$0xff] %v15653_v8  ;;  %15674 = vrcp.f32 %v11453_v11  ;;  %v12741_v5 = vmul.f32 -1.442695, %v13745_v37  ;;  %v4510_v23 = vpop.f32.mrb[86].mxu1 }
 0x45f   : > { %v15657_v17 = vpop.eup %15656  ;;  %12299 = vst [vmem:[%s18333_s17 + $0x130] sm:$0xff] %v15655_v21  ;;  %15676 = vpow2.f32 %v12732_v61  ;;  %v13746_v43 = vadd.f32 %v4510_v23, %v21440_v53  ;;  %v4512_v51 = vpop.f32.mrb[87].mxu1  ;;  %6074 = vmatmul.mubr.f32.gmra.mrb[124].mxu0 %v21441_v12  ;;  %7210 = vmatmul.mubr.f32.vlgmr.msra.gmra.mrb[128].mxu1 %v21061_v52 }
 0x460   : > { %v15659_v25 = vpop.eup %15658  ;;  %v11461_v41 = vadd.f32 1.0, %v15657_v17  ;;  %15678 = vpow2.f32 %v12740_v44  ;;  %v13747_v8 = vadd.f32 %v4512_v51, %v21440_v53  ;;  %6079 = vmatprep.mubr.f32.mxu0 %v20889_v24  ;;  %7215 = vmatprep.mubr.f32.mxu1 %v20889_v24  ;;  %v21442_v17 = vld [vmem:[#allocation134_spill] sm:$0xff] }
 0x461   : > { %v15661_v11 = vpop.eup %15660  ;;  %v11462_v61 = vadd.f32 1.0, %v15659_v25  ;;  %15680 = vpow2.f32 %v12741_v5  ;;  %v12749_v37 = vmul.f32 -1.442695, %v13746_v43  ;;  %13555 = vmatpush1.bf16.msra.mxu1 %v13554_v3 }
 0x462   : > { %v15663_v21 = vpop.eup %15662  ;;  %12300 = vst [vmem:[%s18333_s17 + $0x138] sm:$0xff] %v15661_v11  ;;  %15682 = vrcp.f32 %v11461_v41  ;;  %v12750_v23 = vmul.f32 -1.442695, %v13747_v8  ;;  %v4517_v12 = vpop.f32.mrb[88].mxu1  ;;  %7447 = vmatprep.subr.mxu1 %v18878_v15 }
 0x463   : > { %v15665_v44 = vpop.eup %15664  ;;  %12308 = vst [vmem:[%s18333_s17 + $0x178] sm:$0xff] %v15663_v21  ;;  %15684 = vrcp.f32 %v11462_v61  ;;  %v13748_v51 = vadd.f32 %v4517_v12, %v21442_v17  ;;  %v4519_v53 = vpop.f32.mrb[89].mxu1  ;;  %6083 = vmatmul.mubr.f32.gmra.mrb[126].mxu0 %v21443_v6  ;;  %7217 = vmatmul.mubr.f32.gmra.mrb[130].mxu1 %v21063_v38  ;;  %v21445_v21 = vld [vmem:[#allocation135_spill] sm:$0xff] }
 0x464   : > { %v15667_v5 = vpop.eup %15666  ;;  %v11470_v3 = vadd.f32 1.0, %v15665_v44  ;;  %15686 = vpow2.f32 %v12749_v37  ;;  %v13749_v43 = vadd.f32 %v4519_v53, %v21442_v17  ;;  %6171 = vmatprep.mubr.f32.mxu0 %v20889_v24  ;;  %7222 = vmatprep.mubr.f32.mxu1 %v20889_v24  ;;  %v21444_v37 = vld [vmem:[#allocation137_spill] sm:$0xff] }
 0x465   : > { %v15669_v25 = vpop.eup %15668  ;;  %v11471_v41 = vadd.f32 1.0, %v15667_v5  ;;  %15688 = vpow2.f32 %v12750_v23  ;;  %v12758_v12 = vmul.f32 -1.442695, %v13748_v51  ;;  %7450 = vmatpush1.msra.mxu1 %v18886_v40  ;;  %v19105_v23 = vld [vmem:[%s16617_s4 + $0x40] sm:$0xff]  ;;  %v19108_v51 = vld [vmem:[%s16617_s4 + $0x88] sm:$0xff] }
 0x466   : > { %v15671_v8 = vpop.eup %15670  ;;  %12309 = vst [vmem:[%s18333_s17 + $0x180] sm:$0xff] %v15669_v25  ;;  %15690 = vrcp.f32 %v11470_v3  ;;  %v12759_v11 = vmul.f32 -1.442695, %v13749_v43  ;;  %v4524_v61 = vpop.f32.mrb[90].mxu1  ;;  %13557 = vmatprep.subr.bf16.mxu1 %v21444_v37  ;;  %v20788_v17 = vand.u32 4294901760, %v19108_v51 }
 0x467   : > { %v15673_v53 = vpop.eup %15672  ;;  %12317 = vst [vmem:[%s18333_s17 + $0x1c0] sm:$0xff] %v15671_v8  ;;  %15692 = vrcp.f32 %v11471_v41  ;;  %v13750_v44 = vadd.f32 %v4524_v61, %v21445_v21  ;;  %v4526_v5 = vpop.f32.mrb[91].mxu1  ;;  %6173 = vmatmul.mubr.f32.vlgmr.msra.gmra.mrb[64].mxu0 %v21061_v52  ;;  %7224 = vmatmul.mubr.f32.gmra.mrb[132].mxu1 %v21065_v48  ;;  %v21446_v41 = vld [vmem:[#allocation139_spill] sm:$0xff] }
 0x468   : > { %v15675_v3 = vpop.eup %15674  ;;  %v11479_v43 = vadd.f32 1.0, %v15673_v53  ;;  %15694 = vpow2.f32 %v12758_v12  ;;  %v13751_v25 = vadd.f32 %v4526_v5, %v21445_v21  ;;  %13543 = vmatpush1.bf16.msra.mxu0 %v17985_v22  ;;  %6178 = vmatprep.mubr.f32.mxu0 %v20889_v24 }
 0x469   : > { %v15677_v8 = vpop.eup %15676  ;;  %12318 = vst [vmem:[%s18333_s17 + $0x1c8] sm:$0xff] %v15675_v3  ;;  %15696 = vpow2.f32 %v12759_v11  ;;  %v12767_v61 = vmul.f32 -1.442695, %v13750_v44  ;;  %7229 = vmatprep.mubr.f32.mxu1 %v20889_v24  ;;  %6405 = vmatprep.subr.mxu0 %v17988_v62  ;;  %v21447_v62 = vand.u32 4294901760, %v19105_v23 }
 0x46a   : > { %v15679_v53 = vpop.eup %15678  ;;  %15698 = vrcp.f32 %v11479_v43  ;;  %v11480_v12 = vadd.f32 1.0, %v15677_v8  ;;  %v12768_v5 = vmul.f32 -1.442695, %v13751_v25  ;;  %v4531_v21 = vpop.f32.mrb[92].mxu1 }
 0x46b   : > { %v15681_v22 = vpop.eup %15680  ;;  %v11488_v6 = vadd.f32 1.0, %v15679_v53  ;;  %15700 = vpow2.f32 %v12767_v61  ;;  %v13752_v29 = vadd.f32 %v4531_v21, %v21446_v41  ;;  %v4533_v3 = vpop.f32.mrb[93].mxu1  ;;  %6180 = vmatmul.mubr.f32.gmra.mrb[66].mxu0 %v21063_v38  ;;  %7231 = vmatmul.mubr.f32.gmra.mrb[134].mxu1 %v21070_v56  ;;  %v19125_v11 = vpack.c.bf16 %v20788_v17, %v21447_v62  ;;  %v21448_v62 = vld [vmem:[#allocation141_spill] sm:$0xff] }
 0x46c   : > { %v15683_v44 = vpop.eup %15682  ;;  %15702 = vrcp.f32 %v11480_v12  ;;  %v11489_v43 = vadd.f32 1.0, %v15681_v22  ;;  %v13753_v25 = vadd.f32 %v4533_v3, %v21446_v41  ;;  %6185 = vmatprep.mubr.f32.mxu0 %v20889_v24  ;;  %7236 = vmatprep.mubr.f32.mxu1 %v20889_v24 }
 0x46d   : > { %v15685_v21 = vpop.eup %15684  ;;  %12326 = vst [vmem:[%s18333_s17 + $0x208] sm:$0xff] %v15683_v44  ;;  %15704 = vrcp.f32 %v11488_v6  ;;  %v12776_v8 = vmul.f32 -1.442695, %v13752_v29  ;;  %6407 = vmatpush1.msra.mxu0 %v18007_v14 }
 0x46e   : > { %v15687_v61 = vpop.eup %15686  ;;  %12327 = vst [vmem:[%s18333_s17 + $0x210] sm:$0xff] %v15685_v21  ;;  %15706 = vrcp.f32 %v11489_v43  ;;  %v4538_v53 = vpop.f32.mrb[94].mxu1  ;;  %13569 = vmatprep.subr.bf16.mxu0 %v19125_v11  ;;  %v12777_v3 = vmul.f32 -1.442695, %v13753_v25 }
 0x46f   : > { %v15689_v12 = vpop.eup %15688  ;;  %v11497_v22 = vadd.f32 1.0, %v15687_v61  ;;  %15708 = vpow2.f32 %v12768_v5  ;;  %v13754_v17 = vadd.f32 %v4538_v53, %v21448_v62  ;;  %v4540_v41 = vpop.f32.mrb[95].mxu1  ;;  %6187 = vmatmul.mubr.f32.gmra.mrb[68].mxu0 %v21065_v48  ;;  %7238 = vmatmul.mubr.f32.gmra.mrb[136].mxu1 %v21073_v46 }
 0x470   : > { %v15691_v14 = vpop.eup %15690  ;;  %v11498_v29 = vadd.f32 1.0, %v15689_v12  ;;  %15710 = vpow2.f32 %v12776_v8  ;;  %v13755_v6 = vadd.f32 %v4540_v41, %v21448_v62  ;;  %6192 = vmatprep.mubr.f32.mxu0 %v20889_v24  ;;  %7243 = vmatprep.mubr.f32.mxu1 %v20889_v24  ;;  %v21449_v8 = vld [vmem:[#allocation142_spill] sm:$0xff] }
 0x471   : > { %v15693_v44 = vpop.eup %15692  ;;  %12335 = vst [vmem:[%s18333_s17 + $0x250] sm:$0xff] %v15691_v14  ;;  %15712 = vrcp.f32 %v11497_v22  ;;  %v12785_v5 = vmul.f32 -1.442695, %v13754_v17 }
 0x472   : > { %v15695_v43 = vpop.eup %15694  ;;  %12336 = vst [vmem:[%s18333_s17 + $0x258] sm:$0xff] %v15693_v44  ;;  %15714 = vrcp.f32 %v11498_v29  ;;  %v4545_v25 = vpop.f32.mrb[96].mxu1  ;;  %v12786_v53 = vmul.f32 -1.442695, %v13755_v6 }
 0x473   : > { %v15697_v21 = vpop.eup %15696  ;;  %v11506_v61 = vadd.f32 1.0, %v15695_v43  ;;  %15716 = vpow2.f32 %v12777_v3  ;;  %v13756_v12 = vadd.f32 %v4545_v25, %v21449_v8  ;;  %v4547_v41 = vpop.f32.mrb[97].mxu1  ;;  %6194 = vmatmul.mubr.f32.gmra.mrb[70].mxu0 %v21070_v56  ;;  %7245 = vmatmul.mubr.f32.gmra.mrb[138].mxu1 %v21076_v34 }
 0x474   : > { %v15699_v62 = vpop.eup %15698  ;;  %v11507_v22 = vadd.f32 1.0, %v15697_v21  ;;  %15718 = vpow2.f32 %v12785_v5  ;;  %v13757_v17 = vadd.f32 %v4547_v41, %v21449_v8  ;;  %6199 = vmatprep.mubr.f32.mxu0 %v20889_v24  ;;  %7250 = vmatprep.mubr.f32.mxu1 %v20889_v24  ;;  %v21450_v5 = vld [vmem:[#allocation143_spill] sm:$0xff] }
 0x475   : > { %v15701_v14 = vpop.eup %15700  ;;  %12344 = vst [vmem:[%s18333_s17 + $0x298] sm:$0xff] %v15699_v62  ;;  %15720 = vrcp.f32 %v11506_v61  ;;  %v12794_v3 = vmul.f32 -1.442695, %v13756_v12 }
 0x476   : > { %v15703_v29 = vpop.eup %15702  ;;  %15722 = vrcp.f32 %v11507_v22  ;;  %v11515_v6 = vadd.f32 1.0, %v15701_v14  ;;  %v12795_v44 = vmul.f32 -1.442695, %v13757_v17  ;;  %v4552_v43 = vpop.f32.mrb[98].mxu1 }
 0x477   : > { %v15705_v25 = vpop.eup %15704  ;;  %12345 = vst [vmem:[%s18333_s17 + $0x2a0] sm:$0xff] %v15703_v29  ;;  %15724 = vpow2.f32 %v12786_v53  ;;  %v13758_v21 = vadd.f32 %v4552_v43, %v21450_v5  ;;  %v4554_v41 = vpop.f32.mrb[99].mxu1  ;;  %6201 = vmatmul.mubr.f32.gmra.mrb[72].mxu0 %v21073_v46  ;;  %7252 = vmatmul.mubr.f32.gmra.mrb[140].mxu1 %v21079_v59 }
 0x478   : > { %v15707_v62 = vpop.eup %15706  ;;  %12353 = vst [vmem:[%s18333_s17 + $0x2e0] sm:$0xff] %v15705_v25  ;;  %15726 = vrcp.f32 %v11515_v6  ;;  %v13759_v61 = vadd.f32 %v4554_v41, %v21450_v5  ;;  %6206 = vmatprep.mubr.f32.mxu0 %v20889_v24  ;;  %7257 = vmatprep.mubr.f32.mxu1 %v20889_v24  ;;  %v21451_v6 = vld [vmem:[#allocation144_spill] sm:$0xff] }
 0x479   : > { %v15709_v12 = vpop.eup %15708  ;;  %12354 = vst [vmem:[%s18333_s17 + $0x2e8] sm:$0xff] %v15707_v62  ;;  %15728 = vpow2.f32 %v12794_v3  ;;  %v12803_v53 = vmul.f32 -1.442695, %v13758_v21 }
 0x47a   : > { %v15711_v22 = vpop.eup %15710  ;;  %v11516_v17 = vadd.f32 1.0, %v15709_v12  ;;  %15730 = vpow2.f32 %v12795_v44  ;;  %v12804_v14 = vmul.f32 -1.442695, %v13759_v61  ;;  %v4559_v29 = vpop.f32.mrb[100].mxu1 }
 0x47b   : > { %v15713_v43 = vpop.eup %15712  ;;  %v11524_v25 = vadd.f32 1.0, %v15711_v22  ;;  %15732 = vpow2.f32 %v12803_v53  ;;  %v13760_v41 = vadd.f32 %v4559_v29, %v21451_v6  ;;  %v4561_v5 = vpop.f32.mrb[101].mxu1  ;;  %6208 = vmatmul.mubr.f32.gmra.mrb[74].mxu0 %v21076_v34  ;;  %7259 = vmatmul.mubr.f32.gmra.mrb[142].mxu1 %v21082_v49 }
 0x47c   : > { %v15715_v62 = vpop.eup %15714  ;;  %12362 = vst [vmem:[%s18333_s17 + $0x328] sm:$0xff] %v15713_v43  ;;  %15734 = vrcp.f32 %v11516_v17  ;;  %v13761_v3 = vadd.f32 %v4561_v5, %v21451_v6  ;;  %6213 = vmatprep.mubr.f32.mxu0 %v20889_v24  ;;  %7264 = vmatprep.mubr.f32.mxu1 %v20889_v24  ;;  %v21452_v17 = vld [vmem:[#allocation145_spill] sm:$0xff] }
 0x47d   : > { %v15717_v44 = vpop.eup %15716  ;;  %12363 = vst [vmem:[%s18333_s17 + $0x330] sm:$0xff] %v15715_v62  ;;  %15736 = vrcp.f32 %v11524_v25  ;;  %v12812_v21 = vmul.f32 -1.442695, %v13760_v41 }
 0x47e   : > { %v15719_v61 = vpop.eup %15718  ;;  %v11525_v12 = vadd.f32 1.0, %v15717_v44  ;;  %15738 = vpow2.f32 %v12804_v14  ;;  %v12813_v53 = vmul.f32 -1.442695, %v13761_v3  ;;  %v4566_v22 = vpop.f32.mrb[102].mxu1 }
 0x47f   : > { %v15721_v29 = vpop.eup %15720  ;;  %v11533_v43 = vadd.f32 1.0, %v15719_v61  ;;  %15740 = vpow2.f32 %v12812_v21  ;;  %v13762_v5 = vadd.f32 %v4566_v22, %v21452_v17  ;;  %v4568_v6 = vpop.f32.mrb[103].mxu1  ;;  %6215 = vmatmul.mubr.f32.gmra.mrb[76].mxu0 %v21079_v59  ;;  %7266 = vmatmul.mubr.f32.gmra.mrb[144].mxu1 %v21085_v20 }
 0x480   : > { %v15723_v62 = vpop.eup %15722  ;;  %12371 = vst [vmem:[%s18333_s17 + $0x370] sm:$0xff] %v15721_v29  ;;  %15742 = vrcp.f32 %v11525_v12  ;;  %v13763_v25 = vadd.f32 %v4568_v6, %v21452_v17  ;;  %6220 = vmatprep.mubr.f32.mxu0 %v20889_v24  ;;  %7271 = vmatprep.mubr.f32.mxu1 %v20889_v24  ;;  %v21453_v29 = vld [vmem:[#allocation146_spill] sm:$0xff] }
 0x481   : > { %v15725_v14 = vpop.eup %15724  ;;  %12372 = vst [vmem:[%s18333_s17 + $0x378] sm:$0xff] %v15723_v62  ;;  %15744 = vrcp.f32 %v11533_v43  ;;  %v12821_v41 = vmul.f32 -1.442695, %v13762_v5 }
 0x482   : > { %v15727_v3 = vpop.eup %15726  ;;  %v11534_v44 = vadd.f32 1.0, %v15725_v14  ;;  %15746 = vpow2.f32 %v12813_v53  ;;  %v12822_v21 = vmul.f32 -1.442695, %v13763_v25  ;;  %v4573_v61 = vpop.f32.mrb[104].mxu1 }
 0x483   : > { %v15729_v22 = vpop.eup %15728  ;;  %12380 = vst [vmem:[%s18333_s17 + $0x3b8] sm:$0xff] %v15727_v3  ;;  %15748 = vpow2.f32 %v12821_v41  ;;  %v13764_v12 = vadd.f32 %v4573_v61, %v21453_v29  ;;  %v4575_v8 = vpop.f32.mrb[105].mxu1  ;;  %6222 = vmatmul.mubr.f32.gmra.mrb[78].mxu0 %v21082_v49  ;;  %7273 = vmatmul.mubr.f32.gmra.mrb[146].mxu1 %v21088_v30 }
 0x484   : > { %v15731_v6 = vpop.eup %15730  ;;  %15750 = vrcp.f32 %v11534_v44  ;;  %v11542_v43 = vadd.f32 1.0, %v15729_v22  ;;  %v13765_v5 = vadd.f32 %v4575_v8, %v21453_v29  ;;  %6227 = vmatprep.mubr.f32.mxu0 %v20889_v24  ;;  %7278 = vmatprep.mubr.f32.mxu1 %v20889_v24  ;;  %v21454_v44 = vld [vmem:[#allocation147_spill] sm:$0xff] }
 0x485   : > { %v15733_v53 = vpop.eup %15732  ;;  %v11543_v62 = vadd.f32 1.0, %v15731_v6  ;;  %15752 = vpow2.f32 %v12822_v21  ;;  %v12830_v25 = vmul.f32 -1.442695, %v13764_v12 }
 0x486   : > { %v15735_v14 = vpop.eup %15734  ;;  %15754 = vrcp.f32 %v11542_v43  ;;  %v11551_v41 = vadd.f32 1.0, %v15733_v53  ;;  %v12831_v3 = vmul.f32 -1.442695, %v13765_v5  ;;  %v4580_v61 = vpop.f32.mrb[106].mxu1 }
 0x487   : > { %v15737_v17 = vpop.eup %15736  ;;  %12381 = vst [vmem:[%s18333_s17 + $0x3c0] sm:$0xff] %v15735_v14  ;;  %15756 = vrcp.f32 %v11543_v62  ;;  %v13766_v22 = vadd.f32 %v4580_v61, %v21454_v44  ;;  %v4582_v8 = vpop.f32.mrb[107].mxu1  ;;  %6229 = vmatmul.mubr.f32.gmra.mrb[80].mxu0 %v21085_v20  ;;  %7280 = vmatmul.mubr.f32.gmra.mrb[148].mxu1 %v21091_v36 }
 0x488   : > { %v15739_v29 = vpop.eup %15738  ;;  %12389 = vst [vmem:[%s18333_s17 + $0x400] sm:$0xff] %v15737_v17  ;;  %15758 = vrcp.f32 %v11551_v41  ;;  %v13767_v21 = vadd.f32 %v4582_v8, %v21454_v44  ;;  %6234 = vmatprep.mubr.f32.mxu0 %v20889_v24  ;;  %7285 = vmatprep.mubr.f32.mxu1 %v20889_v24  ;;  %v21455_v17 = vld [vmem:[#allocation148_spill] sm:$0xff]  ;;  %v21484_v44 = vld [vmem:[#allocation69_spill] sm:$0xff] }
 0x489   : > { %v15741_v12 = vpop.eup %15740  ;;  %v11552_v6 = vadd.f32 1.0, %v15739_v29  ;;  %15760 = vpow2.f32 %v12830_v25  ;;  %v12839_v43 = vmul.f32 -1.442695, %v13766_v22 }
 0x48a   : > { %v15743_v5 = vpop.eup %15742  ;;  %v11560_v53 = vadd.f32 1.0, %v15741_v12  ;;  %15762 = vpow2.f32 %v12831_v3  ;;  %v12840_v62 = vmul.f32 -1.442695, %v13767_v21  ;;  %v4587_v14 = vpop.f32.mrb[108].mxu1 }
 0x48b   : > { %v15745_v61 = vpop.eup %15744  ;;  %12390 = vst [vmem:[%s18333_s17 + $0x408] sm:$0xff] %v15743_v5  ;;  %15764 = vrcp.f32 %v11552_v6  ;;  %v13768_v41 = vadd.f32 %v4587_v14, %v21455_v17  ;;  %v4589_v8 = vpop.f32.mrb[109].mxu1  ;;  %6236 = vmatmul.mubr.f32.gmra.mrb[82].mxu0 %v21088_v30  ;;  %7287 = vmatmul.mubr.f32.gmra.mrb[150].mxu1 %v21094_v32 }
 0x48c   : > { %v15747_v29 = vpop.eup %15746  ;;  %12398 = vst [vmem:[%s18333_s17 + $0x448] sm:$0xff] %v15745_v61  ;;  %15766 = vrcp.f32 %v11560_v53  ;;  %v13769_v25 = vadd.f32 %v4589_v8, %v21455_v17  ;;  %6241 = vmatprep.mubr.f32.mxu0 %v20889_v24  ;;  %7292 = vmatprep.mubr.f32.mxu1 %v20889_v24  ;;  %v21456_v53 = vld [vmem:[#allocation149_spill] sm:$0xff] }
 0x48d   : > { %v15749_v3 = vpop.eup %15748  ;;  %v11561_v22 = vadd.f32 1.0, %v15747_v29  ;;  %15768 = vpow2.f32 %v12839_v43  ;;  %v12848_v21 = vmul.f32 -1.442695, %v13768_v41 }
 0x48e   : > { %v15751_v12 = vpop.eup %15750  ;;  %v11569_v6 = vadd.f32 1.0, %v15749_v3  ;;  %15770 = vpow2.f32 %v12840_v62  ;;  %v4594_v5 = vpop.f32.mrb[110].mxu1  ;;  %v12849_v61 = vmul.f32 -1.442695, %v13769_v25 }
 0x48f   : > { %v15753_v14 = vpop.eup %15752  ;;  %12399 = vst [vmem:[%s18333_s17 + $0x450] sm:$0xff] %v15751_v12  ;;  %15772 = vrcp.f32 %v11561_v22  ;;  %v13770_v8 = vadd.f32 %v4594_v5, %v21456_v53  ;;  %v4596_v17 = vpop.f32.mrb[111].mxu1  ;;  %6243 = vmatmul.mubr.f32.gmra.mrb[84].mxu0 %v21091_v36  ;;  %7294 = vmatmul.mubr.f32.gmra.mrb[152].mxu1 %v21097_v19 }
 0x490   : > { %v15755_v29 = vpop.eup %15754  ;;  %15774 = vrcp.f32 %v11569_v6  ;;  %v11570_v43 = vadd.f32 1.0, %v15753_v14  ;;  %v13771_v62 = vadd.f32 %v4596_v17, %v21456_v53  ;;  %6248 = vmatprep.mubr.f32.mxu0 %v20889_v24  ;;  %7299 = vmatprep.mubr.f32.mxu1 %v20889_v24  ;;  %v21457_v6 = vld [vmem:[#allocation123_spill] sm:$0xff] }
 0x491   : > { %v15757_v41 = vpop.eup %15756  ;;  %12407 = vst [vmem:[%s18333_s17 + $0x490] sm:$0xff] %v15755_v29  ;;  %15776 = vpow2.f32 %v12848_v21  ;;  %v12857_v25 = vmul.f32 -1.442695, %v13770_v8 }
 0x492   : > { %v15759_v3 = vpop.eup %15758  ;;  %12408 = vst [vmem:[%s18333_s17 + $0x498] sm:$0xff] %v15757_v41  ;;  %15778 = vrcp.f32 %v11570_v43  ;;  %v12858_v22 = vmul.f32 -1.442695, %v13771_v62  ;;  %v4601_v12 = vpop.f32.mrb[112].mxu1 }
 0x493   : > { %v15761_v5 = vpop.eup %15760  ;;  %12416 = vst [vmem:[%s18333_s17 + $0x4d8] sm:$0xff] %v15759_v3  ;;  %15780 = vpow2.f32 %v12849_v61  ;;  %v13772_v14 = vadd.f32 %v4601_v12, %v21457_v6  ;;  %v4603_v17 = vpop.f32.mrb[113].mxu1  ;;  %6250 = vmatmul.mubr.f32.gmra.mrb[86].mxu0 %v21094_v32  ;;  %7301 = vmatmul.mubr.f32.gmra.mrb[154].mxu1 %v21100_v47 }
 0x494   : > { %v15763_v53 = vpop.eup %15762  ;;  %v11578_v21 = vadd.f32 1.0, %v15761_v5  ;;  %15782 = vpow2.f32 %v12857_v25  ;;  %v13773_v8 = vadd.f32 %v4603_v17, %v21457_v6  ;;  %6255 = vmatprep.mubr.f32.mxu0 %v20889_v24  ;;  %7306 = vmatprep.mubr.f32.mxu1 %v20889_v24  ;;  %v21458_v5 = vld [vmem:[#allocation150_spill] sm:$0xff] }
 0x495   : > { %v15765_v29 = vpop.eup %15764  ;;  %v11579_v61 = vadd.f32 1.0, %v15763_v53  ;;  %15784 = vpow2.f32 %v12858_v22  ;;  %v12866_v43 = vmul.f32 -1.442695, %v13772_v14 }
 0x496   : > { %v15767_v62 = vpop.eup %15766  ;;  %12417 = vst [vmem:[%s18333_s17 + $0x4e0] sm:$0xff] %v15765_v29  ;;  %15786 = vrcp.f32 %v11578_v21  ;;  %v12867_v41 = vmul.f32 -1.442695, %v13773_v8  ;;  %v4608_v3 = vpop.f32.mrb[114].mxu1 }
 0x497   : > { %v15769_v12 = vpop.eup %15768  ;;  %12425 = vst [vmem:[%s18333_s17 + $0x520] sm:$0xff] %v15767_v62  ;;  %15788 = vrcp.f32 %v11579_v61  ;;  %v13774_v25 = vadd.f32 %v4608_v3, %v21458_v5  ;;  %v4610_v17 = vpop.f32.mrb[115].mxu1  ;;  %6257 = vmatmul.mubr.f32.gmra.mrb[88].mxu0 %v21097_v19  ;;  %7308 = vmatmul.mubr.f32.gmra.mrb[156].mxu1 %v21103_v31 }
 0x498   : > { %v15771_v6 = vpop.eup %15770  ;;  %v11587_v53 = vadd.f32 1.0, %v15769_v12  ;;  %15790 = vpow2.f32 %v12866_v43  ;;  %v13775_v22 = vadd.f32 %v4610_v17, %v21458_v5  ;;  %6262 = vmatprep.mubr.f32.mxu0 %v20889_v24  ;;  %7313 = vmatprep.mubr.f32.mxu1 %v20889_v24  ;;  %v21459_v43 = vld [vmem:[#allocation124_spill] sm:$0xff] }
 0x499   : > { %v15773_v14 = vpop.eup %15772  ;;  %v11588_v21 = vadd.f32 1.0, %v15771_v6  ;;  %15792 = vpow2.f32 %v12867_v41  ;;  %v12875_v8 = vmul.f32 -1.442695, %v13774_v25 }
 0x49a   : > { %v15775_v29 = vpop.eup %15774  ;;  %12426 = vst [vmem:[%s18333_s17 + $0x528] sm:$0xff] %v15773_v14  ;;  %15794 = vrcp.f32 %v11587_v53  ;;  %v12876_v61 = vmul.f32 -1.442695, %v13775_v22  ;;  %v4615_v62 = vpop.f32.mrb[116].mxu1 }
 0x49b   : > { %v15777_v3 = vpop.eup %15776  ;;  %12434 = vst [vmem:[%s18333_s17 + $0x568] sm:$0xff] %v15775_v29  ;;  %15796 = vrcp.f32 %v11588_v21  ;;  %v13776_v12 = vadd.f32 %v4615_v62, %v21459_v43  ;;  %v4617_v17 = vpop.f32.mrb[117].mxu1  ;;  %6264 = vmatmul.mubr.f32.gmra.mrb[90].mxu0 %v21100_v47  ;;  %7315 = vmatmul.mubr.f32.gmra.mrb[158].mxu1 %v21106_v18 }
 0x49c   : > { %v15779_v5 = vpop.eup %15778  ;;  %v11596_v6 = vadd.f32 1.0, %v15777_v3  ;;  %15798 = vpow2.f32 %v12875_v8  ;;  %v13777_v41 = vadd.f32 %v4617_v17, %v21459_v43  ;;  %6269 = vmatprep.mubr.f32.mxu0 %v20889_v24  ;;  %7320 = vmatprep.mubr.f32.mxu1 %v20889_v24  ;;  %v21460_v8 = vld [vmem:[#allocation151_spill] sm:$0xff] }
 0x49d   : > { %v15781_v25 = vpop.eup %15780  ;;  %12435 = vst [vmem:[%s18333_s17 + $0x570] sm:$0xff] %v15779_v5  ;;  %15800 = vpow2.f32 %v12876_v61  ;;  %v12884_v53 = vmul.f32 -1.442695, %v13776_v12 }
 0x49e   : > { %v15783_v22 = vpop.eup %15782  ;;  %15802 = vrcp.f32 %v11596_v6  ;;  %v11597_v14 = vadd.f32 1.0, %v15781_v25  ;;  %v4622_v21 = vpop.f32.mrb[118].mxu1  ;;  %v12885_v3 = vmul.f32 -1.442695, %v13777_v41 }
 0x49f   : > { %v15785_v29 = vpop.eup %15784  ;;  %v11605_v62 = vadd.f32 1.0, %v15783_v22  ;;  %15804 = vpow2.f32 %v12884_v53  ;;  %v13778_v17 = vadd.f32 %v4622_v21, %v21460_v8  ;;  %v4624_v43 = vpop.f32.mrb[119].mxu1  ;;  %6271 = vmatmul.mubr.f32.gmra.mrb[92].mxu0 %v21103_v31  ;;  %7322 = vmatmul.mubr.f32.gmra.mrb[160].mxu1 %v17000_v26 }
 0x4a0   : > { %v15787_v5 = vpop.eup %15786  ;;  %15806 = vrcp.f32 %v11597_v14  ;;  %v11606_v61 = vadd.f32 1.0, %v15785_v29  ;;  %v13779_v12 = vadd.f32 %v4624_v43, %v21460_v8  ;;  %6276 = vmatprep.mubr.f32.mxu0 %v20889_v24  ;;  %7327 = vmatprep.mubr.f32.mxu1 %v20889_v24  ;;  %v21461_v29 = vld [vmem:[#allocation152_spill] sm:$0xff] }
 0x4a1   : > { %v15789_v6 = vpop.eup %15788  ;;  %12443 = vst [vmem:[%s18333_s17 + $0x5b0] sm:$0xff] %v15787_v5  ;;  %15808 = vrcp.f32 %v11605_v62  ;;  %v12893_v41 = vmul.f32 -1.442695, %v13778_v17 }
 0x4a2   : > { %v15791_v25 = vpop.eup %15790  ;;  %12444 = vst [vmem:[%s18333_s17 + $0x5b8] sm:$0xff] %v15789_v6  ;;  %15810 = vrcp.f32 %v11606_v61  ;;  %v4629_v53 = vpop.f32.mrb[120].mxu1  ;;  %v12894_v14 = vmul.f32 -1.442695, %v13779_v12 }
 0x4a3   : > { %v15793_v22 = vpop.eup %15792  ;;  %v11614_v21 = vadd.f32 1.0, %v15791_v25  ;;  %15812 = vpow2.f32 %v12885_v3  ;;  %v13780_v43 = vadd.f32 %v4629_v53, %v21461_v29  ;;  %v4631_v8 = vpop.f32.mrb[121].mxu1  ;;  %6278 = vmatmul.mubr.f32.gmra.mrb[94].mxu0 %v21106_v18  ;;  %7329 = vmatmul.mubr.f32.gmra.mrb[162].mxu1 %v17008_v35 }
 0x4a4   : > { %v15795_v5 = vpop.eup %15794  ;;  %v11615_v62 = vadd.f32 1.0, %v15793_v22  ;;  %15814 = vpow2.f32 %v12893_v41  ;;  %v13781_v17 = vadd.f32 %v4631_v8, %v21461_v29  ;;  %6283 = vmatprep.mubr.f32.mxu0 %v20889_v24  ;;  %7334 = vmatprep.mubr.f32.mxu1 %v20889_v24 }
 0x4a5   : > { %v15797_v61 = vpop.eup %15796  ;;  %12452 = vst [vmem:[%s18333_s17 + $0x5f8] sm:$0xff] %v15795_v5  ;;  %15816 = vrcp.f32 %v11614_v21  ;;  %v12902_v3 = vmul.f32 -1.442695, %v13780_v43 }
 0x4a6   : > { %v15799_v12 = vpop.eup %15798  ;;  %12453 = vst [vmem:[%s18333_s17 + $0x600] sm:$0xff] %v15797_v61  ;;  %15818 = vrcp.f32 %v11615_v62  ;;  %v4636_v6 = vpop.f32.mrb[122].mxu1  ;;  %v12903_v22 = vmul.f32 -1.442695, %v13781_v17 }
 0x4a7   : > { %v15801_v25 = vpop.eup %15800  ;;  %v11623_v53 = vadd.f32 1.0, %v15799_v12  ;;  %15820 = vpow2.f32 %v12894_v14  ;;  %v13782_v41 = vadd.f32 %v4636_v6, %v18627_v4  ;;  %v4638_v8 = vpop.f32.mrb[123].mxu1  ;;  %6285 = vmatmul.mubr.f32.gmra.mrb[96].mxu0 %v17000_v26  ;;  %7336 = vmatmul.mubr.f32.gmra.mrb[164].mxu1 %v17028_v7 }
 0x4a8   : > { %v15803_v29 = vpop.eup %15802  ;;  %v11624_v21 = vadd.f32 1.0, %v15801_v25  ;;  %15822 = vpow2.f32 %v12902_v3  ;;  %v13783_v43 = vadd.f32 %v4638_v8, %v18627_v4  ;;  %6290 = vmatprep.mubr.f32.mxu0 %v20889_v24  ;;  %7341 = vmatprep.mubr.f32.mxu1 %v20889_v24  ;;  %v21462_v3 = vld [vmem:[#allocation154_spill] sm:$0xff]  ;;  %v21483_v4 = vld [vmem:[#allocation65_spill] sm:$0xff] }
 0x4a9   : > { %v15805_v5 = vpop.eup %15804  ;;  %12461 = vst [vmem:[%s18333_s17 + $0x640] sm:$0xff] %v15803_v29  ;;  %15824 = vrcp.f32 %v11623_v53  ;;  %v12911_v14 = vmul.f32 -1.442695, %v13782_v41 }
 0x4aa   : > { %v15807_v62 = vpop.eup %15806  ;;  %15826 = vrcp.f32 %v11624_v21  ;;  %v11632_v17 = vadd.f32 1.0, %v15805_v5  ;;  %v12912_v61 = vmul.f32 -1.442695, %v13783_v43  ;;  %v4643_v12 = vpop.f32.mrb[124].mxu1 }
 0x4ab   : > { %v15809_v6 = vpop.eup %15808  ;;  %12462 = vst [vmem:[%s18333_s17 + $0x648] sm:$0xff] %v15807_v62  ;;  %15828 = vpow2.f32 %v12903_v22  ;;  %v13784_v25 = vadd.f32 %v4643_v12, %v21462_v3  ;;  %v4645_v8 = vpop.f32.mrb[125].mxu1  ;;  %6292 = vmatmul.mubr.f32.gmra.mrb[98].mxu0 %v17008_v35  ;;  %7343 = vmatmul.mubr.f32.gmra.mrb[166].mxu1 %v17048_v33 }
 0x4ac   : > { %v15811_v29 = vpop.eup %15810  ;;  %12470 = vst [vmem:[%s18333_s17 + $0x688] sm:$0xff] %v15809_v6  ;;  %15830 = vrcp.f32 %v11632_v17  ;;  %v13785_v53 = vadd.f32 %v4645_v8, %v21462_v3  ;;  %6297 = vmatprep.mubr.f32.mxu0 %v20889_v24  ;;  %7348 = vmatprep.mubr.f32.mxu1 %v20889_v24  ;;  %v21482_v3 = vld [vmem:[#allocation60_spill] sm:$0xff] }
 0x4ad   : > { %v15813_v41 = vpop.eup %15812  ;;  %12471 = vst [vmem:[%s18333_s17 + $0x690] sm:$0xff] %v15811_v29  ;;  %15832 = vpow2.f32 %v12911_v14  ;;  %v12920_v22 = vmul.f32 -1.442695, %v13784_v25 }
 0x4ae   : > { %v15815_v21 = vpop.eup %15814  ;;  %v11633_v43 = vadd.f32 1.0, %v15813_v41  ;;  %15834 = vpow2.f32 %v12912_v61  ;;  %v12921_v5 = vmul.f32 -1.442695, %v13785_v53  ;;  %v4650_v62 = vpop.f32.mrb[126].mxu1 }
 0x4af   : > { %v15817_v12 = vpop.eup %15816  ;;  %v11641_v6 = vadd.f32 1.0, %v15815_v21  ;;  %15836 = vpow2.f32 %v12920_v22  ;;  %v13786_v17 = vadd.f32 %v4650_v62, %v18651_v45  ;;  %v4652_v8 = vpop.f32.mrb[127].mxu1  ;;  %6299 = vmatmul.mubr.f32.gmra.mrb[100].mxu0 %v17028_v7  ;;  %7350 = vmatmul.mubr.f32.gmra.mrb[168].mxu1 %v17081_v57 }
 0x4b0   : > { %v15819_v29 = vpop.eup %15818  ;;  %12479 = vst [vmem:[%s18333_s17 + $0x6d0] sm:$0xff] %v15817_v12  ;;  %15838 = vrcp.f32 %v11633_v43  ;;  %v13787_v14 = vadd.f32 %v4652_v8, %v18651_v45  ;;  %6304 = vmatprep.mubr.f32.mxu0 %v20889_v24  ;;  %7355 = vmatprep.mubr.f32.mxu1 %v20889_v24  ;;  %v21481_v45 = vld [vmem:[#allocation55_spill] sm:$0xff] }
 0x4b1   : > { %v15821_v61 = vpop.eup %15820  ;;  %12480 = vst [vmem:[%s18333_s17 + $0x6d8] sm:$0xff] %v15819_v29  ;;  %15840 = vrcp.f32 %v11641_v6  ;;  %v12929_v25 = vmul.f32 -1.442695, %v13786_v17 }
 0x4b2   : > { %v15823_v53 = vpop.eup %15822  ;;  %v11642_v41 = vadd.f32 1.0, %v15821_v61  ;;  %15842 = vpow2.f32 %v12921_v5  ;;  %v12930_v22 = vmul.f32 -1.442695, %v13787_v14 }
 0x4b3   : > { %v15825_v21 = vpop.eup %15824  ;;  %v11650_v62 = vadd.f32 1.0, %v15823_v53  ;;  %15844 = vpow2.f32 %v12929_v25  ;;  %6306 = vmatmul.mubr.f32.gmra.mrb[102].mxu0 %v17048_v33  ;;  %7357 = vmatmul.mubr.f32.gmra.mrb[170].mxu1 %v17088_v27 }
 0x4b4   : > { %v15827_v43 = vpop.eup %15826  ;;  %12488 = vst [vmem:[%s18333_s17 + $0x718] sm:$0xff] %v15825_v21  ;;  %15846 = vrcp.f32 %v11642_v41  ;;  %6311 = vmatprep.mubr.f32.mxu0 %v20889_v24  ;;  %7362 = vmatprep.mubr.f32.mxu1 %v20889_v24 }
 0x4b5   : > { %v15829_v12 = vpop.eup %15828  ;;  %12489 = vst [vmem:[%s18333_s17 + $0x720] sm:$0xff] %v15827_v43  ;;  %15848 = vrcp.f32 %v11650_v62 }
 0x4b6   : > { %v15831_v5 = vpop.eup %15830  ;;  %v11651_v6 = vadd.f32 1.0, %v15829_v12  ;;  %15850 = vpow2.f32 %v12930_v22 }
 0x4b7   : > { %v15833_v17 = vpop.eup %15832  ;;  %12497 = vst [vmem:[%s18333_s17 + $0x760] sm:$0xff] %v15831_v5  ;;  %6313 = vmatmul.mubr.f32.gmra.mrb[104].mxu0 %v17081_v57  ;;  %7364 = vmatmul.mubr.f32.gmra.mrb[172].mxu1 %v17120_v16 }
 0x4b8   : > { %v15835_v8 = vpop.eup %15834  ;;  %15852 = vrcp.f32 %v11651_v6  ;;  %v11659_v29 = vadd.f32 1.0, %v15833_v17  ;;  %6318 = vmatprep.mubr.f32.mxu0 %v20889_v24  ;;  %7369 = vmatprep.mubr.f32.mxu1 %v20889_v24 }
 0x4b9   : > { %v15837_v14 = vpop.eup %15836  ;;  %v11660_v61 = vadd.f32 1.0, %v15835_v8 }
 0x4ba   : > { %v15839_v25 = vpop.eup %15838  ;;  %15854 = vrcp.f32 %v11659_v29  ;;  %v11668_v53 = vadd.f32 1.0, %v15837_v14 }
 0x4bb   : > { %v15841_v41 = vpop.eup %15840  ;;  %12498 = vst [vmem:[%s18333_s17 + $0x768] sm:$0xff] %v15839_v25  ;;  %15856 = vrcp.f32 %v11660_v61  ;;  %6320 = vmatmul.mubr.f32.gmra.mrb[106].mxu0 %v17088_v27  ;;  %7371 = vmatmul.mubr.f32.gmra.mrb[174].mxu1 %v17140_v60 }
 0x4bc   : > { %v15843_v22 = vpop.eup %15842  ;;  %12506 = vst [vmem:[%s18333_s17 + $0x7a8] sm:$0xff] %v15841_v41  ;;  %15858 = vrcp.f32 %v11668_v53  ;;  %6325 = vmatprep.mubr.f32.mxu0 %v20889_v24  ;;  %7376 = vmatprep.mubr.f32.mxu1 %v20889_v24 }
 0x4bd   : > { %v15845_v21 = vpop.eup %15844  ;;  %v11669_v62 = vadd.f32 1.0, %v15843_v22  ;;  %v265_v22 = vld [vmem:[%s16617_s4 + $0xd0] sm:$0x3] }
 0x4be   : > { %v15847_v43 = vpop.eup %15846  ;;  %v11677_v12 = vadd.f32 1.0, %v15845_v21  ;;  %v19336_v21 = vsel %vm555_vm1, %v265_v22, 0 }
 0x4bf   : > { %v15849_v5 = vpop.eup %15848  ;;  %12507 = vst [vmem:[%s18333_s17 + $0x7b0] sm:$0xff] %v15847_v43  ;;  %15860 = vrcp.f32 %v11669_v62  ;;  %6327 = vmatmul.mubr.f32.gmra.mrb[108].mxu0 %v17120_v16  ;;  %7378 = vmatmul.mubr.f32.gmra.mrb[176].mxu1 %v17167_v1  ;;  %v19343_v62 = vand.u32 4294901760, %v19336_v21  ;;  %v21463_v43 = vld [vmem:[#allocation156_spill] sm:$0xff] }
 0x4c0   : > { %v15851_v6 = vpop.eup %15850  ;;  %12515 = vst [vmem:[%s18333_s17 + $0x7f0] sm:$0xff] %v15849_v5  ;;  %15862 = vrcp.f32 %v11677_v12  ;;  %6332 = vmatprep.mubr.f32.mxu0 %v20889_v24  ;;  %7383 = vmatprep.mubr.f32.mxu1 %v20889_v24  ;;  %v21464_v12 = vld [vmem:[#allocation9_spill] sm:$0xff]  ;;  %v21465_v5 = vld [vmem:[#allocation136_spill] sm:$0xff] }
 0x4c1   : > { %v11678_v17 = vadd.f32 1.0, %v15851_v6  ;;  %v21466_v6 = vand.u32 4294901760, %v21465_v5 }
 0x4c2   : > { %v15853_v8 = vpop.eup %15852 }
 0x4c3   : > { %12516 = vst [vmem:[%s18333_s17 + $0x7f8] sm:$0xff] %v15853_v8  ;;  %15864 = vrcp.f32 %v11678_v17  ;;  %6334 = vmatmul.mubr.f32.gmra.mrb[110].mxu0 %v17140_v60  ;;  %7385 = vmatmul.mubr.f32.gmra.mrb[178].mxu1 %v17175_v39  ;;  %v21467_v17 = vld [vmem:[#allocation138_spill] sm:$0xff] }
 0x4c4   : > { %v15855_v29 = vpop.eup %15854  ;;  %6339 = vmatprep.mubr.f32.mxu0 %v20889_v24  ;;  %7390 = vmatprep.mubr.f32.mxu1 %v20889_v24  ;;  %v21468_v8 = vand.u32 4294901760, %v21467_v17 }
 0x4c5   : > { %v15857_v14 = vpop.eup %15856  ;;  %12524 = vst [vmem:[%s18333_s17 + $0x838] sm:$0xff] %v15855_v29 }
 0x4c6   : > { %v15859_v61 = vpop.eup %15858  ;;  %12525 = vst [vmem:[%s18333_s17 + $0x840] sm:$0xff] %v15857_v14  ;;  %v13560_v29 = vpack.c.bf16 %v21468_v8, %v21466_v6  ;;  %v16506_v14 = vld [vmem:[%s16617_s4 + $0x40] sm:$0xff] }
 0x4c7   : > { %12533 = vst [vmem:[%s18333_s17 + $0x880] sm:$0xff] %v15859_v61  ;;  %6341 = vmatmul.mubr.f32.gmra.mrb[112].mxu0 %v17167_v1  ;;  %7392 = vmatmul.mubr.f32.gmra.mrb[180].mxu1 %v17211_v54  ;;  %v21469_v61 = vand.u32 4294901760, %v19105_v23  ;;  %v21471_v23 = vld [vmem:[#allocation11_spill] sm:$0xff] }
 0x4c8   : > { %6346 = vmatprep.mubr.f32.mxu0 %v20889_v24  ;;  %7397 = vmatprep.mubr.f32.mxu1 %v20889_v24 }
 0x4c9   : > { %v15861_v25 = vpop.eup %15860 }
 0x4ca   : > { %v15863_v53 = vpop.eup %15862  ;;  %12534 = vst [vmem:[%s18333_s17 + $0x888] sm:$0xff] %v15861_v25  ;;  %v19355_v25 = vsub.f32 %v16506_v14, %v21469_v61  ;;  %v21472_v14 = vld [vmem:[#allocation19_spill] sm:$0xff] }
 0x4cb   : > { %12542 = vst [vmem:[%s18333_s17 + $0x8c8] sm:$0xff] %v15863_v53  ;;  %6348 = vmatmul.mubr.f32.gmra.mrb[114].mxu0 %v17175_v39  ;;  %7399 = vmatmul.mubr.f32.gmra.mrb[182].mxu1 %v17221_v9  ;;  %v16507_v53 = vld [vmem:[%s16617_s4 + $0x88] sm:$0xff] }
 0x4cc   : > { %6353 = vmatprep.mubr.f32.mxu0 %v20889_v24  ;;  %7404 = vmatprep.mubr.f32.mxu1 %v20889_v24  ;;  %v20804_v5 = vand.u32 4294901760, %v19355_v25 }
 0x4cd   : > { %v15865_v41 = vpop.eup %15864 }
 0x4ce   : > { %12543 = vst [vmem:[%s18333_s17 + $0x8d0] sm:$0xff] %v15865_v41  ;;  %v21470_v41 = vand.u32 4294901760, %v19108_v51  ;;  %v9119_v51 = vsub.f32 %v19355_v25, %v20804_v5  ;;  %v21480_v5 = vld [vmem:[#allocation51_spill] sm:$0xff] }
 0x4cf   : > { %6355 = vmatmul.mubr.f32.gmra.mrb[116].mxu0 %v17211_v54  ;;  %7406 = vmatmul.mubr.f32.gmra.mrb[184].mxu1 %v17257_v63 }
 0x4d0   : > { %6360 = vmatprep.mubr.f32.mxu0 %v20889_v24  ;;  %7411 = vmatprep.mubr.f32.mxu1 %v20889_v24  ;;  %v19360_v22 = vsub.f32 %v16507_v53, %v21470_v41  ;;  %v9120_v8 = vand.u32 4294901760, %v9119_v51  ;;  %v21473_v53 = vld [vmem:[#allocation22_spill] sm:$0xff]  ;;  %v21474_v41 = vld [vmem:[#allocation28_spill] sm:$0xff] }
 0x4d1   : > { %v21475_v51 = vld [vmem:[#allocation32_spill] sm:$0xff] }
 0x4d2   : > { %v20803_v6 = vand.u32 4294901760, %v19360_v22 }
 0x4d3   : > { %6362 = vmatmul.mubr.f32.gmra.mrb[118].mxu0 %v17221_v9  ;;  %7413 = vmatmul.mubr.f32.gmra.mrb[186].mxu1 %v21138_v55 }
 0x4d4   : > { %6367 = vmatprep.mubr.f32.mxu0 %v20889_v24  ;;  %7418 = vmatprep.mubr.f32.mxu1 %v20889_v24  ;;  %v9126_v17 = vsub.f32 %v19360_v22, %v20803_v6  ;;  %v21479_v6 = vld [vmem:[#allocation46_spill] sm:$0xff] }
 0x4d7   : > { %6369 = vmatmul.mubr.f32.gmra.mrb[120].mxu0 %v17257_v63  ;;  %7420 = vmatmul.mubr.f32.gmra.mrb[188].mxu1 %v21145_v10 }
 0x4d8   : > { %6374 = vmatprep.mubr.f32.mxu0 %v20889_v24  ;;  %7425 = vmatprep.mubr.f32.mxu1 %v20889_v24 }
 0x4db   : > { %6376 = vmatmul.mubr.f32.gmra.mrb[122].mxu0 %v21138_v55  ;;  %7427 = vmatmul.mubr.f32.gmra.mrb[190].mxu1 %v21149_v58 }
 0x4dc   : > { %6381 = vmatprep.mubr.f32.mxu0 %v20889_v24  ;;  %7509 = vmatprep.mubr.f32.mxu1 %v20889_v24 }
 0x4df   : > { %6383 = vmatmul.mubr.f32.gmra.mrb[124].mxu0 %v21145_v10  ;;  %7512 = vmatmul.mubr.f32.vlgmr.msra.gmra.mrb[128].mxu1 %v21322_v13 }
 0x4e0   : > { %6388 = vmatprep.mubr.f32.mxu0 %v20889_v24  ;;  %7517 = vmatprep.mubr.f32.mxu1 %v20889_v24 }
 0x4e1   : > { %13559 = vmatpush1.bf16.msra.mxu1 %v18729_v50 }
 0x4e2   : > { %7775 = vmatprep.subr.mxu1 %v18732_v0 }
 0x4e3   : > { %6390 = vmatmul.mubr.f32.gmra.mrb[126].mxu0 %v21149_v58  ;;  %7520 = vmatmul.mubr.f32.gmra.mrb[130].mxu1 %v21325_v2 }
 0x4e4   : > { %6466 = vmatprep.mubr.f32.mxu0 %v20889_v24  ;;  %7525 = vmatprep.mubr.f32.mxu1 %v20889_v24 }
 0x4e5   : > { %7777 = vmatpush1.msra.mxu1 %v21463_v43 }
 0x4e6   : > { %13561 = vmatprep.subr.bf16.mxu1 %v13560_v29  ;;  %v9127_v29 = vand.u32 4294901760, %v9126_v17  ;;  %v21476_v17 = vld [vmem:[#allocation36_spill] sm:$0xff] }
 0x4e7   : > { %6468 = vmatmul.mubr.f32.vlgmr.msra.gmra.mrb[64].mxu0 %v21061_v52  ;;  %7528 = vmatmul.mubr.f32.gmra.mrb[132].mxu1 %v21464_v12 }
 0x4e8   : > { %13571 = vmatpush3.bf16.msra.mxu0 %v19125_v11  ;;  %6473 = vmatprep.mubr.f32.mxu0 %v20889_v24  ;;  %v19381_v61 = vpack.c.bf16 %v9127_v29, %v9120_v8  ;;  %v21477_v8 = vld [vmem:[#allocation41_spill] sm:$0xff] }
 0x4e9   : > { %7533 = vmatprep.mubr.f32.mxu1 %v20889_v24  ;;  %13152 = vmatprep.subr.mxu0 %v19343_v62  ;;  %v21478_v29 = vld [vmem:[#allocation45_spill] sm:$0xff] }
 0x4eb   : > { %6475 = vmatmul.mubr.f32.gmra.mrb[66].mxu0 %v21063_v38  ;;  %7536 = vmatmul.mubr.f32.gmra.mrb[134].mxu1 %v21471_v23 }
 0x4ec   : > { %6480 = vmatprep.mubr.f32.mxu0 %v20889_v24  ;;  %7541 = vmatprep.mubr.f32.mxu1 %v20889_v24 }
 0x4ed   : > { %13153 = vmatpush3.msra.mxu0 %v19343_v62 }
 0x4ee   : > { %13573 = vmatprep.subr.bf16.mxu0 %v19381_v61 }
 0x4ef   : > { %6482 = vmatmul.mubr.f32.gmra.mrb[68].mxu0 %v21065_v48  ;;  %7544 = vmatmul.mubr.f32.gmra.mrb[136].mxu1 %v21472_v14 }
 0x4f0   : > { %6487 = vmatprep.mubr.f32.mxu0 %v20889_v24  ;;  %7549 = vmatprep.mubr.f32.mxu1 %v20889_v24 }
 0x4f3   : > { %6489 = vmatmul.mubr.f32.gmra.mrb[70].mxu0 %v21070_v56  ;;  %7552 = vmatmul.mubr.f32.gmra.mrb[138].mxu1 %v21473_v53 }
 0x4f4   : > { %6494 = vmatprep.mubr.f32.mxu0 %v20889_v24  ;;  %7557 = vmatprep.mubr.f32.mxu1 %v20889_v24 }
 0x4f7   : > { %6496 = vmatmul.mubr.f32.gmra.mrb[72].mxu0 %v21073_v46  ;;  %7560 = vmatmul.mubr.f32.gmra.mrb[140].mxu1 %v21474_v41 }
 0x4f8   : > { %6501 = vmatprep.mubr.f32.mxu0 %v20889_v24  ;;  %7565 = vmatprep.mubr.f32.mxu1 %v20889_v24 }
 0x4fb   : > { %6503 = vmatmul.mubr.f32.gmra.mrb[74].mxu0 %v21076_v34  ;;  %7568 = vmatmul.mubr.f32.gmra.mrb[142].mxu1 %v21475_v51 }
 0x4fc   : > { %6508 = vmatprep.mubr.f32.mxu0 %v20889_v24  ;;  %7573 = vmatprep.mubr.f32.mxu1 %v20889_v24 }
 0x4ff   : > { %6510 = vmatmul.mubr.f32.gmra.mrb[76].mxu0 %v21079_v59  ;;  %7576 = vmatmul.mubr.f32.gmra.mrb[144].mxu1 %v21476_v17 }
 0x500   : > { %6515 = vmatprep.mubr.f32.mxu0 %v20889_v24  ;;  %7581 = vmatprep.mubr.f32.mxu1 %v20889_v24 }
 0x503   : > { %6517 = vmatmul.mubr.f32.gmra.mrb[78].mxu0 %v21082_v49  ;;  %7584 = vmatmul.mubr.f32.gmra.mrb[146].mxu1 %v21477_v8 }
 0x504   : > { %6522 = vmatprep.mubr.f32.mxu0 %v20889_v24  ;;  %7589 = vmatprep.mubr.f32.mxu1 %v20889_v24 }
 0x507   : > { %6524 = vmatmul.mubr.f32.gmra.mrb[80].mxu0 %v21085_v20  ;;  %7592 = vmatmul.mubr.f32.gmra.mrb[148].mxu1 %v21478_v29 }
 0x508   : > { %6529 = vmatprep.mubr.f32.mxu0 %v20889_v24  ;;  %7597 = vmatprep.mubr.f32.mxu1 %v20889_v24 }
 0x50b   : > { %6531 = vmatmul.mubr.f32.gmra.mrb[82].mxu0 %v21088_v30  ;;  %7600 = vmatmul.mubr.f32.gmra.mrb[150].mxu1 %v21479_v6 }
 0x50c   : > { %6536 = vmatprep.mubr.f32.mxu0 %v20889_v24  ;;  %7605 = vmatprep.mubr.f32.mxu1 %v20889_v24 }
 0x50f   : > { %6538 = vmatmul.mubr.f32.gmra.mrb[84].mxu0 %v21091_v36  ;;  %7608 = vmatmul.mubr.f32.gmra.mrb[152].mxu1 %v21480_v5  ;;  %v21499_v5 = vld [vmem:[#allocation118_spill] sm:$0xff] }
 0x510   : > { %6543 = vmatprep.mubr.f32.mxu0 %v20889_v24  ;;  %7613 = vmatprep.mubr.f32.mxu1 %v20889_v24 }
 0x513   : > { %6545 = vmatmul.mubr.f32.gmra.mrb[86].mxu0 %v21094_v32  ;;  %7616 = vmatmul.mubr.f32.gmra.mrb[154].mxu1 %v21481_v45  ;;  %v19442_v45 = vpack.c.bf16 %v19360_v22, %v19355_v25 }
 0x514   : > { %6550 = vmatprep.mubr.f32.mxu0 %v20889_v24  ;;  %7621 = vmatprep.mubr.f32.mxu1 %v20889_v24 }
 0x517   : > { %6552 = vmatmul.mubr.f32.gmra.mrb[88].mxu0 %v21097_v19  ;;  %7624 = vmatmul.mubr.f32.gmra.mrb[156].mxu1 %v21482_v3  ;;  %v21485_v3 = vld [vmem:[#allocation72_spill] sm:$0xff] }
 0x518   : > { %6557 = vmatprep.mubr.f32.mxu0 %v20889_v24  ;;  %7629 = vmatprep.mubr.f32.mxu1 %v20889_v24 }
 0x51b   : > { %6559 = vmatmul.mubr.f32.gmra.mrb[90].mxu0 %v21100_v47  ;;  %7632 = vmatmul.mubr.f32.gmra.mrb[158].mxu1 %v21483_v4  ;;  %v21486_v4 = vld [vmem:[#allocation76_spill] sm:$0xff] }
 0x51c   : > { %6564 = vmatprep.mubr.f32.mxu0 %v20889_v24  ;;  %7637 = vmatprep.mubr.f32.mxu1 %v20889_v24 }
 0x51f   : > { %6566 = vmatmul.mubr.f32.gmra.mrb[92].mxu0 %v21103_v31  ;;  %7640 = vmatmul.mubr.f32.gmra.mrb[160].mxu1 %v21484_v44  ;;  %v21487_v44 = vld [vmem:[#allocation77_spill] sm:$0xff] }
 0x520   : > { %6571 = vmatprep.mubr.f32.mxu0 %v20889_v24  ;;  %7645 = vmatprep.mubr.f32.mxu1 %v20889_v24 }
 0x523   : > { %6573 = vmatmul.mubr.f32.gmra.mrb[94].mxu0 %v21106_v18  ;;  %7648 = vmatmul.mubr.f32.gmra.mrb[162].mxu1 %v21485_v3  ;;  %v21488_v3 = vld [vmem:[#allocation82_spill] sm:$0xff] }
 0x524   : > { %6578 = vmatprep.mubr.f32.mxu0 %v20889_v24  ;;  %7653 = vmatprep.mubr.f32.mxu1 %v20889_v24 }
 0x527   : > { %6580 = vmatmul.mubr.f32.gmra.mrb[96].mxu0 %v17000_v26  ;;  %7656 = vmatmul.mubr.f32.gmra.mrb[164].mxu1 %v21486_v4  ;;  %v21489_v4 = vld [vmem:[#allocation83_spill] sm:$0xff] }
 0x528   : > { %6585 = vmatprep.mubr.f32.mxu0 %v20889_v24  ;;  %7661 = vmatprep.mubr.f32.mxu1 %v20889_v24 }
 0x52b   : > { %6587 = vmatmul.mubr.f32.gmra.mrb[98].mxu0 %v17008_v35  ;;  %7664 = vmatmul.mubr.f32.gmra.mrb[166].mxu1 %v21487_v44  ;;  %v21490_v44 = vld [vmem:[#allocation88_spill] sm:$0xff] }
 0x52c   : > { %6592 = vmatprep.mubr.f32.mxu0 %v20889_v24  ;;  %7669 = vmatprep.mubr.f32.mxu1 %v20889_v24 }
 0x52f   : > { %6594 = vmatmul.mubr.f32.gmra.mrb[100].mxu0 %v17028_v7  ;;  %7672 = vmatmul.mubr.f32.gmra.mrb[168].mxu1 %v21488_v3  ;;  %v21491_v3 = vld [vmem:[#allocation91_spill] sm:$0xff] }
 0x530   : > { %6599 = vmatprep.mubr.f32.mxu0 %v20889_v24  ;;  %7677 = vmatprep.mubr.f32.mxu1 %v20889_v24 }
 0x533   : > { %6601 = vmatmul.mubr.f32.gmra.mrb[102].mxu0 %v17048_v33  ;;  %7680 = vmatmul.mubr.f32.gmra.mrb[170].mxu1 %v21489_v4  ;;  %v21492_v4 = vld [vmem:[#allocation94_spill] sm:$0xff] }
 0x534   : > { %6606 = vmatprep.mubr.f32.mxu0 %v20889_v24  ;;  %7685 = vmatprep.mubr.f32.mxu1 %v20889_v24 }
 0x537   : > { %6608 = vmatmul.mubr.f32.gmra.mrb[104].mxu0 %v17081_v57  ;;  %7688 = vmatmul.mubr.f32.gmra.mrb[172].mxu1 %v21490_v44  ;;  %v21493_v44 = vld [vmem:[#allocation95_spill] sm:$0xff] }
 0x538   : > { %6613 = vmatprep.mubr.f32.mxu0 %v20889_v24  ;;  %7693 = vmatprep.mubr.f32.mxu1 %v20889_v24 }
 0x53b   : > { %6615 = vmatmul.mubr.f32.gmra.mrb[106].mxu0 %v17088_v27  ;;  %7696 = vmatmul.mubr.f32.gmra.mrb[174].mxu1 %v21491_v3  ;;  %v21494_v3 = vld [vmem:[#allocation100_spill] sm:$0xff] }
 0x53c   : > { %6620 = vmatprep.mubr.f32.mxu0 %v20889_v24  ;;  %7701 = vmatprep.mubr.f32.mxu1 %v20889_v24 }
 0x53f   : > { %6622 = vmatmul.mubr.f32.gmra.mrb[108].mxu0 %v17120_v16  ;;  %7704 = vmatmul.mubr.f32.gmra.mrb[176].mxu1 %v21492_v4  ;;  %v21495_v4 = vld [vmem:[#allocation101_spill] sm:$0xff] }
 0x540   : > { %6627 = vmatprep.mubr.f32.mxu0 %v20889_v24  ;;  %7709 = vmatprep.mubr.f32.mxu1 %v20889_v24 }
 0x543   : > { %6629 = vmatmul.mubr.f32.gmra.mrb[110].mxu0 %v17140_v60  ;;  %7712 = vmatmul.mubr.f32.gmra.mrb[178].mxu1 %v21493_v44  ;;  %v21496_v44 = vld [vmem:[#allocation107_spill] sm:$0xff] }
 0x544   : > { %6634 = vmatprep.mubr.f32.mxu0 %v20889_v24  ;;  %7717 = vmatprep.mubr.f32.mxu1 %v20889_v24 }
 0x547   : > { %6636 = vmatmul.mubr.f32.gmra.mrb[112].mxu0 %v17167_v1  ;;  %7720 = vmatmul.mubr.f32.gmra.mrb[180].mxu1 %v21494_v3  ;;  %v21497_v3 = vld [vmem:[#allocation108_spill] sm:$0xff] }
 0x548   : > { %6641 = vmatprep.mubr.f32.mxu0 %v20889_v24  ;;  %7725 = vmatprep.mubr.f32.mxu1 %v20889_v24 }
 0x54b   : > { %6643 = vmatmul.mubr.f32.gmra.mrb[114].mxu0 %v17175_v39  ;;  %7728 = vmatmul.mubr.f32.gmra.mrb[182].mxu1 %v21495_v4  ;;  %v21498_v4 = vld [vmem:[#allocation114_spill] sm:$0xff] }
 0x54c   : > { %6648 = vmatprep.mubr.f32.mxu0 %v20889_v24  ;;  %7733 = vmatprep.mubr.f32.mxu1 %v20889_v24 }
 0x54f   : > { %6650 = vmatmul.mubr.f32.gmra.mrb[116].mxu0 %v17211_v54  ;;  %7736 = vmatmul.mubr.f32.gmra.mrb[184].mxu1 %v21496_v44  ;;  %v19496_v44 = vsub.f32 %v19336_v21, %v19343_v62  ;;  %v21503_v21 = vld [vmem:[#allocation8_spill] sm:$0xff] }
 0x550   : > { %6655 = vmatprep.mubr.f32.mxu0 %v20889_v24  ;;  %7741 = vmatprep.mubr.f32.mxu1 %v20889_v24 }
 0x551   : > { %v19507_v29 = vand.u32 4294901760, %v19496_v44 }
 0x553   : > { %6657 = vmatmul.mubr.f32.gmra.mrb[118].mxu0 %v17221_v9  ;;  %7744 = vmatmul.mubr.f32.gmra.mrb[186].mxu1 %v21497_v3  ;;  %v21500_v3 = vand.u32 4294901760, %v18437_v42  ;;  %21502 = vst [vmem:[#allocation157_spill] sm:$0xff] %v19507_v29  ;;  %v21504_v42 = vand.u32 4294901760, %v18878_v15  ;;  %v21510_v15 = vld [vmem:[#allocation23_spill] sm:$0xff] }
 0x554   : > { %6662 = vmatprep.mubr.f32.mxu0 %v20889_v24  ;;  %7749 = vmatprep.mubr.f32.mxu1 %v20889_v24 }
 0x557   : > { %6664 = vmatmul.mubr.f32.gmra.mrb[120].mxu0 %v17257_v63  ;;  %7752 = vmatmul.mubr.f32.gmra.mrb[188].mxu1 %v21498_v4  ;;  %v21501_v4 = vand.u32 4294901760, %v21351_v28  ;;  %v21506_v28 = vld [vmem:[#allocation17_spill] sm:$0xff] }
 0x558   : > { %6669 = vmatprep.mubr.f32.mxu0 %v20889_v24  ;;  %7757 = vmatprep.mubr.f32.mxu1 %v20889_v24 }
 0x559   : > { %v13562_v6 = vpack.c.bf16 %v21501_v4, %v21500_v3  ;;  %v21505_v4 = vld [vmem:[#allocation12_spill] sm:$0xff] }
 0x55b   : > { %6671 = vmatmul.mubr.f32.gmra.mrb[122].mxu0 %v21138_v55  ;;  %7760 = vmatmul.mubr.f32.gmra.mrb[190].mxu1 %v21499_v5  ;;  %v9133_v5 = vsub.f32 %v19496_v44, %v19507_v29  ;;  %v21509_v29 = vld [vmem:[#allocation21_spill] sm:$0xff] }
 0x55c   : > { %6676 = vmatprep.mubr.f32.mxu0 %v20889_v24  ;;  %7836 = vmatprep.mubr.f32.mxu1 %v20889_v24 }
 0x55d   : > { %v9134_v3 = vand.u32 4294901760, %v9133_v5  ;;  %v21515_v5 = vld [vmem:[#allocation34_spill] sm:$0xff] }
 0x55f   : > { %6678 = vmatmul.mubr.f32.gmra.mrb[124].mxu0 %v21145_v10  ;;  %7840 = vmatmul.mubr.f32.vlgmr.msra.gmra.mrb[128].mxu1 %v21503_v21  ;;  %v21507_v21 = vand.u32 4294901760, %v18886_v40  ;;  %v21513_v40 = vld [vmem:[#allocation30_spill] sm:$0xff] }
 0x560   : > { %6683 = vmatprep.mubr.f32.mxu0 %v20889_v24  ;;  %7845 = vmatprep.mubr.f32.mxu1 %v20889_v24 }
 0x561   : > { %13563 = vmatpush1.bf16.msra.mxu1 %v13562_v6  ;;  %v21508_v6 = vld [vmem:[#allocation16_spill] sm:$0xff] }
 0x562   : > { %8144 = vmatprep.subr.mxu1 %v21504_v42  ;;  %v21511_v42 = vld [vmem:[#allocation20_spill] sm:$0xff] }
 0x563   : > { %6685 = vmatmul.mubr.f32.gmra.mrb[126].mxu0 %v21149_v58  ;;  %7849 = vmatmul.mubr.f32.gmra.mrb[130].mxu1 %v21505_v4 }
 0x564   : > { %7854 = vmatprep.mubr.f32.mxu1 %v20889_v24  ;;  %13154 = vmatprep.mubr.f32.mxu0 %v21506_v28  ;;  %v21512_v28 = vld [vmem:[#allocation27_spill] sm:$0xff] }
 0x565   : > { %8148 = vmatpush1.msra.mxu1 %v21507_v21  ;;  %v21518_v21 = vld [vmem:[#allocation43_spill] sm:$0xff] }
 0x566   : > { %13565 = vmatprep.subr.bf16.mxu1 %v21444_v37  ;;  %v21514_v37 = vld [vmem:[#allocation24_spill] sm:$0xff] }
 0x567   : > { %7858 = vmatmul.mubr.f32.gmra.mrb[132].mxu1 %v21508_v6  ;;  %13155 = vmatmul.mubr.f32.vlgmr.msra.gmra.mrb[128].mxu0 %v21509_v29  ;;  %v21517_v29 = vld [vmem:[#allocation26_spill] sm:$0xff]  ;;  %v21563_v6 = vld [vmem:[#allocation97_spill] sm:$0xff] }
 0x568   : > { %13575 = vmatpush3.bf16.msra.mxu0 %v19381_v61  ;;  %7863 = vmatprep.mubr.f32.mxu1 %v20889_v24  ;;  %v21516_v61 = vld [vmem:[#allocation39_spill] sm:$0xff] }
 0x569   : > { %13157 = vmatprep.mubr.f32.mxu0 %v21510_v15  ;;  %13206 = vmatprep.subr.mxu0 %v9134_v3  ;;  %v21519_v15 = vld [vmem:[#allocation48_spill] sm:$0xff] }
 0x56b   : > { %7867 = vmatmul.mubr.f32.gmra.mrb[134].mxu1 %v21511_v42  ;;  %13158 = vmatmul.mubr.f32.gmra.mrb[130].mxu0 %v21512_v28  ;;  %v21520_v28 = vld [vmem:[#allocation31_spill] sm:$0xff] }
 0x56c   : > { %7872 = vmatprep.mubr.f32.mxu1 %v20889_v24  ;;  %13160 = vmatprep.mubr.f32.mxu0 %v21513_v40  ;;  %v21522_v40 = vld [vmem:[#allocation57_spill] sm:$0xff] }
 0x56d   : > { %13207 = vmatpush3.msra.mxu0 %v9134_v3  ;;  %v21521_v3 = vld [vmem:[#allocation53_spill] sm:$0xff] }
 0x56e   : > { %13577 = vmatprep.subr.bf16.mxu0 %v19442_v45 }
 0x56f   : > { %7876 = vmatmul.mubr.f32.gmra.mrb[136].mxu1 %v21514_v37  ;;  %13161 = vmatmul.mubr.f32.gmra.mrb[132].mxu0 %v21515_v5  ;;  %v21523_v5 = vld [vmem:[#allocation35_spill] sm:$0xff]  ;;  %v21524_v37 = vld [vmem:[#allocation58_spill] sm:$0xff] }
 0x570   : > { %7881 = vmatprep.mubr.f32.mxu1 %v20889_v24  ;;  %13163 = vmatprep.mubr.f32.mxu0 %v21516_v61  ;;  %v21525_v61 = vld [vmem:[#allocation63_spill] sm:$0xff] }
 0x573   : > { %7885 = vmatmul.mubr.f32.gmra.mrb[138].mxu1 %v21517_v29  ;;  %13164 = vmatmul.mubr.f32.gmra.mrb[134].mxu0 %v21518_v21  ;;  %v21526_v21 = vld [vmem:[#allocation40_spill] sm:$0xff]  ;;  %v21527_v29 = vld [vmem:[#allocation67_spill] sm:$0xff] }
 0x574   : > { %7890 = vmatprep.mubr.f32.mxu1 %v20889_v24  ;;  %13166 = vmatprep.mubr.f32.mxu0 %v21519_v15  ;;  %v21528_v15 = vld [vmem:[#allocation70_spill] sm:$0xff] }
 0x577   : > { %7894 = vmatmul.mubr.f32.gmra.mrb[140].mxu1 %v21520_v28  ;;  %13167 = vmatmul.mubr.f32.gmra.mrb[136].mxu0 %v21521_v3  ;;  %v21529_v3 = vld [vmem:[#allocation44_spill] sm:$0xff]  ;;  %v21530_v28 = vld [vmem:[#allocation74_spill] sm:$0xff] }
 0x578   : > { %7899 = vmatprep.mubr.f32.mxu1 %v20889_v24  ;;  %13169 = vmatprep.mubr.f32.mxu0 %v21522_v40  ;;  %v21531_v40 = vld [vmem:[#allocation78_spill] sm:$0xff] }
 0x57b   : > { %7903 = vmatmul.mubr.f32.gmra.mrb[142].mxu1 %v21523_v5  ;;  %13170 = vmatmul.mubr.f32.gmra.mrb[138].mxu0 %v21524_v37  ;;  %v21532_v37 = vld [vmem:[#allocation49_spill] sm:$0xff]  ;;  %v21533_v5 = vld [vmem:[#allocation80_spill] sm:$0xff] }
 0x57c   : > { %7908 = vmatprep.mubr.f32.mxu1 %v20889_v24  ;;  %13172 = vmatprep.mubr.f32.mxu0 %v21525_v61  ;;  %v21534_v61 = vld [vmem:[#allocation84_spill] sm:$0xff] }
 0x57f   : > { %7912 = vmatmul.mubr.f32.gmra.mrb[144].mxu1 %v21526_v21  ;;  %13173 = vmatmul.mubr.f32.gmra.mrb[140].mxu0 %v21527_v29  ;;  %v21535_v29 = vld [vmem:[#allocation50_spill] sm:$0xff]  ;;  %v21536_v21 = vld [vmem:[#allocation87_spill] sm:$0xff] }
 0x580   : > { %7917 = vmatprep.mubr.f32.mxu1 %v20889_v24  ;;  %13175 = vmatprep.mubr.f32.mxu0 %v21528_v15  ;;  %v21537_v15 = vld [vmem:[#allocation89_spill] sm:$0xff] }
 0x583   : > { %7921 = vmatmul.mubr.f32.gmra.mrb[146].mxu1 %v21529_v3  ;;  %13176 = vmatmul.mubr.f32.gmra.mrb[142].mxu0 %v21530_v28  ;;  %v21538_v28 = vld [vmem:[#allocation54_spill] sm:$0xff]  ;;  %v21539_v3 = vld [vmem:[#allocation92_spill] sm:$0xff] }
 0x584   : > { %7926 = vmatprep.mubr.f32.mxu1 %v20889_v24  ;;  %13178 = vmatprep.mubr.f32.mxu0 %v21531_v40  ;;  %v21540_v40 = vld [vmem:[#allocation96_spill] sm:$0xff] }
 0x587   : > { %7930 = vmatmul.mubr.f32.gmra.mrb[148].mxu1 %v21532_v37  ;;  %13179 = vmatmul.mubr.f32.gmra.mrb[144].mxu0 %v21533_v5  ;;  %v21541_v5 = vld [vmem:[#allocation59_spill] sm:$0xff]  ;;  %v21542_v37 = vld [vmem:[#allocation98_spill] sm:$0xff] }
 0x588   : > { %7935 = vmatprep.mubr.f32.mxu1 %v20889_v24  ;;  %13181 = vmatprep.mubr.f32.mxu0 %v21534_v61  ;;  %v21543_v61 = vld [vmem:[#allocation102_spill] sm:$0xff] }
 0x58b   : > { %7939 = vmatmul.mubr.f32.gmra.mrb[150].mxu1 %v21535_v29  ;;  %13182 = vmatmul.mubr.f32.gmra.mrb[146].mxu0 %v21536_v21  ;;  %v21544_v21 = vld [vmem:[#allocation64_spill] sm:$0xff]  ;;  %v21545_v29 = vld [vmem:[#allocation105_spill] sm:$0xff] }
 0x58c   : > { %7944 = vmatprep.mubr.f32.mxu1 %v20889_v24  ;;  %13184 = vmatprep.mubr.f32.mxu0 %v21537_v15  ;;  %v21546_v15 = vld [vmem:[#allocation109_spill] sm:$0xff] }
 0x58f   : > { %7948 = vmatmul.mubr.f32.gmra.mrb[152].mxu1 %v21538_v28  ;;  %13185 = vmatmul.mubr.f32.gmra.mrb[148].mxu0 %v21539_v3  ;;  %v21547_v3 = vld [vmem:[#allocation68_spill] sm:$0xff]  ;;  %v21548_v28 = vld [vmem:[#allocation113_spill] sm:$0xff] }
 0x590   : > { %7953 = vmatprep.mubr.f32.mxu1 %v20889_v24  ;;  %13187 = vmatprep.mubr.f32.mxu0 %v21540_v40  ;;  %v21549_v40 = vld [vmem:[#allocation116_spill] sm:$0xff] }
 0x593   : > { %7957 = vmatmul.mubr.f32.gmra.mrb[154].mxu1 %v21541_v5  ;;  %13188 = vmatmul.mubr.f32.gmra.mrb[150].mxu0 %v21542_v37  ;;  %v21550_v37 = vld [vmem:[#allocation71_spill] sm:$0xff] }
 0x594   : > { %7962 = vmatprep.mubr.f32.mxu1 %v20889_v24  ;;  %13190 = vmatprep.mubr.f32.mxu0 %v21543_v61  ;;  %v21551_v5 = vld [vmem:[#allocation119_spill] sm:$0xff]  ;;  %v21552_v61 = vld [vmem:[#allocation121_spill] sm:$0xff] }
 0x597   : > { %7966 = vmatmul.mubr.f32.gmra.mrb[156].mxu1 %v21544_v21  ;;  %13191 = vmatmul.mubr.f32.gmra.mrb[152].mxu0 %v21545_v29  ;;  %v21553_v29 = vld [vmem:[#allocation75_spill] sm:$0xff]  ;;  %v21554_v21 = vld [vmem:[#allocation122_spill] sm:$0xff] }
 0x598   : > { %7971 = vmatprep.mubr.f32.mxu1 %v20889_v24  ;;  %13193 = vmatprep.mubr.f32.mxu0 %v21546_v15  ;;  %v21559_v15 = vld [vmem:[#allocation90_spill] sm:$0xff] }
 0x59b   : > { %7975 = vmatmul.mubr.f32.gmra.mrb[158].mxu1 %v21547_v3  ;;  %13194 = vmatmul.mubr.f32.gmra.mrb[154].mxu0 %v21548_v28  ;;  %v21555_v28 = vld [vmem:[#allocation79_spill] sm:$0xff] }
 0x59c   : > { %7980 = vmatprep.mubr.f32.mxu1 %v20889_v24  ;;  %13196 = vmatprep.mubr.f32.mxu0 %v21549_v40  ;;  %v21560_v40 = vld [vmem:[#allocation125_spill] sm:$0xff] }
 0x59f   : > { %7984 = vmatmul.mubr.f32.gmra.mrb[160].mxu1 %v21550_v37  ;;  %13197 = vmatmul.mubr.f32.gmra.mrb[156].mxu0 %v21551_v5  ;;  %v21556_v5 = vld [vmem:[#allocation81_spill] sm:$0xff]  ;;  %v21562_v37 = vld [vmem:[#allocation126_spill] sm:$0xff] }
 0x5a0   : > { %7989 = vmatprep.mubr.f32.mxu1 %v20889_v24  ;;  %13199 = vmatprep.mubr.f32.mxu0 %v21552_v61 }
 0x5a3   : > { %7993 = vmatmul.mubr.f32.gmra.mrb[162].mxu1 %v21553_v29  ;;  %13200 = vmatmul.mubr.f32.gmra.mrb[158].mxu0 %v21554_v21  ;;  %v21557_v21 = vld [vmem:[#allocation85_spill] sm:$0xff] }
 0x5a4   : > { %7998 = vmatprep.mubr.f32.mxu1 %v20889_v24  ;;  %13208 = vmatprep.mubr.f32.mxu0 %v21061_v52 }
 0x5a7   : > { %8002 = vmatmul.mubr.f32.gmra.mrb[164].mxu1 %v21555_v28  ;;  %13209 = vmatmul.mubr.f32.vlgmr.msra.gmra.mrb[128].mxu0 %v21063_v38 }
 0x5a8   : > { %13579 = vmatpush3.bf16.msra.mxu0 %v19442_v45  ;;  %8007 = vmatprep.mubr.f32.mxu1 %v20889_v24  ;;  %v21558_v45 = vld [vmem:[#allocation86_spill] sm:$0xff] }
 0x5a9   : > { %13211 = vmatprep.mubr.f32.mxu0 %v21065_v48  ;;  %13260 = vmatprep.subr.mxu0 %v19496_v44 }
 0x5ab   : > { %8011 = vmatmul.mubr.f32.gmra.mrb[166].mxu1 %v21556_v5  ;;  %13212 = vmatmul.mubr.f32.gmra.mrb[130].mxu0 %v21070_v56  ;;  %v21561_v5 = vld [vmem:[#allocation93_spill] sm:$0xff] }
 0x5ac   : > { %8016 = vmatprep.mubr.f32.mxu1 %v20889_v24  ;;  %13214 = vmatprep.mubr.f32.mxu0 %v21073_v46 }
 0x5ad   : > { %13261 = vmatpush3.msra.mxu0 %v19496_v44 }
 0x5ae   : > { %13581 = vmatprep.subr.bf16.mxu0 %v19125_v11 }
 0x5af   : > { %8020 = vmatmul.mubr.f32.gmra.mrb[168].mxu1 %v21557_v21  ;;  %13215 = vmatmul.mubr.f32.gmra.mrb[132].mxu0 %v21076_v34 }
 0x5b0   : > { %8025 = vmatprep.mubr.f32.mxu1 %v20889_v24  ;;  %13217 = vmatprep.mubr.f32.mxu0 %v21079_v59 }
 0x5b3   : > { %8029 = vmatmul.mubr.f32.gmra.mrb[170].mxu1 %v21558_v45  ;;  %13218 = vmatmul.mubr.f32.gmra.mrb[134].mxu0 %v21082_v49 }
 0x5b4   : > { %8034 = vmatprep.mubr.f32.mxu1 %v20889_v24  ;;  %13220 = vmatprep.mubr.f32.mxu0 %v21085_v20 }
 0x5b7   : > { %8038 = vmatmul.mubr.f32.gmra.mrb[172].mxu1 %v21559_v15  ;;  %13221 = vmatmul.mubr.f32.gmra.mrb[136].mxu0 %v21088_v30 }
 0x5b8   : > { %8043 = vmatprep.mubr.f32.mxu1 %v20889_v24  ;;  %13223 = vmatprep.mubr.f32.mxu0 %v21091_v36 }
 0x5ba   : > { %v6469_v44 = vpop.f32.mrb[64].mxu0 }
 0x5bb   : > { %v13788_v61 = vadd.f32 %v6469_v44, %v21560_v40  ;;  %v6471_v21 = vpop.f32.mrb[65].mxu0  ;;  %8047 = vmatmul.mubr.f32.gmra.mrb[174].mxu1 %v21561_v5  ;;  %13224 = vmatmul.mubr.f32.gmra.mrb[138].mxu0 %v21094_v32 }
 0x5bc   : > { %v13789_v45 = vadd.f32 %v6471_v21, %v21560_v40  ;;  %8052 = vmatprep.mubr.f32.mxu1 %v20889_v24  ;;  %13226 = vmatprep.mubr.f32.mxu0 %v21097_v19 }
 0x5bd   : > { %v12652_v15 = vmul.f32 -1.442695, %v13788_v61 }
 0x5be   : > { %v12653_v28 = vmul.f32 -1.442695, %v13789_v45  ;;  %v6476_v29 = vpop.f32.mrb[66].mxu0  ;;  %v21564_v45 = vld [vmem:[#allocation111_spill] sm:$0xff] }
 0x5bf   : > { %15866 = vpow2.f32 %v12652_v15  ;;  %v13790_v3 = vadd.f32 %v6476_v29, %v21562_v37  ;;  %v6478_v42 = vpop.f32.mrb[67].mxu0  ;;  %8056 = vmatmul.mubr.f32.gmra.mrb[176].mxu1 %v21563_v6  ;;  %13227 = vmatmul.mubr.f32.gmra.mrb[140].mxu0 %v21100_v47  ;;  %v21565_v29 = vld [vmem:[#allocation99_spill] sm:$0xff] }
 0x5c0   : > { %15868 = vpow2.f32 %v12653_v28  ;;  %v13791_v44 = vadd.f32 %v6478_v42, %v21562_v37  ;;  %8061 = vmatprep.mubr.f32.mxu1 %v20889_v24  ;;  %13229 = vmatprep.mubr.f32.mxu0 %v21103_v31 }
 0x5c1   : > { %v12661_v21 = vmul.f32 -1.442695, %v13790_v3 }
 0x5c2   : > { %v12662_v40 = vmul.f32 -1.442695, %v13791_v44  ;;  %v6483_v61 = vpop.f32.mrb[68].mxu0  ;;  %v21566_v44 = vld [vmem:[#allocation127_spill] sm:$0xff] }
 0x5c3   : > { %15870 = vpow2.f32 %v12661_v21  ;;  %v13792_v15 = vadd.f32 %v6483_v61, %v21564_v45  ;;  %v6485_v5 = vpop.f32.mrb[69].mxu0  ;;  %8065 = vmatmul.mubr.f32.gmra.mrb[178].mxu1 %v21565_v29  ;;  %13230 = vmatmul.mubr.f32.gmra.mrb[142].mxu0 %v21106_v18  ;;  %v21567_v61 = vld [vmem:[#allocation103_spill] sm:$0xff]  ;;  %v21569_v18 = vld [vmem:[#allocation106_spill] sm:$0xff] }
 0x5c4   : > { %15872 = vpow2.f32 %v12662_v40  ;;  %v13793_v28 = vadd.f32 %v6485_v5, %v21564_v45  ;;  %8070 = vmatprep.mubr.f32.mxu1 %v20889_v24  ;;  %13232 = vmatprep.mubr.f32.mxu0 %v17000_v26 }
 0x5c5   : > { %v12670_v42 = vmul.f32 -1.442695, %v13792_v15 }
 0x5c6   : > { %v12671_v37 = vmul.f32 -1.442695, %v13793_v28  ;;  %v6490_v3 = vpop.f32.mrb[70].mxu0 }
 0x5c7   : > { %15874 = vpow2.f32 %v12670_v42  ;;  %v13794_v21 = vadd.f32 %v6490_v3, %v21566_v44  ;;  %v6492_v6 = vpop.f32.mrb[71].mxu0  ;;  %8074 = vmatmul.mubr.f32.gmra.mrb[180].mxu1 %v21567_v61  ;;  %13233 = vmatmul.mubr.f32.gmra.mrb[144].mxu0 %v17008_v35  ;;  %v21568_v3 = vld [vmem:[#allocation115_spill] sm:$0xff] }
 0x5c8   : > { %15876 = vpow2.f32 %v12671_v37  ;;  %v13795_v40 = vadd.f32 %v6492_v6, %v21566_v44  ;;  %8079 = vmatprep.mubr.f32.mxu1 %v20889_v24  ;;  %13235 = vmatprep.mubr.f32.mxu0 %v17028_v7  ;;  %v21570_v44 = vld [vmem:[#allocation128_spill] sm:$0xff] }
 0x5c9   : > { %v15867_v5 = vpop.eup %15866  ;;  %v12679_v45 = vmul.f32 -1.442695, %v13794_v21 }
 0x5ca   : > { %v15869_v15 = vpop.eup %15868  ;;  %v11400_v28 = vadd.f32 1.0, %v15867_v5  ;;  %v12680_v29 = vmul.f32 -1.442695, %v13795_v40  ;;  %v6497_v42 = vpop.f32.mrb[72].mxu0 }
 0x5cb   : > { %v11401_v4 = vadd.f32 1.0, %v15869_v15  ;;  %15878 = vpow2.f32 %v12679_v45  ;;  %v13796_v26 = vadd.f32 %v6497_v42, %v21568_v3  ;;  %v6499_v61 = vpop.f32.mrb[73].mxu0  ;;  %8083 = vmatmul.mubr.f32.gmra.mrb[182].mxu1 %v21569_v18  ;;  %13236 = vmatmul.mubr.f32.gmra.mrb[146].mxu0 %v17048_v33 }
 0x5cc   : > { %15880 = vrcp.f32 %v11400_v28  ;;  %v13797_v6 = vadd.f32 %v6499_v61, %v21568_v3  ;;  %8088 = vmatprep.mubr.f32.mxu1 %v20889_v24  ;;  %13238 = vmatprep.mubr.f32.mxu0 %v17081_v57  ;;  %v21571_v28 = vld [vmem:[#allocation110_spill] sm:$0xff] }
 0x5cd   : > { %v15871_v37 = vpop.eup %15870  ;;  %15882 = vrcp.f32 %v11401_v4  ;;  %v12688_v21 = vmul.f32 -1.442695, %v13796_v26 }
 0x5ce   : > { %v15873_v40 = vpop.eup %15872  ;;  %v11409_v5 = vadd.f32 1.0, %v15871_v37  ;;  %15884 = vpow2.f32 %v12680_v29  ;;  %v12689_v45 = vmul.f32 -1.442695, %v13797_v6  ;;  %v6504_v15 = vpop.f32.mrb[74].mxu0 }
 0x5cf   : > { %v11410_v42 = vadd.f32 1.0, %v15873_v40  ;;  %15886 = vpow2.f32 %v12688_v21  ;;  %v13798_v18 = vadd.f32 %v6504_v15, %v21570_v44  ;;  %v6506_v33 = vpop.f32.mrb[75].mxu0  ;;  %8092 = vmatmul.mubr.f32.gmra.mrb[184].mxu1 %v21571_v28  ;;  %13239 = vmatmul.mubr.f32.gmra.mrb[148].mxu0 %v17088_v27  ;;  %v21572_v15 = vld [vmem:[#allocation62_spill] sm:$0xff] }
 0x5d0   : > { %15888 = vrcp.f32 %v11409_v5  ;;  %v13799_v61 = vadd.f32 %v6506_v33, %v21570_v44  ;;  %8097 = vmatprep.mubr.f32.mxu1 %v20889_v24  ;;  %13241 = vmatprep.mubr.f32.mxu0 %v17120_v16  ;;  %v21573_v5 = vld [vmem:[#allocation112_spill] sm:$0xff] }
 0x5d1   : > { %v15875_v26 = vpop.eup %15874  ;;  %15890 = vrcp.f32 %v11410_v42  ;;  %v12697_v4 = vmul.f32 -1.442695, %v13798_v18 }
 0x5d2   : > { %v15877_v29 = vpop.eup %15876  ;;  %v11418_v6 = vadd.f32 1.0, %v15875_v26  ;;  %15892 = vpow2.f32 %v12689_v45  ;;  %v12698_v37 = vmul.f32 -1.442695, %v13799_v61  ;;  %v6511_v21 = vpop.f32.mrb[76].mxu0 }
 0x5d3   : > { %v11419_v40 = vadd.f32 1.0, %v15877_v29  ;;  %15894 = vpow2.f32 %v12697_v4  ;;  %v13800_v3 = vadd.f32 %v6511_v21, %v21572_v15  ;;  %v6513_v28 = vpop.f32.mrb[77].mxu0  ;;  %8101 = vmatmul.mubr.f32.gmra.mrb[186].mxu1 %v21573_v5  ;;  %13242 = vmatmul.mubr.f32.gmra.mrb[150].mxu0 %v17140_v60  ;;  %v21574_v21 = vld [vmem:[#allocation129_spill] sm:$0xff] }
 0x5d4   : > { %15896 = vrcp.f32 %v11418_v6  ;;  %v13801_v33 = vadd.f32 %v6513_v28, %v21572_v15  ;;  %8106 = vmatprep.mubr.f32.mxu1 %v20889_v24  ;;  %13244 = vmatprep.mubr.f32.mxu0 %v17167_v1  ;;  %v21575_v28 = vld [vmem:[#allocation117_spill] sm:$0xff] }
 0x5d5   : > { %v15879_v18 = vpop.eup %15878  ;;  %15898 = vrcp.f32 %v11419_v40  ;;  %v12706_v45 = vmul.f32 -1.442695, %v13800_v3 }
 0x5d6   : > { %v15881_v42 = vpop.eup %15880  ;;  %v11427_v61 = vadd.f32 1.0, %v15879_v18  ;;  %15900 = vpow2.f32 %v12698_v37  ;;  %v12707_v26 = vmul.f32 -1.442695, %v13801_v33  ;;  %v6518_v4 = vpop.f32.mrb[78].mxu0 }
 0x5d7   : > { %v15883_v29 = vpop.eup %15882  ;;  %12264 = vst [vmem:[%s18333_s17 + $0x20] sm:$0xff] %v15881_v42  ;;  %15902 = vpow2.f32 %v12706_v45  ;;  %v13802_v6 = vadd.f32 %v6518_v4, %v21574_v21  ;;  %v6520_v44 = vpop.f32.mrb[79].mxu0  ;;  %8110 = vmatmul.mubr.f32.gmra.mrb[188].mxu1 %v21575_v28  ;;  %13245 = vmatmul.mubr.f32.gmra.mrb[152].mxu0 %v17175_v39 }
 0x5d8   : > { %v15885_v15 = vpop.eup %15884  ;;  %12265 = vst [vmem:[%s18333_s17 + $0x28] sm:$0xff] %v15883_v29  ;;  %15904 = vrcp.f32 %v11427_v61  ;;  %v13803_v3 = vadd.f32 %v6520_v44, %v21574_v21  ;;  %8115 = vmatprep.mubr.f32.mxu1 %v20889_v24  ;;  %13247 = vmatprep.mubr.f32.mxu0 %v17211_v54  ;;  %v21576_v29 = vld [vmem:[#allocation130_spill] sm:$0xff]  ;;  %v21577_v44 = vld [vmem:[#allocation120_spill] sm:$0xff] }
 0x5d9   : > { %v15887_v37 = vpop.eup %15886  ;;  %v11428_v40 = vadd.f32 1.0, %v15885_v15  ;;  %15906 = vpow2.f32 %v12707_v26  ;;  %v12715_v33 = vmul.f32 -1.442695, %v13802_v6 }
 0x5da   : > { %v15889_v18 = vpop.eup %15888  ;;  %v11436_v45 = vadd.f32 1.0, %v15887_v37  ;;  %v12716_v42 = vmul.f32 -1.442695, %v13803_v3  ;;  %v6525_v4 = vpop.f32.mrb[80].mxu0 }
 0x5db   : > { %v15891_v28 = vpop.eup %15890  ;;  %12274 = vst [vmem:[%s18333_s17 + $0x68] sm:$0xff] %v15889_v18  ;;  %15908 = vrcp.f32 %v11428_v40  ;;  %v13804_v61 = vadd.f32 %v6525_v4, %v21576_v29  ;;  %v6527_v5 = vpop.f32.mrb[81].mxu0  ;;  %8119 = vmatmul.mubr.f32.gmra.mrb[190].mxu1 %v21577_v44  ;;  %13248 = vmatmul.mubr.f32.gmra.mrb[154].mxu0 %v17221_v9 }
 0x5dc   : > { %v15893_v21 = vpop.eup %15892  ;;  %12275 = vst [vmem:[%s18333_s17 + $0x70] sm:$0xff] %v15891_v28  ;;  %15910 = vrcp.f32 %v11436_v45  ;;  %v13805_v15 = vadd.f32 %v6527_v5, %v21576_v29  ;;  %8207 = vmatprep.mubr.f32.mxu1 %v20889_v24  ;;  %13250 = vmatprep.mubr.f32.mxu0 %v17257_v63  ;;  %v21578_v28 = vld [vmem:[#allocation131_spill] sm:$0xff] }
 0x5dd   : > { %v15895_v26 = vpop.eup %15894  ;;  %v11437_v6 = vadd.f32 1.0, %v15893_v21  ;;  %15912 = vpow2.f32 %v12715_v33  ;;  %v12724_v3 = vmul.f32 -1.442695, %v13804_v61 }
 0x5de   : > { %v15897_v37 = vpop.eup %15896  ;;  %v11445_v40 = vadd.f32 1.0, %v15895_v26  ;;  %15914 = vpow2.f32 %v12716_v42  ;;  %v12725_v18 = vmul.f32 -1.442695, %v13805_v15  ;;  %v6532_v4 = vpop.f32.mrb[82].mxu0 }
 0x5df   : > { %v15899_v44 = vpop.eup %15898  ;;  %12283 = vst [vmem:[%s18333_s17 + $0xb0] sm:$0xff] %v15897_v37  ;;  %15916 = vrcp.f32 %v11437_v6  ;;  %v13806_v45 = vadd.f32 %v6532_v4, %v21578_v28  ;;  %v6534_v5 = vpop.f32.mrb[83].mxu0  ;;  %8209 = vmatmul.mubr.f32.vlgmr.msra.gmra.mrb[128].mxu1 %v21061_v52  ;;  %13251 = vmatmul.mubr.f32.gmra.mrb[156].mxu0 %v21138_v55 }
 0x5e0   : > { %v15901_v29 = vpop.eup %15900  ;;  %12284 = vst [vmem:[%s18333_s17 + $0xb8] sm:$0xff] %v15899_v44  ;;  %15918 = vrcp.f32 %v11445_v40  ;;  %v13807_v21 = vadd.f32 %v6534_v5, %v21578_v28  ;;  %8214 = vmatprep.mubr.f32.mxu1 %v20889_v24  ;;  %13253 = vmatprep.mubr.f32.mxu0 %v21145_v10  ;;  %v21579_v40 = vld [vmem:[#allocation132_spill] sm:$0xff] }
 0x5e1   : > { %v15903_v33 = vpop.eup %15902  ;;  %v11446_v42 = vadd.f32 1.0, %v15901_v29  ;;  %15920 = vpow2.f32 %v12724_v3  ;;  %v12733_v61 = vmul.f32 -1.442695, %v13806_v45  ;;  %13567 = vmatpush1.bf16.msra.mxu1 %v18729_v50 }
 0x5e2   : > { %v15905_v15 = vpop.eup %15904  ;;  %v11454_v26 = vadd.f32 1.0, %v15903_v33  ;;  %15922 = vpow2.f32 %v12725_v18  ;;  %v6539_v6 = vpop.f32.mrb[84].mxu0  ;;  %8441 = vmatprep.subr.mxu1 %v18732_v0  ;;  %v12734_v37 = vmul.f32 -1.442695, %v13807_v21 }
 0x5e3   : > { %v15907_v44 = vpop.eup %15906  ;;  %12292 = vst [vmem:[%s18333_s17 + $0xf8] sm:$0xff] %v15905_v15  ;;  %15924 = vrcp.f32 %v11446_v42  ;;  %v13808_v4 = vadd.f32 %v6539_v6, %v21579_v40  ;;  %v6541_v5 = vpop.f32.mrb[85].mxu0  ;;  %8216 = vmatmul.mubr.f32.gmra.mrb[130].mxu1 %v21063_v38  ;;  %13254 = vmatmul.mubr.f32.gmra.mrb[158].mxu0 %v21149_v58  ;;  %v21580_v42 = vld [vmem:[#allocation133_spill] sm:$0xff] }
 0x5e4   : > { %15926 = vrcp.f32 %v11454_v26  ;;  %v11455_v50 = vadd.f32 1.0, %v15907_v44  ;;  %v13809_v29 = vadd.f32 %v6541_v5, %v21579_v40  ;;  %8221 = vmatprep.mubr.f32.mxu1 %v20889_v24  ;;  %13262 = vmatprep.mubr.f32.mxu0 %v21322_v13 }
 0x5e5   : > { %v15909_v0 = vpop.eup %15908  ;;  %15928 = vpow2.f32 %v12733_v61  ;;  %v12742_v3 = vmul.f32 -1.442695, %v13808_v4  ;;  %8443 = vmatpush1.msra.mxu1 %v21463_v43 }
 0x5e6   : > { %v15911_v18 = vpop.eup %15910  ;;  %12293 = vst [vmem:[%s18333_s17 + $0x100] sm:$0xff] %v15909_v0  ;;  %15930 = vrcp.f32 %v11455_v50  ;;  %v12743_v45 = vmul.f32 -1.442695, %v13809_v29  ;;  %v6546_v21 = vpop.f32.mrb[86].mxu0  ;;  %v21581_v50 = vand.u32 4294901760, %v19355_v25  ;;  %v21582_v29 = vand.u32 4294901760, %v19360_v22 }
 0x5e7   : > { %v15913_v33 = vpop.eup %15912  ;;  %12301 = vst [vmem:[%s18333_s17 + $0x140] sm:$0xff] %v15911_v18  ;;  %15932 = vpow2.f32 %v12734_v37  ;;  %v13810_v15 = vadd.f32 %v6546_v21, %v21580_v42  ;;  %v6548_v26 = vpop.f32.mrb[87].mxu0  ;;  %8223 = vmatmul.mubr.f32.gmra.mrb[132].mxu1 %v21065_v48  ;;  %13263 = vmatmul.mubr.f32.vlgmr.msra.gmra.mrb[128].mxu0 %v21325_v2  ;;  %v21583_v18 = vld [vmem:[#allocation134_spill] sm:$0xff] }
 0x5e8   : > { %v15915_v13 = vpop.eup %15914  ;;  %v11463_v61 = vadd.f32 1.0, %v15913_v33  ;;  %15934 = vpow2.f32 %v12742_v3  ;;  %v13811_v43 = vadd.f32 %v6548_v26, %v21580_v42  ;;  %13583 = vmatpush3.bf16.msra.mxu0 %v19125_v11  ;;  %8228 = vmatprep.mubr.f32.mxu1 %v20889_v24  ;;  %v19705_v0 = vpack.c.bf16 %v21582_v29, %v21581_v50 }
 0x5e9   : > { %v15917_v6 = vpop.eup %15916  ;;  %v11464_v44 = vadd.f32 1.0, %v15915_v13  ;;  %15936 = vpow2.f32 %v12743_v45  ;;  %v12751_v37 = vmul.f32 -1.442695, %v13810_v15  ;;  %13265 = vmatprep.mubr.f32.mxu0 %v21464_v12  ;;  %13314 = vmatprep.subr.mxu0 %v19343_v62 }
 0x5ea   : > { %v15919_v4 = vpop.eup %15918  ;;  %12302 = vst [vmem:[%s18333_s17 + $0x148] sm:$0xff] %v15917_v6  ;;  %15938 = vrcp.f32 %v11463_v61  ;;  %v12752_v2 = vmul.f32 -1.442695, %v13811_v43  ;;  %v6553_v5 = vpop.f32.mrb[88].mxu0  ;;  %v21584_v6 = vld [vmem:[#allocation135_spill] sm:$0xff] }
 0x5eb   : > { %v15921_v3 = vpop.eup %15920  ;;  %12310 = vst [vmem:[%s18333_s17 + $0x188] sm:$0xff] %v15919_v4  ;;  %15940 = vrcp.f32 %v11464_v44  ;;  %v13812_v45 = vadd.f32 %v6553_v5, %v21583_v18  ;;  %v6555_v12 = vpop.f32.mrb[89].mxu0  ;;  %8230 = vmatmul.mubr.f32.gmra.mrb[134].mxu1 %v21070_v56  ;;  %13266 = vmatmul.mubr.f32.gmra.mrb[130].mxu0 %v21471_v23 }
 0x5ec   : > { %v15923_v21 = vpop.eup %15922  ;;  %v11472_v33 = vadd.f32 1.0, %v15921_v3  ;;  %15942 = vpow2.f32 %v12751_v37  ;;  %v13813_v25 = vadd.f32 %v6555_v12, %v21583_v18  ;;  %8235 = vmatprep.mubr.f32.mxu1 %v20889_v24  ;;  %13268 = vmatprep.mubr.f32.mxu0 %v21472_v14 }
 0x5ed   : > { %v15925_v22 = vpop.eup %15924  ;;  %v11473_v15 = vadd.f32 1.0, %v15923_v21  ;;  %15944 = vpow2.f32 %v12752_v2  ;;  %v12760_v26 = vmul.f32 -1.442695, %v13812_v45  ;;  %13315 = vmatpush3.msra.mxu0 %v19343_v62 }
 0x5ee   : > { %v15927_v13 = vpop.eup %15926  ;;  %12311 = vst [vmem:[%s18333_s17 + $0x190] sm:$0xff] %v15925_v22  ;;  %15946 = vrcp.f32 %v11472_v33  ;;  %v12761_v23 = vmul.f32 -1.442695, %v13813_v25  ;;  %v6560_v61 = vpop.f32.mrb[90].mxu0  ;;  %13585 = vmatprep.subr.bf16.mxu0 %v19705_v0  ;;  %v21585_v33 = vld [vmem:[#allocation139_spill] sm:$0xff] }
 0x5ef   : > { %v15929_v43 = vpop.eup %15928  ;;  %12319 = vst [vmem:[%s18333_s17 + $0x1d0] sm:$0xff] %v15927_v13  ;;  %15948 = vrcp.f32 %v11473_v15  ;;  %v13814_v44 = vadd.f32 %v6560_v61, %v21584_v6  ;;  %v6562_v14 = vpop.f32.mrb[91].mxu0  ;;  %8237 = vmatmul.mubr.f32.gmra.mrb[136].mxu1 %v21073_v46  ;;  %13269 = vmatmul.mubr.f32.gmra.mrb[132].mxu0 %v21473_v53 }
 0x5f0   : > { %v15931_v37 = vpop.eup %15930  ;;  %v11481_v4 = vadd.f32 1.0, %v15929_v43  ;;  %15950 = vpow2.f32 %v12760_v26  ;;  %v13815_v2 = vadd.f32 %v6562_v14, %v21584_v6  ;;  %8242 = vmatprep.mubr.f32.mxu1 %v20889_v24  ;;  %13271 = vmatprep.mubr.f32.mxu0 %v21474_v41 }
 0x5f1   : > { %v15933_v5 = vpop.eup %15932  ;;  %12320 = vst [vmem:[%s18333_s17 + $0x1d8] sm:$0xff] %v15931_v37  ;;  %15952 = vpow2.f32 %v12761_v23  ;;  %v12769_v50 = vmul.f32 -1.442695, %v13814_v44  ;;  %v21586_v37 = vld [vmem:[#allocation141_spill] sm:$0xff] }
 0x5f2   : > { %v15935_v29 = vpop.eup %15934  ;;  %15954 = vrcp.f32 %v11481_v4  ;;  %v11482_v3 = vadd.f32 1.0, %v15933_v5  ;;  %v6567_v45 = vpop.f32.mrb[92].mxu0  ;;  %v12770_v21 = vmul.f32 -1.442695, %v13815_v2 }
 0x5f3   : > { %v15937_v12 = vpop.eup %15936  ;;  %v11490_v53 = vadd.f32 1.0, %v15935_v29  ;;  %15956 = vpow2.f32 %v12769_v50  ;;  %v13816_v25 = vadd.f32 %v6567_v45, %v21585_v33  ;;  %v6569_v22 = vpop.f32.mrb[93].mxu0  ;;  %8244 = vmatmul.mubr.f32.gmra.mrb[138].mxu1 %v21076_v34  ;;  %13272 = vmatmul.mubr.f32.gmra.mrb[134].mxu0 %v21475_v51  ;;  %v21587_v29 = vld [vmem:[#allocation45_spill] sm:$0xff] }
 0x5f4   : > { %v15939_v41 = vpop.eup %15938  ;;  %15958 = vrcp.f32 %v11482_v3  ;;  %v11491_v15 = vadd.f32 1.0, %v15937_v12  ;;  %v13817_v26 = vadd.f32 %v6569_v22, %v21585_v33  ;;  %8249 = vmatprep.mubr.f32.mxu1 %v20889_v24  ;;  %13274 = vmatprep.mubr.f32.mxu0 %v21476_v17  ;;  %v21588_v22 = vld [vmem:[#allocation142_spill] sm:$0xff] }
 0x5f5   : > { %v15941_v13 = vpop.eup %15940  ;;  %12328 = vst [vmem:[%s18333_s17 + $0x218] sm:$0xff] %v15939_v41  ;;  %15960 = vrcp.f32 %v11490_v53  ;;  %v12778_v23 = vmul.f32 -1.442695, %v13816_v25 }
 0x5f6   : > { %v15943_v61 = vpop.eup %15942  ;;  %12329 = vst [vmem:[%s18333_s17 + $0x220] sm:$0xff] %v15941_v13  ;;  %15962 = vrcp.f32 %v11491_v15  ;;  %v6574_v43 = vpop.f32.mrb[94].mxu0  ;;  %v12779_v14 = vmul.f32 -1.442695, %v13817_v26  ;;  %v21589_v26 = vld [vmem:[#allocation46_spill] sm:$0xff] }
 0x5f7   : > { %v15945_v44 = vpop.eup %15944  ;;  %v11499_v51 = vadd.f32 1.0, %v15943_v61  ;;  %15964 = vpow2.f32 %v12770_v21  ;;  %v13818_v4 = vadd.f32 %v6574_v43, %v21586_v37  ;;  %v6576_v2 = vpop.f32.mrb[95].mxu0  ;;  %8251 = vmatmul.mubr.f32.gmra.mrb[140].mxu1 %v21079_v59  ;;  %13275 = vmatmul.mubr.f32.gmra.mrb[136].mxu0 %v21477_v8  ;;  %v21590_v43 = vld [vmem:[#allocation51_spill] sm:$0xff] }
 0x5f8   : > { %v15947_v17 = vpop.eup %15946  ;;  %v11500_v5 = vadd.f32 1.0, %v15945_v44  ;;  %15966 = vpow2.f32 %v12778_v23  ;;  %v13819_v50 = vadd.f32 %v6576_v2, %v21586_v37  ;;  %8256 = vmatprep.mubr.f32.mxu1 %v20889_v24  ;;  %13277 = vmatprep.mubr.f32.mxu0 %v21587_v29 }
 0x5f9   : > { %v15949_v3 = vpop.eup %15948  ;;  %12337 = vst [vmem:[%s18333_s17 + $0x260] sm:$0xff] %v15947_v17  ;;  %15968 = vrcp.f32 %v11499_v51  ;;  %v12787_v45 = vmul.f32 -1.442695, %v13818_v4 }
 0x5fa   : > { %v15951_v12 = vpop.eup %15950  ;;  %12338 = vst [vmem:[%s18333_s17 + $0x268] sm:$0xff] %v15949_v3  ;;  %15970 = vrcp.f32 %v11500_v5  ;;  %v6581_v53 = vpop.f32.mrb[96].mxu0  ;;  %v12788_v25 = vmul.f32 -1.442695, %v13819_v50  ;;  %v21591_v50 = vld [vmem:[#allocation143_spill] sm:$0xff] }
 0x5fb   : > { %v15953_v21 = vpop.eup %15952  ;;  %v11508_v8 = vadd.f32 1.0, %v15951_v12  ;;  %15972 = vpow2.f32 %v12779_v14  ;;  %v13820_v41 = vadd.f32 %v6581_v53, %v21588_v22  ;;  %v6583_v15 = vpop.f32.mrb[97].mxu0  ;;  %8258 = vmatmul.mubr.f32.gmra.mrb[142].mxu1 %v21082_v49  ;;  %13278 = vmatmul.mubr.f32.gmra.mrb[138].mxu0 %v21589_v26 }
 0x5fc   : > { %v15955_v13 = vpop.eup %15954  ;;  %v11509_v23 = vadd.f32 1.0, %v15953_v21  ;;  %15974 = vpow2.f32 %v12787_v45  ;;  %v13821_v61 = vadd.f32 %v6583_v15, %v21588_v22  ;;  %8263 = vmatprep.mubr.f32.mxu1 %v20889_v24  ;;  %13280 = vmatprep.mubr.f32.mxu0 %v21590_v43  ;;  %v21592_v45 = vld [vmem:[#allocation55_spill] sm:$0xff]  ;;  %v21593_v21 = vld [vmem:[#allocation60_spill] sm:$0xff] }
 0x5fd   : > { %v15957_v44 = vpop.eup %15956  ;;  %12346 = vst [vmem:[%s18333_s17 + $0x2a8] sm:$0xff] %v15955_v13  ;;  %15976 = vrcp.f32 %v11508_v8  ;;  %v12796_v51 = vmul.f32 -1.442695, %v13820_v41  ;;  %v21594_v43 = vld [vmem:[#allocation144_spill] sm:$0xff] }
 0x5fe   : > { %v15959_v14 = vpop.eup %15958  ;;  %15978 = vrcp.f32 %v11509_v23  ;;  %v11517_v4 = vadd.f32 1.0, %v15957_v44  ;;  %v12797_v2 = vmul.f32 -1.442695, %v13821_v61  ;;  %v6588_v17 = vpop.f32.mrb[98].mxu0 }
 0x5ff   : > { %v15961_v5 = vpop.eup %15960  ;;  %12347 = vst [vmem:[%s18333_s17 + $0x2b0] sm:$0xff] %v15959_v14  ;;  %15980 = vpow2.f32 %v12788_v25  ;;  %v13822_v29 = vadd.f32 %v6588_v17, %v21591_v50  ;;  %v6590_v3 = vpop.f32.mrb[99].mxu0  ;;  %8265 = vmatmul.mubr.f32.gmra.mrb[144].mxu1 %v21085_v20  ;;  %13281 = vmatmul.mubr.f32.gmra.mrb[140].mxu0 %v21592_v45 }
 0x600   : > { %v15963_v12 = vpop.eup %15962  ;;  %12355 = vst [vmem:[%s18333_s17 + $0x2f0] sm:$0xff] %v15961_v5  ;;  %15982 = vrcp.f32 %v11517_v4  ;;  %v13823_v53 = vadd.f32 %v6590_v3, %v21591_v50  ;;  %8270 = vmatprep.mubr.f32.mxu1 %v20889_v24  ;;  %13283 = vmatprep.mubr.f32.mxu0 %v21593_v21  ;;  %v21595_v4 = vld [vmem:[#allocation65_spill] sm:$0xff] }
 0x601   : > { %v15965_v8 = vpop.eup %15964  ;;  %12356 = vst [vmem:[%s18333_s17 + $0x2f8] sm:$0xff] %v15963_v12  ;;  %15984 = vpow2.f32 %v12796_v51  ;;  %v12805_v25 = vmul.f32 -1.442695, %v13822_v29 }
 0x602   : > { %v15967_v41 = vpop.eup %15966  ;;  %v11518_v15 = vadd.f32 1.0, %v15965_v8  ;;  %15986 = vpow2.f32 %v12797_v2  ;;  %v12806_v26 = vmul.f32 -1.442695, %v13823_v53  ;;  %v6595_v13 = vpop.f32.mrb[100].mxu0  ;;  %v21596_v2 = vld [vmem:[#allocation69_spill] sm:$0xff] }
 0x603   : > { %v15969_v23 = vpop.eup %15968  ;;  %v11526_v61 = vadd.f32 1.0, %v15967_v41  ;;  %15988 = vpow2.f32 %v12805_v25  ;;  %v13824_v44 = vadd.f32 %v6595_v13, %v21594_v43  ;;  %v6597_v14 = vpop.f32.mrb[101].mxu0  ;;  %8272 = vmatmul.mubr.f32.gmra.mrb[146].mxu1 %v21088_v30  ;;  %13284 = vmatmul.mubr.f32.gmra.mrb[142].mxu0 %v21595_v4  ;;  %v21597_v25 = vld [vmem:[#allocation145_spill] sm:$0xff]  ;;  %v21598_v13 = vld [vmem:[#allocation72_spill] sm:$0xff] }
 0x604   : > { %v15971_v17 = vpop.eup %15970  ;;  %12364 = vst [vmem:[%s18333_s17 + $0x338] sm:$0xff] %v15969_v23  ;;  %15990 = vrcp.f32 %v11518_v15  ;;  %v13825_v51 = vadd.f32 %v6597_v14, %v21594_v43  ;;  %8277 = vmatprep.mubr.f32.mxu1 %v20889_v24  ;;  %13286 = vmatprep.mubr.f32.mxu0 %v21596_v2 }
 0x605   : > { %v15973_v5 = vpop.eup %15972  ;;  %12365 = vst [vmem:[%s18333_s17 + $0x340] sm:$0xff] %v15971_v17  ;;  %15992 = vrcp.f32 %v11526_v61  ;;  %v12814_v29 = vmul.f32 -1.442695, %v13824_v44 }
 0x606   : > { %v15975_v3 = vpop.eup %15974  ;;  %v11527_v45 = vadd.f32 1.0, %v15973_v5  ;;  %15994 = vpow2.f32 %v12806_v26  ;;  %v12815_v12 = vmul.f32 -1.442695, %v13825_v51  ;;  %v6602_v53 = vpop.f32.mrb[102].mxu0  ;;  %v21599_v26 = vld [vmem:[#allocation76_spill] sm:$0xff] }
 0x607   : > { %v15977_v21 = vpop.eup %15976  ;;  %v11535_v8 = vadd.f32 1.0, %v15975_v3  ;;  %15996 = vpow2.f32 %v12814_v29  ;;  %v13826_v41 = vadd.f32 %v6602_v53, %v21597_v25  ;;  %v6604_v15 = vpop.f32.mrb[103].mxu0  ;;  %8279 = vmatmul.mubr.f32.gmra.mrb[148].mxu1 %v21091_v36  ;;  %13287 = vmatmul.mubr.f32.gmra.mrb[144].mxu0 %v21598_v13  ;;  %v21600_v29 = vld [vmem:[#allocation146_spill] sm:$0xff]  ;;  %v21601_v53 = vld [vmem:[#allocation77_spill] sm:$0xff] }
 0x608   : > { %v15979_v23 = vpop.eup %15978  ;;  %12373 = vst [vmem:[%s18333_s17 + $0x380] sm:$0xff] %v15977_v21  ;;  %15998 = vrcp.f32 %v11527_v45  ;;  %v13827_v61 = vadd.f32 %v6604_v15, %v21597_v25  ;;  %8284 = vmatprep.mubr.f32.mxu1 %v20889_v24  ;;  %13289 = vmatprep.mubr.f32.mxu0 %v21599_v26 }
 0x609   : > { %v15981_v44 = vpop.eup %15980  ;;  %12374 = vst [vmem:[%s18333_s17 + $0x388] sm:$0xff] %v15979_v23  ;;  %16000 = vrcp.f32 %v11535_v8  ;;  %v12823_v14 = vmul.f32 -1.442695, %v13826_v41 }
 0x60a   : > { %v15983_v4 = vpop.eup %15982  ;;  %v11536_v17 = vadd.f32 1.0, %v15981_v44  ;;  %16002 = vpow2.f32 %v12815_v12  ;;  %v12824_v51 = vmul.f32 -1.442695, %v13827_v61  ;;  %v6609_v2 = vpop.f32.mrb[104].mxu0  ;;  %v21602_v12 = vld [vmem:[#allocation82_spill] sm:$0xff] }
 0x60b   : > { %v15985_v5 = vpop.eup %15984  ;;  %12382 = vst [vmem:[%s18333_s17 + $0x3c8] sm:$0xff] %v15983_v4  ;;  %16004 = vpow2.f32 %v12823_v14  ;;  %v13828_v3 = vadd.f32 %v6609_v2, %v21600_v29  ;;  %v6611_v45 = vpop.f32.mrb[105].mxu0  ;;  %8286 = vmatmul.mubr.f32.gmra.mrb[150].mxu1 %v21094_v32  ;;  %13290 = vmatmul.mubr.f32.gmra.mrb[146].mxu0 %v21601_v53 }
 0x60c   : > { %v15987_v21 = vpop.eup %15986  ;;  %16006 = vrcp.f32 %v11536_v17  ;;  %v11544_v8 = vadd.f32 1.0, %v15985_v5  ;;  %v13829_v41 = vadd.f32 %v6611_v45, %v21600_v29  ;;  %8291 = vmatprep.mubr.f32.mxu1 %v20889_v24  ;;  %13292 = vmatprep.mubr.f32.mxu0 %v21602_v12  ;;  %v21603_v17 = vld [vmem:[#allocation147_spill] sm:$0xff] }
 0x60d   : > { %v15989_v15 = vpop.eup %15988  ;;  %v11545_v13 = vadd.f32 1.0, %v15987_v21  ;;  %16008 = vpow2.f32 %v12824_v51  ;;  %v12832_v23 = vmul.f32 -1.442695, %v13828_v3  ;;  %v21604_v45 = vld [vmem:[#allocation83_spill] sm:$0xff]  ;;  %v21605_v3 = vld [vmem:[#allocation88_spill] sm:$0xff] }
 0x60e   : > { %v15991_v61 = vpop.eup %15990  ;;  %16010 = vrcp.f32 %v11544_v8  ;;  %v11553_v26 = vadd.f32 1.0, %v15989_v15  ;;  %v12833_v44 = vmul.f32 -1.442695, %v13829_v41  ;;  %v6616_v14 = vpop.f32.mrb[106].mxu0 }
 0x60f   : > { %v15993_v4 = vpop.eup %15992  ;;  %12383 = vst [vmem:[%s18333_s17 + $0x3d0] sm:$0xff] %v15991_v61  ;;  %16012 = vrcp.f32 %v11545_v13  ;;  %v13830_v2 = vadd.f32 %v6616_v14, %v21603_v17  ;;  %v6618_v5 = vpop.f32.mrb[107].mxu0  ;;  %8293 = vmatmul.mubr.f32.gmra.mrb[152].mxu1 %v21097_v19  ;;  %13293 = vmatmul.mubr.f32.gmra.mrb[148].mxu0 %v21604_v45  ;;  %v21607_v45 = vld [vmem:[#allocation91_spill] sm:$0xff] }
 0x610   : > { %v15995_v53 = vpop.eup %15994  ;;  %12391 = vst [vmem:[%s18333_s17 + $0x410] sm:$0xff] %v15993_v4  ;;  %16014 = vrcp.f32 %v11553_v26  ;;  %v13831_v51 = vadd.f32 %v6618_v5, %v21603_v17  ;;  %8298 = vmatprep.mubr.f32.mxu1 %v20889_v24  ;;  %13295 = vmatprep.mubr.f32.mxu0 %v21605_v3  ;;  %v21606_v26 = vld [vmem:[#allocation148_spill] sm:$0xff] }
 0x611   : > { %v15997_v21 = vpop.eup %15996  ;;  %v11554_v8 = vadd.f32 1.0, %v15995_v53  ;;  %16016 = vpow2.f32 %v12832_v23  ;;  %v12841_v41 = vmul.f32 -1.442695, %v13830_v2  ;;  %v21618_v17 = vld [vmem:[#allocation108_spill] sm:$0xff] }
 0x612   : > { %v15999_v12 = vpop.eup %15998  ;;  %v11562_v15 = vadd.f32 1.0, %v15997_v21  ;;  %16018 = vpow2.f32 %v12833_v44  ;;  %v12842_v13 = vmul.f32 -1.442695, %v13831_v51  ;;  %v6623_v61 = vpop.f32.mrb[108].mxu0  ;;  %v21608_v44 = vld [vmem:[#allocation94_spill] sm:$0xff] }
 0x613   : > { %v16001_v14 = vpop.eup %16000  ;;  %12392 = vst [vmem:[%s18333_s17 + $0x418] sm:$0xff] %v15999_v12  ;;  %16020 = vrcp.f32 %v11554_v8  ;;  %v13832_v4 = vadd.f32 %v6623_v61, %v21606_v26  ;;  %v6625_v5 = vpop.f32.mrb[109].mxu0  ;;  %8300 = vmatmul.mubr.f32.gmra.mrb[154].mxu1 %v21100_v47  ;;  %13296 = vmatmul.mubr.f32.gmra.mrb[150].mxu0 %v21607_v45 }
 0x614   : > { %v16003_v53 = vpop.eup %16002  ;;  %12400 = vst [vmem:[%s18333_s17 + $0x458] sm:$0xff] %v16001_v14  ;;  %16022 = vrcp.f32 %v11562_v15  ;;  %v13833_v23 = vadd.f32 %v6625_v5, %v21606_v26  ;;  %8305 = vmatprep.mubr.f32.mxu1 %v20889_v24  ;;  %13298 = vmatprep.mubr.f32.mxu0 %v21608_v44  ;;  %v21609_v15 = vld [vmem:[#allocation149_spill] sm:$0xff]  ;;  %v21610_v44 = vld [vmem:[#allocation95_spill] sm:$0xff] }
 0x615   : > { %v16005_v2 = vpop.eup %16004  ;;  %v11563_v51 = vadd.f32 1.0, %v16003_v53  ;;  %16024 = vpow2.f32 %v12841_v41  ;;  %v12850_v3 = vmul.f32 -1.442695, %v13832_v4  ;;  %v21611_v4 = vld [vmem:[#allocation100_spill] sm:$0xff]  ;;  %v21614_v26 = vld [vmem:[#allocation101_spill] sm:$0xff] }
 0x616   : > { %v16007_v21 = vpop.eup %16006  ;;  %v11571_v8 = vadd.f32 1.0, %v16005_v2  ;;  %16026 = vpow2.f32 %v12842_v13  ;;  %v6630_v12 = vpop.f32.mrb[110].mxu0  ;;  %v12851_v14 = vmul.f32 -1.442695, %v13833_v23 }
 0x617   : > { %v16009_v61 = vpop.eup %16008  ;;  %12401 = vst [vmem:[%s18333_s17 + $0x460] sm:$0xff] %v16007_v21  ;;  %16028 = vrcp.f32 %v11563_v51  ;;  %v13834_v5 = vadd.f32 %v6630_v12, %v21609_v15  ;;  %v6632_v45 = vpop.f32.mrb[111].mxu0  ;;  %8307 = vmatmul.mubr.f32.gmra.mrb[156].mxu1 %v21103_v31  ;;  %13299 = vmatmul.mubr.f32.gmra.mrb[152].mxu0 %v21610_v44 }
 0x618   : > { %v16011_v53 = vpop.eup %16010  ;;  %16030 = vrcp.f32 %v11571_v8  ;;  %v11572_v41 = vadd.f32 1.0, %v16009_v61  ;;  %v13835_v13 = vadd.f32 %v6632_v45, %v21609_v15  ;;  %8312 = vmatprep.mubr.f32.mxu1 %v20889_v24  ;;  %13301 = vmatprep.mubr.f32.mxu0 %v21611_v4  ;;  %v21612_v8 = vld [vmem:[#allocation123_spill] sm:$0xff]  ;;  %v21613_v15 = vld [vmem:[#allocation61_spill] sm:$0xff] }
 0x619   : > { %v16013_v2 = vpop.eup %16012  ;;  %12409 = vst [vmem:[%s18333_s17 + $0x4a0] sm:$0xff] %v16011_v53  ;;  %16032 = vpow2.f32 %v12850_v3  ;;  %v12859_v23 = vmul.f32 -1.442695, %v13834_v5  ;;  %v21615_v53 = vld [vmem:[#allocation107_spill] sm:$0xff] }
 0x61a   : > { %v16015_v51 = vpop.eup %16014  ;;  %12410 = vst [vmem:[%s18333_s17 + $0x4a8] sm:$0xff] %v16013_v2  ;;  %16034 = vrcp.f32 %v11572_v41  ;;  %v12860_v21 = vmul.f32 -1.442695, %v13835_v13  ;;  %v6637_v12 = vpop.f32.mrb[112].mxu0 }
 0x61b   : > { %v16017_v44 = vpop.eup %16016  ;;  %12418 = vst [vmem:[%s18333_s17 + $0x4e8] sm:$0xff] %v16015_v51  ;;  %16036 = vpow2.f32 %v12851_v14  ;;  %v13836_v61 = vadd.f32 %v6637_v12, %v21612_v8  ;;  %v6639_v45 = vpop.f32.mrb[113].mxu0  ;;  %8314 = vmatmul.mubr.f32.gmra.mrb[158].mxu1 %v21613_v15  ;;  %13302 = vmatmul.mubr.f32.gmra.mrb[154].mxu0 %v21614_v26 }
 0x61c   : > { %v16019_v4 = vpop.eup %16018  ;;  %v11580_v3 = vadd.f32 1.0, %v16017_v44  ;;  %16038 = vpow2.f32 %v12859_v23  ;;  %v13837_v5 = vadd.f32 %v6639_v45, %v21612_v8  ;;  %8319 = vmatprep.mubr.f32.mxu1 %v20889_v24  ;;  %13304 = vmatprep.mubr.f32.mxu0 %v21615_v53  ;;  %v21616_v44 = vld [vmem:[#allocation150_spill] sm:$0xff] }
 0x61d   : > { %v16021_v41 = vpop.eup %16020  ;;  %v11581_v14 = vadd.f32 1.0, %v16019_v4  ;;  %16040 = vpow2.f32 %v12860_v21  ;;  %v12868_v13 = vmul.f32 -1.442695, %v13836_v61  ;;  %v21617_v8 = vld [vmem:[#allocation66_spill] sm:$0xff] }
 0x61e   : > { %v16023_v2 = vpop.eup %16022  ;;  %12419 = vst [vmem:[%s18333_s17 + $0x4f0] sm:$0xff] %v16021_v41  ;;  %16042 = vrcp.f32 %v11580_v3  ;;  %v12869_v51 = vmul.f32 -1.442695, %v13837_v5  ;;  %v6644_v12 = vpop.f32.mrb[114].mxu0  ;;  %v21619_v4 = vld [vmem:[#allocation114_spill] sm:$0xff] }
 0x61f   : > { %v16025_v26 = vpop.eup %16024  ;;  %12427 = vst [vmem:[%s18333_s17 + $0x530] sm:$0xff] %v16023_v2  ;;  %16044 = vrcp.f32 %v11581_v14  ;;  %v13838_v23 = vadd.f32 %v6644_v12, %v21616_v44  ;;  %v6646_v45 = vpop.f32.mrb[115].mxu0  ;;  %8321 = vmatmul.mubr.f32.gmra.mrb[160].mxu1 %v21617_v8  ;;  %13305 = vmatmul.mubr.f32.gmra.mrb[156].mxu0 %v21618_v17 }
 0x620   : > { %v16027_v53 = vpop.eup %16026  ;;  %v11589_v21 = vadd.f32 1.0, %v16025_v26  ;;  %16046 = vpow2.f32 %v12868_v13  ;;  %v13839_v61 = vadd.f32 %v6646_v45, %v21616_v44  ;;  %8326 = vmatprep.mubr.f32.mxu1 %v20889_v24  ;;  %13307 = vmatprep.mubr.f32.mxu0 %v21619_v4  ;;  %v21620_v13 = vld [vmem:[#allocation124_spill] sm:$0xff]  ;;  %v21621_v44 = vld [vmem:[#allocation118_spill] sm:$0xff] }
 0x621   : > { %v16029_v3 = vpop.eup %16028  ;;  %v11590_v5 = vadd.f32 1.0, %v16027_v53  ;;  %16048 = vpow2.f32 %v12869_v51  ;;  %v12877_v41 = vmul.f32 -1.442695, %v13838_v23  ;;  %v21622_v23 = vld [vmem:[#allocation8_spill] sm:$0xff] }
 0x622   : > { %v16031_v14 = vpop.eup %16030  ;;  %12428 = vst [vmem:[%s18333_s17 + $0x538] sm:$0xff] %v16029_v3  ;;  %16050 = vrcp.f32 %v11589_v21  ;;  %v12878_v2 = vmul.f32 -1.442695, %v13839_v61  ;;  %v6651_v17 = vpop.f32.mrb[116].mxu0 }
 0x623   : > { %v16033_v12 = vpop.eup %16032  ;;  %12436 = vst [vmem:[%s18333_s17 + $0x578] sm:$0xff] %v16031_v14  ;;  %16052 = vrcp.f32 %v11590_v5  ;;  %v13840_v26 = vadd.f32 %v6651_v17, %v21620_v13  ;;  %v6653_v45 = vpop.f32.mrb[117].mxu0  ;;  %8328 = vmatmul.mubr.f32.gmra.mrb[162].mxu1 %v17008_v35  ;;  %13308 = vmatmul.mubr.f32.gmra.mrb[158].mxu0 %v21621_v44 }
 0x624   : > { %v16035_v4 = vpop.eup %16034  ;;  %v11598_v53 = vadd.f32 1.0, %v16033_v12  ;;  %16054 = vpow2.f32 %v12877_v41  ;;  %v13841_v51 = vadd.f32 %v6653_v45, %v21620_v13  ;;  %8333 = vmatprep.mubr.f32.mxu1 %v20889_v24  ;;  %13316 = vmatprep.mubr.f32.mxu0 %v21622_v23  ;;  %v21623_v41 = vld [vmem:[#allocation151_spill] sm:$0xff]  ;;  %v21624_v23 = vld [vmem:[#allocation12_spill] sm:$0xff] }
 0x625   : > { %v16037_v21 = vpop.eup %16036  ;;  %12437 = vst [vmem:[%s18333_s17 + $0x580] sm:$0xff] %v16035_v4  ;;  %16056 = vpow2.f32 %v12878_v2  ;;  %v12886_v61 = vmul.f32 -1.442695, %v13840_v26 }
 0x626   : > { %v16039_v3 = vpop.eup %16038  ;;  %16058 = vrcp.f32 %v11598_v53  ;;  %v11599_v5 = vadd.f32 1.0, %v16037_v21  ;;  %v6658_v14 = vpop.f32.mrb[118].mxu0  ;;  %v12887_v12 = vmul.f32 -1.442695, %v13841_v51  ;;  %v21625_v21 = vld [vmem:[#allocation16_spill] sm:$0xff] }
 0x627   : > { %v16041_v17 = vpop.eup %16040  ;;  %v11607_v44 = vadd.f32 1.0, %v16039_v3  ;;  %16060 = vpow2.f32 %v12886_v61  ;;  %v13842_v29 = vadd.f32 %v6658_v14, %v21623_v41  ;;  %v6660_v45 = vpop.f32.mrb[119].mxu0  ;;  %8335 = vmatmul.mubr.f32.gmra.mrb[164].mxu1 %v17028_v7  ;;  %13317 = vmatmul.mubr.f32.vlgmr.msra.gmra.mrb[128].mxu0 %v21624_v23  ;;  %v21626_v61 = vld [vmem:[#allocation157_spill] sm:$0xff] }
 0x628   : > { %v16043_v4 = vpop.eup %16042  ;;  %16062 = vrcp.f32 %v11599_v5  ;;  %v11608_v2 = vadd.f32 1.0, %v16041_v17  ;;  %v13843_v26 = vadd.f32 %v6660_v45, %v21623_v41  ;;  %13587 = vmatpush3.bf16.msra.mxu0 %v19705_v0  ;;  %8340 = vmatprep.mubr.f32.mxu1 %v20889_v24  ;;  %v21627_v0 = vld [vmem:[#allocation152_spill] sm:$0xff] }
 0x629   : > { %v16045_v53 = vpop.eup %16044  ;;  %12445 = vst [vmem:[%s18333_s17 + $0x5c0] sm:$0xff] %v16043_v4  ;;  %16064 = vrcp.f32 %v11607_v44  ;;  %v12895_v51 = vmul.f32 -1.442695, %v13842_v29  ;;  %13319 = vmatprep.mubr.f32.mxu0 %v21625_v21  ;;  %13368 = vmatprep.subr.mxu0 %v21626_v61  ;;  %v21628_v4 = vld [vmem:[#allocation73_spill] sm:$0xff]  ;;  %v21629_v29 = vld [vmem:[#allocation20_spill] sm:$0xff] }
 0x62a   : > { %v16047_v3 = vpop.eup %16046  ;;  %12446 = vst [vmem:[%s18333_s17 + $0x5c8] sm:$0xff] %v16045_v53  ;;  %16066 = vrcp.f32 %v11608_v2  ;;  %v6665_v14 = vpop.f32.mrb[120].mxu0  ;;  %v12896_v45 = vmul.f32 -1.442695, %v13843_v26  ;;  %v21630_v2 = vld [vmem:[#allocation24_spill] sm:$0xff] }
 0x62b   : > { %v16049_v5 = vpop.eup %16048  ;;  %v11616_v17 = vadd.f32 1.0, %v16047_v3  ;;  %16068 = vpow2.f32 %v12887_v12  ;;  %v13844_v23 = vadd.f32 %v6665_v14, %v21627_v0  ;;  %v6667_v41 = vpop.f32.mrb[121].mxu0  ;;  %8342 = vmatmul.mubr.f32.gmra.mrb[166].mxu1 %v21628_v4  ;;  %13320 = vmatmul.mubr.f32.gmra.mrb[130].mxu0 %v21629_v29  ;;  %v21631_v29 = vld [vmem:[#allocation153_spill] sm:$0xff] }
 0x62c   : > { %v16051_v44 = vpop.eup %16050  ;;  %v11617_v21 = vadd.f32 1.0, %v16049_v5  ;;  %16070 = vpow2.f32 %v12895_v51  ;;  %v13845_v53 = vadd.f32 %v6667_v41, %v21627_v0  ;;  %8347 = vmatprep.mubr.f32.mxu1 %v20889_v24  ;;  %13322 = vmatprep.mubr.f32.mxu0 %v21630_v2 }
 0x62d   : > { %v16053_v3 = vpop.eup %16052  ;;  %12454 = vst [vmem:[%s18333_s17 + $0x608] sm:$0xff] %v16051_v44  ;;  %16072 = vrcp.f32 %v11616_v17  ;;  %v12904_v12 = vmul.f32 -1.442695, %v13844_v23  ;;  %13369 = vmatpush3.msra.mxu0 %v21626_v61  ;;  %v21632_v17 = vld [vmem:[#allocation26_spill] sm:$0xff] }
 0x62e   : > { %v16055_v26 = vpop.eup %16054  ;;  %12455 = vst [vmem:[%s18333_s17 + $0x610] sm:$0xff] %v16053_v3  ;;  %16074 = vrcp.f32 %v11617_v21  ;;  %v6672_v14 = vpop.f32.mrb[122].mxu0  ;;  %13589 = vmatprep.subr.bf16.mxu0 %v19125_v11  ;;  %v12905_v41 = vmul.f32 -1.442695, %v13845_v53  ;;  %v21633_v21 = vld [vmem:[#allocation31_spill] sm:$0xff] }
 0x62f   : > { %v16057_v51 = vpop.eup %16056  ;;  %v11625_v5 = vadd.f32 1.0, %v16055_v26  ;;  %16076 = vpow2.f32 %v12896_v45  ;;  %v13846_v0 = vadd.f32 %v6672_v14, %v21631_v29  ;;  %v6674_v2 = vpop.f32.mrb[123].mxu0  ;;  %8349 = vmatmul.mubr.f32.gmra.mrb[168].mxu1 %v17081_v57  ;;  %13323 = vmatmul.mubr.f32.gmra.mrb[132].mxu0 %v21632_v17 }
 0x630   : > { %v16059_v23 = vpop.eup %16058  ;;  %v11626_v61 = vadd.f32 1.0, %v16057_v51  ;;  %16078 = vpow2.f32 %v12904_v12  ;;  %v13847_v44 = vadd.f32 %v6674_v2, %v21631_v29  ;;  %8354 = vmatprep.mubr.f32.mxu1 %v20889_v24  ;;  %13325 = vmatprep.mubr.f32.mxu0 %v21633_v21  ;;  %v21634_v12 = vld [vmem:[#allocation154_spill] sm:$0xff]  ;;  %v21635_v21 = vld [vmem:[#allocation35_spill] sm:$0xff] }
 0x631   : > { %v16061_v3 = vpop.eup %16060  ;;  %12463 = vst [vmem:[%s18333_s17 + $0x650] sm:$0xff] %v16059_v23  ;;  %16080 = vrcp.f32 %v11625_v5  ;;  %v12913_v45 = vmul.f32 -1.442695, %v13846_v0  ;;  %v21636_v5 = vld [vmem:[#allocation40_spill] sm:$0xff] }
 0x632   : > { %v16063_v53 = vpop.eup %16062  ;;  %16082 = vrcp.f32 %v11626_v61  ;;  %v11634_v26 = vadd.f32 1.0, %v16061_v3  ;;  %v12914_v14 = vmul.f32 -1.442695, %v13847_v44  ;;  %v6679_v17 = vpop.f32.mrb[124].mxu0 }
 0x633   : > { %v16065_v13 = vpop.eup %16064  ;;  %12464 = vst [vmem:[%s18333_s17 + $0x658] sm:$0xff] %v16063_v53  ;;  %16084 = vpow2.f32 %v12905_v41  ;;  %v13848_v51 = vadd.f32 %v6679_v17, %v21634_v12  ;;  %v6681_v2 = vpop.f32.mrb[125].mxu0  ;;  %8356 = vmatmul.mubr.f32.gmra.mrb[170].mxu1 %v17088_v27  ;;  %13326 = vmatmul.mubr.f32.gmra.mrb[134].mxu0 %v21635_v21 }
 0x634   : > { %v16067_v23 = vpop.eup %16066  ;;  %12472 = vst [vmem:[%s18333_s17 + $0x698] sm:$0xff] %v16065_v13  ;;  %16086 = vrcp.f32 %v11634_v26  ;;  %v13849_v0 = vadd.f32 %v6681_v2, %v21634_v12  ;;  %8361 = vmatprep.mubr.f32.mxu1 %v20889_v24  ;;  %13328 = vmatprep.mubr.f32.mxu0 %v21636_v5  ;;  %v21637_v26 = vld [vmem:[#allocation155_spill] sm:$0xff]  ;;  %v21638_v5 = vld [vmem:[#allocation44_spill] sm:$0xff] }
 0x635   : > { %v16069_v61 = vpop.eup %16068  ;;  %12473 = vst [vmem:[%s18333_s17 + $0x6a0] sm:$0xff] %v16067_v23  ;;  %16088 = vpow2.f32 %v12913_v45  ;;  %v12922_v41 = vmul.f32 -1.442695, %v13848_v51 }
 0x636   : > { %v16071_v44 = vpop.eup %16070  ;;  %v11635_v3 = vadd.f32 1.0, %v16069_v61  ;;  %16090 = vpow2.f32 %v12914_v14  ;;  %v12923_v53 = vmul.f32 -1.442695, %v13849_v0  ;;  %v6686_v17 = vpop.f32.mrb[126].mxu0  ;;  %v21639_v14 = vld [vmem:[#allocation49_spill] sm:$0xff] }
 0x637   : > { %v16073_v21 = vpop.eup %16072  ;;  %v11643_v13 = vadd.f32 1.0, %v16071_v44  ;;  %16092 = vpow2.f32 %v12922_v41  ;;  %v13850_v2 = vadd.f32 %v6686_v17, %v21637_v26  ;;  %v6688_v12 = vpop.f32.mrb[127].mxu0  ;;  %8363 = vmatmul.mubr.f32.gmra.mrb[172].mxu1 %v17120_v16  ;;  %13329 = vmatmul.mubr.f32.gmra.mrb[136].mxu0 %v21638_v5 }
 0x638   : > { %v16075_v23 = vpop.eup %16074  ;;  %12481 = vst [vmem:[%s18333_s17 + $0x6e0] sm:$0xff] %v16073_v21  ;;  %16094 = vrcp.f32 %v11635_v3  ;;  %v13851_v45 = vadd.f32 %v6688_v12, %v21637_v26  ;;  %8368 = vmatprep.mubr.f32.mxu1 %v20889_v24  ;;  %13331 = vmatprep.mubr.f32.mxu0 %v21639_v14  ;;  %v21640_v12 = vld [vmem:[#allocation50_spill] sm:$0xff] }
 0x639   : > { %v16077_v51 = vpop.eup %16076  ;;  %12482 = vst [vmem:[%s18333_s17 + $0x6e8] sm:$0xff] %v16075_v23  ;;  %16096 = vrcp.f32 %v11643_v13  ;;  %v12931_v0 = vmul.f32 -1.442695, %v13850_v2  ;;  %v21641_v21 = vld [vmem:[#allocation54_spill] sm:$0xff] }
 0x63a   : > { %v16079_v61 = vpop.eup %16078  ;;  %v11644_v41 = vadd.f32 1.0, %v16077_v51  ;;  %16098 = vpow2.f32 %v12923_v53  ;;  %v12932_v44 = vmul.f32 -1.442695, %v13851_v45  ;;  %v21642_v45 = vld [vmem:[#allocation59_spill] sm:$0xff] }
 0x63b   : > { %v16081_v17 = vpop.eup %16080  ;;  %v11652_v5 = vadd.f32 1.0, %v16079_v61  ;;  %16100 = vpow2.f32 %v12931_v0  ;;  %8370 = vmatmul.mubr.f32.gmra.mrb[174].mxu1 %v17140_v60  ;;  %13332 = vmatmul.mubr.f32.gmra.mrb[138].mxu0 %v21640_v12  ;;  %v21643_v0 = vld [vmem:[#allocation64_spill] sm:$0xff] }
 0x63c   : > { %v16083_v3 = vpop.eup %16082  ;;  %12490 = vst [vmem:[%s18333_s17 + $0x728] sm:$0xff] %v16081_v17  ;;  %16102 = vrcp.f32 %v11644_v41  ;;  %8375 = vmatprep.mubr.f32.mxu1 %v20889_v24  ;;  %13334 = vmatprep.mubr.f32.mxu0 %v21641_v21  ;;  %v21644_v12 = vld [vmem:[#allocation68_spill] sm:$0xff]  ;;  %v21645_v21 = vld [vmem:[#allocation71_spill] sm:$0xff] }
 0x63d   : > { %v16085_v13 = vpop.eup %16084  ;;  %12491 = vst [vmem:[%s18333_s17 + $0x730] sm:$0xff] %v16083_v3  ;;  %16104 = vrcp.f32 %v11652_v5 }
 0x63e   : > { %v16087_v53 = vpop.eup %16086  ;;  %v11653_v2 = vadd.f32 1.0, %v16085_v13  ;;  %16106 = vpow2.f32 %v12932_v44 }
 0x63f   : > { %v16089_v23 = vpop.eup %16088  ;;  %12499 = vst [vmem:[%s18333_s17 + $0x770] sm:$0xff] %v16087_v53  ;;  %8377 = vmatmul.mubr.f32.gmra.mrb[176].mxu1 %v17167_v1  ;;  %13335 = vmatmul.mubr.f32.gmra.mrb[140].mxu0 %v21642_v45 }
 0x640   : > { %v16091_v14 = vpop.eup %16090  ;;  %16108 = vrcp.f32 %v11653_v2  ;;  %v11661_v51 = vadd.f32 1.0, %v16089_v23  ;;  %8382 = vmatprep.mubr.f32.mxu1 %v20889_v24  ;;  %13337 = vmatprep.mubr.f32.mxu0 %v21643_v0  ;;  %v21647_v0 = vld [vmem:[#allocation79_spill] sm:$0xff] }
 0x641   : > { %v16093_v61 = vpop.eup %16092  ;;  %v11662_v41 = vadd.f32 1.0, %v16091_v14  ;;  %v21646_v14 = vld [vmem:[#allocation75_spill] sm:$0xff] }
 0x642   : > { %v16095_v17 = vpop.eup %16094  ;;  %16110 = vrcp.f32 %v11661_v51  ;;  %v11670_v44 = vadd.f32 1.0, %v16093_v61 }
 0x643   : > { %v16097_v5 = vpop.eup %16096  ;;  %12500 = vst [vmem:[%s18333_s17 + $0x778] sm:$0xff] %v16095_v17  ;;  %16112 = vrcp.f32 %v11662_v41  ;;  %8384 = vmatmul.mubr.f32.gmra.mrb[178].mxu1 %v17175_v39  ;;  %13338 = vmatmul.mubr.f32.gmra.mrb[142].mxu0 %v21644_v12  ;;  %v21648_v17 = vld [vmem:[#allocation81_spill] sm:$0xff] }
 0x644   : > { %v16099_v3 = vpop.eup %16098  ;;  %12508 = vst [vmem:[%s18333_s17 + $0x7b8] sm:$0xff] %v16097_v5  ;;  %16114 = vrcp.f32 %v11670_v44  ;;  %8389 = vmatprep.mubr.f32.mxu1 %v20889_v24  ;;  %13340 = vmatprep.mubr.f32.mxu0 %v21645_v21  ;;  %v21649_v5 = vld [vmem:[#allocation85_spill] sm:$0xff]  ;;  %v21650_v21 = vld [vmem:[#allocation86_spill] sm:$0xff] }
 0x645   : > { %v16101_v13 = vpop.eup %16100  ;;  %v11671_v53 = vadd.f32 1.0, %v16099_v3 }
 0x646   : > { %v16103_v2 = vpop.eup %16102  ;;  %v11679_v23 = vadd.f32 1.0, %v16101_v13  ;;  %v21651_v13 = vld [vmem:[#allocation90_spill] sm:$0xff] }
 0x647   : > { %v16105_v45 = vpop.eup %16104  ;;  %12509 = vst [vmem:[%s18333_s17 + $0x7c0] sm:$0xff] %v16103_v2  ;;  %16116 = vrcp.f32 %v11671_v53  ;;  %8391 = vmatmul.mubr.f32.gmra.mrb[180].mxu1 %v17211_v54  ;;  %13341 = vmatmul.mubr.f32.gmra.mrb[144].mxu0 %v21646_v14 }
 0x648   : > { %v16107_v51 = vpop.eup %16106  ;;  %12517 = vst [vmem:[%s18333_s17 + $0x800] sm:$0xff] %v16105_v45  ;;  %16118 = vrcp.f32 %v11679_v23  ;;  %8396 = vmatprep.mubr.f32.mxu1 %v20889_v24  ;;  %13343 = vmatprep.mubr.f32.mxu0 %v21647_v0  ;;  %v21652_v23 = vld [vmem:[#allocation93_spill] sm:$0xff]  ;;  %v21655_v0 = vld [vmem:[#allocation103_spill] sm:$0xff] }
 0x649   : > { %v11680_v61 = vadd.f32 1.0, %v16107_v51  ;;  %v21653_v45 = vld [vmem:[#allocation97_spill] sm:$0xff]  ;;  %v21654_v51 = vld [vmem:[#allocation99_spill] sm:$0xff] }
 0x64a   : > { %v16109_v41 = vpop.eup %16108 }
 0x64b   : > { %12518 = vst [vmem:[%s18333_s17 + $0x808] sm:$0xff] %v16109_v41  ;;  %16120 = vrcp.f32 %v11680_v61  ;;  %8398 = vmatmul.mubr.f32.gmra.mrb[182].mxu1 %v17221_v9  ;;  %13344 = vmatmul.mubr.f32.gmra.mrb[146].mxu0 %v21648_v17  ;;  %v21656_v61 = vld [vmem:[#allocation106_spill] sm:$0xff]  ;;  %v21658_v17 = vld [vmem:[#allocation112_spill] sm:$0xff] }
 0x64c   : > { %v16111_v44 = vpop.eup %16110  ;;  %8403 = vmatprep.mubr.f32.mxu1 %v20889_v24  ;;  %13346 = vmatprep.mubr.f32.mxu0 %v21649_v5  ;;  %v21657_v41 = vld [vmem:[#allocation110_spill] sm:$0xff]  ;;  %v21660_v5 = vld [vmem:[#allocation120_spill] sm:$0xff] }
 0x64d   : > { %v16113_v12 = vpop.eup %16112  ;;  %12526 = vst [vmem:[%s18333_s17 + $0x848] sm:$0xff] %v16111_v44  ;;  %v21659_v44 = vld [vmem:[#allocation117_spill] sm:$0xff] }
 0x64e   : > { %v16115_v3 = vpop.eup %16114  ;;  %12527 = vst [vmem:[%s18333_s17 + $0x850] sm:$0xff] %v16113_v12 }
 0x64f   : > { %12535 = vst [vmem:[%s18333_s17 + $0x890] sm:$0xff] %v16115_v3  ;;  %8405 = vmatmul.mubr.f32.gmra.mrb[184].mxu1 %v17257_v63  ;;  %13347 = vmatmul.mubr.f32.gmra.mrb[148].mxu0 %v21650_v21 }
 0x650   : > { %8410 = vmatprep.mubr.f32.mxu1 %v20889_v24  ;;  %13349 = vmatprep.mubr.f32.mxu0 %v21651_v13 }
 0x651   : > { %v16117_v53 = vpop.eup %16116 }
 0x652   : > { %v16119_v2 = vpop.eup %16118  ;;  %12536 = vst [vmem:[%s18333_s17 + $0x898] sm:$0xff] %v16117_v53 }
 0x653   : > { %12544 = vst [vmem:[%s18333_s17 + $0x8d8] sm:$0xff] %v16119_v2  ;;  %8412 = vmatmul.mubr.f32.gmra.mrb[186].mxu1 %v21138_v55  ;;  %13350 = vmatmul.mubr.f32.gmra.mrb[150].mxu0 %v21652_v23 }
 0x654   : > { %8417 = vmatprep.mubr.f32.mxu1 %v20889_v24  ;;  %13352 = vmatprep.mubr.f32.mxu0 %v21653_v45 }
 0x655   : > { %v16121_v14 = vpop.eup %16120 }
 0x656   : > { %12545 = vst [vmem:[%s18333_s17 + $0x8e0] sm:$0xff] %v16121_v14 }
 0x657   : > { %8419 = vmatmul.mubr.f32.gmra.mrb[188].mxu1 %v21145_v10  ;;  %13353 = vmatmul.mubr.f32.gmra.mrb[152].mxu0 %v21654_v51  ;;  %v21666_v51 = vld [vmem:[#allocation128_spill] sm:$0xff] }
 0x658   : > { %8424 = vmatprep.mubr.f32.mxu1 %v20889_v24  ;;  %13355 = vmatprep.mubr.f32.mxu0 %v21655_v0 }
 0x65b   : > { %8426 = vmatmul.mubr.f32.gmra.mrb[190].mxu1 %v21149_v58  ;;  %13356 = vmatmul.mubr.f32.gmra.mrb[154].mxu0 %v21656_v61 }
 0x65c   : > { %8502 = vmatprep.mubr.f32.mxu1 %v20889_v24  ;;  %13358 = vmatprep.mubr.f32.mxu0 %v21657_v41 }
 0x65f   : > { %8504 = vmatmul.mubr.f32.vlgmr.msra.gmra.mrb[128].mxu1 %v21061_v52  ;;  %13359 = vmatmul.mubr.f32.gmra.mrb[156].mxu0 %v21658_v17 }
 0x660   : > { %8509 = vmatprep.mubr.f32.mxu1 %v20889_v24  ;;  %13361 = vmatprep.mubr.f32.mxu0 %v21659_v44 }
 0x663   : > { %8511 = vmatmul.mubr.f32.gmra.mrb[130].mxu1 %v21063_v38  ;;  %13362 = vmatmul.mubr.f32.gmra.mrb[158].mxu0 %v21660_v5 }
 0x664   : > { %8516 = vmatprep.mubr.f32.mxu1 %v20889_v24  ;;  %13370 = vmatprep.mubr.f32.mxu0 %v21061_v52 }
 0x667   : > { %8518 = vmatmul.mubr.f32.gmra.mrb[132].mxu1 %v21065_v48  ;;  %13371 = vmatmul.mubr.f32.vlgmr.msra.gmra.mrb[128].mxu0 %v21063_v38 }
 0x668   : > { %13591 = vmatpush3.bf16.msra.mxu0 %v19125_v11  ;;  %8523 = vmatprep.mubr.f32.mxu1 %v20889_v24 }
 0x669   : > { %13373 = vmatprep.mubr.f32.mxu0 %v21065_v48  ;;  %13422 = vmatprep.subr.mxu0 %v19343_v62 }
 0x66b   : > { %8525 = vmatmul.mubr.f32.gmra.mrb[134].mxu1 %v21070_v56  ;;  %13374 = vmatmul.mubr.f32.gmra.mrb[130].mxu0 %v21070_v56 }
 0x66c   : > { %8530 = vmatprep.mubr.f32.mxu1 %v20889_v24  ;;  %13376 = vmatprep.mubr.f32.mxu0 %v21073_v46 }
 0x66d   : > { %13423 = vmatpush3.msra.mxu0 %v19343_v62 }
 0x66f   : > { %8532 = vmatmul.mubr.f32.gmra.mrb[136].mxu1 %v21073_v46  ;;  %13377 = vmatmul.mubr.f32.gmra.mrb[132].mxu0 %v21076_v34 }
 0x670   : > { %8537 = vmatprep.mubr.f32.mxu1 %v20889_v24  ;;  %13379 = vmatprep.mubr.f32.mxu0 %v21079_v59 }
 0x673   : > { %8539 = vmatmul.mubr.f32.gmra.mrb[138].mxu1 %v21076_v34  ;;  %13380 = vmatmul.mubr.f32.gmra.mrb[134].mxu0 %v21082_v49 }
 0x674   : > { %8544 = vmatprep.mubr.f32.mxu1 %v20889_v24  ;;  %13382 = vmatprep.mubr.f32.mxu0 %v21085_v20 }
 0x677   : > { %8546 = vmatmul.mubr.f32.gmra.mrb[140].mxu1 %v21079_v59  ;;  %13383 = vmatmul.mubr.f32.gmra.mrb[136].mxu0 %v21088_v30 }
 0x678   : > { %8551 = vmatprep.mubr.f32.mxu1 %v20889_v24  ;;  %13385 = vmatprep.mubr.f32.mxu0 %v21091_v36 }
 0x67b   : > { %8553 = vmatmul.mubr.f32.gmra.mrb[142].mxu1 %v21082_v49  ;;  %13386 = vmatmul.mubr.f32.gmra.mrb[138].mxu0 %v21094_v32 }
 0x67c   : > { %8558 = vmatprep.mubr.f32.mxu1 %v20889_v24  ;;  %13388 = vmatprep.mubr.f32.mxu0 %v21097_v19 }
 0x67f   : > { %8560 = vmatmul.mubr.f32.gmra.mrb[144].mxu1 %v21085_v20  ;;  %13389 = vmatmul.mubr.f32.gmra.mrb[140].mxu0 %v21100_v47 }
 0x680   : > { %8565 = vmatprep.mubr.f32.mxu1 %v20889_v24  ;;  %13391 = vmatprep.mubr.f32.mxu0 %v21103_v31 }
 0x683   : > { %8567 = vmatmul.mubr.f32.gmra.mrb[146].mxu1 %v21088_v30  ;;  %13392 = vmatmul.mubr.f32.gmra.mrb[142].mxu0 %v21613_v15 }
 0x684   : > { %8572 = vmatprep.mubr.f32.mxu1 %v20889_v24  ;;  %13394 = vmatprep.mubr.f32.mxu0 %v21617_v8 }
 0x687   : > { %8574 = vmatmul.mubr.f32.gmra.mrb[148].mxu1 %v21091_v36  ;;  %13395 = vmatmul.mubr.f32.gmra.mrb[144].mxu0 %v17008_v35 }
 0x688   : > { %8579 = vmatprep.mubr.f32.mxu1 %v20889_v24  ;;  %13397 = vmatprep.mubr.f32.mxu0 %v17028_v7 }
 0x68b   : > { %8581 = vmatmul.mubr.f32.gmra.mrb[150].mxu1 %v21094_v32  ;;  %13398 = vmatmul.mubr.f32.gmra.mrb[146].mxu0 %v21628_v4 }
 0x68c   : > { %8586 = vmatprep.mubr.f32.mxu1 %v20889_v24  ;;  %13400 = vmatprep.mubr.f32.mxu0 %v17081_v57 }
 0x68f   : > { %8588 = vmatmul.mubr.f32.gmra.mrb[152].mxu1 %v21097_v19  ;;  %13401 = vmatmul.mubr.f32.gmra.mrb[148].mxu0 %v17088_v27 }
 0x690   : > { %8593 = vmatprep.mubr.f32.mxu1 %v20889_v24  ;;  %13403 = vmatprep.mubr.f32.mxu0 %v17120_v16 }
 0x693   : > { %8595 = vmatmul.mubr.f32.gmra.mrb[154].mxu1 %v21100_v47  ;;  %13404 = vmatmul.mubr.f32.gmra.mrb[150].mxu0 %v17140_v60 }
 0x694   : > { %8600 = vmatprep.mubr.f32.mxu1 %v20889_v24  ;;  %13406 = vmatprep.mubr.f32.mxu0 %v17167_v1 }
 0x697   : > { %8602 = vmatmul.mubr.f32.gmra.mrb[156].mxu1 %v21103_v31  ;;  %13407 = vmatmul.mubr.f32.gmra.mrb[152].mxu0 %v17175_v39 }
 0x698   : > { %8607 = vmatprep.mubr.f32.mxu1 %v20889_v24  ;;  %13409 = vmatprep.mubr.f32.mxu0 %v17211_v54 }
 0x69b   : > { %8609 = vmatmul.mubr.f32.gmra.mrb[158].mxu1 %v21613_v15  ;;  %13410 = vmatmul.mubr.f32.gmra.mrb[154].mxu0 %v17221_v9 }
 0x69c   : > { %8614 = vmatprep.mubr.f32.mxu1 %v20889_v24  ;;  %13412 = vmatprep.mubr.f32.mxu0 %v17257_v63 }
 0x69f   : > { %8616 = vmatmul.mubr.f32.gmra.mrb[160].mxu1 %v21617_v8  ;;  %13413 = vmatmul.mubr.f32.gmra.mrb[156].mxu0 %v21138_v55 }
 0x6a0   : > { %8621 = vmatprep.mubr.f32.mxu1 %v20889_v24  ;;  %13415 = vmatprep.mubr.f32.mxu0 %v21145_v10 }
 0x6a3   : > { %8623 = vmatmul.mubr.f32.gmra.mrb[162].mxu1 %v17008_v35  ;;  %13416 = vmatmul.mubr.f32.gmra.mrb[158].mxu0 %v21149_v58 }
 0x6a4   : > { %8628 = vmatprep.mubr.f32.mxu1 %v20889_v24  ;;  %13424 = vmatprep.mubr.f32.mxu0 %v21061_v52 }
 0x6a7   : > { %8630 = vmatmul.mubr.f32.gmra.mrb[164].mxu1 %v17028_v7  ;;  %13425 = vmatmul.mubr.f32.vlgmr.msra.gmra.mrb[128].mxu0 %v21063_v38 }
 0x6a8   : > { %8635 = vmatprep.mubr.f32.mxu1 %v20889_v24  ;;  %13427 = vmatprep.mubr.f32.mxu0 %v21065_v48 }
 0x6ab   : > { %8637 = vmatmul.mubr.f32.gmra.mrb[166].mxu1 %v21628_v4  ;;  %13428 = vmatmul.mubr.f32.gmra.mrb[130].mxu0 %v21070_v56 }
 0x6ac   : > { %8642 = vmatprep.mubr.f32.mxu1 %v20889_v24  ;;  %13430 = vmatprep.mubr.f32.mxu0 %v21073_v46 }
 0x6af   : > { %8644 = vmatmul.mubr.f32.gmra.mrb[168].mxu1 %v17081_v57  ;;  %13431 = vmatmul.mubr.f32.gmra.mrb[132].mxu0 %v21076_v34 }
 0x6b0   : > { %8649 = vmatprep.mubr.f32.mxu1 %v20889_v24  ;;  %13433 = vmatprep.mubr.f32.mxu0 %v21079_v59 }
 0x6b3   : > { %8651 = vmatmul.mubr.f32.gmra.mrb[170].mxu1 %v17088_v27  ;;  %13434 = vmatmul.mubr.f32.gmra.mrb[134].mxu0 %v21082_v49 }
 0x6b4   : > { %8656 = vmatprep.mubr.f32.mxu1 %v20889_v24  ;;  %13436 = vmatprep.mubr.f32.mxu0 %v21085_v20 }
 0x6b7   : > { %8658 = vmatmul.mubr.f32.gmra.mrb[172].mxu1 %v17120_v16  ;;  %13437 = vmatmul.mubr.f32.gmra.mrb[136].mxu0 %v21088_v30 }
 0x6b8   : > { %8663 = vmatprep.mubr.f32.mxu1 %v20889_v24  ;;  %13439 = vmatprep.mubr.f32.mxu0 %v21091_v36  ;;  %v21661_v36 = vld [vmem:[#allocation125_spill] sm:$0xff] }
 0x6bb   : > { %8665 = vmatmul.mubr.f32.gmra.mrb[174].mxu1 %v17140_v60  ;;  %13440 = vmatmul.mubr.f32.gmra.mrb[138].mxu0 %v21094_v32  ;;  %v21664_v32 = vld [vmem:[#allocation127_spill] sm:$0xff] }
 0x6bc   : > { %8670 = vmatprep.mubr.f32.mxu1 %v20889_v24  ;;  %13442 = vmatprep.mubr.f32.mxu0 %v21097_v19 }
 0x6bf   : > { %8672 = vmatmul.mubr.f32.gmra.mrb[176].mxu1 %v17167_v1  ;;  %13443 = vmatmul.mubr.f32.gmra.mrb[140].mxu0 %v21100_v47 }
 0x6c0   : > { %8677 = vmatprep.mubr.f32.mxu1 %v20889_v24  ;;  %13445 = vmatprep.mubr.f32.mxu0 %v21103_v31 }
 0x6c3   : > { %8679 = vmatmul.mubr.f32.gmra.mrb[178].mxu1 %v17175_v39  ;;  %13446 = vmatmul.mubr.f32.gmra.mrb[142].mxu0 %v21613_v15 }
 0x6c4   : > { %8684 = vmatprep.mubr.f32.mxu1 %v20889_v24  ;;  %13448 = vmatprep.mubr.f32.mxu0 %v21617_v8  ;;  %v21665_v8 = vld [vmem:[#allocation115_spill] sm:$0xff] }
 0x6c7   : > { %8686 = vmatmul.mubr.f32.gmra.mrb[180].mxu1 %v17211_v54  ;;  %13449 = vmatmul.mubr.f32.gmra.mrb[144].mxu0 %v17008_v35 }
 0x6c8   : > { %8691 = vmatprep.mubr.f32.mxu1 %v20889_v24  ;;  %13451 = vmatprep.mubr.f32.mxu0 %v17028_v7  ;;  %v21662_v7 = vld [vmem:[#allocation126_spill] sm:$0xff] }
 0x6cb   : > { %8693 = vmatmul.mubr.f32.gmra.mrb[182].mxu1 %v17221_v9  ;;  %13452 = vmatmul.mubr.f32.gmra.mrb[146].mxu0 %v21628_v4 }
 0x6cc   : > { %8698 = vmatprep.mubr.f32.mxu1 %v20889_v24  ;;  %13454 = vmatprep.mubr.f32.mxu0 %v17081_v57 }
 0x6cf   : > { %8700 = vmatmul.mubr.f32.gmra.mrb[184].mxu1 %v17257_v63  ;;  %13455 = vmatmul.mubr.f32.gmra.mrb[148].mxu0 %v17088_v27 }
 0x6d0   : > { %8705 = vmatprep.mubr.f32.mxu1 %v20889_v24  ;;  %13457 = vmatprep.mubr.f32.mxu0 %v17120_v16 }
 0x6d3   : > { %8707 = vmatmul.mubr.f32.gmra.mrb[186].mxu1 %v21138_v55  ;;  %13458 = vmatmul.mubr.f32.gmra.mrb[150].mxu0 %v17140_v60 }
 0x6d4   : > { %8712 = vmatprep.mubr.f32.mxu1 %v20889_v24  ;;  %13460 = vmatprep.mubr.f32.mxu0 %v17167_v1 }
 0x6d7   : > { %8714 = vmatmul.mubr.f32.gmra.mrb[188].mxu1 %v21145_v10  ;;  %13461 = vmatmul.mubr.f32.gmra.mrb[152].mxu0 %v17175_v39 }
 0x6d8   : > { %8719 = vmatprep.mubr.f32.mxu1 %v20889_v24  ;;  %13463 = vmatprep.mubr.f32.mxu0 %v17211_v54  ;;  %v21663_v54 = vld [vmem:[#allocation111_spill] sm:$0xff] }
 0x6db   : > { %8721 = vmatmul.mubr.f32.gmra.mrb[190].mxu1 %v21149_v58  ;;  %13464 = vmatmul.mubr.f32.gmra.mrb[154].mxu0 %v17221_v9 }
 0x6dc   : > { %13466 = vmatprep.mubr.f32.mxu0 %v17257_v63 }
 0x6df   : > { %13467 = vmatmul.mubr.f32.gmra.mrb[156].mxu0 %v21138_v55 }
 0x6e0   : > { %13469 = vmatprep.mubr.f32.mxu0 %v21145_v10 }
 0x6e3   : > { %13470 = vmatmul.mubr.f32.gmra.mrb[158].mxu0 %v21149_v58 }
 0x732   : > { %v8505_v19 = vpop.f32.mrb[128].mxu1 }
 0x733   : > { %v13852_v49 = vadd.f32 %v8505_v19, %v21661_v36  ;;  %v8507_v56 = vpop.f32.mrb[129].mxu1 }
 0x734   : > { %v13853_v24 = vadd.f32 %v8507_v56, %v21661_v36 }
 0x735   : > { %v12654_v34 = vmul.f32 -1.442695, %v13852_v49 }
 0x736   : > { %v12655_v57 = vmul.f32 -1.442695, %v13853_v24  ;;  %v8512_v35 = vpop.f32.mrb[130].mxu1 }
 0x737   : > { %16122 = vpow2.f32 %v12654_v34  ;;  %v13854_v27 = vadd.f32 %v8512_v35, %v21662_v7  ;;  %v8514_v16 = vpop.f32.mrb[131].mxu1  ;;  %v21667_v34 = vld [vmem:[#allocation62_spill] sm:$0xff] }
 0x738   : > { %16124 = vpow2.f32 %v12655_v57  ;;  %v13855_v63 = vadd.f32 %v8514_v16, %v21662_v7 }
 0x739   : > { %v12663_v1 = vmul.f32 -1.442695, %v13854_v27 }
 0x73a   : > { %v12664_v10 = vmul.f32 -1.442695, %v13855_v63  ;;  %v8519_v60 = vpop.f32.mrb[132].mxu1 }
 0x73b   : > { %16126 = vpow2.f32 %v12663_v1  ;;  %v13856_v39 = vadd.f32 %v8519_v60, %v21663_v54  ;;  %v8521_v38 = vpop.f32.mrb[133].mxu1 }
 0x73c   : > { %16128 = vpow2.f32 %v12664_v10  ;;  %v13857_v9 = vadd.f32 %v8521_v38, %v21663_v54 }
 0x73d   : > { %v12672_v55 = vmul.f32 -1.442695, %v13856_v39 }
 0x73e   : > { %v12673_v31 = vmul.f32 -1.442695, %v13857_v9  ;;  %v8526_v47 = vpop.f32.mrb[134].mxu1  ;;  %v21668_v9 = vld [vmem:[#allocation129_spill] sm:$0xff] }
 0x73f   : > { %16130 = vpow2.f32 %v12672_v55  ;;  %v13858_v30 = vadd.f32 %v8526_v47, %v21664_v32  ;;  %v8528_v48 = vpop.f32.mrb[135].mxu1 }
 0x740   : > { %16132 = vpow2.f32 %v12673_v31  ;;  %v13859_v20 = vadd.f32 %v8528_v48, %v21664_v32 }
 0x741   : > { %v16123_v59 = vpop.eup %16122  ;;  %v12681_v52 = vmul.f32 -1.442695, %v13858_v30 }
 0x742   : > { %v16125_v46 = vpop.eup %16124  ;;  %v11402_v58 = vadd.f32 1.0, %v16123_v59  ;;  %v12682_v11 = vmul.f32 -1.442695, %v13859_v20  ;;  %v8533_v62 = vpop.f32.mrb[136].mxu1 }
 0x743   : > { %v11403_v15 = vadd.f32 1.0, %v16125_v46  ;;  %16134 = vpow2.f32 %v12681_v52  ;;  %v13860_v4 = vadd.f32 %v8533_v62, %v21665_v8  ;;  %v8535_v12 = vpop.f32.mrb[137].mxu1 }
 0x744   : > { %16136 = vrcp.f32 %v11402_v58  ;;  %v13861_v3 = vadd.f32 %v8535_v12, %v21665_v8 }
 0x745   : > { %v16127_v21 = vpop.eup %16126  ;;  %16138 = vrcp.f32 %v11403_v15  ;;  %v12690_v13 = vmul.f32 -1.442695, %v13860_v4  ;;  %v21669_v15 = vld [vmem:[#allocation130_spill] sm:$0xff] }
 0x746   : > { %v16129_v53 = vpop.eup %16128  ;;  %v11411_v2 = vadd.f32 1.0, %v16127_v21  ;;  %16140 = vpow2.f32 %v12682_v11  ;;  %v12691_v23 = vmul.f32 -1.442695, %v13861_v3  ;;  %v8540_v45 = vpop.f32.mrb[138].mxu1 }
 0x747   : > { %v11412_v14 = vadd.f32 1.0, %v16129_v53  ;;  %16142 = vpow2.f32 %v12690_v13  ;;  %v13862_v0 = vadd.f32 %v8540_v45, %v21666_v51  ;;  %v8542_v61 = vpop.f32.mrb[139].mxu1 }
 0x748   : > { %16144 = vrcp.f32 %v11411_v2  ;;  %v13863_v41 = vadd.f32 %v8542_v61, %v21666_v51 }
 0x749   : > { %v16131_v17 = vpop.eup %16130  ;;  %16146 = vrcp.f32 %v11412_v14  ;;  %v12699_v44 = vmul.f32 -1.442695, %v13862_v0 }
 0x74a   : > { %v16133_v5 = vpop.eup %16132  ;;  %v11420_v19 = vadd.f32 1.0, %v16131_v17  ;;  %16148 = vpow2.f32 %v12691_v23  ;;  %v12700_v49 = vmul.f32 -1.442695, %v13863_v41  ;;  %v8547_v56 = vpop.f32.mrb[140].mxu1 }
 0x74b   : > { %v11421_v24 = vadd.f32 1.0, %v16133_v5  ;;  %16150 = vpow2.f32 %v12699_v44  ;;  %v13864_v57 = vadd.f32 %v8547_v56, %v21667_v34  ;;  %v8549_v35 = vpop.f32.mrb[141].mxu1 }
 0x74c   : > { %16152 = vrcp.f32 %v11420_v19  ;;  %v13865_v27 = vadd.f32 %v8549_v35, %v21667_v34 }
 0x74d   : > { %v16135_v16 = vpop.eup %16134  ;;  %16154 = vrcp.f32 %v11421_v24  ;;  %v12708_v63 = vmul.f32 -1.442695, %v13864_v57 }
 0x74e   : > { %v16137_v1 = vpop.eup %16136  ;;  %v11429_v10 = vadd.f32 1.0, %v16135_v16  ;;  %16156 = vpow2.f32 %v12700_v49  ;;  %v12709_v60 = vmul.f32 -1.442695, %v13865_v27  ;;  %v8554_v39 = vpop.f32.mrb[142].mxu1 }
 0x74f   : > { %v16139_v38 = vpop.eup %16138  ;;  %12266 = vst [vmem:[%s18333_s17 + $0x30] sm:$0xff] %v16137_v1  ;;  %16158 = vpow2.f32 %v12708_v63  ;;  %v13866_v55 = vadd.f32 %v8554_v39, %v21668_v9  ;;  %v8556_v31 = vpop.f32.mrb[143].mxu1 }
 0x750   : > { %v16141_v47 = vpop.eup %16140  ;;  %12267 = vst [vmem:[%s18333_s17 + $0x38] sm:$0xff] %v16139_v38  ;;  %16160 = vrcp.f32 %v11429_v10  ;;  %v13867_v30 = vadd.f32 %v8556_v31, %v21668_v9 }
 0x751   : > { %v16143_v48 = vpop.eup %16142  ;;  %v11430_v20 = vadd.f32 1.0, %v16141_v47  ;;  %16162 = vpow2.f32 %v12709_v60  ;;  %v12717_v59 = vmul.f32 -1.442695, %v13866_v55 }
 0x752   : > { %v16145_v52 = vpop.eup %16144  ;;  %v11438_v46 = vadd.f32 1.0, %v16143_v48  ;;  %v12718_v58 = vmul.f32 -1.442695, %v13867_v30  ;;  %v8561_v11 = vpop.f32.mrb[144].mxu1 }
 0x753   : > { %v16147_v62 = vpop.eup %16146  ;;  %12276 = vst [vmem:[%s18333_s17 + $0x78] sm:$0xff] %v16145_v52  ;;  %16164 = vrcp.f32 %v11430_v20  ;;  %v13868_v4 = vadd.f32 %v8561_v11, %v21669_v15  ;;  %v8563_v12 = vpop.f32.mrb[145].mxu1 }
 0x754   : > { %v16149_v3 = vpop.eup %16148  ;;  %12277 = vst [vmem:[%s18333_s17 + $0x80] sm:$0xff] %v16147_v62  ;;  %16166 = vrcp.f32 %v11438_v46  ;;  %v13869_v21 = vadd.f32 %v8563_v12, %v21669_v15 }
 0x755   : > { %v16151_v13 = vpop.eup %16150  ;;  %v11439_v53 = vadd.f32 1.0, %v16149_v3  ;;  %16168 = vpow2.f32 %v12717_v59  ;;  %v12726_v2 = vmul.f32 -1.442695, %v13868_v4 }
 0x756   : > { %v16153_v23 = vpop.eup %16152  ;;  %v11447_v45 = vadd.f32 1.0, %v16151_v13  ;;  %16170 = vpow2.f32 %v12718_v58  ;;  %v12727_v14 = vmul.f32 -1.442695, %v13869_v21  ;;  %v8568_v0 = vpop.f32.mrb[146].mxu1 }
 0x757   : > { %v16155_v61 = vpop.eup %16154  ;;  %12285 = vst [vmem:[%s18333_s17 + $0xc0] sm:$0xff] %v16153_v23  ;;  %16172 = vrcp.f32 %v11439_v53  ;;  %v13870_v41 = vadd.f32 %v8568_v0, %v21578_v28  ;;  %v8570_v17 = vpop.f32.mrb[147].mxu1 }
 0x758   : > { %v16157_v44 = vpop.eup %16156  ;;  %12286 = vst [vmem:[%s18333_s17 + $0xc8] sm:$0xff] %v16155_v61  ;;  %16174 = vrcp.f32 %v11447_v45  ;;  %v13871_v5 = vadd.f32 %v8570_v17, %v21578_v28 }
 0x759   : > { %v16159_v19 = vpop.eup %16158  ;;  %v11448_v49 = vadd.f32 1.0, %v16157_v44  ;;  %16176 = vpow2.f32 %v12726_v2  ;;  %v12735_v56 = vmul.f32 -1.442695, %v13870_v41 }
 0x75a   : > { %v16161_v24 = vpop.eup %16160  ;;  %v11456_v57 = vadd.f32 1.0, %v16159_v19  ;;  %16178 = vpow2.f32 %v12727_v14  ;;  %v8575_v35 = vpop.f32.mrb[148].mxu1  ;;  %v12736_v16 = vmul.f32 -1.442695, %v13871_v5 }
 0x75b   : > { %v16163_v27 = vpop.eup %16162  ;;  %12294 = vst [vmem:[%s18333_s17 + $0x108] sm:$0xff] %v16161_v24  ;;  %16180 = vrcp.f32 %v11448_v49  ;;  %v13872_v63 = vadd.f32 %v8575_v35, %v21579_v40  ;;  %v8577_v1 = vpop.f32.mrb[149].mxu1 }
 0x75c   : > { %16182 = vrcp.f32 %v11456_v57  ;;  %v11457_v10 = vadd.f32 1.0, %v16163_v27  ;;  %v13873_v60 = vadd.f32 %v8577_v1, %v21579_v40 }
 0x75d   : > { %v16165_v39 = vpop.eup %16164  ;;  %16184 = vpow2.f32 %v12735_v56  ;;  %v12744_v38 = vmul.f32 -1.442695, %v13872_v63 }
 0x75e   : > { %v16167_v55 = vpop.eup %16166  ;;  %12295 = vst [vmem:[%s18333_s17 + $0x110] sm:$0xff] %v16165_v39  ;;  %16186 = vrcp.f32 %v11457_v10  ;;  %v12745_v31 = vmul.f32 -1.442695, %v13873_v60  ;;  %v8582_v47 = vpop.f32.mrb[150].mxu1 }
 0x75f   : > { %v16169_v30 = vpop.eup %16168  ;;  %12303 = vst [vmem:[%s18333_s17 + $0x150] sm:$0xff] %v16167_v55  ;;  %16188 = vpow2.f32 %v12736_v16  ;;  %v13874_v48 = vadd.f32 %v8582_v47, %v21580_v42  ;;  %v8584_v20 = vpop.f32.mrb[151].mxu1 }
 0x760   : > { %v16171_v59 = vpop.eup %16170  ;;  %v11465_v52 = vadd.f32 1.0, %v16169_v30  ;;  %16190 = vpow2.f32 %v12744_v38  ;;  %v13875_v46 = vadd.f32 %v8584_v20, %v21580_v42 }
 0x761   : > { %v16173_v58 = vpop.eup %16172  ;;  %v11466_v11 = vadd.f32 1.0, %v16171_v59  ;;  %16192 = vpow2.f32 %v12745_v31  ;;  %v12753_v62 = vmul.f32 -1.442695, %v13874_v48 }
 0x762   : > { %v16175_v4 = vpop.eup %16174  ;;  %12304 = vst [vmem:[%s18333_s17 + $0x158] sm:$0xff] %v16173_v58  ;;  %16194 = vrcp.f32 %v11465_v52  ;;  %v12754_v12 = vmul.f32 -1.442695, %v13875_v46  ;;  %v8589_v3 = vpop.f32.mrb[152].mxu1 }
 0x763   : > { %v16177_v21 = vpop.eup %16176  ;;  %12312 = vst [vmem:[%s18333_s17 + $0x198] sm:$0xff] %v16175_v4  ;;  %16196 = vrcp.f32 %v11466_v11  ;;  %v13876_v13 = vadd.f32 %v8589_v3, %v21583_v18  ;;  %v8591_v53 = vpop.f32.mrb[153].mxu1 }
 0x764   : > { %v16179_v2 = vpop.eup %16178  ;;  %v11474_v23 = vadd.f32 1.0, %v16177_v21  ;;  %16198 = vpow2.f32 %v12753_v62  ;;  %v13877_v45 = vadd.f32 %v8591_v53, %v21583_v18 }
 0x765   : > { %v16181_v14 = vpop.eup %16180  ;;  %v11475_v0 = vadd.f32 1.0, %v16179_v2  ;;  %16200 = vpow2.f32 %v12754_v12  ;;  %v12762_v61 = vmul.f32 -1.442695, %v13876_v13 }
 0x766   : > { %v16183_v41 = vpop.eup %16182  ;;  %12313 = vst [vmem:[%s18333_s17 + $0x1a0] sm:$0xff] %v16181_v14  ;;  %16202 = vrcp.f32 %v11474_v23  ;;  %v12763_v17 = vmul.f32 -1.442695, %v13877_v45  ;;  %v8596_v44 = vpop.f32.mrb[154].mxu1 }
 0x767   : > { %v16185_v5 = vpop.eup %16184  ;;  %12321 = vst [vmem:[%s18333_s17 + $0x1e0] sm:$0xff] %v16183_v41  ;;  %16204 = vrcp.f32 %v11475_v0  ;;  %v13878_v19 = vadd.f32 %v8596_v44, %v21584_v6  ;;  %v8598_v49 = vpop.f32.mrb[155].mxu1 }
 0x768   : > { %v16187_v56 = vpop.eup %16186  ;;  %v11483_v24 = vadd.f32 1.0, %v16185_v5  ;;  %16206 = vpow2.f32 %v12762_v61  ;;  %v13879_v57 = vadd.f32 %v8598_v49, %v21584_v6 }
 0x769   : > { %v16189_v35 = vpop.eup %16188  ;;  %12322 = vst [vmem:[%s18333_s17 + $0x1e8] sm:$0xff] %v16187_v56  ;;  %16208 = vpow2.f32 %v12763_v17  ;;  %v12771_v27 = vmul.f32 -1.442695, %v13878_v19 }
 0x76a   : > { %v16191_v16 = vpop.eup %16190  ;;  %16210 = vrcp.f32 %v11483_v24  ;;  %v11484_v63 = vadd.f32 1.0, %v16189_v35  ;;  %v8603_v1 = vpop.f32.mrb[156].mxu1  ;;  %v12772_v39 = vmul.f32 -1.442695, %v13879_v57 }
 0x76b   : > { %v16193_v10 = vpop.eup %16192  ;;  %v11492_v60 = vadd.f32 1.0, %v16191_v16  ;;  %16212 = vpow2.f32 %v12771_v27  ;;  %v13880_v38 = vadd.f32 %v8603_v1, %v21585_v33  ;;  %v8605_v55 = vpop.f32.mrb[157].mxu1 }
 0x76c   : > { %v16195_v31 = vpop.eup %16194  ;;  %16214 = vrcp.f32 %v11484_v63  ;;  %v11493_v47 = vadd.f32 1.0, %v16193_v10  ;;  %v13881_v30 = vadd.f32 %v8605_v55, %v21585_v33 }
 0x76d   : > { %v16197_v48 = vpop.eup %16196  ;;  %12330 = vst [vmem:[%s18333_s17 + $0x228] sm:$0xff] %v16195_v31  ;;  %16216 = vrcp.f32 %v11492_v60  ;;  %v12780_v20 = vmul.f32 -1.442695, %v13880_v38 }
 0x76e   : > { %v16199_v59 = vpop.eup %16198  ;;  %12331 = vst [vmem:[%s18333_s17 + $0x230] sm:$0xff] %v16197_v48  ;;  %16218 = vrcp.f32 %v11493_v47  ;;  %v8610_v52 = vpop.f32.mrb[158].mxu1  ;;  %v12781_v11 = vmul.f32 -1.442695, %v13881_v30 }
 0x76f   : > { %v16201_v46 = vpop.eup %16200  ;;  %v11501_v58 = vadd.f32 1.0, %v16199_v59  ;;  %16220 = vpow2.f32 %v12772_v39  ;;  %v13882_v62 = vadd.f32 %v8610_v52, %v21586_v37  ;;  %v8612_v4 = vpop.f32.mrb[159].mxu1 }
 0x770   : > { %v16203_v12 = vpop.eup %16202  ;;  %v11502_v3 = vadd.f32 1.0, %v16201_v46  ;;  %16222 = vpow2.f32 %v12780_v20  ;;  %v13883_v21 = vadd.f32 %v8612_v4, %v21586_v37 }
 0x771   : > { %v16205_v13 = vpop.eup %16204  ;;  %12339 = vst [vmem:[%s18333_s17 + $0x270] sm:$0xff] %v16203_v12  ;;  %16224 = vrcp.f32 %v11501_v58  ;;  %v12789_v53 = vmul.f32 -1.442695, %v13882_v62 }
 0x772   : > { %v16207_v2 = vpop.eup %16206  ;;  %12340 = vst [vmem:[%s18333_s17 + $0x278] sm:$0xff] %v16205_v13  ;;  %16226 = vrcp.f32 %v11502_v3  ;;  %v8617_v23 = vpop.f32.mrb[160].mxu1  ;;  %v12790_v0 = vmul.f32 -1.442695, %v13883_v21 }
 0x773   : > { %v16209_v45 = vpop.eup %16208  ;;  %v11510_v14 = vadd.f32 1.0, %v16207_v2  ;;  %16228 = vpow2.f32 %v12781_v11  ;;  %v13884_v61 = vadd.f32 %v8617_v23, %v21588_v22  ;;  %v8619_v41 = vpop.f32.mrb[161].mxu1 }
 0x774   : > { %v16211_v17 = vpop.eup %16210  ;;  %v11511_v44 = vadd.f32 1.0, %v16209_v45  ;;  %16230 = vpow2.f32 %v12789_v53  ;;  %v13885_v5 = vadd.f32 %v8619_v41, %v21588_v22 }
 0x775   : > { %v16213_v19 = vpop.eup %16212  ;;  %12348 = vst [vmem:[%s18333_s17 + $0x2b8] sm:$0xff] %v16211_v17  ;;  %16232 = vrcp.f32 %v11510_v14  ;;  %v12798_v49 = vmul.f32 -1.442695, %v13884_v61 }
 0x776   : > { %v16215_v56 = vpop.eup %16214  ;;  %16234 = vrcp.f32 %v11511_v44  ;;  %v11519_v24 = vadd.f32 1.0, %v16213_v19  ;;  %v12799_v57 = vmul.f32 -1.442695, %v13885_v5  ;;  %v8624_v35 = vpop.f32.mrb[162].mxu1 }
 0x777   : > { %v16217_v27 = vpop.eup %16216  ;;  %12349 = vst [vmem:[%s18333_s17 + $0x2c0] sm:$0xff] %v16215_v56  ;;  %16236 = vpow2.f32 %v12790_v0  ;;  %v13886_v16 = vadd.f32 %v8624_v35, %v21591_v50  ;;  %v8626_v63 = vpop.f32.mrb[163].mxu1 }
 0x778   : > { %v16219_v1 = vpop.eup %16218  ;;  %12357 = vst [vmem:[%s18333_s17 + $0x300] sm:$0xff] %v16217_v27  ;;  %16238 = vrcp.f32 %v11519_v24  ;;  %v13887_v10 = vadd.f32 %v8626_v63, %v21591_v50 }
 0x779   : > { %v16221_v60 = vpop.eup %16220  ;;  %12358 = vst [vmem:[%s18333_s17 + $0x308] sm:$0xff] %v16219_v1  ;;  %16240 = vpow2.f32 %v12798_v49  ;;  %v12807_v39 = vmul.f32 -1.442695, %v13886_v16 }
 0x77a   : > { %v16223_v38 = vpop.eup %16222  ;;  %v11520_v55 = vadd.f32 1.0, %v16221_v60  ;;  %16242 = vpow2.f32 %v12799_v57  ;;  %v12808_v31 = vmul.f32 -1.442695, %v13887_v10  ;;  %v8631_v47 = vpop.f32.mrb[164].mxu1 }
 0x77b   : > { %v13426_v30 = vpop.f32.mrb[128].mxu0  ;;  %v16225_v48 = vpop.eup %16224  ;;  %v11528_v20 = vadd.f32 1.0, %v16223_v38  ;;  %16244 = vpow2.f32 %v12807_v39  ;;  %v13888_v59 = vadd.f32 %v8631_v47, %v21594_v43 }
 0x77c   : > { %v13916_v52 = vadd.f32 %v13426_v30, %v21662_v7  ;;  %v8633_v46 = vpop.f32.mrb[165].mxu1  ;;  %v10342_v58 = vpop.f32.mrb[129].mxu0  ;;  %12366 = vst [vmem:[%s18333_s17 + $0x348] sm:$0xff] %v16225_v48  ;;  %16246 = vrcp.f32 %v11520_v55 }
 0x77d   : > { %v16227_v11 = vpop.eup %16226  ;;  %v13889_v62 = vadd.f32 %v8633_v46, %v21594_v43  ;;  %16248 = vrcp.f32 %v11528_v20  ;;  %v12816_v12 = vmul.f32 -1.442695, %v13888_v59  ;;  %v13917_v3 = vadd.f32 %v10342_v58, %v21661_v36 }
 0x77e   : > { %v16229_v4 = vpop.eup %16228  ;;  %12367 = vst [vmem:[%s18333_s17 + $0x350] sm:$0xff] %v16227_v11  ;;  %16250 = vpow2.f32 %v12808_v31  ;;  %v12665_v53 = vmul.f32 -1.442695, %v13916_v52  ;;  %v8638_v7 = vpop.f32.mrb[166].mxu1 }
 0x77f   : > { %v16231_v21 = vpop.eup %16230  ;;  %v11529_v13 = vadd.f32 1.0, %v16229_v4  ;;  %16252 = vpow2.f32 %v12816_v12  ;;  %v12817_v45 = vmul.f32 -1.442695, %v13889_v62  ;;  %v13429_v14 = vpop.f32.mrb[130].mxu0  ;;  %v12656_v36 = vmul.f32 -1.442695, %v13917_v3 }
 0x780   : > { %v16233_v2 = vpop.eup %16232  ;;  %v11537_v23 = vadd.f32 1.0, %v16231_v21  ;;  %v8640_v0 = vpop.f32.mrb[167].mxu1  ;;  %v13890_v44 = vadd.f32 %v8638_v7, %v21597_v25  ;;  %v13918_v49 = vadd.f32 %v13429_v14, %v21664_v32  ;;  %v21670_v62 = vld [vmem:[#allocation146_spill] sm:$0xff] }
 0x781   : > { %v16235_v61 = vpop.eup %16234  ;;  %12375 = vst [vmem:[%s18333_s17 + $0x390] sm:$0xff] %v16233_v2  ;;  %16254 = vrcp.f32 %v11529_v13  ;;  %v10354_v41 = vpop.f32.mrb[131].mxu0  ;;  %v13891_v39 = vadd.f32 %v8640_v0, %v21597_v25 }
 0x782   : > { %v16237_v17 = vpop.eup %16236  ;;  %12376 = vst [vmem:[%s18333_s17 + $0x398] sm:$0xff] %v16235_v61  ;;  %16256 = vrcp.f32 %v11537_v23  ;;  %v8645_v56 = vpop.f32.mrb[168].mxu1  ;;  %v12825_v60 = vmul.f32 -1.442695, %v13890_v44  ;;  %v12683_v55 = vmul.f32 -1.442695, %v13918_v49  ;;  %v13919_v31 = vadd.f32 %v10354_v41, %v21663_v54 }
 0x783   : > { %v16239_v5 = vpop.eup %16238  ;;  %v11538_v19 = vadd.f32 1.0, %v16237_v17  ;;  %16258 = vpow2.f32 %v12665_v53  ;;  %v13432_v57 = vpop.f32.mrb[132].mxu0  ;;  %v12826_v11 = vmul.f32 -1.442695, %v13891_v39  ;;  %v13892_v54 = vadd.f32 %v8645_v56, %v21670_v62 }
 0x784   : > { %v16241_v24 = vpop.eup %16240  ;;  %12384 = vst [vmem:[%s18333_s17 + $0x3d8] sm:$0xff] %v16239_v5  ;;  %16260 = vpow2.f32 %v12817_v45  ;;  %v8647_v35 = vpop.f32.mrb[169].mxu1  ;;  %v12674_v3 = vmul.f32 -1.442695, %v13919_v31  ;;  %v13920_v53 = vadd.f32 %v13432_v57, %v21666_v51 }
 0x785   : > { %v16243_v27 = vpop.eup %16242  ;;  %16262 = vrcp.f32 %v11538_v19  ;;  %v11546_v16 = vadd.f32 1.0, %v16241_v24  ;;  %v10366_v63 = vpop.f32.mrb[133].mxu0  ;;  %v13893_v45 = vadd.f32 %v8647_v35, %v21670_v62  ;;  %v12834_v41 = vmul.f32 -1.442695, %v13892_v54  ;;  %v21671_v35 = vld [vmem:[#allocation147_spill] sm:$0xff] }
 0x786   : > { %v16245_v1 = vpop.eup %16244  ;;  %v11547_v10 = vadd.f32 1.0, %v16243_v27  ;;  %16264 = vpow2.f32 %v12656_v36  ;;  %v8652_v47 = vpop.f32.mrb[170].mxu1  ;;  %v13921_v17 = vadd.f32 %v10366_v63, %v21665_v8  ;;  %v12701_v19 = vmul.f32 -1.442695, %v13920_v53 }
 0x787   : > { %v16247_v38 = vpop.eup %16246  ;;  %16266 = vrcp.f32 %v11546_v16  ;;  %v11555_v32 = vadd.f32 1.0, %v16245_v1  ;;  %v13435_v48 = vpop.f32.mrb[134].mxu0  ;;  %v12835_v8 = vmul.f32 -1.442695, %v13893_v45  ;;  %v13894_v27 = vadd.f32 %v8652_v47, %v21671_v35 }
 0x788   : > { %v16249_v30 = vpop.eup %16248  ;;  %12385 = vst [vmem:[%s18333_s17 + $0x3e0] sm:$0xff] %v16247_v38  ;;  %16268 = vrcp.f32 %v11547_v10  ;;  %v20128_v20 = vpop.f32.mrb[171].mxu1  ;;  %v12692_v1 = vmul.f32 -1.442695, %v13921_v17  ;;  %v13922_v10 = vadd.f32 %v13435_v48, %v21668_v9 }
 0x789   : > { %v16251_v59 = vpop.eup %16250  ;;  %12393 = vst [vmem:[%s18333_s17 + $0x420] sm:$0xff] %v16249_v30  ;;  %16270 = vrcp.f32 %v11555_v32  ;;  %v20131_v52 = vpop.f32.mrb[135].mxu0  ;;  %v12843_v9 = vmul.f32 -1.442695, %v13894_v27  ;;  %v13895_v48 = vadd.f32 %v20128_v20, %v21671_v35  ;;  %v21672_v20 = vld [vmem:[#allocation148_spill] sm:$0xff] }
 0x78a   : > { %v16253_v46 = vpop.eup %16252  ;;  %v11556_v58 = vadd.f32 1.0, %v16251_v59  ;;  %16272 = vpow2.f32 %v12825_v60  ;;  %v20134_v21 = vpop.f32.mrb[172].mxu1 }
 0x78b   : > { %v16255_v4 = vpop.eup %16254  ;;  %v11564_v12 = vadd.f32 1.0, %v16253_v46  ;;  %16274 = vpow2.f32 %v12683_v55  ;;  %v20138_v7 = vpop.f32.mrb[136].mxu0  ;;  %v12844_v45 = vmul.f32 -1.442695, %v13895_v48 }
 0x78c   : > { %v16257_v13 = vpop.eup %16256  ;;  %12394 = vst [vmem:[%s18333_s17 + $0x428] sm:$0xff] %v16255_v4  ;;  %16276 = vrcp.f32 %v11556_v58  ;;  %v20140_v2 = vpop.f32.mrb[173].mxu1  ;;  %v12719_v58 = vmul.f32 -1.442695, %v13922_v10 }
 0x78d   : > { %v16259_v23 = vpop.eup %16258  ;;  %12402 = vst [vmem:[%s18333_s17 + $0x468] sm:$0xff] %v16257_v13  ;;  %16278 = vrcp.f32 %v11564_v12  ;;  %v20144_v14 = vpop.f32.mrb[137].mxu0  ;;  %v13896_v13 = vadd.f32 %v20134_v21, %v21672_v20 }
 0x78e   : > { %v16261_v0 = vpop.eup %16260  ;;  %v11413_v61 = vadd.f32 1.0, %v16259_v23  ;;  %16280 = vpow2.f32 %v12826_v11  ;;  %v20147_v44 = vpop.f32.mrb[174].mxu1  ;;  %v13923_v11 = vadd.f32 %v20131_v52, %v21667_v34 }
 0x78f   : > { %v16263_v36 = vpop.eup %16262  ;;  %v11565_v51 = vadd.f32 1.0, %v16261_v0  ;;  %16282 = vpow2.f32 %v12674_v3  ;;  %v20150_v49 = vpop.f32.mrb[138].mxu0 }
 0x790   : > { %v16265_v5 = vpop.eup %16264  ;;  %12403 = vst [vmem:[%s18333_s17 + $0x470] sm:$0xff] %v16263_v36  ;;  %16284 = vrcp.f32 %v11413_v61  ;;  %v20152_v56 = vpop.f32.mrb[175].mxu1 }
 0x791   : > { %v16267_v24 = vpop.eup %16266  ;;  %16286 = vrcp.f32 %v11565_v51  ;;  %v11404_v57 = vadd.f32 1.0, %v16265_v5  ;;  %v20155_v16 = vpop.f32.mrb[139].mxu0  ;;  %v12852_v5 = vmul.f32 -1.442695, %v13896_v13 }
 0x792   : > { %v16269_v63 = vpop.eup %16268  ;;  %12411 = vst [vmem:[%s18333_s17 + $0x4b0] sm:$0xff] %v16267_v24  ;;  %16288 = vpow2.f32 %v12834_v41  ;;  %v20160_v39 = vpop.f32.mrb[176].mxu1  ;;  %v12710_v41 = vmul.f32 -1.442695, %v13923_v11 }
 0x793   : > { %v16271_v60 = vpop.eup %16270  ;;  %12412 = vst [vmem:[%s18333_s17 + $0x4b8] sm:$0xff] %v16269_v63  ;;  %16290 = vrcp.f32 %v11404_v57  ;;  %v20162_v38 = vpop.f32.mrb[140].mxu0  ;;  %v13897_v63 = vadd.f32 %v20140_v2, %v21672_v20 }
 0x794   : > { %v16273_v32 = vpop.eup %16272  ;;  %12420 = vst [vmem:[%s18333_s17 + $0x4f8] sm:$0xff] %v16271_v60  ;;  %16292 = vpow2.f32 %v12701_v19  ;;  %v20165_v55 = vpop.f32.mrb[177].mxu1  ;;  %v13924_v19 = vadd.f32 %v20138_v7, %v21578_v28 }
 0x795   : > { %v20167_v31 = vpop.f32.mrb[141].mxu0  ;;  %v16275_v47 = vpop.eup %16274  ;;  %v11573_v30 = vadd.f32 1.0, %v16273_v32  ;;  %16294 = vpow2.f32 %v12835_v8 }
 0x796   : > { %v16277_v59 = vpop.eup %16276  ;;  %v11431_v46 = vadd.f32 1.0, %v16275_v47  ;;  %16296 = vpow2.f32 %v12692_v1  ;;  %v20174_v4 = vpop.f32.mrb[178].mxu1  ;;  %v12737_v47 = vmul.f32 -1.442695, %v13924_v19 }
 0x797   : > { %v16279_v54 = vpop.eup %16278  ;;  %12421 = vst [vmem:[%s18333_s17 + $0x500] sm:$0xff] %v16277_v59  ;;  %16298 = vrcp.f32 %v11573_v30  ;;  %v20176_v12 = vpop.f32.mrb[142].mxu0  ;;  %v13925_v30 = vadd.f32 %v20144_v14, %v21669_v15 }
 0x798   : > { %v16281_v3 = vpop.eup %16280  ;;  %12429 = vst [vmem:[%s18333_s17 + $0x540] sm:$0xff] %v16279_v54  ;;  %16300 = vrcp.f32 %v11431_v46  ;;  %v20181_v53 = vpop.f32.mrb[179].mxu1  ;;  %v12853_v46 = vmul.f32 -1.442695, %v13897_v63 }
 0x799   : > { %v20183_v23 = vpop.f32.mrb[143].mxu0  ;;  %v16283_v34 = vpop.eup %16282  ;;  %v11574_v52 = vadd.f32 1.0, %v16281_v3  ;;  %16302 = vpow2.f32 %v12843_v9 }
 0x79a   : > { %v16285_v0 = vpop.eup %16284  ;;  %v11422_v61 = vadd.f32 1.0, %v16283_v34  ;;  %16304 = vpow2.f32 %v12719_v58  ;;  %v20187_v36 = vpop.f32.mrb[180].mxu1  ;;  %v21673_v58 = vld [vmem:[#allocation149_spill] sm:$0xff] }
 0x79b   : > { %v16287_v17 = vpop.eup %16286  ;;  %12278 = vst.msk [vmem:[%s18333_s17 + $0x88] sm:$0xff] %vm12268_vm2, %v16285_v0  ;;  %16306 = vrcp.f32 %v11574_v52  ;;  %v20189_v21 = vpop.f32.mrb[144].mxu0  ;;  %v13898_v11 = vadd.f32 %v20147_v44, %v21673_v58  ;;  %v13926_v44 = vadd.f32 %v20150_v49, %v21580_v42  ;;  %v13899_v19 = vadd.f32 %v20152_v56, %v21673_v58 }
 0x79c   : > { %v16289_v51 = vpop.eup %16288  ;;  %12430 = vst [vmem:[%s18333_s17 + $0x548] sm:$0xff] %v16287_v17  ;;  %16308 = vrcp.f32 %v11422_v61  ;;  %v20194_v24 = vpop.f32.mrb[181].mxu1  ;;  %v13927_v42 = vadd.f32 %v20155_v16, %v21579_v40 }
 0x79d   : > { %v20196_v57 = vpop.f32.mrb[145].mxu0  ;;  %v16291_v8 = vpop.eup %16290  ;;  %v11582_v27 = vadd.f32 1.0, %v16289_v51  ;;  %16310 = vpow2.f32 %v12844_v45  ;;  %v12728_v45 = vmul.f32 -1.442695, %v13925_v30  ;;  %v12861_v51 = vmul.f32 -1.442695, %v13898_v11 }
 0x79e   : > { %v16293_v1 = vpop.eup %16292  ;;  %12269 = vst.msk [vmem:[%s18333_s17 + $0x40] sm:$0xff] %vm12268_vm2, %v16291_v8  ;;  %16312 = vpow2.f32 %v12710_v41  ;;  %v20202_v32 = vpop.f32.mrb[182].mxu1  ;;  %v12862_v16 = vmul.f32 -1.442695, %v13899_v19 }
 0x79f   : > { %v16295_v10 = vpop.eup %16294  ;;  %16314 = vrcp.f32 %v11582_v27  ;;  %v11449_v60 = vadd.f32 1.0, %v16293_v1  ;;  %v20206_v9 = vpop.f32.mrb[146].mxu0 }
 0x7a0   : > { %v16297_v28 = vpop.eup %16296  ;;  %v11583_v7 = vadd.f32 1.0, %v16295_v10  ;;  %16316 = vpow2.f32 %v12852_v5  ;;  %v20208_v2 = vpop.f32.mrb[183].mxu1  ;;  %v12755_v10 = vmul.f32 -1.442695, %v13926_v44 }
 0x7a1   : > { %v16299_v48 = vpop.eup %16298  ;;  %16318 = vrcp.f32 %v11449_v60  ;;  %v11440_v59 = vadd.f32 1.0, %v16297_v28  ;;  %v20212_v54 = vpop.f32.mrb[147].mxu0  ;;  %v21674_v60 = vld [vmem:[#allocation123_spill] sm:$0xff] }
 0x7a2   : > { %v16301_v3 = vpop.eup %16300  ;;  %12438 = vst [vmem:[%s18333_s17 + $0x588] sm:$0xff] %v16299_v48  ;;  %16320 = vrcp.f32 %v11583_v7  ;;  %v20217_v15 = vpop.f32.mrb[184].mxu1  ;;  %v13900_v28 = vadd.f32 %v20160_v39, %v21674_v60  ;;  %v13928_v39 = vadd.f32 %v20162_v38, %v21584_v6 }
 0x7a3   : > { %v16303_v13 = vpop.eup %16302  ;;  %12296 = vst.msk [vmem:[%s18333_s17 + $0x118] sm:$0xff] %vm12268_vm2, %v16301_v3  ;;  %16322 = vrcp.f32 %v11440_v59  ;;  %v20219_v14 = vpop.f32.mrb[148].mxu0 }
 0x7a4   : > { %v16305_v34 = vpop.eup %16304  ;;  %v11591_v52 = vadd.f32 1.0, %v16303_v13  ;;  %16324 = vpow2.f32 %v12737_v47  ;;  %v20223_v0 = vpop.f32.mrb[185].mxu1  ;;  %v12870_v13 = vmul.f32 -1.442695, %v13900_v28 }
 0x7a5   : > { %v20225_v61 = vpop.f32.mrb[149].mxu0  ;;  %v16307_v41 = vpop.eup %16306  ;;  %v11467_v17 = vadd.f32 1.0, %v16305_v34  ;;  %16326 = vpow2.f32 %v12853_v46  ;;  %v12746_v46 = vmul.f32 -1.442695, %v13927_v42  ;;  %v13901_v34 = vadd.f32 %v20165_v55, %v21674_v60 }
 0x7a6   : > { %v16309_v5 = vpop.eup %16308  ;;  %12439 = vst [vmem:[%s18333_s17 + $0x590] sm:$0xff] %v16307_v41  ;;  %16328 = vrcp.f32 %v11591_v52  ;;  %v20234_v49 = vpop.f32.mrb[186].mxu1  ;;  %v13929_v55 = vadd.f32 %v20167_v31, %v21583_v18  ;;  %v13930_v31 = vadd.f32 %v20176_v12, %v21586_v37 }
 0x7a7   : > { %v16311_v8 = vpop.eup %16310  ;;  %12287 = vst.msk [vmem:[%s18333_s17 + $0xd0] sm:$0xff] %vm12268_vm2, %v16309_v5  ;;  %16330 = vrcp.f32 %v11467_v17  ;;  %v20236_v27 = vpop.f32.mrb[150].mxu0  ;;  %v12871_v42 = vmul.f32 -1.442695, %v13901_v34 }
 0x7a8   : > { %v16313_v63 = vpop.eup %16312  ;;  %v11592_v1 = vadd.f32 1.0, %v16311_v8  ;;  %16332 = vpow2.f32 %v12728_v45  ;;  %v20240_v56 = vpop.f32.mrb[187].mxu1  ;;  %v12791_v37 = vmul.f32 -1.442695, %v13930_v31 }
 0x7a9   : > { %v20242_v7 = vpop.f32.mrb[151].mxu0  ;;  %v16315_v47 = vpop.eup %16314  ;;  %v11458_v30 = vadd.f32 1.0, %v16313_v63  ;;  %16334 = vpow2.f32 %v12861_v51  ;;  %v12773_v51 = vmul.f32 -1.442695, %v13928_v39  ;;  %v21675_v63 = vld [vmem:[#allocation150_spill] sm:$0xff] }
 0x7aa   : > { %v16317_v40 = vpop.eup %16316  ;;  %12447 = vst [vmem:[%s18333_s17 + $0x5d0] sm:$0xff] %v16315_v47  ;;  %16336 = vrcp.f32 %v11592_v1  ;;  %v20247_v11 = vpop.f32.mrb[188].mxu1  ;;  %v13902_v1 = vadd.f32 %v20174_v4, %v21675_v63  ;;  %v13903_v12 = vadd.f32 %v20181_v53, %v21675_v63 }
 0x7ab   : > { %v16319_v48 = vpop.eup %16318  ;;  %16338 = vrcp.f32 %v11458_v30  ;;  %v11600_v59 = vadd.f32 1.0, %v16317_v40  ;;  %v20253_v52 = vpop.f32.mrb[152].mxu0 }
 0x7ac   : > { %v16321_v3 = vpop.eup %16320  ;;  %12314 = vst.msk [vmem:[%s18333_s17 + $0x1a8] sm:$0xff] %vm12268_vm2, %v16319_v48  ;;  %16340 = vpow2.f32 %v12755_v10  ;;  %v20255_v45 = vpop.f32.mrb[189].mxu1  ;;  %v12879_v39 = vmul.f32 -1.442695, %v13902_v1  ;;  %v12880_v1 = vmul.f32 -1.442695, %v13903_v12 }
 0x7ad   : > { %v16323_v44 = vpop.eup %16322  ;;  %12448 = vst [vmem:[%s18333_s17 + $0x5d8] sm:$0xff] %v16321_v3  ;;  %16342 = vrcp.f32 %v11600_v59  ;;  %v20258_v41 = vpop.f32.mrb[153].mxu0 }
 0x7ae   : > { %v16325_v6 = vpop.eup %16324  ;;  %12305 = vst.msk [vmem:[%s18333_s17 + $0x160] sm:$0xff] %vm12268_vm2, %v16323_v44  ;;  %16344 = vpow2.f32 %v12862_v16  ;;  %v20264_v5 = vpop.f32.mrb[190].mxu1  ;;  %v12764_v16 = vmul.f32 -1.442695, %v13929_v55 }
 0x7af   : > { %v16327_v38 = vpop.eup %16326  ;;  %v11485_v17 = vadd.f32 1.0, %v16325_v6  ;;  %16346 = vpow2.f32 %v12746_v46  ;;  %v20268_v10 = vpop.f32.mrb[154].mxu0 }
 0x7b0   : > { %v16329_v19 = vpop.eup %16328  ;;  %v11601_v8 = vadd.f32 1.0, %v16327_v38  ;;  %16348 = vpow2.f32 %v12870_v13  ;;  %v20270_v28 = vpop.f32.mrb[191].mxu1  ;;  %v13931_v38 = vadd.f32 %v20183_v23, %v21585_v33 }
 0x7b1   : > { %v16331_v47 = vpop.eup %16330  ;;  %12456 = vst [vmem:[%s18333_s17 + $0x618] sm:$0xff] %v16329_v19  ;;  %16350 = vrcp.f32 %v11485_v17  ;;  %v20273_v30 = vpop.f32.mrb[155].mxu0 }
 0x7b2   : > { %v16333_v18 = vpop.eup %16332  ;;  %12332 = vst.msk [vmem:[%s18333_s17 + $0x238] sm:$0xff] %vm12268_vm2, %v16331_v47  ;;  %16352 = vrcp.f32 %v11601_v8  ;;  %v20279_v48 = vpop.f32.mrb[156].mxu0  ;;  %v21676_v47 = vld [vmem:[#allocation124_spill] sm:$0xff]  ;;  %v12782_v31 = vmul.f32 -1.442695, %v13931_v38 }
 0x7b3   : > { %v16335_v40 = vpop.eup %16334  ;;  %v11476_v4 = vadd.f32 1.0, %v16333_v18  ;;  %16354 = vpow2.f32 %v12773_v51  ;;  %v20281_v3 = vpop.f32.mrb[157].mxu0  ;;  %v13904_v18 = vadd.f32 %v20187_v36, %v21676_v47 }
 0x7b4   : > { %v16337_v59 = vpop.eup %16336  ;;  %v11609_v46 = vadd.f32 1.0, %v16335_v40  ;;  %16356 = vpow2.f32 %v12871_v42  ;;  %v13932_v40 = vadd.f32 %v20189_v21, %v21591_v50 }
 0x7b5   : > { %v16339_v13 = vpop.eup %16338  ;;  %12457 = vst [vmem:[%s18333_s17 + $0x620] sm:$0xff] %v16337_v59  ;;  %16358 = vrcp.f32 %v11476_v4  ;;  %v12888_v36 = vmul.f32 -1.442695, %v13904_v18 }
 0x7b6   : > { %v16341_v34 = vpop.eup %16340  ;;  %12323 = vst.msk [vmem:[%s18333_s17 + $0x1f0] sm:$0xff] %vm12268_vm2, %v16339_v13  ;;  %16360 = vrcp.f32 %v11609_v46  ;;  %v20290_v17 = vpop.f32.mrb[158].mxu0  ;;  %v12809_v50 = vmul.f32 -1.442695, %v13932_v40 }
 0x7b7   : > { %v16343_v44 = vpop.eup %16342  ;;  %v11503_v6 = vadd.f32 1.0, %v16341_v34  ;;  %16362 = vpow2.f32 %v12764_v16  ;;  %v20293_v55 = vpop.f32.mrb[159].mxu0 }
 0x7b8   : > { %v16345_v51 = vpop.eup %16344  ;;  %12465 = vst [vmem:[%s18333_s17 + $0x660] sm:$0xff] %v16343_v44  ;;  %16364 = vpow2.f32 %v12879_v39  ;;  %v13905_v39 = vadd.f32 %v20194_v24, %v21676_v47  ;;  %v21677_v44 = vld [vmem:[#allocation151_spill] sm:$0xff] }
 0x7b9   : > { %v16347_v19 = vpop.eup %16346  ;;  %16366 = vrcp.f32 %v11503_v6  ;;  %v11610_v8 = vadd.f32 1.0, %v16345_v51  ;;  %v13906_v6 = vadd.f32 %v20202_v32, %v21677_v44  ;;  %v13907_v18 = vadd.f32 %v20208_v2, %v21677_v44 }
 0x7ba   : > { %v16349_v42 = vpop.eup %16348  ;;  %v11494_v53 = vadd.f32 1.0, %v16347_v19  ;;  %16368 = vpow2.f32 %v12791_v37  ;;  %v13933_v37 = vadd.f32 %v20196_v57, %v21588_v22  ;;  %v12889_v51 = vmul.f32 -1.442695, %v13905_v39 }
 0x7bb   : > { %v16351_v33 = vpop.eup %16350  ;;  %16370 = vrcp.f32 %v11610_v8  ;;  %v11618_v23 = vadd.f32 1.0, %v16349_v42  ;;  %v13934_v19 = vadd.f32 %v20206_v9, %v21597_v25  ;;  %v13935_v9 = vadd.f32 %v20212_v54, %v21594_v43 }
 0x7bc   : > { %v16353_v4 = vpop.eup %16352  ;;  %12350 = vst.msk [vmem:[%s18333_s17 + $0x2c8] sm:$0xff] %vm12268_vm2, %v16351_v33  ;;  %16372 = vrcp.f32 %v11494_v53  ;;  %v12800_v22 = vmul.f32 -1.442695, %v13933_v37  ;;  %v12898_v2 = vmul.f32 -1.442695, %v13907_v18  ;;  %v13936_v54 = vadd.f32 %v20219_v14, %v21671_v35 }
 0x7bd   : > { %v16355_v16 = vpop.eup %16354  ;;  %12466 = vst [vmem:[%s18333_s17 + $0x668] sm:$0xff] %v16353_v4  ;;  %16374 = vrcp.f32 %v11618_v23  ;;  %v12827_v25 = vmul.f32 -1.442695, %v13934_v19  ;;  %v12818_v43 = vmul.f32 -1.442695, %v13935_v9  ;;  %v13910_v19 = vadd.f32 %v20234_v49, %v21631_v29 }
 0x7be   : > { %v16357_v59 = vpop.eup %16356  ;;  %v11521_v46 = vadd.f32 1.0, %v16355_v16  ;;  %16376 = vpow2.f32 %v12880_v1  ;;  %v12897_v1 = vmul.f32 -1.442695, %v13906_v6  ;;  %v21678_v16 = vld [vmem:[#allocation152_spill] sm:$0xff]  ;;  %v12845_v35 = vmul.f32 -1.442695, %v13936_v54 }
 0x7bf   : > { %v16359_v13 = vpop.eup %16358  ;;  %v11619_v34 = vadd.f32 1.0, %v16357_v59  ;;  %16378 = vpow2.f32 %v12782_v31  ;;  %v13908_v59 = vadd.f32 %v20217_v15, %v21678_v16  ;;  %v12915_v49 = vmul.f32 -1.442695, %v13910_v19 }
 0x7c0   : > { %v16361_v21 = vpop.eup %16360  ;;  %12341 = vst.msk [vmem:[%s18333_s17 + $0x280] sm:$0xff] %vm12268_vm2, %v16359_v13  ;;  %16380 = vrcp.f32 %v11521_v46  ;;  %v13911_v18 = vadd.f32 %v20240_v56, %v21631_v29 }
 0x7c1   : > { %v16363_v12 = vpop.eup %16362  ;;  %12474 = vst [vmem:[%s18333_s17 + $0x6a8] sm:$0xff] %v16361_v21  ;;  %16382 = vrcp.f32 %v11619_v34  ;;  %v13909_v34 = vadd.f32 %v20223_v0, %v21678_v16  ;;  %v12906_v21 = vmul.f32 -1.442695, %v13908_v59  ;;  %v13937_v0 = vadd.f32 %v20225_v61, %v21670_v62 }
 0x7c2   : > { %v16365_v38 = vpop.eup %16364  ;;  %v11512_v24 = vadd.f32 1.0, %v16363_v12  ;;  %16384 = vpow2.f32 %v12888_v36  ;;  %v13938_v62 = vadd.f32 %v20236_v27, %v21673_v58  ;;  %v13939_v27 = vadd.f32 %v20242_v7, %v21672_v20 }
 0x7c3   : > { %v16367_v8 = vpop.eup %16366  ;;  %v11627_v42 = vadd.f32 1.0, %v16365_v38  ;;  %16386 = vpow2.f32 %v12809_v50  ;;  %v12907_v38 = vmul.f32 -1.442695, %v13909_v34  ;;  %v12916_v56 = vmul.f32 -1.442695, %v13911_v18 }
 0x7c4   : > { %v16369_v53 = vpop.eup %16368  ;;  %12368 = vst.msk [vmem:[%s18333_s17 + $0x358] sm:$0xff] %vm12268_vm2, %v16367_v8  ;;  %16388 = vrcp.f32 %v11512_v24  ;;  %v12863_v58 = vmul.f32 -1.442695, %v13938_v62  ;;  %v12854_v7 = vmul.f32 -1.442695, %v13939_v27 }
 0x7c5   : > { %v16371_v57 = vpop.eup %16370  ;;  %16390 = vrcp.f32 %v11627_v42  ;;  %v11539_v32 = vadd.f32 1.0, %v16369_v53 }
 0x7c6   : > { %v16373_v33 = vpop.eup %16372  ;;  %12475 = vst [vmem:[%s18333_s17 + $0x6b0] sm:$0xff] %v16371_v57  ;;  %16392 = vpow2.f32 %v12889_v51 }
 0x7c7   : > { %v16375_v23 = vpop.eup %16374  ;;  %12359 = vst.msk [vmem:[%s18333_s17 + $0x310] sm:$0xff] %vm12268_vm2, %v16373_v33  ;;  %16394 = vrcp.f32 %v11539_v32  ;;  %v12836_v32 = vmul.f32 -1.442695, %v13937_v0 }
 0x7c8   : > { %v16377_v31 = vpop.eup %16376  ;;  %12483 = vst [vmem:[%s18333_s17 + $0x6f0] sm:$0xff] %v16375_v23  ;;  %16396 = vpow2.f32 %v12800_v22 }
 0x7c9   : > { %v16379_v40 = vpop.eup %16378  ;;  %v11628_v4 = vadd.f32 1.0, %v16377_v31  ;;  %16398 = vpow2.f32 %v12897_v1 }
 0x7ca   : > { %v16381_v46 = vpop.eup %16380  ;;  %v11530_v36 = vadd.f32 1.0, %v16379_v40  ;;  %16400 = vpow2.f32 %v12827_v25 }
 0x7cb   : > { %v16383_v39 = vpop.eup %16382  ;;  %12386 = vst.msk [vmem:[%s18333_s17 + $0x3e8] sm:$0xff] %vm12268_vm2, %v16381_v46  ;;  %16402 = vrcp.f32 %v11628_v4 }
 0x7cc   : > { %v16385_v13 = vpop.eup %16384  ;;  %12484 = vst [vmem:[%s18333_s17 + $0x6f8] sm:$0xff] %v16383_v39  ;;  %16404 = vrcp.f32 %v11530_v36  ;;  %v13940_v36 = vadd.f32 %v20253_v52, %v21675_v63 }
 0x7cd   : > { %v16387_v15 = vpop.eup %16386  ;;  %v11636_v50 = vadd.f32 1.0, %v16385_v13  ;;  %16406 = vpow2.f32 %v12898_v2  ;;  %v21679_v2 = vld [vmem:[#allocation154_spill] sm:$0xff] }
 0x7ce   : > { %v16389_v37 = vpop.eup %16388  ;;  %v11557_v12 = vadd.f32 1.0, %v16387_v15  ;;  %16408 = vpow2.f32 %v12818_v43  ;;  %v13912_v59 = vadd.f32 %v20247_v11, %v21679_v2  ;;  %v13913_v54 = vadd.f32 %v20255_v45, %v21679_v2 }
 0x7cf   : > { %v16391_v14 = vpop.eup %16390  ;;  %12377 = vst.msk [vmem:[%s18333_s17 + $0x3a0] sm:$0xff] %vm12268_vm2, %v16389_v37  ;;  %16410 = vrcp.f32 %v11636_v50  ;;  %v12881_v63 = vmul.f32 -1.442695, %v13940_v36  ;;  %v13941_v50 = vadd.f32 %v20258_v41, %v21674_v60  ;;  %v13914_v37 = vadd.f32 %v20264_v5, %v21637_v26 }
 0x7d0   : > { %v16393_v6 = vpop.eup %16392  ;;  %12492 = vst [vmem:[%s18333_s17 + $0x738] sm:$0xff] %v16391_v14  ;;  %16412 = vrcp.f32 %v11557_v12  ;;  %v12924_v34 = vmul.f32 -1.442695, %v13912_v59  ;;  %v12925_v45 = vmul.f32 -1.442695, %v13913_v54  ;;  %v13942_v41 = vadd.f32 %v20268_v10, %v21677_v44 }
 0x7d1   : > { %v16395_v24 = vpop.eup %16394  ;;  %v11637_v51 = vadd.f32 1.0, %v16393_v6  ;;  %16414 = vpow2.f32 %v12906_v21  ;;  %v12872_v60 = vmul.f32 -1.442695, %v13941_v50  ;;  %v12933_v5 = vmul.f32 -1.442695, %v13914_v37 }
 0x7d2   : > { %v16397_v8 = vpop.eup %16396  ;;  %12404 = vst.msk [vmem:[%s18333_s17 + $0x478] sm:$0xff] %vm12268_vm2, %v16395_v24  ;;  %16416 = vpow2.f32 %v12845_v35  ;;  %v13915_v24 = vadd.f32 %v20270_v28, %v21637_v26 }
 0x7d3   : > { %v16399_v42 = vpop.eup %16398  ;;  %16418 = vrcp.f32 %v11637_v51  ;;  %v11548_v53 = vadd.f32 1.0, %v16397_v8  ;;  %v13943_v8 = vadd.f32 %v20273_v30, %v21676_v47  ;;  %v13944_v30 = vadd.f32 %v20279_v48, %v21631_v29 }
 0x7d4   : > { %v16401_v22 = vpop.eup %16400  ;;  %v11645_v57 = vadd.f32 1.0, %v16399_v42  ;;  %16420 = vpow2.f32 %v12907_v38  ;;  %v12899_v42 = vmul.f32 -1.442695, %v13942_v41  ;;  %v12934_v28 = vmul.f32 -1.442695, %v13915_v24 }
 0x7d5   : > { %v16403_v61 = vpop.eup %16402  ;;  %16422 = vrcp.f32 %v11548_v53  ;;  %v11575_v1 = vadd.f32 1.0, %v16401_v22  ;;  %v12890_v62 = vmul.f32 -1.442695, %v13943_v8  ;;  %v13946_v29 = vadd.f32 %v20290_v17, %v21637_v26 }
 0x7d6   : > { %v16405_v33 = vpop.eup %16404  ;;  %12493 = vst [vmem:[%s18333_s17 + $0x740] sm:$0xff] %v16403_v61  ;;  %16424 = vrcp.f32 %v11645_v57 }
 0x7d7   : > { %v16407_v25 = vpop.eup %16406  ;;  %12395 = vst.msk [vmem:[%s18333_s17 + $0x430] sm:$0xff] %vm12268_vm2, %v16405_v33  ;;  %16426 = vrcp.f32 %v11575_v1  ;;  %v13945_v1 = vadd.f32 %v20281_v3, %v21678_v16  ;;  %v13947_v3 = vadd.f32 %v20293_v55, %v21679_v2  ;;  %v12935_v26 = vmul.f32 -1.442695, %v13946_v29 }
 0x7d8   : > { %v16409_v9 = vpop.eup %16408  ;;  %v11646_v23 = vadd.f32 1.0, %v16407_v25  ;;  %16428 = vpow2.f32 %v12836_v32 }
 0x7d9   : > { %v16411_v31 = vpop.eup %16410  ;;  %v11566_v40 = vadd.f32 1.0, %v16409_v9  ;;  %16430 = vpow2.f32 %v12915_v49  ;;  %v12908_v27 = vmul.f32 -1.442695, %v13945_v1  ;;  %v12926_v59 = vmul.f32 -1.442695, %v13947_v3 }
 0x7da   : > { %v16413_v4 = vpop.eup %16412  ;;  %12501 = vst [vmem:[%s18333_s17 + $0x780] sm:$0xff] %v16411_v31  ;;  %16432 = vrcp.f32 %v11646_v23  ;;  %v12917_v23 = vmul.f32 -1.442695, %v13944_v30 }
 0x7db   : > { %v16415_v46 = vpop.eup %16414  ;;  %12422 = vst.msk [vmem:[%s18333_s17 + $0x508] sm:$0xff] %vm12268_vm2, %v16413_v4  ;;  %16434 = vrcp.f32 %v11566_v40 }
 0x7dc   : > { %v16417_v43 = vpop.eup %16416  ;;  %v11654_v20 = vadd.f32 1.0, %v16415_v46  ;;  %16436 = vpow2.f32 %v12863_v58 }
 0x7dd   : > { %v16419_v39 = vpop.eup %16418  ;;  %v11593_v13 = vadd.f32 1.0, %v16417_v43  ;;  %16438 = vpow2.f32 %v12916_v56 }
 0x7de   : > { %v16421_v11 = vpop.eup %16420  ;;  %12502 = vst [vmem:[%s18333_s17 + $0x788] sm:$0xff] %v16419_v39  ;;  %16440 = vrcp.f32 %v11654_v20 }
 0x7df   : > { %v16423_v15 = vpop.eup %16422  ;;  %16442 = vrcp.f32 %v11593_v13  ;;  %v11655_v52 = vadd.f32 1.0, %v16421_v11 }
 0x7e0   : > { %v16425_v21 = vpop.eup %16424  ;;  %12413 = vst.msk [vmem:[%s18333_s17 + $0x4c0] sm:$0xff] %vm12268_vm2, %v16423_v15  ;;  %16444 = vpow2.f32 %v12854_v7 }
 0x7e1   : > { %v16427_v12 = vpop.eup %16426  ;;  %12510 = vst [vmem:[%s18333_s17 + $0x7c8] sm:$0xff] %v16425_v21  ;;  %16446 = vrcp.f32 %v11655_v52 }
 0x7e2   : > { %v16429_v35 = vpop.eup %16428  ;;  %12440 = vst.msk [vmem:[%s18333_s17 + $0x598] sm:$0xff] %vm12268_vm2, %v16427_v12  ;;  %16448 = vpow2.f32 %v12924_v34 }
 0x7e3   : > { %v16431_v14 = vpop.eup %16430  ;;  %v11584_v6 = vadd.f32 1.0, %v16429_v35  ;;  %16450 = vpow2.f32 %v12881_v63 }
 0x7e4   : > { %v16433_v38 = vpop.eup %16432  ;;  %v11663_v0 = vadd.f32 1.0, %v16431_v14  ;;  %16452 = vpow2.f32 %v12925_v45 }
 0x7e5   : > { %v16435_v51 = vpop.eup %16434  ;;  %12511 = vst [vmem:[%s18333_s17 + $0x7d0] sm:$0xff] %v16433_v38  ;;  %16454 = vrcp.f32 %v11584_v6 }
 0x7e6   : > { %v16437_v19 = vpop.eup %16436  ;;  %12431 = vst.msk [vmem:[%s18333_s17 + $0x550] sm:$0xff] %vm12268_vm2, %v16435_v51  ;;  %16456 = vrcp.f32 %v11663_v0 }
 0x7e7   : > { %v16439_v10 = vpop.eup %16438  ;;  %v11611_v44 = vadd.f32 1.0, %v16437_v19  ;;  %16458 = vpow2.f32 %v12872_v60 }
 0x7e8   : > { %v16441_v53 = vpop.eup %16440  ;;  %v11664_v22 = vadd.f32 1.0, %v16439_v10  ;;  %16460 = vpow2.f32 %v12933_v5 }
 0x7e9   : > { %v16443_v57 = vpop.eup %16442  ;;  %12519 = vst [vmem:[%s18333_s17 + $0x810] sm:$0xff] %v16441_v53  ;;  %16462 = vrcp.f32 %v11611_v44 }
 0x7ea   : > { %v16445_v32 = vpop.eup %16444  ;;  %12458 = vst.msk [vmem:[%s18333_s17 + $0x628] sm:$0xff] %vm12268_vm2, %v16443_v57  ;;  %16464 = vrcp.f32 %v11664_v22 }
 0x7eb   : > { %v16447_v47 = vpop.eup %16446  ;;  %v11602_v61 = vadd.f32 1.0, %v16445_v32  ;;  %16466 = vpow2.f32 %v12899_v42 }
 0x7ec   : > { %v16449_v49 = vpop.eup %16448  ;;  %12520 = vst [vmem:[%s18333_s17 + $0x818] sm:$0xff] %v16447_v47  ;;  %16468 = vpow2.f32 %v12934_v28 }
 0x7ed   : > { %v16451_v18 = vpop.eup %16450  ;;  %16470 = vrcp.f32 %v11602_v61  ;;  %v11672_v33 = vadd.f32 1.0, %v16449_v49 }
 0x7ee   : > { %v16453_v25 = vpop.eup %16452  ;;  %v11629_v9 = vadd.f32 1.0, %v16451_v18  ;;  %16472 = vpow2.f32 %v12890_v62 }
 0x7ef   : > { %v16455_v48 = vpop.eup %16454  ;;  %16474 = vrcp.f32 %v11672_v33  ;;  %v11673_v58 = vadd.f32 1.0, %v16453_v25 }
 0x7f0   : > { %v16457_v16 = vpop.eup %16456  ;;  %12449 = vst.msk [vmem:[%s18333_s17 + $0x5e0] sm:$0xff] %vm12268_vm2, %v16455_v48  ;;  %16476 = vrcp.f32 %v11629_v9 }
 0x7f1   : > { %v16459_v31 = vpop.eup %16458  ;;  %12528 = vst [vmem:[%s18333_s17 + $0x858] sm:$0xff] %v16457_v16  ;;  %16478 = vrcp.f32 %v11673_v58 }
 0x7f2   : > { %v16461_v40 = vpop.eup %16460  ;;  %v11620_v56 = vadd.f32 1.0, %v16459_v31  ;;  %16480 = vpow2.f32 %v12917_v23 }
 0x7f3   : > { %v16463_v17 = vpop.eup %16462  ;;  %v11681_v4 = vadd.f32 1.0, %v16461_v40  ;;  %16482 = vpow2.f32 %v12908_v27 }
 0x7f4   : > { %v16465_v46 = vpop.eup %16464  ;;  %12476 = vst.msk [vmem:[%s18333_s17 + $0x6b8] sm:$0xff] %vm12268_vm2, %v16463_v17  ;;  %16484 = vrcp.f32 %v11620_v56 }
 0x7f5   : > { %v16467_v55 = vpop.eup %16466  ;;  %12529 = vst [vmem:[%s18333_s17 + $0x860] sm:$0xff] %v16465_v46  ;;  %16486 = vrcp.f32 %v11681_v4 }
 0x7f6   : > { %v16469_v2 = vpop.eup %16468  ;;  %v11647_v36 = vadd.f32 1.0, %v16467_v55  ;;  %16488 = vpow2.f32 %v12935_v26 }
 0x7f7   : > { %v16471_v43 = vpop.eup %16470  ;;  %v11682_v20 = vadd.f32 1.0, %v16469_v2  ;;  %16490 = vpow2.f32 %v12926_v59 }
 0x7f8   : > { %v16473_v7 = vpop.eup %16472  ;;  %12467 = vst.msk [vmem:[%s18333_s17 + $0x670] sm:$0xff] %vm12268_vm2, %v16471_v43  ;;  %16492 = vrcp.f32 %v11647_v36 }
 0x7f9   : > { %v16475_v54 = vpop.eup %16474  ;;  %16494 = vrcp.f32 %v11682_v20  ;;  %v11638_v39 = vadd.f32 1.0, %v16473_v7 }
 0x7fa   : > { %v16477_v13 = vpop.eup %16476  ;;  %12537 = vst [vmem:[%s18333_s17 + $0x8a0] sm:$0xff] %v16475_v54 }
 0x7fb   : > { %v16479_v11 = vpop.eup %16478  ;;  %12494 = vst.msk [vmem:[%s18333_s17 + $0x748] sm:$0xff] %vm12268_vm2, %v16477_v13  ;;  %16496 = vrcp.f32 %v11638_v39 }
 0x7fc   : > { %v16481_v34 = vpop.eup %16480  ;;  %12538 = vst [vmem:[%s18333_s17 + $0x8a8] sm:$0xff] %v16479_v11 }
 0x7fd   : > { %v16483_v15 = vpop.eup %16482  ;;  %v11665_v52 = vadd.f32 1.0, %v16481_v34 }
 0x7fe   : > { %v16485_v63 = vpop.eup %16484  ;;  %v11656_v50 = vadd.f32 1.0, %v16483_v15 }
 0x7ff   : > { %v16487_v21 = vpop.eup %16486  ;;  %12485 = vst.msk [vmem:[%s18333_s17 + $0x700] sm:$0xff] %vm12268_vm2, %v16485_v63  ;;  %16498 = vrcp.f32 %v11665_v52 }
 0x800   : > { %v16489_v45 = vpop.eup %16488  ;;  %12546 = vst [vmem:[%s18333_s17 + $0x8e8] sm:$0xff] %v16487_v21  ;;  %16500 = vrcp.f32 %v11656_v50 }
 0x801   : > { %v16491_v37 = vpop.eup %16490  ;;  %v11683_v12 = vadd.f32 1.0, %v16489_v45 }
 0x802   : > { %v16493_v35 = vpop.eup %16492  ;;  %v11674_v14 = vadd.f32 1.0, %v16491_v37 }
 0x803   : > { %v16495_v6 = vpop.eup %16494  ;;  %12512 = vst.msk [vmem:[%s18333_s17 + $0x7d8] sm:$0xff] %vm12268_vm2, %v16493_v35  ;;  %16502 = vrcp.f32 %v11683_v12 }
 0x804   : > { %12547 = vst [vmem:[%s18333_s17 + $0x8f0] sm:$0xff] %v16495_v6  ;;  %16504 = vrcp.f32 %v11674_v14 }
 0x805   : > { %v16497_v60 = vpop.eup %16496 }
 0x806   : > { %12503 = vst.msk [vmem:[%s18333_s17 + $0x790] sm:$0xff] %vm12268_vm2, %v16497_v60 }
 0x809   : > { %v16499_v41 = vpop.eup %16498 }
 0x80a   : > { %v16501_v38 = vpop.eup %16500  ;;  %12530 = vst.msk [vmem:[%s18333_s17 + $0x868] sm:$0xff] %vm12268_vm2, %v16499_v41 }
 0x80b   : > { %12521 = vst.msk [vmem:[%s18333_s17 + $0x820] sm:$0xff] %vm12268_vm2, %v16501_v38 }
 0x80d   : > { %v16503_v0 = vpop.eup %16502 }
 0x80e   : > { %v16505_v5 = vpop.eup %16504  ;;  %12548 = vst.msk [vmem:[%s18333_s17 + $0x8f8] sm:$0xff] %vm12268_vm2, %v16503_v0 }
 0x80f   : > { %12539 = vst.msk [vmem:[%s18333_s17 + $0x8b0] sm:$0xff] %vm12268_vm2, %v16505_v5 }
 0x810 PF: > { %s13_s14 = sadd.s32 1, %s16530_s14   ;;  %s21680_s12 = smov %s16526_s13 }
 0x811   : > { %p10_p5 = scmp.ge.s32.totalorder %s13_s14, 4   ;;  %s21681_s13 = smov %s21683_s15 }
 0x813   :  { %12 = sbr.rel (!%p10_p5) target bundleno = 2 (0x2), region = 62 }

</bundles_post_ra>
